<compile_context>
chip_gen: v7x
topology: tpu7x:2x2x1
jax: 0.10.0
libtpu: 0.0.40
codegen_flags: <defaults>
</compile_context>

<pallas_src>
import functools
import math

import jax
import jax.numpy as jnp
from jax import lax
from jax.experimental import pallas as pl
from jax.experimental.pallas import tpu as pltpu


def _round_up(x, m):
    return (x + m - 1) // m * m


def _pad2(x, rows, cols):
    pr, pc = rows - x.shape[0], cols - x.shape[1]
    if pr == 0 and pc == 0:
        return x
    return jnp.pad(x, ((0, pr), (0, pc)))


def _detect_two_tensorcores():
    """v7x has 2 TensorCores per chip; shard the conv-matmul M dim across them."""
    try:
        kind = jax.devices()[0].device_kind.lower()
    except Exception:
        return False
    return ("v7" in kind) or ("tpu7" in kind)


_SPLIT_M = _detect_two_tensorcores()


# ----------------------------------------------------------------------------
# Pallas kernels
# ----------------------------------------------------------------------------
def _mm_bias_kernel(a_ref, b_ref, bias_ref, o_ref, *, relu):
    """Single-step matmul: dot + bias (+ReLU) straight to the output tile."""
    out = jnp.dot(a_ref[...], b_ref[...], preferred_element_type=jnp.float32)
    out = out + bias_ref[...]
    if relu:
        out = jnp.maximum(out, 0.0)
    o_ref[...] = out.astype(o_ref.dtype)


def _enc_pol_dec_kernel(x_ref, w1_ref, b1_ref, w2_ref, b2_ref, w3_ref, b3_ref,
                        pol_ref, dec_ref):
    """Fused: enc = relu(x@w1+b1) (VMEM-resident), policy = enc@w2+b2,
    dec = enc@w3+b3.  Single K step, no scratch."""
    enc = jnp.dot(x_ref[...], w1_ref[...], preferred_element_type=jnp.float32)
    enc = jnp.maximum(enc + b1_ref[...], 0.0)
    enc_bf = enc.astype(jnp.bfloat16)
    pol = jnp.dot(enc_bf, w2_ref[...], preferred_element_type=jnp.float32)
    pol_ref[...] = (pol + b2_ref[...]).astype(pol_ref.dtype)
    dec = jnp.dot(enc_bf, w3_ref[...], preferred_element_type=jnp.float32)
    dec_ref[...] = (dec + b3_ref[...]).astype(dec_ref.dtype)


# ----------------------------------------------------------------------------
# Wrappers
# ----------------------------------------------------------------------------
def linear_pallas(x, w, b_row, n_out, *, relu, out_dtype):
    """y = relu?(x @ w + b).  x:(M,K) bf16, w:(K,Np) bf16 (N pre-padded to 128),
    b_row:(1,Np) f32.  Whole K and N in one block; M split in 2 on v7x only."""
    M, K = x.shape
    Kw, Np = w.shape
    assert K == Kw, (K, Kw)
    x = x.astype(jnp.bfloat16)

    if _SPLIT_M and M >= 32:
        Mp = _round_up(M, 32)           # tm = Mp/2 stays a multiple of 16
        tm, gm = Mp // 2, 2
        if Mp != M:
            x = jnp.pad(x, ((0, Mp - M), (0, 0)))
    else:
        Mp, tm, gm = M, M, 1            # single block: no pad needed at all

    out = pl.pallas_call(
        functools.partial(_mm_bias_kernel, relu=relu),
        out_shape=jax.ShapeDtypeStruct((Mp, Np), out_dtype),
        grid_spec=pltpu.PrefetchScalarGridSpec(
            num_scalar_prefetch=0,
            grid=(gm,),
            in_specs=[
                pl.BlockSpec((tm, K), lambda i: (i, 0)),
                pl.BlockSpec((K, Np), lambda i: (0, 0)),
                pl.BlockSpec((1, Np), lambda i: (0, 0)),
            ],
            out_specs=pl.BlockSpec((tm, Np), lambda i: (i, 0)),
        ),
        compiler_params=pltpu.CompilerParams(
            dimension_semantics=("parallel",)),
    )(x, w, b_row)
    if Mp != M or Np != n_out:
        out = out[:M, :n_out]
    return out


def encoder_policy_decoder_pallas(x, enc_wb, pol_wb, dec_wb, n_pol, n_dec):
    """Fused encoder FC (+ReLU), policy head and decoder linear in one call.
    Returns (policy f32 (M,n_pol), dec bf16 (M,n_dec))."""
    w1, b1 = enc_wb
    w2, b2 = pol_wb
    w3, b3 = dec_wb
    M, K = x.shape
    N1, N2, N3 = w1.shape[1], w2.shape[1], w3.shape[1]
    assert w1.shape[0] == K and w2.shape[0] == N1 and w3.shape[0] == N1
    x = x.astype(jnp.bfloat16)

    pol, dec = pl.pallas_call(
        _enc_pol_dec_kernel,
        out_shape=(jax.ShapeDtypeStruct((M, N2), jnp.float32),
                   jax.ShapeDtypeStruct((M, N3), jnp.bfloat16)),
        grid_spec=pltpu.PrefetchScalarGridSpec(
            num_scalar_prefetch=0,
            grid=(1,),
            in_specs=[
                pl.BlockSpec((M, K), lambda i: (0, 0)),
                pl.BlockSpec((K, N1), lambda i: (0, 0)),
                pl.BlockSpec((1, N1), lambda i: (0, 0)),
                pl.BlockSpec((N1, N2), lambda i: (0, 0)),
                pl.BlockSpec((1, N2), lambda i: (0, 0)),
                pl.BlockSpec((N1, N3), lambda i: (0, 0)),
                pl.BlockSpec((1, N3), lambda i: (0, 0)),
            ],
            out_specs=[pl.BlockSpec((M, N2), lambda i: (0, 0)),
                       pl.BlockSpec((M, N3), lambda i: (0, 0))],
        ),
        compiler_params=pltpu.CompilerParams(
            dimension_semantics=("arbitrary",),
            # w1 + w_dec together ~6.5 MB (x2 buffering ~13 MB): raise v5e's
            # 16 MiB default scoped-VMEM limit; 32 MiB fits all generations.
            vmem_limit_bytes=32 * 1024 * 1024),
    )(x, w1, b1, w2, b2, w3, b3)
    return pol[:, :n_pol], dec[:, :n_dec]


# ----------------------------------------------------------------------------
# Conv / ConvTranspose via fused NHWC patch extraction + Pallas matmul
# ----------------------------------------------------------------------------
def conv2d_nhwc_pallas(x_nhwc, wb, n_out, k, stride, pad=0, relu=True,
                       out_dtype=jnp.bfloat16):
    """x:(B,H,W,C) bf16, wb = (w:(C*k*k, Np) bf16, b:(1,Np) f32).
    Patch features are channel-major (c, ki, kj) - weights built to match."""
    w, b_row = wb
    patches = lax.conv_general_dilated_patches(
        x_nhwc, filter_shape=(k, k), window_strides=(stride, stride),
        padding=[(pad, pad), (pad, pad)],
        dimension_numbers=("NHWC", "HWIO", "NHWC"))
    B, Ho, Wo, K = patches.shape
    cols = patches.reshape(B * Ho * Wo, K)
    y = linear_pallas(cols, w, b_row, n_out, relu=relu, out_dtype=out_dtype)
    return y.reshape(B, Ho, Wo, n_out)


# ----------------------------------------------------------------------------
# Parameters: PyTorch-layout init, then one-time conversion to matmul layout
# ----------------------------------------------------------------------------
def _uniform(key, shape, bound):
    return jax.random.uniform(key, shape, jnp.float32, -bound, bound)


def init_params(key, in_channels, n_actions):
    keys = iter(jax.random.split(key, 32))

    def conv_p(ci, co, kk):
        bnd = 1.0 / math.sqrt(ci * kk * kk)
        return (_uniform(next(keys), (co, ci, kk, kk), bnd),
                _uniform(next(keys), (co,), bnd))

    def convT_p(ci, co, kk):
        bnd = 1.0 / math.sqrt(co * kk * kk)
        return (_uniform(next(keys), (ci, co, kk, kk), bnd),
                _uniform(next(keys), (co,), bnd))

    def lin_p(fi, fo):
        bnd = 1.0 / math.sqrt(fi)
        return (_uniform(next(keys), (fi, fo), bnd),
                _uniform(next(keys), (fo,), bnd))

    return dict(
        conv1=conv_p(in_channels, 32, 8),
        conv2=conv_p(32, 64, 4),
        conv3=conv_p(64, 64, 3),
        enc=lin_p(64 * 7 * 7, 512),
        policy=lin_p(512, n_actions),
        dec_lin=lin_p(512, 64 * 7 * 7),
        deconv1=convT_p(64, 64, 3),
        deconv2=convT_p(64, 32, 3),
        deconv3=convT_p(32, in_channels, 3),
    )


def prepare_params(p):
    """One-time conversion: matmul-ready bf16 weights + f32 bias rows, with N
    pre-padded to a multiple of 128 and the permutations needed so NHWC
    flattening matches PyTorch's NCHW .view()/Unflatten."""

    def pad_n(w, b):
        N = w.shape[1]
        Np = _round_up(N, 128)
        return (_pad2(w.astype(jnp.bfloat16), w.shape[0], Np),
                _pad2(b.astype(jnp.float32).reshape(1, N), 1, Np))

    def conv_w(w):                # (O,I,k,k) -> (I*k*k, O); rows (i, ki, kj)
        return w.reshape(w.shape[0], -1).T

    def convT_w(w):               # (I,O,k,k) -> flipped "full conv" -> (I*k*k, O)
        w = jnp.transpose(w[:, :, ::-1, ::-1], (1, 0, 2, 3))   # (O,I,k,k)
        return conv_w(w)

    # enc: PyTorch flattens (B,64,7,7) as (c,h,w); we flatten NHWC as (h,w,c).
    w_enc, b_enc = p["enc"]
    w_enc = w_enc.reshape(64, 7, 7, 512).transpose(1, 2, 0, 3).reshape(64 * 7 * 7, 512)

    # dec_lin: PyTorch unflattens to (64,7,7) NCHW; we reshape to (7,7,64) NHWC.
    w_dec, b_dec = p["dec_lin"]
    w_dec = w_dec.reshape(512, 64, 7, 7).transpose(0, 2, 3, 1).reshape(512, 64 * 7 * 7)
    b_dec = b_dec.reshape(64, 7, 7).transpose(1, 2, 0).reshape(-1)

    return dict(
        conv1=pad_n(conv_w(p["conv1"][0]), p["conv1"][1]),
        conv2=pad_n(conv_w(p["conv2"][0]), p["conv2"][1]),
        conv3=pad_n(conv_w(p["conv3"][0]), p["conv3"][1]),
        enc=pad_n(w_enc, b_enc),
        policy=pad_n(p["policy"][0], p["policy"][1]),
        dec_lin=pad_n(w_dec, b_dec),
        deconv1=pad_n(convT_w(p["deconv1"][0]), p["deconv1"][1]),
        deconv2=pad_n(convT_w(p["deconv2"][0]), p["deconv2"][1]),
        deconv3=pad_n(convT_w(p["deconv3"][0]), p["deconv3"][1]),
    )


# ----------------------------------------------------------------------------
# DQN forward (NCHW at the boundary, NHWC internally)
# ----------------------------------------------------------------------------
def dqn_forward(prep, x_nchw, n_actions):
    """x:(B,C,84,84) f32 -> (policy (B,n_actions) f32, decoder (B,C,13,13) f32)."""
    B, C = x_nchw.shape[0], x_nchw.shape[1]
    x = jnp.transpose(x_nchw, (0, 2, 3, 1)).astype(jnp.bfloat16)          # -> NHWC

    h = conv2d_nhwc_pallas(x, prep["conv1"], 32, k=8, stride=4)           # (B,20,20,32)
    h = conv2d_nhwc_pallas(h, prep["conv2"], 64, k=4, stride=2)           # (B,9,9,64)
    h = conv2d_nhwc_pallas(h, prep["conv3"], 64, k=3, stride=1)           # (B,7,7,64)

    flat = h.reshape(B, -1)                 # NHWC flatten; enc weight pre-permuted
    policy, dec = encoder_policy_decoder_pallas(
        flat, prep["enc"], prep["policy"], prep["dec_lin"],
        n_pol=n_actions, n_dec=64 * 7 * 7)                                # (B,na),(B,3136)

    d = dec.reshape(B, 7, 7, 64)            # NHWC Unflatten; dec weight pre-permuted
    # ConvTranspose (stride=1, no pad) == "full" conv with flipped kernel; the
    # k-1 halo padding is folded into the patch-extraction op (pad=2).
    d = conv2d_nhwc_pallas(d, prep["deconv1"], 64, k=3, stride=1, pad=2)  # (B,9,9,64)
    d = conv2d_nhwc_pallas(d, prep["deconv2"], 32, k=3, stride=1, pad=2)  # (B,11,11,32)
    d = conv2d_nhwc_pallas(d, prep["deconv3"], C, k=3, stride=1, pad=2,
                           out_dtype=jnp.float32)                         # (B,13,13,C)

    return policy, jnp.transpose(d, (0, 3, 1, 2))                         # -> NCHW


if __name__ == "__main__":
    key = jax.random.PRNGKey(0)
    kp, kx = jax.random.split(key)

    # Atari DQN: observation (4, 84, 84) is required by the hardcoded 64*7*7 FC.
    B, C, H, W = 2, 4, 84, 84
    n_actions = 6

    params = init_params(kp, C, n_actions)
    prep = prepare_params(params)
    x = jax.random.uniform(kx, (B, C, H, W), jnp.float32)

    fwd = jax.jit(functools.partial(dqn_forward, n_actions=n_actions))
    policy, dec = fwd(prep, x)
    jax.block_until_ready((policy, dec))

    assert policy.shape == (B, n_actions), policy.shape
    assert dec.shape == (B, C, 13, 13), dec.shape
    assert bool(jnp.all(jnp.isfinite(policy))) and bool(jnp.all(jnp.isfinite(dec)))
    print("KERNEL_OK")
</pallas_src>

<mosaic_0001>
module attributes {stable_mosaic.version = 11 : i64} {
  func.func @_mm_bias_kernel(%arg0: i32, %arg1: memref<800x256xbf16, #tpu.memory_space<vmem>>, %arg2: memref<256x128xbf16, #tpu.memory_space<vmem>>, %arg3: memref<1x128xf32, #tpu.memory_space<vmem>>, %arg4: memref<800x128xbf16, #tpu.memory_space<vmem>>) attributes {dimension_semantics = [#tpu.dimension_semantics<parallel>], iteration_bounds = array<i64: 1>, scalar_prefetch = 0 : i64, scratch_operands = 0 : i64, tpu.core_type = #tpu.core_type<tc>, window_params = [{transform_indices = @transform_0, window_bounds = array<i64: 800, 256>}, {pipeline_mode = #tpu.pipeline_mode<synchronous>, transform_indices = @transform_1, window_bounds = array<i64: 256, 128>}, {pipeline_mode = #tpu.pipeline_mode<synchronous>, transform_indices = @transform_2, window_bounds = array<i64: 1, 128>}, {transform_indices = @transform_3, window_bounds = array<i64: 800, 128>}]} {
    %c0 = arith.constant 0 : index
    %c0_0 = arith.constant 0 : index
    %0 = vector.load %arg1[%c0, %c0_0] : memref<800x256xbf16, #tpu.memory_space<vmem>>, vector<800x256xbf16>
    %c0_1 = arith.constant 0 : index
    %c0_2 = arith.constant 0 : index
    %1 = vector.load %arg2[%c0_1, %c0_2] : memref<256x128xbf16, #tpu.memory_space<vmem>>, vector<256x128xbf16>
    %cst = arith.constant dense<0.000000e+00> : vector<800x128xf32>
    %2 = tpu.matmul %0, %1, %cst {dimension_numbers = #tpu.dot_dimension_numbers<[1], [0], [0], [1], [0, 0, 1, 1], [], []>} : vector<800x256xbf16>, vector<256x128xbf16>, vector<800x128xf32> -> vector<800x128xf32>
    %c0_3 = arith.constant 0 : index
    %c0_4 = arith.constant 0 : index
    %3 = vector.load %arg3[%c0_3, %c0_4] : memref<1x128xf32, #tpu.memory_space<vmem>>, vector<1x128xf32>
    %4 = vector.broadcast %3 : vector<1x128xf32> to vector<800x128xf32>
    %5 = arith.addf %2, %4 : vector<800x128xf32>
    %cst_5 = arith.constant 0.000000e+00 : f32
    %6 = vector.broadcast %cst_5 : f32 to vector<800x128xf32>
    %7 = arith.maximumf %5, %6 : vector<800x128xf32>
    %8 = arith.truncf %7 : vector<800x128xf32> to vector<800x128xbf16>
    %c0_6 = arith.constant 0 : index
    %c0_7 = arith.constant 0 : index
    %9 = vector.load %arg4[%c0_6, %c0_7] : memref<800x128xbf16, #tpu.memory_space<vmem>>, vector<800x128xbf16>
    tpu.vector_store %arg4[%c0_6, %c0_7], %8 {strides = array<i32>} : memref<800x128xbf16, #tpu.memory_space<vmem>>, vector<800x128xbf16>,
    return
  }
  func.func @transform_0(%arg0: i32) -> (i32, i32) {
    %c0_i32 = arith.constant 0 : i32
    %c0_i32_0 = arith.constant 0 : i32
    return %arg0, %c0_i32 : i32, i32
  }
  func.func @transform_1(%arg0: i32) -> (i32, i32) {
    %c0_i32 = arith.constant 0 : i32
    %c0_i32_0 = arith.constant 0 : i32
    %c0_i32_1 = arith.constant 0 : i32
    return %c0_i32, %c0_i32_0 : i32, i32
  }
  func.func @transform_2(%arg0: i32) -> (i32, i32) {
    %c0_i32 = arith.constant 0 : i32
    %c0_i32_0 = arith.constant 0 : i32
    %c0_i32_1 = arith.constant 0 : i32
    return %c0_i32, %c0_i32_0 : i32, i32
  }
  func.func @transform_3(%arg0: i32) -> (i32, i32) {
    %c0_i32 = arith.constant 0 : i32
    %c0_i32_0 = arith.constant 0 : i32
    return %arg0, %c0_i32 : i32, i32
  }
}

module attributes {stable_mosaic.version = 11 : i64} {
  func.func @_mm_bias_kernel(%arg0: i32, %arg1: memref<162x512xbf16, #tpu.memory_space<vmem>>, %arg2: memref<512x128xbf16, #tpu.memory_space<vmem>>, %arg3: memref<1x128xf32, #tpu.memory_space<vmem>>, %arg4: memref<162x128xbf16, #tpu.memory_space<vmem>>) attributes {dimension_semantics = [#tpu.dimension_semantics<parallel>], iteration_bounds = array<i64: 1>, scalar_prefetch = 0 : i64, scratch_operands = 0 : i64, tpu.core_type = #tpu.core_type<tc>, window_params = [{transform_indices = @transform_0, window_bounds = array<i64: 162, 512>}, {pipeline_mode = #tpu.pipeline_mode<synchronous>, transform_indices = @transform_1, window_bounds = array<i64: 512, 128>}, {pipeline_mode = #tpu.pipeline_mode<synchronous>, transform_indices = @transform_2, window_bounds = array<i64: 1, 128>}, {transform_indices = @transform_3, window_bounds = array<i64: 162, 128>}]} {
    %c0 = arith.constant 0 : index
    %c0_0 = arith.constant 0 : index
    %0 = vector.load %arg1[%c0, %c0_0] : memref<162x512xbf16, #tpu.memory_space<vmem>>, vector<162x512xbf16>
    %c0_1 = arith.constant 0 : index
    %c0_2 = arith.constant 0 : index
    %1 = vector.load %arg2[%c0_1, %c0_2] : memref<512x128xbf16, #tpu.memory_space<vmem>>, vector<512x128xbf16>
    %cst = arith.constant dense<0.000000e+00> : vector<162x128xf32>
    %2 = tpu.matmul %0, %1, %cst {dimension_numbers = #tpu.dot_dimension_numbers<[1], [0], [0], [1], [0, 0, 1, 1], [], []>} : vector<162x512xbf16>, vector<512x128xbf16>, vector<162x128xf32> -> vector<162x128xf32>
    %c0_3 = arith.constant 0 : index
    %c0_4 = arith.constant 0 : index
    %3 = vector.load %arg3[%c0_3, %c0_4] : memref<1x128xf32, #tpu.memory_space<vmem>>, vector<1x128xf32>
    %4 = vector.broadcast %3 : vector<1x128xf32> to vector<162x128xf32>
    %5 = arith.addf %2, %4 : vector<162x128xf32>
    %cst_5 = arith.constant 0.000000e+00 : f32
    %6 = vector.broadcast %cst_5 : f32 to vector<162x128xf32>
    %7 = arith.maximumf %5, %6 : vector<162x128xf32>
    %8 = arith.truncf %7 : vector<162x128xf32> to vector<162x128xbf16>
    %c0_6 = arith.constant 0 : index
    %c0_7 = arith.constant 0 : index
    %9 = vector.load %arg4[%c0_6, %c0_7] : memref<162x128xbf16, #tpu.memory_space<vmem>>, vector<162x128xbf16>
    tpu.vector_store %arg4[%c0_6, %c0_7], %8 {strides = array<i32>} : memref<162x128xbf16, #tpu.memory_space<vmem>>, vector<162x128xbf16>,
    return
  }
  func.func @transform_0(%arg0: i32) -> (i32, i32) {
    %c0_i32 = arith.constant 0 : i32
    %c0_i32_0 = arith.constant 0 : i32
    return %arg0, %c0_i32 : i32, i32
  }
  func.func @transform_1(%arg0: i32) -> (i32, i32) {
    %c0_i32 = arith.constant 0 : i32
    %c0_i32_0 = arith.constant 0 : i32
    %c0_i32_1 = arith.constant 0 : i32
    return %c0_i32, %c0_i32_0 : i32, i32
  }
  func.func @transform_2(%arg0: i32) -> (i32, i32) {
    %c0_i32 = arith.constant 0 : i32
    %c0_i32_0 = arith.constant 0 : i32
    %c0_i32_1 = arith.constant 0 : i32
    return %c0_i32, %c0_i32_0 : i32, i32
  }
  func.func @transform_3(%arg0: i32) -> (i32, i32) {
    %c0_i32 = arith.constant 0 : i32
    %c0_i32_0 = arith.constant 0 : i32
    return %arg0, %c0_i32 : i32, i32
  }
}

module attributes {stable_mosaic.version = 11 : i64} {
  func.func @_mm_bias_kernel(%arg0: i32, %arg1: memref<98x576xbf16, #tpu.memory_space<vmem>>, %arg2: memref<576x128xbf16, #tpu.memory_space<vmem>>, %arg3: memref<1x128xf32, #tpu.memory_space<vmem>>, %arg4: memref<98x128xbf16, #tpu.memory_space<vmem>>) attributes {dimension_semantics = [#tpu.dimension_semantics<parallel>], iteration_bounds = array<i64: 1>, scalar_prefetch = 0 : i64, scratch_operands = 0 : i64, tpu.core_type = #tpu.core_type<tc>, window_params = [{transform_indices = @transform_0, window_bounds = array<i64: 98, 576>}, {pipeline_mode = #tpu.pipeline_mode<synchronous>, transform_indices = @transform_1, window_bounds = array<i64: 576, 128>}, {pipeline_mode = #tpu.pipeline_mode<synchronous>, transform_indices = @transform_2, window_bounds = array<i64: 1, 128>}, {transform_indices = @transform_3, window_bounds = array<i64: 98, 128>}]} {
    %c0 = arith.constant 0 : index
    %c0_0 = arith.constant 0 : index
    %0 = vector.load %arg1[%c0, %c0_0] : memref<98x576xbf16, #tpu.memory_space<vmem>>, vector<98x576xbf16>
    %c0_1 = arith.constant 0 : index
    %c0_2 = arith.constant 0 : index
    %1 = vector.load %arg2[%c0_1, %c0_2] : memref<576x128xbf16, #tpu.memory_space<vmem>>, vector<576x128xbf16>
    %cst = arith.constant dense<0.000000e+00> : vector<98x128xf32>
    %2 = tpu.matmul %0, %1, %cst {dimension_numbers = #tpu.dot_dimension_numbers<[1], [0], [0], [1], [0, 0, 1, 1], [], []>} : vector<98x576xbf16>, vector<576x128xbf16>, vector<98x128xf32> -> vector<98x128xf32>
    %c0_3 = arith.constant 0 : index
    %c0_4 = arith.constant 0 : index
    %3 = vector.load %arg3[%c0_3, %c0_4] : memref<1x128xf32, #tpu.memory_space<vmem>>, vector<1x128xf32>
    %4 = vector.broadcast %3 : vector<1x128xf32> to vector<98x128xf32>
    %5 = arith.addf %2, %4 : vector<98x128xf32>
    %cst_5 = arith.constant 0.000000e+00 : f32
    %6 = vector.broadcast %cst_5 : f32 to vector<98x128xf32>
    %7 = arith.maximumf %5, %6 : vector<98x128xf32>
    %8 = arith.truncf %7 : vector<98x128xf32> to vector<98x128xbf16>
    %c0_6 = arith.constant 0 : index
    %c0_7 = arith.constant 0 : index
    %9 = vector.load %arg4[%c0_6, %c0_7] : memref<98x128xbf16, #tpu.memory_space<vmem>>, vector<98x128xbf16>
    tpu.vector_store %arg4[%c0_6, %c0_7], %8 {strides = array<i32>} : memref<98x128xbf16, #tpu.memory_space<vmem>>, vector<98x128xbf16>,
    return
  }
  func.func @transform_0(%arg0: i32) -> (i32, i32) {
    %c0_i32 = arith.constant 0 : i32
    %c0_i32_0 = arith.constant 0 : i32
    return %arg0, %c0_i32 : i32, i32
  }
  func.func @transform_1(%arg0: i32) -> (i32, i32) {
    %c0_i32 = arith.constant 0 : i32
    %c0_i32_0 = arith.constant 0 : i32
    %c0_i32_1 = arith.constant 0 : i32
    return %c0_i32, %c0_i32_0 : i32, i32
  }
  func.func @transform_2(%arg0: i32) -> (i32, i32) {
    %c0_i32 = arith.constant 0 : i32
    %c0_i32_0 = arith.constant 0 : i32
    %c0_i32_1 = arith.constant 0 : i32
    return %c0_i32, %c0_i32_0 : i32, i32
  }
  func.func @transform_3(%arg0: i32) -> (i32, i32) {
    %c0_i32 = arith.constant 0 : i32
    %c0_i32_0 = arith.constant 0 : i32
    return %arg0, %c0_i32 : i32, i32
  }
}

module attributes {stable_mosaic.version = 11 : i64} {
  func.func @_enc_pol_dec_kernel(%arg0: i32, %arg1: memref<2x3136xbf16, #tpu.memory_space<vmem>>, %arg2: memref<3136x512xbf16, #tpu.memory_space<vmem>>, %arg3: memref<1x512xf32, #tpu.memory_space<vmem>>, %arg4: memref<512x128xbf16, #tpu.memory_space<vmem>>, %arg5: memref<1x128xf32, #tpu.memory_space<vmem>>, %arg6: memref<512x3200xbf16, #tpu.memory_space<vmem>>, %arg7: memref<1x3200xf32, #tpu.memory_space<vmem>>, %arg8: memref<2x128xf32, #tpu.memory_space<vmem>>, %arg9: memref<2x3200xbf16, #tpu.memory_space<vmem>>) attributes {dimension_semantics = [#tpu.dimension_semantics<arbitrary>], iteration_bounds = array<i64: 1>, scalar_prefetch = 0 : i64, scratch_operands = 0 : i64, tpu.core_type = #tpu.core_type<tc>, window_params = [{pipeline_mode = #tpu.pipeline_mode<synchronous>, transform_indices = @transform_0, window_bounds = array<i64: 2, 3136>}, {pipeline_mode = #tpu.pipeline_mode<synchronous>, transform_indices = @transform_1, window_bounds = array<i64: 3136, 512>}, {pipeline_mode = #tpu.pipeline_mode<synchronous>, transform_indices = @transform_2, window_bounds = array<i64: 1, 512>}, {pipeline_mode = #tpu.pipeline_mode<synchronous>, transform_indices = @transform_3, window_bounds = array<i64: 512, 128>}, {pipeline_mode = #tpu.pipeline_mode<synchronous>, transform_indices = @transform_4, window_bounds = array<i64: 1, 128>}, {pipeline_mode = #tpu.pipeline_mode<synchronous>, transform_indices = @transform_5, window_bounds = array<i64: 512, 3200>}, {pipeline_mode = #tpu.pipeline_mode<synchronous>, transform_indices = @transform_6, window_bounds = array<i64: 1, 3200>}, {pipeline_mode = #tpu.pipeline_mode<synchronous>, transform_indices = @transform_7, window_bounds = array<i64: 2, 128>}, {pipeline_mode = #tpu.pipeline_mode<synchronous>, transform_indices = @transform_8, window_bounds = array<i64: 2, 3200>}]} {
    %c0 = arith.constant 0 : index
    %c0_0 = arith.constant 0 : index
    %0 = vector.load %arg1[%c0, %c0_0] : memref<2x3136xbf16, #tpu.memory_space<vmem>>, vector<2x3136xbf16>
    %c0_1 = arith.constant 0 : index
    %c0_2 = arith.constant 0 : index
    %1 = vector.load %arg2[%c0_1, %c0_2] : memref<3136x512xbf16, #tpu.memory_space<vmem>>, vector<3136x512xbf16>
    %cst = arith.constant dense<0.000000e+00> : vector<2x512xf32>
    %2 = tpu.matmul %0, %1, %cst {dimension_numbers = #tpu.dot_dimension_numbers<[1], [0], [0], [1], [0, 0, 1, 1], [], []>} : vector<2x3136xbf16>, vector<3136x512xbf16>, vector<2x512xf32> -> vector<2x512xf32>
    %c0_3 = arith.constant 0 : index
    %c0_4 = arith.constant 0 : index
    %3 = vector.load %arg3[%c0_3, %c0_4] : memref<1x512xf32, #tpu.memory_space<vmem>>, vector<1x512xf32>
    %4 = vector.broadcast %3 : vector<1x512xf32> to vector<2x512xf32>
    %5 = arith.addf %2, %4 : vector<2x512xf32>
    %cst_5 = arith.constant 0.000000e+00 : f32
    %6 = vector.broadcast %cst_5 : f32 to vector<2x512xf32>
    %7 = arith.maximumf %5, %6 : vector<2x512xf32>
    %8 = arith.truncf %7 : vector<2x512xf32> to vector<2x512xbf16>
    %c0_6 = arith.constant 0 : index
    %c0_7 = arith.constant 0 : index
    %9 = vector.load %arg4[%c0_6, %c0_7] : memref<512x128xbf16, #tpu.memory_space<vmem>>, vector<512x128xbf16>
    %cst_8 = arith.constant dense<0.000000e+00> : vector<2x128xf32>
    %10 = tpu.matmul %8, %9, %cst_8 {dimension_numbers = #tpu.dot_dimension_numbers<[1], [0], [0], [1], [0, 0, 1, 1], [], []>} : vector<2x512xbf16>, vector<512x128xbf16>, vector<2x128xf32> -> vector<2x128xf32>
    %c0_9 = arith.constant 0 : index
    %c0_10 = arith.constant 0 : index
    %11 = vector.load %arg5[%c0_9, %c0_10] : memref<1x128xf32, #tpu.memory_space<vmem>>, vector<1x128xf32>
    %12 = vector.broadcast %11 : vector<1x128xf32> to vector<2x128xf32>
    %13 = arith.addf %10, %12 : vector<2x128xf32>
    %c0_11 = arith.constant 0 : index
    %c0_12 = arith.constant 0 : index
    %14 = vector.load %arg8[%c0_11, %c0_12] : memref<2x128xf32, #tpu.memory_space<vmem>>, vector<2x128xf32>
    tpu.vector_store %arg8[%c0_11, %c0_12], %13 {strides = array<i32>} : memref<2x128xf32, #tpu.memory_space<vmem>>, vector<2x128xf32>,
    %c0_13 = arith.constant 0 : index
    %c0_14 = arith.constant 0 : index
    %15 = vector.load %arg6[%c0_13, %c0_14] : memref<512x3200xbf16, #tpu.memory_space<vmem>>, vector<512x3200xbf16>
    %cst_15 = arith.constant dense<0.000000e+00> : vector<2x3200xf32>
    %16 = tpu.matmul %8, %15, %cst_15 {dimension_numbers = #tpu.dot_dimension_numbers<[1], [0], [0], [1], [0, 0, 1, 1], [], []>} : vector<2x512xbf16>, vector<512x3200xbf16>, vector<2x3200xf32> -> vector<2x3200xf32>
    %c0_16 = arith.constant 0 : index
    %c0_17 = arith.constant 0 : index
    %17 = vector.load %arg7[%c0_16, %c0_17] : memref<1x3200xf32, #tpu.memory_space<vmem>>, vector<1x3200xf32>
    %18 = vector.broadcast %17 : vector<1x3200xf32> to vector<2x3200xf32>
    %19 = arith.addf %16, %18 : vector<2x3200xf32>
    %20 = arith.truncf %19 : vector<2x3200xf32> to vector<2x3200xbf16>
    %c0_18 = arith.constant 0 : index
    %c0_19 = arith.constant 0 : index
    %21 = vector.load %arg9[%c0_18, %c0_19] : memref<2x3200xbf16, #tpu.memory_space<vmem>>, vector<2x3200xbf16>
    tpu.vector_store %arg9[%c0_18, %c0_19], %20 {strides = array<i32>} : memref<2x3200xbf16, #tpu.memory_space<vmem>>, vector<2x3200xbf16>,
    return
  }
  func.func @transform_0(%arg0: i32) -> (i32, i32) {
    %c0_i32 = arith.constant 0 : i32
    %c0_i32_0 = arith.constant 0 : i32
    %c0_i32_1 = arith.constant 0 : i32
    return %c0_i32, %c0_i32_0 : i32, i32
  }
  func.func @transform_1(%arg0: i32) -> (i32, i32) {
    %c0_i32 = arith.constant 0 : i32
    %c0_i32_0 = arith.constant 0 : i32
    %c0_i32_1 = arith.constant 0 : i32
    return %c0_i32, %c0_i32_0 : i32, i32
  }
  func.func @transform_2(%arg0: i32) -> (i32, i32) {
    %c0_i32 = arith.constant 0 : i32
    %c0_i32_0 = arith.constant 0 : i32
    %c0_i32_1 = arith.constant 0 : i32
    return %c0_i32, %c0_i32_0 : i32, i32
  }
  func.func @transform_3(%arg0: i32) -> (i32, i32) {
    %c0_i32 = arith.constant 0 : i32
    %c0_i32_0 = arith.constant 0 : i32
    %c0_i32_1 = arith.constant 0 : i32
    return %c0_i32, %c0_i32_0 : i32, i32
  }
  func.func @transform_4(%arg0: i32) -> (i32, i32) {
    %c0_i32 = arith.constant 0 : i32
    %c0_i32_0 = arith.constant 0 : i32
    %c0_i32_1 = arith.constant 0 : i32
    return %c0_i32, %c0_i32_0 : i32, i32
  }
  func.func @transform_5(%arg0: i32) -> (i32, i32) {
    %c0_i32 = arith.constant 0 : i32
    %c0_i32_0 = arith.constant 0 : i32
    %c0_i32_1 = arith.constant 0 : i32
    return %c0_i32, %c0_i32_0 : i32, i32
  }
  func.func @transform_6(%arg0: i32) -> (i32, i32) {
    %c0_i32 = arith.constant 0 : i32
    %c0_i32_0 = arith.constant 0 : i32
    %c0_i32_1 = arith.constant 0 : i32
    return %c0_i32, %c0_i32_0 : i32, i32
  }
  func.func @transform_7(%arg0: i32) -> (i32, i32) {
    %c0_i32 = arith.constant 0 : i32
    %c0_i32_0 = arith.constant 0 : i32
    %c0_i32_1 = arith.constant 0 : i32
    return %c0_i32, %c0_i32_0 : i32, i32
  }
  func.func @transform_8(%arg0: i32) -> (i32, i32) {
    %c0_i32 = arith.constant 0 : i32
    %c0_i32_0 = arith.constant 0 : i32
    %c0_i32_1 = arith.constant 0 : i32
    return %c0_i32, %c0_i32_0 : i32, i32
  }
}

module attributes {stable_mosaic.version = 11 : i64} {
  func.func @_mm_bias_kernel(%arg0: i32, %arg1: memref<162x576xbf16, #tpu.memory_space<vmem>>, %arg2: memref<576x128xbf16, #tpu.memory_space<vmem>>, %arg3: memref<1x128xf32, #tpu.memory_space<vmem>>, %arg4: memref<162x128xbf16, #tpu.memory_space<vmem>>) attributes {dimension_semantics = [#tpu.dimension_semantics<parallel>], iteration_bounds = array<i64: 1>, scalar_prefetch = 0 : i64, scratch_operands = 0 : i64, tpu.core_type = #tpu.core_type<tc>, window_params = [{transform_indices = @transform_0, window_bounds = array<i64: 162, 576>}, {pipeline_mode = #tpu.pipeline_mode<synchronous>, transform_indices = @transform_1, window_bounds = array<i64: 576, 128>}, {pipeline_mode = #tpu.pipeline_mode<synchronous>, transform_indices = @transform_2, window_bounds = array<i64: 1, 128>}, {transform_indices = @transform_3, window_bounds = array<i64: 162, 128>}]} {
    %c0 = arith.constant 0 : index
    %c0_0 = arith.constant 0 : index
    %0 = vector.load %arg1[%c0, %c0_0] : memref<162x576xbf16, #tpu.memory_space<vmem>>, vector<162x576xbf16>
    %c0_1 = arith.constant 0 : index
    %c0_2 = arith.constant 0 : index
    %1 = vector.load %arg2[%c0_1, %c0_2] : memref<576x128xbf16, #tpu.memory_space<vmem>>, vector<576x128xbf16>
    %cst = arith.constant dense<0.000000e+00> : vector<162x128xf32>
    %2 = tpu.matmul %0, %1, %cst {dimension_numbers = #tpu.dot_dimension_numbers<[1], [0], [0], [1], [0, 0, 1, 1], [], []>} : vector<162x576xbf16>, vector<576x128xbf16>, vector<162x128xf32> -> vector<162x128xf32>
    %c0_3 = arith.constant 0 : index
    %c0_4 = arith.constant 0 : index
    %3 = vector.load %arg3[%c0_3, %c0_4] : memref<1x128xf32, #tpu.memory_space<vmem>>, vector<1x128xf32>
    %4 = vector.broadcast %3 : vector<1x128xf32> to vector<162x128xf32>
    %5 = arith.addf %2, %4 : vector<162x128xf32>
    %cst_5 = arith.constant 0.000000e+00 : f32
    %6 = vector.broadcast %cst_5 : f32 to vector<162x128xf32>
    %7 = arith.maximumf %5, %6 : vector<162x128xf32>
    %8 = arith.truncf %7 : vector<162x128xf32> to vector<162x128xbf16>
    %c0_6 = arith.constant 0 : index
    %c0_7 = arith.constant 0 : index
    %9 = vector.load %arg4[%c0_6, %c0_7] : memref<162x128xbf16, #tpu.memory_space<vmem>>, vector<162x128xbf16>
    tpu.vector_store %arg4[%c0_6, %c0_7], %8 {strides = array<i32>} : memref<162x128xbf16, #tpu.memory_space<vmem>>, vector<162x128xbf16>,
    return
  }
  func.func @transform_0(%arg0: i32) -> (i32, i32) {
    %c0_i32 = arith.constant 0 : i32
    %c0_i32_0 = arith.constant 0 : i32
    return %arg0, %c0_i32 : i32, i32
  }
  func.func @transform_1(%arg0: i32) -> (i32, i32) {
    %c0_i32 = arith.constant 0 : i32
    %c0_i32_0 = arith.constant 0 : i32
    %c0_i32_1 = arith.constant 0 : i32
    return %c0_i32, %c0_i32_0 : i32, i32
  }
  func.func @transform_2(%arg0: i32) -> (i32, i32) {
    %c0_i32 = arith.constant 0 : i32
    %c0_i32_0 = arith.constant 0 : i32
    %c0_i32_1 = arith.constant 0 : i32
    return %c0_i32, %c0_i32_0 : i32, i32
  }
  func.func @transform_3(%arg0: i32) -> (i32, i32) {
    %c0_i32 = arith.constant 0 : i32
    %c0_i32_0 = arith.constant 0 : i32
    return %arg0, %c0_i32 : i32, i32
  }
}

module attributes {stable_mosaic.version = 11 : i64} {
  func.func @_mm_bias_kernel(%arg0: i32, %arg1: memref<242x576xbf16, #tpu.memory_space<vmem>>, %arg2: memref<576x128xbf16, #tpu.memory_space<vmem>>, %arg3: memref<1x128xf32, #tpu.memory_space<vmem>>, %arg4: memref<242x128xbf16, #tpu.memory_space<vmem>>) attributes {dimension_semantics = [#tpu.dimension_semantics<parallel>], iteration_bounds = array<i64: 1>, scalar_prefetch = 0 : i64, scratch_operands = 0 : i64, tpu.core_type = #tpu.core_type<tc>, window_params = [{transform_indices = @transform_0, window_bounds = array<i64: 242, 576>}, {pipeline_mode = #tpu.pipeline_mode<synchronous>, transform_indices = @transform_1, window_bounds = array<i64: 576, 128>}, {pipeline_mode = #tpu.pipeline_mode<synchronous>, transform_indices = @transform_2, window_bounds = array<i64: 1, 128>}, {transform_indices = @transform_3, window_bounds = array<i64: 242, 128>}]} {
    %c0 = arith.constant 0 : index
    %c0_0 = arith.constant 0 : index
    %0 = vector.load %arg1[%c0, %c0_0] : memref<242x576xbf16, #tpu.memory_space<vmem>>, vector<242x576xbf16>
    %c0_1 = arith.constant 0 : index
    %c0_2 = arith.constant 0 : index
    %1 = vector.load %arg2[%c0_1, %c0_2] : memref<576x128xbf16, #tpu.memory_space<vmem>>, vector<576x128xbf16>
    %cst = arith.constant dense<0.000000e+00> : vector<242x128xf32>
    %2 = tpu.matmul %0, %1, %cst {dimension_numbers = #tpu.dot_dimension_numbers<[1], [0], [0], [1], [0, 0, 1, 1], [], []>} : vector<242x576xbf16>, vector<576x128xbf16>, vector<242x128xf32> -> vector<242x128xf32>
    %c0_3 = arith.constant 0 : index
    %c0_4 = arith.constant 0 : index
    %3 = vector.load %arg3[%c0_3, %c0_4] : memref<1x128xf32, #tpu.memory_space<vmem>>, vector<1x128xf32>
    %4 = vector.broadcast %3 : vector<1x128xf32> to vector<242x128xf32>
    %5 = arith.addf %2, %4 : vector<242x128xf32>
    %cst_5 = arith.constant 0.000000e+00 : f32
    %6 = vector.broadcast %cst_5 : f32 to vector<242x128xf32>
    %7 = arith.maximumf %5, %6 : vector<242x128xf32>
    %8 = arith.truncf %7 : vector<242x128xf32> to vector<242x128xbf16>
    %c0_6 = arith.constant 0 : index
    %c0_7 = arith.constant 0 : index
    %9 = vector.load %arg4[%c0_6, %c0_7] : memref<242x128xbf16, #tpu.memory_space<vmem>>, vector<242x128xbf16>
    tpu.vector_store %arg4[%c0_6, %c0_7], %8 {strides = array<i32>} : memref<242x128xbf16, #tpu.memory_space<vmem>>, vector<242x128xbf16>,
    return
  }
  func.func @transform_0(%arg0: i32) -> (i32, i32) {
    %c0_i32 = arith.constant 0 : i32
    %c0_i32_0 = arith.constant 0 : i32
    return %arg0, %c0_i32 : i32, i32
  }
  func.func @transform_1(%arg0: i32) -> (i32, i32) {
    %c0_i32 = arith.constant 0 : i32
    %c0_i32_0 = arith.constant 0 : i32
    %c0_i32_1 = arith.constant 0 : i32
    return %c0_i32, %c0_i32_0 : i32, i32
  }
  func.func @transform_2(%arg0: i32) -> (i32, i32) {
    %c0_i32 = arith.constant 0 : i32
    %c0_i32_0 = arith.constant 0 : i32
    %c0_i32_1 = arith.constant 0 : i32
    return %c0_i32, %c0_i32_0 : i32, i32
  }
  func.func @transform_3(%arg0: i32) -> (i32, i32) {
    %c0_i32 = arith.constant 0 : i32
    %c0_i32_0 = arith.constant 0 : i32
    return %arg0, %c0_i32 : i32, i32
  }
}

module attributes {stable_mosaic.version = 11 : i64} {
  func.func @_mm_bias_kernel(%arg0: i32, %arg1: memref<338x288xbf16, #tpu.memory_space<vmem>>, %arg2: memref<288x128xbf16, #tpu.memory_space<vmem>>, %arg3: memref<1x128xf32, #tpu.memory_space<vmem>>, %arg4: memref<338x128xf32, #tpu.memory_space<vmem>>) attributes {dimension_semantics = [#tpu.dimension_semantics<parallel>], iteration_bounds = array<i64: 1>, scalar_prefetch = 0 : i64, scratch_operands = 0 : i64, tpu.core_type = #tpu.core_type<tc>, window_params = [{transform_indices = @transform_0, window_bounds = array<i64: 338, 288>}, {pipeline_mode = #tpu.pipeline_mode<synchronous>, transform_indices = @transform_1, window_bounds = array<i64: 288, 128>}, {pipeline_mode = #tpu.pipeline_mode<synchronous>, transform_indices = @transform_2, window_bounds = array<i64: 1, 128>}, {transform_indices = @transform_3, window_bounds = array<i64: 338, 128>}]} {
    %c0 = arith.constant 0 : index
    %c0_0 = arith.constant 0 : index
    %0 = vector.load %arg1[%c0, %c0_0] : memref<338x288xbf16, #tpu.memory_space<vmem>>, vector<338x288xbf16>
    %c0_1 = arith.constant 0 : index
    %c0_2 = arith.constant 0 : index
    %1 = vector.load %arg2[%c0_1, %c0_2] : memref<288x128xbf16, #tpu.memory_space<vmem>>, vector<288x128xbf16>
    %cst = arith.constant dense<0.000000e+00> : vector<338x128xf32>
    %2 = tpu.matmul %0, %1, %cst {dimension_numbers = #tpu.dot_dimension_numbers<[1], [0], [0], [1], [0, 0, 1, 1], [], []>} : vector<338x288xbf16>, vector<288x128xbf16>, vector<338x128xf32> -> vector<338x128xf32>
    %c0_3 = arith.constant 0 : index
    %c0_4 = arith.constant 0 : index
    %3 = vector.load %arg3[%c0_3, %c0_4] : memref<1x128xf32, #tpu.memory_space<vmem>>, vector<1x128xf32>
    %4 = vector.broadcast %3 : vector<1x128xf32> to vector<338x128xf32>
    %5 = arith.addf %2, %4 : vector<338x128xf32>
    %cst_5 = arith.constant 0.000000e+00 : f32
    %6 = vector.broadcast %cst_5 : f32 to vector<338x128xf32>
    %7 = arith.maximumf %5, %6 : vector<338x128xf32>
    %c0_6 = arith.constant 0 : index
    %c0_7 = arith.constant 0 : index
    %8 = vector.load %arg4[%c0_6, %c0_7] : memref<338x128xf32, #tpu.memory_space<vmem>>, vector<338x128xf32>
    tpu.vector_store %arg4[%c0_6, %c0_7], %7 {strides = array<i32>} : memref<338x128xf32, #tpu.memory_space<vmem>>, vector<338x128xf32>,
    return
  }
  func.func @transform_0(%arg0: i32) -> (i32, i32) {
    %c0_i32 = arith.constant 0 : i32
    %c0_i32_0 = arith.constant 0 : i32
    return %arg0, %c0_i32 : i32, i32
  }
  func.func @transform_1(%arg0: i32) -> (i32, i32) {
    %c0_i32 = arith.constant 0 : i32
    %c0_i32_0 = arith.constant 0 : i32
    %c0_i32_1 = arith.constant 0 : i32
    return %c0_i32, %c0_i32_0 : i32, i32
  }
  func.func @transform_2(%arg0: i32) -> (i32, i32) {
    %c0_i32 = arith.constant 0 : i32
    %c0_i32_0 = arith.constant 0 : i32
    %c0_i32_1 = arith.constant 0 : i32
    return %c0_i32, %c0_i32_0 : i32, i32
  }
  func.func @transform_3(%arg0: i32) -> (i32, i32) {
    %c0_i32 = arith.constant 0 : i32
    %c0_i32_0 = arith.constant 0 : i32
    return %arg0, %c0_i32 : i32, i32
  }
}

</mosaic_0001>

<bundles_post_ra>
// kernel: dqn_forward.7
= control target key start
LH: loop header
LB: loop body
LE: loop exit
PB: predicated region body
PF: predicated region fallthrough
CT: control target
= control target key end

     0   :  { %v2602_v0 = vmov 0   ;;  %s3258_s1 = inlined_call_operand.vmem [shape: bf16[256,128], index: 1, kind: input, shape index: {}]   ;;  %s3259_s0 = inlined_call_operand.vmem [shape: bf16[800,256], index: 0, kind: input, shape index: {}]   ;;  %s3260_s2 = inlined_call_operand.vmem [shape: f32[1,128], index: 2, kind: input, shape index: {}]   ;;  %s3261_s3 = inlined_call_operand.vmem [shape: bf16[800,128], index: 3, kind: output, shape index: {}]  }
   0x1   :  { %750 = vmatprep.subr.bf16.mxu0 %v2602_v0  ;;  %2403 = vmatprep.subr.bf16.mxu1 %v2602_v0  ;;  %v2436_v1 = vld [vmem:[%s3258_s1] sm:$0xff]   ;;  %v2437_v2 = vld [vmem:[%s3258_s1 + $0x8] sm:$0xff]   ;;  %v2438_v3 = vld [vmem:[%s3258_s1 + $0x10] sm:$0xff]  }
   0x2   :  { %751 = vmatpush1.bf16.msra.mxu0 %v2436_v1  ;;  %2419 = vmatpush1.bf16.msra.mxu1 %v2436_v1  ;;  %v2439_v4 = vld [vmem:[%s3258_s1 + $0x18] sm:$0xff]   ;;  %v2440_v5 = vld [vmem:[%s3258_s1 + $0x20] sm:$0xff]   ;;  %v2441_v7 = vld [vmem:[%s3258_s1 + $0x28] sm:$0xff]  }
   0x3   :  { %752 = vmatprep.subr.bf16.mxu0 %v2602_v0  ;;  %2404 = vmatprep.subr.bf16.mxu1 %v2602_v0  ;;  %v2454_v6 = vld [vmem:[%s3259_s0 + $0x4] ss:$8 sps:$4 sm:$0xff]   ;;  %v2457_v8 = vld [vmem:[%s3259_s0 + $0x194] ss:$8 sps:$4 sm:$0xff]   ;;  %v2452_v19 = vld [vmem:[%s3259_s0] ss:$8 sps:$4 sm:$0xff]  }
   0x4   :  { %782 = vmatprep.mubr.bf16.mxu0 %v2454_v6  ;;  %982 = vmatprep.mubr.bf16.mxu1 %v2457_v8  ;;  %v2442_v9 = vld [vmem:[%s3258_s1 + $0x30] sm:$0xff]   ;;  %v2443_v10 = vld [vmem:[%s3258_s1 + $0x38] sm:$0xff]   ;;  %v2444_v11 = vld [vmem:[%s3258_s1 + $0x40] sm:$0xff]  }
   0x5   :  { %v2445_v12 = vld [vmem:[%s3258_s1 + $0x48] sm:$0xff]   ;;  %v2446_v13 = vld [vmem:[%s3258_s1 + $0x50] sm:$0xff]   ;;  %v2447_v14 = vld [vmem:[%s3258_s1 + $0x58] sm:$0xff]  }
   0x6   :  { %753 = vmatpush1.bf16.msra.mxu0 %v2437_v2  ;;  %2420 = vmatpush1.bf16.msra.mxu1 %v2437_v2  ;;  %v2448_v15 = vld [vmem:[%s3258_s1 + $0x60] sm:$0xff]   ;;  %v2449_v16 = vld [vmem:[%s3258_s1 + $0x68] sm:$0xff]   ;;  %v2450_v17 = vld [vmem:[%s3258_s1 + $0x70] sm:$0xff]  }
   0x7   :  { %754 = vmatprep.subr.bf16.mxu0 %v2602_v0  ;;  %2405 = vmatprep.subr.bf16.mxu1 %v2602_v0  ;;  %v2451_v18 = vld [vmem:[%s3258_s1 + $0x78] sm:$0xff]   ;;  %v2460_v22 = vld [vmem:[%s3259_s0 + $0x1a4] ss:$8 sps:$4 sm:$0xff]   ;;  %v2463_v24 = vld [vmem:[%s3259_s0 + $0x1a0] ss:$8 sps:$4 sm:$0xff]  }
   0x8   :  { %v2455_v20 = vld [vmem:[%s3259_s0 + $0x190] ss:$8 sps:$4 sm:$0xff]   ;;  %v2458_v21 = vld [vmem:[%s3259_s0 + $0x14] ss:$8 sps:$4 sm:$0xff]   ;;  %v2464_v25 = vld [vmem:[%s3259_s0 + $0x24] ss:$8 sps:$4 sm:$0xff]  }
   0x9   :  { %v2462_v23 = vld [vmem:[%s3259_s0 + $0x10] ss:$8 sps:$4 sm:$0xff]   ;;  %v2466_v26 = vld [vmem:[%s3259_s0 + $0x1b4] ss:$8 sps:$4 sm:$0xff]   ;;  %v2468_v27 = vld [vmem:[%s3259_s0 + $0x20] ss:$8 sps:$4 sm:$0xff]  }
   0xa   :  { %755 = vmatpush1.bf16.msra.mxu0 %v2438_v3  ;;  %2421 = vmatpush1.bf16.msra.mxu1 %v2438_v3  ;;  %v2469_v28 = vld [vmem:[%s3259_s0 + $0x1b0] ss:$8 sps:$4 sm:$0xff]   ;;  %v2470_v29 = vld [vmem:[%s3259_s0 + $0x34] ss:$8 sps:$4 sm:$0xff]   ;;  %v2472_v30 = vld [vmem:[%s3259_s0 + $0x1c4] ss:$8 sps:$4 sm:$0xff]  }
   0xb   :  { %756 = vmatprep.subr.bf16.mxu0 %v2602_v0  ;;  %2406 = vmatprep.subr.bf16.mxu1 %v2602_v0  ;;  %v2474_v31 = vld [vmem:[%s3259_s0 + $0x30] ss:$8 sps:$4 sm:$0xff]   ;;  %v2475_v32 = vld [vmem:[%s3259_s0 + $0x1c0] ss:$8 sps:$4 sm:$0xff]   ;;  %v2476_v33 = vld [vmem:[%s3259_s0 + $0x44] ss:$8 sps:$4 sm:$0xff]  }
   0xc   :  { %v2478_v34 = vld [vmem:[%s3259_s0 + $0x1d4] ss:$8 sps:$4 sm:$0xff]   ;;  %v2480_v35 = vld [vmem:[%s3259_s0 + $0x40] ss:$8 sps:$4 sm:$0xff]   ;;  %v2481_v36 = vld [vmem:[%s3259_s0 + $0x1d0] ss:$8 sps:$4 sm:$0xff]  }
   0xd   :  { %v2482_v37 = vld [vmem:[%s3259_s0 + $0x54] ss:$8 sps:$4 sm:$0xff]   ;;  %v2484_v38 = vld [vmem:[%s3259_s0 + $0x1e4] ss:$8 sps:$4 sm:$0xff]   ;;  %v2486_v39 = vld [vmem:[%s3259_s0 + $0x50] ss:$8 sps:$4 sm:$0xff]  }
   0xe   :  { %757 = vmatpush1.bf16.msra.mxu0 %v2439_v4  ;;  %2422 = vmatpush1.bf16.msra.mxu1 %v2439_v4  ;;  %v2487_v40 = vld [vmem:[%s3259_s0 + $0x1e0] ss:$8 sps:$4 sm:$0xff]   ;;  %v2488_v41 = vld [vmem:[%s3259_s0 + $0x64] ss:$8 sps:$4 sm:$0xff]   ;;  %v2490_v42 = vld [vmem:[%s3259_s0 + $0x1f4] ss:$8 sps:$4 sm:$0xff]  }
   0xf   :  { %758 = vmatprep.subr.bf16.mxu0 %v2602_v0  ;;  %2407 = vmatprep.subr.bf16.mxu1 %v2602_v0  ;;  %v2492_v43 = vld [vmem:[%s3259_s0 + $0x60] ss:$8 sps:$4 sm:$0xff]   ;;  %v2493_v44 = vld [vmem:[%s3259_s0 + $0x1f0] ss:$8 sps:$4 sm:$0xff]   ;;  %v2494_v45 = vld [vmem:[%s3259_s0 + $0x74] ss:$8 sps:$4 sm:$0xff]  }
  0x10   :  { %v2496_v46 = vld [vmem:[%s3259_s0 + $0x204] ss:$8 sps:$4 sm:$0xff]   ;;  %v2498_v47 = vld [vmem:[%s3259_s0 + $0x70] ss:$8 sps:$4 sm:$0xff]   ;;  %v2499_v48 = vld [vmem:[%s3259_s0 + $0x200] ss:$8 sps:$4 sm:$0xff]  }
  0x11   :  { %v2500_v49 = vld [vmem:[%s3259_s0 + $0x84] ss:$8 sps:$4 sm:$0xff]   ;;  %v2502_v50 = vld [vmem:[%s3259_s0 + $0x214] ss:$8 sps:$4 sm:$0xff]   ;;  %v2504_v51 = vld [vmem:[%s3259_s0 + $0x80] ss:$8 sps:$4 sm:$0xff]  }
  0x12   :  { %759 = vmatpush1.bf16.msra.mxu0 %v2440_v5  ;;  %2423 = vmatpush1.bf16.msra.mxu1 %v2440_v5  ;;  %v2505_v52 = vld [vmem:[%s3259_s0 + $0x210] ss:$8 sps:$4 sm:$0xff]   ;;  %v2506_v53 = vld [vmem:[%s3259_s0 + $0x94] ss:$8 sps:$4 sm:$0xff]   ;;  %v2508_v54 = vld [vmem:[%s3259_s0 + $0x224] ss:$8 sps:$4 sm:$0xff]  }
  0x13   :  { %760 = vmatprep.subr.bf16.mxu0 %v2602_v0  ;;  %2408 = vmatprep.subr.bf16.mxu1 %v2602_v0  ;;  %v2510_v55 = vld [vmem:[%s3259_s0 + $0x90] ss:$8 sps:$4 sm:$0xff]   ;;  %v2511_v56 = vld [vmem:[%s3259_s0 + $0x220] ss:$8 sps:$4 sm:$0xff]   ;;  %v2512_v57 = vld [vmem:[%s3259_s0 + $0xa4] ss:$8 sps:$4 sm:$0xff]  }
  0x14   :  { %v2514_v58 = vld [vmem:[%s3259_s0 + $0x234] ss:$8 sps:$4 sm:$0xff]   ;;  %v2516_v59 = vld [vmem:[%s3259_s0 + $0xa0] ss:$8 sps:$4 sm:$0xff]   ;;  %v2517_v60 = vld [vmem:[%s3259_s0 + $0x230] ss:$8 sps:$4 sm:$0xff]  }
  0x15   :  { %v2518_v61 = vld [vmem:[%s3259_s0 + $0xb4] ss:$8 sps:$4 sm:$0xff]   ;;  %v2520_v62 = vld [vmem:[%s3259_s0 + $0x244] ss:$8 sps:$4 sm:$0xff]   ;;  %v2522_v63 = vld [vmem:[%s3259_s0 + $0xb0] ss:$8 sps:$4 sm:$0xff]  }
  0x16   :  { %761 = vmatpush1.bf16.msra.mxu0 %v2441_v7  ;;  %2424 = vmatpush1.bf16.msra.mxu1 %v2441_v7  ;;  %v2524_v1 = vld [vmem:[%s3259_s0 + $0xc4] ss:$8 sps:$4 sm:$0xff]   ;;  %v2526_v2 = vld [vmem:[%s3259_s0 + $0x254] ss:$8 sps:$4 sm:$0xff]   ;;  %v2528_v3 = vld [vmem:[%s3259_s0 + $0xc0] ss:$8 sps:$4 sm:$0xff]  }
  0x17   :  { %762 = vmatprep.subr.bf16.mxu0 %v2602_v0  ;;  %2409 = vmatprep.subr.bf16.mxu1 %v2602_v0  ;;  %v2529_v4 = vld [vmem:[%s3259_s0 + $0x250] ss:$8 sps:$4 sm:$0xff]   ;;  %v2530_v5 = vld [vmem:[%s3259_s0 + $0xd4] ss:$8 sps:$4 sm:$0xff]   ;;  %v2532_v6 = vld [vmem:[%s3259_s0 + $0x264] ss:$8 sps:$4 sm:$0xff]  }
  0x18   :  { %v2534_v7 = vld [vmem:[%s3259_s0 + $0xd0] ss:$8 sps:$4 sm:$0xff]   ;;  %v2535_v8 = vld [vmem:[%s3259_s0 + $0x260] ss:$8 sps:$4 sm:$0xff]  }
  0x1a   :  { %763 = vmatpush1.bf16.msra.mxu0 %v2442_v9  ;;  %2425 = vmatpush1.bf16.msra.mxu1 %v2442_v9  ;;  %v2536_v9 = vld [vmem:[%s3259_s0 + $0xe4] ss:$8 sps:$4 sm:$0xff]  }
  0x1b   :  { %764 = vmatprep.subr.bf16.mxu0 %v2602_v0  ;;  %2410 = vmatprep.subr.bf16.mxu1 %v2602_v0 }
  0x1e   :  { %765 = vmatpush1.bf16.msra.mxu0 %v2443_v10  ;;  %2426 = vmatpush1.bf16.msra.mxu1 %v2443_v10  ;;  %v2538_v10 = vld [vmem:[%s3259_s0 + $0x274] ss:$8 sps:$4 sm:$0xff]  }
  0x1f   :  { %766 = vmatprep.subr.bf16.mxu0 %v2602_v0  ;;  %2411 = vmatprep.subr.bf16.mxu1 %v2602_v0 }
  0x22   :  { %767 = vmatpush1.bf16.msra.mxu0 %v2444_v11  ;;  %2427 = vmatpush1.bf16.msra.mxu1 %v2444_v11  ;;  %v2540_v11 = vld [vmem:[%s3259_s0 + $0xe0] ss:$8 sps:$4 sm:$0xff]  }
  0x23   :  { %768 = vmatprep.subr.bf16.mxu0 %v2602_v0  ;;  %2412 = vmatprep.subr.bf16.mxu1 %v2602_v0 }
  0x26   :  { %769 = vmatpush1.bf16.msra.mxu0 %v2445_v12  ;;  %2428 = vmatpush1.bf16.msra.mxu1 %v2445_v12  ;;  %v2541_v12 = vld [vmem:[%s3259_s0 + $0x270] ss:$8 sps:$4 sm:$0xff]  }
  0x27   :  { %770 = vmatprep.subr.bf16.mxu0 %v2602_v0  ;;  %2413 = vmatprep.subr.bf16.mxu1 %v2602_v0 }
  0x2a   :  { %771 = vmatpush1.bf16.msra.mxu0 %v2446_v13  ;;  %2429 = vmatpush1.bf16.msra.mxu1 %v2446_v13  ;;  %v2542_v13 = vld [vmem:[%s3259_s0 + $0xf4] ss:$8 sps:$4 sm:$0xff]  }
  0x2b   :  { %772 = vmatprep.subr.bf16.mxu0 %v2602_v0  ;;  %2414 = vmatprep.subr.bf16.mxu1 %v2602_v0 }
  0x2e   :  { %773 = vmatpush1.bf16.msra.mxu0 %v2447_v14  ;;  %2430 = vmatpush1.bf16.msra.mxu1 %v2447_v14  ;;  %v2544_v14 = vld [vmem:[%s3259_s0 + $0x284] ss:$8 sps:$4 sm:$0xff]  }
  0x2f   :  { %774 = vmatprep.subr.bf16.mxu0 %v2602_v0  ;;  %2415 = vmatprep.subr.bf16.mxu1 %v2602_v0 }
  0x32   :  { %775 = vmatpush1.bf16.msra.mxu0 %v2448_v15  ;;  %2431 = vmatpush1.bf16.msra.mxu1 %v2448_v15  ;;  %v2546_v15 = vld [vmem:[%s3259_s0 + $0xf0] ss:$8 sps:$4 sm:$0xff]  }
  0x33   :  { %776 = vmatprep.subr.bf16.mxu0 %v2602_v0  ;;  %2416 = vmatprep.subr.bf16.mxu1 %v2602_v0 }
  0x36   :  { %777 = vmatpush1.bf16.msra.mxu0 %v2449_v16  ;;  %2432 = vmatpush1.bf16.msra.mxu1 %v2449_v16  ;;  %v2547_v16 = vld [vmem:[%s3259_s0 + $0x280] ss:$8 sps:$4 sm:$0xff]  }
  0x37   :  { %778 = vmatprep.subr.bf16.mxu0 %v2602_v0  ;;  %2417 = vmatprep.subr.bf16.mxu1 %v2602_v0 }
  0x3a   :  { %779 = vmatpush1.bf16.msra.mxu0 %v2450_v17  ;;  %2433 = vmatpush1.bf16.msra.mxu1 %v2450_v17  ;;  %v2548_v17 = vld [vmem:[%s3259_s0 + $0x104] ss:$8 sps:$4 sm:$0xff]  }
  0x3b   :  { %780 = vmatprep.subr.bf16.mxu0 %v2602_v0  ;;  %2418 = vmatprep.subr.bf16.mxu1 %v2602_v0  ;;  %v2523_v0 = vld [vmem:[%s3259_s0 + $0x240] ss:$8 sps:$4 sm:$0xff]  }
  0x3e   :  { %781 = vmatpush1.bf16.msra.mxu0 %v2451_v18  ;;  %2434 = vmatpush1.bf16.msra.mxu1 %v2451_v18  ;;  %v2550_v18 = vld [vmem:[%s3259_s0 + $0x294] ss:$8 sps:$4 sm:$0xff]  }
  0x41   :  { %783 = vmatmul.mubr.bf16.vlgmr.msra.gmra.mrb[0].mxu0 %v2452_v19  ;;  %983 = vmatmul.mubr.bf16.vlgmr.msra.gmra.mrb[0].mxu1 %v2455_v20  ;;  %v2552_v19 = vld [vmem:[%s3259_s0 + $0x100] ss:$8 sps:$4 sm:$0xff]   ;;  %v2553_v20 = vld [vmem:[%s3259_s0 + $0x290] ss:$8 sps:$4 sm:$0xff]  }
  0x42   :  { %790 = vmatprep.mubr.bf16.mxu0 %v2458_v21  ;;  %990 = vmatprep.mubr.bf16.mxu1 %v2460_v22  ;;  %v2554_v21 = vld [vmem:[%s3259_s0 + $0x114] ss:$8 sps:$4 sm:$0xff]   ;;  %v2556_v22 = vld [vmem:[%s3259_s0 + $0x2a4] ss:$8 sps:$4 sm:$0xff]  }
  0x49   :  { %791 = vmatmul.mubr.bf16.gmra.mrb[4].mxu0 %v2462_v23  ;;  %991 = vmatmul.mubr.bf16.gmra.mrb[4].mxu1 %v2463_v24  ;;  %v2558_v23 = vld [vmem:[%s3259_s0 + $0x110] ss:$8 sps:$4 sm:$0xff]   ;;  %v2559_v24 = vld [vmem:[%s3259_s0 + $0x2a0] ss:$8 sps:$4 sm:$0xff]  }
  0x4a   :  { %798 = vmatprep.mubr.bf16.mxu0 %v2464_v25  ;;  %998 = vmatprep.mubr.bf16.mxu1 %v2466_v26  ;;  %v2560_v25 = vld [vmem:[%s3259_s0 + $0x124] ss:$8 sps:$4 sm:$0xff]   ;;  %v2562_v26 = vld [vmem:[%s3259_s0 + $0x2b4] ss:$8 sps:$4 sm:$0xff]  }
  0x51   :  { %799 = vmatmul.mubr.bf16.gmra.mrb[8].mxu0 %v2468_v27  ;;  %999 = vmatmul.mubr.bf16.gmra.mrb[8].mxu1 %v2469_v28  ;;  %v2564_v27 = vld [vmem:[%s3259_s0 + $0x120] ss:$8 sps:$4 sm:$0xff]   ;;  %v2565_v28 = vld [vmem:[%s3259_s0 + $0x2b0] ss:$8 sps:$4 sm:$0xff]  }
  0x52   :  { %806 = vmatprep.mubr.bf16.mxu0 %v2470_v29  ;;  %1006 = vmatprep.mubr.bf16.mxu1 %v2472_v30  ;;  %v2566_v29 = vld [vmem:[%s3259_s0 + $0x134] ss:$8 sps:$4 sm:$0xff]   ;;  %v2568_v30 = vld [vmem:[%s3259_s0 + $0x2c4] ss:$8 sps:$4 sm:$0xff]  }
  0x59   :  { %807 = vmatmul.mubr.bf16.gmra.mrb[12].mxu0 %v2474_v31  ;;  %1007 = vmatmul.mubr.bf16.gmra.mrb[12].mxu1 %v2475_v32  ;;  %v2570_v31 = vld [vmem:[%s3259_s0 + $0x130] ss:$8 sps:$4 sm:$0xff]   ;;  %v2571_v32 = vld [vmem:[%s3259_s0 + $0x2c0] ss:$8 sps:$4 sm:$0xff]  }
  0x5a   :  { %814 = vmatprep.mubr.bf16.mxu0 %v2476_v33  ;;  %1014 = vmatprep.mubr.bf16.mxu1 %v2478_v34  ;;  %v2572_v33 = vld [vmem:[%s3259_s0 + $0x144] ss:$8 sps:$4 sm:$0xff]   ;;  %v2574_v34 = vld [vmem:[%s3259_s0 + $0x2d4] ss:$8 sps:$4 sm:$0xff]  }
  0x61   :  { %815 = vmatmul.mubr.bf16.gmra.mrb[16].mxu0 %v2480_v35  ;;  %1015 = vmatmul.mubr.bf16.gmra.mrb[16].mxu1 %v2481_v36  ;;  %v2576_v35 = vld [vmem:[%s3259_s0 + $0x140] ss:$8 sps:$4 sm:$0xff]   ;;  %v2577_v36 = vld [vmem:[%s3259_s0 + $0x2d0] ss:$8 sps:$4 sm:$0xff]  }
  0x62   :  { %822 = vmatprep.mubr.bf16.mxu0 %v2482_v37  ;;  %1022 = vmatprep.mubr.bf16.mxu1 %v2484_v38  ;;  %v2578_v37 = vld [vmem:[%s3259_s0 + $0x154] ss:$8 sps:$4 sm:$0xff]   ;;  %v2580_v38 = vld [vmem:[%s3259_s0 + $0x2e4] ss:$8 sps:$4 sm:$0xff]  }
  0x69   :  { %823 = vmatmul.mubr.bf16.gmra.mrb[20].mxu0 %v2486_v39  ;;  %1023 = vmatmul.mubr.bf16.gmra.mrb[20].mxu1 %v2487_v40  ;;  %v2582_v39 = vld [vmem:[%s3259_s0 + $0x150] ss:$8 sps:$4 sm:$0xff]   ;;  %v2583_v40 = vld [vmem:[%s3259_s0 + $0x2e0] ss:$8 sps:$4 sm:$0xff]  }
  0x6a   :  { %830 = vmatprep.mubr.bf16.mxu0 %v2488_v41  ;;  %1030 = vmatprep.mubr.bf16.mxu1 %v2490_v42  ;;  %v2584_v41 = vld [vmem:[%s3259_s0 + $0x164] ss:$8 sps:$4 sm:$0xff]   ;;  %v2586_v42 = vld [vmem:[%s3259_s0 + $0x2f4] ss:$8 sps:$4 sm:$0xff]  }
  0x71   :  { %831 = vmatmul.mubr.bf16.gmra.mrb[24].mxu0 %v2492_v43  ;;  %1031 = vmatmul.mubr.bf16.gmra.mrb[24].mxu1 %v2493_v44  ;;  %v2588_v43 = vld [vmem:[%s3259_s0 + $0x160] ss:$8 sps:$4 sm:$0xff]   ;;  %v2589_v44 = vld [vmem:[%s3259_s0 + $0x2f0] ss:$8 sps:$4 sm:$0xff]  }
  0x72   :  { %838 = vmatprep.mubr.bf16.mxu0 %v2494_v45  ;;  %1038 = vmatprep.mubr.bf16.mxu1 %v2496_v46  ;;  %v2590_v45 = vld [vmem:[%s3259_s0 + $0x174] ss:$8 sps:$4 sm:$0xff]   ;;  %v2592_v46 = vld [vmem:[%s3259_s0 + $0x304] ss:$8 sps:$4 sm:$0xff]  }
  0x79   :  { %839 = vmatmul.mubr.bf16.gmra.mrb[28].mxu0 %v2498_v47  ;;  %1039 = vmatmul.mubr.bf16.gmra.mrb[28].mxu1 %v2499_v48  ;;  %v2594_v47 = vld [vmem:[%s3259_s0 + $0x170] ss:$8 sps:$4 sm:$0xff]   ;;  %v2595_v48 = vld [vmem:[%s3259_s0 + $0x300] ss:$8 sps:$4 sm:$0xff]  }
  0x7a   :  { %846 = vmatprep.mubr.bf16.mxu0 %v2500_v49  ;;  %1046 = vmatprep.mubr.bf16.mxu1 %v2502_v50  ;;  %v2596_v49 = vld [vmem:[%s3259_s0 + $0x184] ss:$8 sps:$4 sm:$0xff]   ;;  %v2598_v50 = vld [vmem:[%s3259_s0 + $0x314] ss:$8 sps:$4 sm:$0xff]  }
  0x81   :  { %847 = vmatmul.mubr.bf16.gmra.mrb[32].mxu0 %v2504_v51  ;;  %1047 = vmatmul.mubr.bf16.gmra.mrb[32].mxu1 %v2505_v52  ;;  %v2600_v51 = vld [vmem:[%s3259_s0 + $0x180] ss:$8 sps:$4 sm:$0xff]   ;;  %v2601_v52 = vld [vmem:[%s3259_s0 + $0x310] ss:$8 sps:$4 sm:$0xff]  }
  0x82   :  { %854 = vmatprep.mubr.bf16.mxu0 %v2506_v53  ;;  %1054 = vmatprep.mubr.bf16.mxu1 %v2508_v54  ;;  %v3006_v53 = vld [vmem:[%s3260_s2] ss:$0 sm:$0xff] }
  0x89   :  { %855 = vmatmul.mubr.bf16.gmra.mrb[36].mxu0 %v2510_v55  ;;  %1055 = vmatmul.mubr.bf16.gmra.mrb[36].mxu1 %v2511_v56 }
  0x8a   :  { %862 = vmatprep.mubr.bf16.mxu0 %v2512_v57  ;;  %1062 = vmatprep.mubr.bf16.mxu1 %v2514_v58 }
  0x91   :  { %863 = vmatmul.mubr.bf16.gmra.mrb[40].mxu0 %v2516_v59  ;;  %1063 = vmatmul.mubr.bf16.gmra.mrb[40].mxu1 %v2517_v60 }
  0x92   :  { %870 = vmatprep.mubr.bf16.mxu0 %v2518_v61  ;;  %1070 = vmatprep.mubr.bf16.mxu1 %v2520_v62 }
  0x99   :  { %871 = vmatmul.mubr.bf16.gmra.mrb[44].mxu0 %v2522_v63  ;;  %1071 = vmatmul.mubr.bf16.gmra.mrb[44].mxu1 %v2523_v0 }
  0x9a   :  { %878 = vmatprep.mubr.bf16.mxu0 %v2524_v1  ;;  %1078 = vmatprep.mubr.bf16.mxu1 %v2526_v2 }
  0xa1   :  { %879 = vmatmul.mubr.bf16.gmra.mrb[48].mxu0 %v2528_v3  ;;  %1079 = vmatmul.mubr.bf16.gmra.mrb[48].mxu1 %v2529_v4 }
  0xa2   :  { %886 = vmatprep.mubr.bf16.mxu0 %v2530_v5  ;;  %1086 = vmatprep.mubr.bf16.mxu1 %v2532_v6 }
  0xa9   :  { %887 = vmatmul.mubr.bf16.gmra.mrb[52].mxu0 %v2534_v7  ;;  %1087 = vmatmul.mubr.bf16.gmra.mrb[52].mxu1 %v2535_v8 }
  0xaa   :  { %894 = vmatprep.mubr.bf16.mxu0 %v2536_v9  ;;  %1094 = vmatprep.mubr.bf16.mxu1 %v2538_v10 }
  0xb1   :  { %895 = vmatmul.mubr.bf16.gmra.mrb[56].mxu0 %v2540_v11  ;;  %1095 = vmatmul.mubr.bf16.gmra.mrb[56].mxu1 %v2541_v12 }
  0xb2   :  { %902 = vmatprep.mubr.bf16.mxu0 %v2542_v13  ;;  %1102 = vmatprep.mubr.bf16.mxu1 %v2544_v14 }
  0xb9   :  { %903 = vmatmul.mubr.bf16.gmra.mrb[60].mxu0 %v2546_v15  ;;  %1103 = vmatmul.mubr.bf16.gmra.mrb[60].mxu1 %v2547_v16 }
  0xba   :  { %910 = vmatprep.mubr.bf16.mxu0 %v2548_v17  ;;  %1110 = vmatprep.mubr.bf16.mxu1 %v2550_v18 }
  0xc1   :  { %911 = vmatmul.mubr.bf16.gmra.mrb[64].mxu0 %v2552_v19  ;;  %1111 = vmatmul.mubr.bf16.gmra.mrb[64].mxu1 %v2553_v20 }
  0xc2   :  { %918 = vmatprep.mubr.bf16.mxu0 %v2554_v21  ;;  %1118 = vmatprep.mubr.bf16.mxu1 %v2556_v22 }
  0xc9   :  { %919 = vmatmul.mubr.bf16.gmra.mrb[68].mxu0 %v2558_v23  ;;  %1119 = vmatmul.mubr.bf16.gmra.mrb[68].mxu1 %v2559_v24 }
  0xca   :  { %926 = vmatprep.mubr.bf16.mxu0 %v2560_v25  ;;  %1126 = vmatprep.mubr.bf16.mxu1 %v2562_v26 }
  0xd1   :  { %927 = vmatmul.mubr.bf16.gmra.mrb[72].mxu0 %v2564_v27  ;;  %1127 = vmatmul.mubr.bf16.gmra.mrb[72].mxu1 %v2565_v28 }
  0xd2   :  { %934 = vmatprep.mubr.bf16.mxu0 %v2566_v29  ;;  %1134 = vmatprep.mubr.bf16.mxu1 %v2568_v30 }
  0xd9   :  { %935 = vmatmul.mubr.bf16.gmra.mrb[76].mxu0 %v2570_v31  ;;  %1135 = vmatmul.mubr.bf16.gmra.mrb[76].mxu1 %v2571_v32 }
  0xda   :  { %942 = vmatprep.mubr.bf16.mxu0 %v2572_v33  ;;  %1142 = vmatprep.mubr.bf16.mxu1 %v2574_v34 }
  0xe1   :  { %943 = vmatmul.mubr.bf16.gmra.mrb[80].mxu0 %v2576_v35  ;;  %1143 = vmatmul.mubr.bf16.gmra.mrb[80].mxu1 %v2577_v36 }
  0xe2   :  { %950 = vmatprep.mubr.bf16.mxu0 %v2578_v37  ;;  %1150 = vmatprep.mubr.bf16.mxu1 %v2580_v38 }
  0xe9   :  { %951 = vmatmul.mubr.bf16.gmra.mrb[84].mxu0 %v2582_v39  ;;  %1151 = vmatmul.mubr.bf16.gmra.mrb[84].mxu1 %v2583_v40 }
  0xea   :  { %958 = vmatprep.mubr.bf16.mxu0 %v2584_v41  ;;  %1158 = vmatprep.mubr.bf16.mxu1 %v2586_v42 }
  0xf1   :  { %959 = vmatmul.mubr.bf16.gmra.mrb[88].mxu0 %v2588_v43  ;;  %1159 = vmatmul.mubr.bf16.gmra.mrb[88].mxu1 %v2589_v44 }
  0xf2   :  { %966 = vmatprep.mubr.bf16.mxu0 %v2590_v45  ;;  %1166 = vmatprep.mubr.bf16.mxu1 %v2592_v46 }
  0xf9   :  { %967 = vmatmul.mubr.bf16.gmra.mrb[92].mxu0 %v2594_v47  ;;  %1167 = vmatmul.mubr.bf16.gmra.mrb[92].mxu1 %v2595_v48 }
  0xfa   :  { %974 = vmatprep.mubr.bf16.mxu0 %v2596_v49  ;;  %1174 = vmatprep.mubr.bf16.mxu1 %v2598_v50 }
 0x101   :  { %975 = vmatmul.mubr.bf16.gmra.mrb[96].mxu0 %v2600_v51  ;;  %1175 = vmatmul.mubr.bf16.gmra.mrb[96].mxu1 %v2601_v52 }
 0x114   :  { %v784_v54 = vpop.f32.mrb[0].mxu0  ;;  %v984_v55 = vpop.f32.mrb[0].mxu1 }
 0x115   :  { %v785_v56 = vadd.f32 %v3006_v53, %v784_v54  ;;  %v985_v57 = vadd.f32 %v3006_v53, %v984_v55  ;;  %v786_v58 = vpop.f32.mrb[1].mxu0  ;;  %v986_v59 = vpop.f32.mrb[1].mxu1 }
 0x116   :  { %v787_v60 = vpop.f32.mrb[2].mxu0  ;;  %v987_v61 = vpop.f32.mrb[2].mxu1 }
 0x117   :  { %v788_v62 = vadd.f32 %v3006_v53, %v787_v60  ;;  %v988_v63 = vadd.f32 %v3006_v53, %v987_v61  ;;  %v789_v0 = vpop.f32.mrb[3].mxu0  ;;  %v989_v1 = vpop.f32.mrb[3].mxu1  ;;  %v1183_v2 = vmax.f32 %v785_v56, 0.0  ;;  %v1233_v3 = vmax.f32 %v985_v57, 0.0 }
 0x119   :  { %v1184_v4 = vmax.f32 %v788_v62, 0.0  ;;  %v1234_v5 = vmax.f32 %v988_v63, 0.0 }
 0x11b   :  { %v2107_v6 = vpack.c.bf16 %v1184_v4, %v1183_v2  ;;  %v2232_v7 = vpack.c.bf16 %v1234_v5, %v1233_v3 }
 0x11c   :  { %v792_v8 = vpop.f32.mrb[4].mxu0  ;;  %v992_v9 = vpop.f32.mrb[4].mxu1 }
 0x11d   :  { %2108 = vst [vmem:[%s3261_s3] sm:$0xff] %v2107_v6   ;;  %2378 = vst [vmem:[%s3261_s3 + $0xc8] sm:$0xff] %v2232_v7   ;;  %v793_v10 = vadd.f32 %v3006_v53, %v792_v8  ;;  %v993_v11 = vadd.f32 %v3006_v53, %v992_v9  ;;  %v794_v12 = vpop.f32.mrb[5].mxu0  ;;  %v994_v13 = vpop.f32.mrb[5].mxu1 }
 0x11e   :  { %v795_v14 = vpop.f32.mrb[6].mxu0  ;;  %v995_v15 = vpop.f32.mrb[6].mxu1 }
 0x11f   :  { %v796_v16 = vadd.f32 %v3006_v53, %v795_v14  ;;  %v996_v17 = vadd.f32 %v3006_v53, %v995_v15  ;;  %v797_v18 = vpop.f32.mrb[7].mxu0  ;;  %v997_v19 = vpop.f32.mrb[7].mxu1  ;;  %v1185_v20 = vmax.f32 %v793_v10, 0.0  ;;  %v1235_v21 = vmax.f32 %v993_v11, 0.0 }
 0x121   :  { %v1186_v22 = vmax.f32 %v796_v16, 0.0  ;;  %v1236_v23 = vmax.f32 %v996_v17, 0.0 }
 0x123   :  { %v2112_v24 = vpack.c.bf16 %v1186_v22, %v1185_v20  ;;  %v2237_v25 = vpack.c.bf16 %v1236_v23, %v1235_v21 }
 0x124   :  { %v800_v26 = vpop.f32.mrb[8].mxu0  ;;  %v1000_v27 = vpop.f32.mrb[8].mxu1 }
 0x125   :  { %2354 = vst [vmem:[%s3261_s3 + $0x8] sm:$0xff] %v2112_v24   ;;  %2379 = vst [vmem:[%s3261_s3 + $0xd0] sm:$0xff] %v2237_v25   ;;  %v801_v28 = vadd.f32 %v3006_v53, %v800_v26  ;;  %v1001_v29 = vadd.f32 %v3006_v53, %v1000_v27  ;;  %v802_v30 = vpop.f32.mrb[9].mxu0  ;;  %v1002_v31 = vpop.f32.mrb[9].mxu1 }
 0x126   :  { %v803_v32 = vpop.f32.mrb[10].mxu0  ;;  %v1003_v33 = vpop.f32.mrb[10].mxu1 }
 0x127   :  { %v804_v34 = vadd.f32 %v3006_v53, %v803_v32  ;;  %v1004_v35 = vadd.f32 %v3006_v53, %v1003_v33  ;;  %v805_v36 = vpop.f32.mrb[11].mxu0  ;;  %v1005_v37 = vpop.f32.mrb[11].mxu1  ;;  %v1187_v38 = vmax.f32 %v801_v28, 0.0  ;;  %v1237_v39 = vmax.f32 %v1001_v29, 0.0 }
 0x129   :  { %v1188_v40 = vmax.f32 %v804_v34, 0.0  ;;  %v1238_v41 = vmax.f32 %v1004_v35, 0.0 }
 0x12b   :  { %v2117_v42 = vpack.c.bf16 %v1188_v40, %v1187_v38  ;;  %v2242_v43 = vpack.c.bf16 %v1238_v41, %v1237_v39 }
 0x12c   :  { %v808_v44 = vpop.f32.mrb[12].mxu0  ;;  %v1008_v45 = vpop.f32.mrb[12].mxu1 }
 0x12d   :  { %2355 = vst [vmem:[%s3261_s3 + $0x10] sm:$0xff] %v2117_v42   ;;  %2380 = vst [vmem:[%s3261_s3 + $0xd8] sm:$0xff] %v2242_v43   ;;  %v809_v46 = vadd.f32 %v3006_v53, %v808_v44  ;;  %v1009_v47 = vadd.f32 %v3006_v53, %v1008_v45  ;;  %v810_v48 = vpop.f32.mrb[13].mxu0  ;;  %v1010_v49 = vpop.f32.mrb[13].mxu1 }
 0x12e   :  { %v811_v50 = vpop.f32.mrb[14].mxu0  ;;  %v1011_v51 = vpop.f32.mrb[14].mxu1 }
 0x12f   :  { %v812_v52 = vadd.f32 %v3006_v53, %v811_v50  ;;  %v1012_v54 = vadd.f32 %v3006_v53, %v1011_v51  ;;  %v813_v55 = vpop.f32.mrb[15].mxu0  ;;  %v1013_v56 = vpop.f32.mrb[15].mxu1  ;;  %v1189_v57 = vmax.f32 %v809_v46, 0.0  ;;  %v1239_v58 = vmax.f32 %v1009_v47, 0.0 }
 0x131   :  { %v1190_v59 = vmax.f32 %v812_v52, 0.0  ;;  %v1240_v60 = vmax.f32 %v1012_v54, 0.0 }
 0x133   :  { %v2122_v61 = vpack.c.bf16 %v1190_v59, %v1189_v57  ;;  %v2247_v62 = vpack.c.bf16 %v1240_v60, %v1239_v58 }
 0x134   :  { %v816_v63 = vpop.f32.mrb[16].mxu0  ;;  %v1016_v0 = vpop.f32.mrb[16].mxu1 }
 0x135   :  { %2356 = vst [vmem:[%s3261_s3 + $0x18] sm:$0xff] %v2122_v61   ;;  %2381 = vst [vmem:[%s3261_s3 + $0xe0] sm:$0xff] %v2247_v62   ;;  %v817_v1 = vadd.f32 %v3006_v53, %v816_v63  ;;  %v1017_v2 = vadd.f32 %v3006_v53, %v1016_v0  ;;  %v818_v3 = vpop.f32.mrb[17].mxu0  ;;  %v1018_v4 = vpop.f32.mrb[17].mxu1 }
 0x136   :  { %v819_v5 = vpop.f32.mrb[18].mxu0  ;;  %v1019_v6 = vpop.f32.mrb[18].mxu1 }
 0x137   :  { %v820_v7 = vadd.f32 %v3006_v53, %v819_v5  ;;  %v1020_v8 = vadd.f32 %v3006_v53, %v1019_v6  ;;  %v821_v9 = vpop.f32.mrb[19].mxu0  ;;  %v1021_v10 = vpop.f32.mrb[19].mxu1  ;;  %v1191_v11 = vmax.f32 %v817_v1, 0.0  ;;  %v1241_v12 = vmax.f32 %v1017_v2, 0.0 }
 0x139   :  { %v1192_v13 = vmax.f32 %v820_v7, 0.0  ;;  %v1242_v14 = vmax.f32 %v1020_v8, 0.0 }
 0x13b   :  { %v2127_v15 = vpack.c.bf16 %v1192_v13, %v1191_v11  ;;  %v2252_v16 = vpack.c.bf16 %v1242_v14, %v1241_v12 }
 0x13c   :  { %v824_v17 = vpop.f32.mrb[20].mxu0  ;;  %v1024_v18 = vpop.f32.mrb[20].mxu1 }
 0x13d   :  { %2357 = vst [vmem:[%s3261_s3 + $0x20] sm:$0xff] %v2127_v15   ;;  %2382 = vst [vmem:[%s3261_s3 + $0xe8] sm:$0xff] %v2252_v16   ;;  %v825_v19 = vadd.f32 %v3006_v53, %v824_v17  ;;  %v1025_v20 = vadd.f32 %v3006_v53, %v1024_v18  ;;  %v826_v21 = vpop.f32.mrb[21].mxu0  ;;  %v1026_v22 = vpop.f32.mrb[21].mxu1 }
 0x13e   :  { %v827_v23 = vpop.f32.mrb[22].mxu0  ;;  %v1027_v24 = vpop.f32.mrb[22].mxu1 }
 0x13f   :  { %v828_v25 = vadd.f32 %v3006_v53, %v827_v23  ;;  %v1028_v26 = vadd.f32 %v3006_v53, %v1027_v24  ;;  %v829_v27 = vpop.f32.mrb[23].mxu0  ;;  %v1029_v28 = vpop.f32.mrb[23].mxu1  ;;  %v1193_v29 = vmax.f32 %v825_v19, 0.0  ;;  %v1243_v30 = vmax.f32 %v1025_v20, 0.0 }
 0x141   :  { %v1194_v31 = vmax.f32 %v828_v25, 0.0  ;;  %v1244_v32 = vmax.f32 %v1028_v26, 0.0 }
 0x143   :  { %v2132_v33 = vpack.c.bf16 %v1194_v31, %v1193_v29  ;;  %v2257_v34 = vpack.c.bf16 %v1244_v32, %v1243_v30 }
 0x144   :  { %v832_v35 = vpop.f32.mrb[24].mxu0  ;;  %v1032_v36 = vpop.f32.mrb[24].mxu1 }
 0x145   :  { %2358 = vst [vmem:[%s3261_s3 + $0x28] sm:$0xff] %v2132_v33   ;;  %2383 = vst [vmem:[%s3261_s3 + $0xf0] sm:$0xff] %v2257_v34   ;;  %v833_v37 = vadd.f32 %v3006_v53, %v832_v35  ;;  %v1033_v38 = vadd.f32 %v3006_v53, %v1032_v36  ;;  %v834_v39 = vpop.f32.mrb[25].mxu0  ;;  %v1034_v40 = vpop.f32.mrb[25].mxu1 }
 0x146   :  { %v835_v41 = vpop.f32.mrb[26].mxu0  ;;  %v1035_v42 = vpop.f32.mrb[26].mxu1 }
 0x147   :  { %v836_v43 = vadd.f32 %v3006_v53, %v835_v41  ;;  %v1036_v44 = vadd.f32 %v3006_v53, %v1035_v42  ;;  %v837_v45 = vpop.f32.mrb[27].mxu0  ;;  %v1037_v46 = vpop.f32.mrb[27].mxu1  ;;  %v1195_v47 = vmax.f32 %v833_v37, 0.0  ;;  %v1245_v48 = vmax.f32 %v1033_v38, 0.0 }
 0x149   :  { %v1196_v49 = vmax.f32 %v836_v43, 0.0  ;;  %v1246_v50 = vmax.f32 %v1036_v44, 0.0 }
 0x14b   :  { %v2137_v51 = vpack.c.bf16 %v1196_v49, %v1195_v47  ;;  %v2262_v52 = vpack.c.bf16 %v1246_v50, %v1245_v48 }
 0x14c   :  { %v840_v54 = vpop.f32.mrb[28].mxu0  ;;  %v1040_v55 = vpop.f32.mrb[28].mxu1 }
 0x14d   :  { %2359 = vst [vmem:[%s3261_s3 + $0x30] sm:$0xff] %v2137_v51   ;;  %2384 = vst [vmem:[%s3261_s3 + $0xf8] sm:$0xff] %v2262_v52   ;;  %v841_v56 = vadd.f32 %v3006_v53, %v840_v54  ;;  %v1041_v57 = vadd.f32 %v3006_v53, %v1040_v55  ;;  %v842_v58 = vpop.f32.mrb[29].mxu0  ;;  %v1042_v59 = vpop.f32.mrb[29].mxu1 }
 0x14e   :  { %v843_v60 = vpop.f32.mrb[30].mxu0  ;;  %v1043_v61 = vpop.f32.mrb[30].mxu1 }
 0x14f   :  { %v844_v62 = vadd.f32 %v3006_v53, %v843_v60  ;;  %v1044_v63 = vadd.f32 %v3006_v53, %v1043_v61  ;;  %v845_v0 = vpop.f32.mrb[31].mxu0  ;;  %v1045_v1 = vpop.f32.mrb[31].mxu1  ;;  %v1197_v2 = vmax.f32 %v841_v56, 0.0  ;;  %v1247_v3 = vmax.f32 %v1041_v57, 0.0 }
 0x151   :  { %v1198_v4 = vmax.f32 %v844_v62, 0.0  ;;  %v1248_v5 = vmax.f32 %v1044_v63, 0.0 }
 0x153   :  { %v2142_v6 = vpack.c.bf16 %v1198_v4, %v1197_v2  ;;  %v2267_v7 = vpack.c.bf16 %v1248_v5, %v1247_v3 }
 0x154   :  { %v848_v8 = vpop.f32.mrb[32].mxu0  ;;  %v1048_v9 = vpop.f32.mrb[32].mxu1 }
 0x155   :  { %2360 = vst [vmem:[%s3261_s3 + $0x38] sm:$0xff] %v2142_v6   ;;  %2385 = vst [vmem:[%s3261_s3 + $0x100] sm:$0xff] %v2267_v7   ;;  %v849_v10 = vadd.f32 %v3006_v53, %v848_v8  ;;  %v1049_v11 = vadd.f32 %v3006_v53, %v1048_v9  ;;  %v850_v12 = vpop.f32.mrb[33].mxu0  ;;  %v1050_v13 = vpop.f32.mrb[33].mxu1 }
 0x156   :  { %v851_v14 = vpop.f32.mrb[34].mxu0  ;;  %v1051_v15 = vpop.f32.mrb[34].mxu1 }
 0x157   :  { %v852_v16 = vadd.f32 %v3006_v53, %v851_v14  ;;  %v1052_v17 = vadd.f32 %v3006_v53, %v1051_v15  ;;  %v853_v18 = vpop.f32.mrb[35].mxu0  ;;  %v1053_v19 = vpop.f32.mrb[35].mxu1  ;;  %v1199_v20 = vmax.f32 %v849_v10, 0.0  ;;  %v1249_v21 = vmax.f32 %v1049_v11, 0.0 }
 0x159   :  { %v1200_v22 = vmax.f32 %v852_v16, 0.0  ;;  %v1250_v23 = vmax.f32 %v1052_v17, 0.0 }
 0x15b   :  { %v2147_v24 = vpack.c.bf16 %v1200_v22, %v1199_v20  ;;  %v2272_v25 = vpack.c.bf16 %v1250_v23, %v1249_v21 }
 0x15c   :  { %v856_v26 = vpop.f32.mrb[36].mxu0  ;;  %v1056_v27 = vpop.f32.mrb[36].mxu1 }
 0x15d   :  { %2361 = vst [vmem:[%s3261_s3 + $0x40] sm:$0xff] %v2147_v24   ;;  %2386 = vst [vmem:[%s3261_s3 + $0x108] sm:$0xff] %v2272_v25   ;;  %v857_v28 = vadd.f32 %v3006_v53, %v856_v26  ;;  %v1057_v29 = vadd.f32 %v3006_v53, %v1056_v27  ;;  %v858_v30 = vpop.f32.mrb[37].mxu0  ;;  %v1058_v31 = vpop.f32.mrb[37].mxu1 }
 0x15e   :  { %v859_v32 = vpop.f32.mrb[38].mxu0  ;;  %v1059_v33 = vpop.f32.mrb[38].mxu1 }
 0x15f   :  { %v860_v34 = vadd.f32 %v3006_v53, %v859_v32  ;;  %v1060_v35 = vadd.f32 %v3006_v53, %v1059_v33  ;;  %v861_v36 = vpop.f32.mrb[39].mxu0  ;;  %v1061_v37 = vpop.f32.mrb[39].mxu1  ;;  %v1201_v38 = vmax.f32 %v857_v28, 0.0  ;;  %v1251_v39 = vmax.f32 %v1057_v29, 0.0 }
 0x161   :  { %v1202_v40 = vmax.f32 %v860_v34, 0.0  ;;  %v1252_v41 = vmax.f32 %v1060_v35, 0.0 }
 0x163   :  { %v2152_v42 = vpack.c.bf16 %v1202_v40, %v1201_v38  ;;  %v2277_v43 = vpack.c.bf16 %v1252_v41, %v1251_v39 }
 0x164   :  { %v864_v44 = vpop.f32.mrb[40].mxu0  ;;  %v1064_v45 = vpop.f32.mrb[40].mxu1 }
 0x165   :  { %2362 = vst [vmem:[%s3261_s3 + $0x48] sm:$0xff] %v2152_v42   ;;  %2387 = vst [vmem:[%s3261_s3 + $0x110] sm:$0xff] %v2277_v43   ;;  %v865_v46 = vadd.f32 %v3006_v53, %v864_v44  ;;  %v1065_v47 = vadd.f32 %v3006_v53, %v1064_v45  ;;  %v866_v48 = vpop.f32.mrb[41].mxu0  ;;  %v1066_v49 = vpop.f32.mrb[41].mxu1 }
 0x166   :  { %v867_v50 = vpop.f32.mrb[42].mxu0  ;;  %v1067_v51 = vpop.f32.mrb[42].mxu1 }
 0x167   :  { %v868_v52 = vadd.f32 %v3006_v53, %v867_v50  ;;  %v1068_v54 = vadd.f32 %v3006_v53, %v1067_v51  ;;  %v869_v55 = vpop.f32.mrb[43].mxu0  ;;  %v1069_v56 = vpop.f32.mrb[43].mxu1  ;;  %v1203_v57 = vmax.f32 %v865_v46, 0.0  ;;  %v1253_v58 = vmax.f32 %v1065_v47, 0.0 }
 0x169   :  { %v1204_v59 = vmax.f32 %v868_v52, 0.0  ;;  %v1254_v60 = vmax.f32 %v1068_v54, 0.0 }
 0x16b   :  { %v2157_v61 = vpack.c.bf16 %v1204_v59, %v1203_v57  ;;  %v2282_v62 = vpack.c.bf16 %v1254_v60, %v1253_v58 }
 0x16c   :  { %v872_v63 = vpop.f32.mrb[44].mxu0  ;;  %v1072_v0 = vpop.f32.mrb[44].mxu1 }
 0x16d   :  { %2363 = vst [vmem:[%s3261_s3 + $0x50] sm:$0xff] %v2157_v61   ;;  %2388 = vst [vmem:[%s3261_s3 + $0x118] sm:$0xff] %v2282_v62   ;;  %v873_v1 = vadd.f32 %v3006_v53, %v872_v63  ;;  %v1073_v2 = vadd.f32 %v3006_v53, %v1072_v0  ;;  %v874_v3 = vpop.f32.mrb[45].mxu0  ;;  %v1074_v4 = vpop.f32.mrb[45].mxu1 }
 0x16e   :  { %v875_v5 = vpop.f32.mrb[46].mxu0  ;;  %v1075_v6 = vpop.f32.mrb[46].mxu1 }
 0x16f   :  { %v876_v7 = vadd.f32 %v3006_v53, %v875_v5  ;;  %v1076_v8 = vadd.f32 %v3006_v53, %v1075_v6  ;;  %v877_v9 = vpop.f32.mrb[47].mxu0  ;;  %v1077_v10 = vpop.f32.mrb[47].mxu1  ;;  %v1205_v11 = vmax.f32 %v873_v1, 0.0  ;;  %v1255_v12 = vmax.f32 %v1073_v2, 0.0 }
 0x171   :  { %v1206_v13 = vmax.f32 %v876_v7, 0.0  ;;  %v1256_v14 = vmax.f32 %v1076_v8, 0.0 }
 0x173   :  { %v2162_v15 = vpack.c.bf16 %v1206_v13, %v1205_v11  ;;  %v2287_v16 = vpack.c.bf16 %v1256_v14, %v1255_v12 }
 0x174   :  { %v880_v17 = vpop.f32.mrb[48].mxu0  ;;  %v1080_v18 = vpop.f32.mrb[48].mxu1 }
 0x175   :  { %2364 = vst [vmem:[%s3261_s3 + $0x58] sm:$0xff] %v2162_v15   ;;  %2389 = vst [vmem:[%s3261_s3 + $0x120] sm:$0xff] %v2287_v16   ;;  %v881_v19 = vadd.f32 %v3006_v53, %v880_v17  ;;  %v1081_v20 = vadd.f32 %v3006_v53, %v1080_v18  ;;  %v882_v21 = vpop.f32.mrb[49].mxu0  ;;  %v1082_v22 = vpop.f32.mrb[49].mxu1 }
 0x176   :  { %v883_v23 = vpop.f32.mrb[50].mxu0  ;;  %v1083_v24 = vpop.f32.mrb[50].mxu1 }
 0x177   :  { %v884_v25 = vadd.f32 %v3006_v53, %v883_v23  ;;  %v1084_v26 = vadd.f32 %v3006_v53, %v1083_v24  ;;  %v885_v27 = vpop.f32.mrb[51].mxu0  ;;  %v1085_v28 = vpop.f32.mrb[51].mxu1  ;;  %v1207_v29 = vmax.f32 %v881_v19, 0.0  ;;  %v1257_v30 = vmax.f32 %v1081_v20, 0.0 }
 0x179   :  { %v1208_v31 = vmax.f32 %v884_v25, 0.0  ;;  %v1258_v32 = vmax.f32 %v1084_v26, 0.0 }
 0x17b   :  { %v2167_v33 = vpack.c.bf16 %v1208_v31, %v1207_v29  ;;  %v2292_v34 = vpack.c.bf16 %v1258_v32, %v1257_v30 }
 0x17c   :  { %v888_v35 = vpop.f32.mrb[52].mxu0  ;;  %v1088_v36 = vpop.f32.mrb[52].mxu1 }
 0x17d   :  { %2365 = vst [vmem:[%s3261_s3 + $0x60] sm:$0xff] %v2167_v33   ;;  %2390 = vst [vmem:[%s3261_s3 + $0x128] sm:$0xff] %v2292_v34   ;;  %v889_v37 = vadd.f32 %v3006_v53, %v888_v35  ;;  %v1089_v38 = vadd.f32 %v3006_v53, %v1088_v36  ;;  %v890_v39 = vpop.f32.mrb[53].mxu0  ;;  %v1090_v40 = vpop.f32.mrb[53].mxu1 }
 0x17e   :  { %v891_v41 = vpop.f32.mrb[54].mxu0  ;;  %v1091_v42 = vpop.f32.mrb[54].mxu1 }
 0x17f   :  { %v892_v43 = vadd.f32 %v3006_v53, %v891_v41  ;;  %v1092_v44 = vadd.f32 %v3006_v53, %v1091_v42  ;;  %v893_v45 = vpop.f32.mrb[55].mxu0  ;;  %v1093_v46 = vpop.f32.mrb[55].mxu1  ;;  %v1209_v47 = vmax.f32 %v889_v37, 0.0  ;;  %v1259_v48 = vmax.f32 %v1089_v38, 0.0 }
 0x181   :  { %v1210_v49 = vmax.f32 %v892_v43, 0.0  ;;  %v1260_v50 = vmax.f32 %v1092_v44, 0.0 }
 0x183   :  { %v2172_v51 = vpack.c.bf16 %v1210_v49, %v1209_v47  ;;  %v2297_v52 = vpack.c.bf16 %v1260_v50, %v1259_v48 }
 0x184   :  { %v896_v54 = vpop.f32.mrb[56].mxu0  ;;  %v1096_v55 = vpop.f32.mrb[56].mxu1 }
 0x185   :  { %2366 = vst [vmem:[%s3261_s3 + $0x68] sm:$0xff] %v2172_v51   ;;  %2391 = vst [vmem:[%s3261_s3 + $0x130] sm:$0xff] %v2297_v52   ;;  %v897_v56 = vadd.f32 %v3006_v53, %v896_v54  ;;  %v1097_v57 = vadd.f32 %v3006_v53, %v1096_v55  ;;  %v898_v58 = vpop.f32.mrb[57].mxu0  ;;  %v1098_v59 = vpop.f32.mrb[57].mxu1 }
 0x186   :  { %v899_v60 = vpop.f32.mrb[58].mxu0  ;;  %v1099_v61 = vpop.f32.mrb[58].mxu1 }
 0x187   :  { %v900_v62 = vadd.f32 %v3006_v53, %v899_v60  ;;  %v1100_v63 = vadd.f32 %v3006_v53, %v1099_v61  ;;  %v901_v0 = vpop.f32.mrb[59].mxu0  ;;  %v1101_v1 = vpop.f32.mrb[59].mxu1  ;;  %v1211_v2 = vmax.f32 %v897_v56, 0.0  ;;  %v1261_v3 = vmax.f32 %v1097_v57, 0.0 }
 0x189   :  { %v1212_v4 = vmax.f32 %v900_v62, 0.0  ;;  %v1262_v5 = vmax.f32 %v1100_v63, 0.0 }
 0x18b   :  { %v2177_v6 = vpack.c.bf16 %v1212_v4, %v1211_v2  ;;  %v2302_v7 = vpack.c.bf16 %v1262_v5, %v1261_v3 }
 0x18c   :  { %v904_v8 = vpop.f32.mrb[60].mxu0  ;;  %v1104_v9 = vpop.f32.mrb[60].mxu1 }
 0x18d   :  { %2367 = vst [vmem:[%s3261_s3 + $0x70] sm:$0xff] %v2177_v6   ;;  %2392 = vst [vmem:[%s3261_s3 + $0x138] sm:$0xff] %v2302_v7   ;;  %v905_v10 = vadd.f32 %v3006_v53, %v904_v8  ;;  %v1105_v11 = vadd.f32 %v3006_v53, %v1104_v9  ;;  %v906_v12 = vpop.f32.mrb[61].mxu0  ;;  %v1106_v13 = vpop.f32.mrb[61].mxu1 }
 0x18e   :  { %v907_v14 = vpop.f32.mrb[62].mxu0  ;;  %v1107_v15 = vpop.f32.mrb[62].mxu1 }
 0x18f   :  { %v908_v16 = vadd.f32 %v3006_v53, %v907_v14  ;;  %v1108_v17 = vadd.f32 %v3006_v53, %v1107_v15  ;;  %v909_v18 = vpop.f32.mrb[63].mxu0  ;;  %v1109_v19 = vpop.f32.mrb[63].mxu1  ;;  %v1213_v20 = vmax.f32 %v905_v10, 0.0  ;;  %v1263_v21 = vmax.f32 %v1105_v11, 0.0 }
 0x191   :  { %v1214_v22 = vmax.f32 %v908_v16, 0.0  ;;  %v1264_v23 = vmax.f32 %v1108_v17, 0.0 }
 0x193   :  { %v2182_v24 = vpack.c.bf16 %v1214_v22, %v1213_v20  ;;  %v2307_v25 = vpack.c.bf16 %v1264_v23, %v1263_v21 }
 0x194   :  { %v912_v26 = vpop.f32.mrb[64].mxu0  ;;  %v1112_v27 = vpop.f32.mrb[64].mxu1 }
 0x195   :  { %2368 = vst [vmem:[%s3261_s3 + $0x78] sm:$0xff] %v2182_v24   ;;  %2393 = vst [vmem:[%s3261_s3 + $0x140] sm:$0xff] %v2307_v25   ;;  %v913_v28 = vadd.f32 %v3006_v53, %v912_v26  ;;  %v1113_v29 = vadd.f32 %v3006_v53, %v1112_v27  ;;  %v914_v30 = vpop.f32.mrb[65].mxu0  ;;  %v1114_v31 = vpop.f32.mrb[65].mxu1 }
 0x196   :  { %v915_v32 = vpop.f32.mrb[66].mxu0  ;;  %v1115_v33 = vpop.f32.mrb[66].mxu1 }
 0x197   :  { %v916_v34 = vadd.f32 %v3006_v53, %v915_v32  ;;  %v1116_v35 = vadd.f32 %v3006_v53, %v1115_v33  ;;  %v917_v36 = vpop.f32.mrb[67].mxu0  ;;  %v1117_v37 = vpop.f32.mrb[67].mxu1  ;;  %v1215_v38 = vmax.f32 %v913_v28, 0.0  ;;  %v1265_v39 = vmax.f32 %v1113_v29, 0.0 }
 0x199   :  { %v1216_v40 = vmax.f32 %v916_v34, 0.0  ;;  %v1266_v41 = vmax.f32 %v1116_v35, 0.0 }
 0x19b   :  { %v2187_v42 = vpack.c.bf16 %v1216_v40, %v1215_v38  ;;  %v2312_v43 = vpack.c.bf16 %v1266_v41, %v1265_v39 }
 0x19c   :  { %v920_v44 = vpop.f32.mrb[68].mxu0  ;;  %v1120_v45 = vpop.f32.mrb[68].mxu1 }
 0x19d   :  { %2369 = vst [vmem:[%s3261_s3 + $0x80] sm:$0xff] %v2187_v42   ;;  %2394 = vst [vmem:[%s3261_s3 + $0x148] sm:$0xff] %v2312_v43   ;;  %v921_v46 = vadd.f32 %v3006_v53, %v920_v44  ;;  %v1121_v47 = vadd.f32 %v3006_v53, %v1120_v45  ;;  %v922_v48 = vpop.f32.mrb[69].mxu0  ;;  %v1122_v49 = vpop.f32.mrb[69].mxu1 }
 0x19e   :  { %v923_v50 = vpop.f32.mrb[70].mxu0  ;;  %v1123_v51 = vpop.f32.mrb[70].mxu1 }
 0x19f   :  { %v924_v52 = vadd.f32 %v3006_v53, %v923_v50  ;;  %v1124_v54 = vadd.f32 %v3006_v53, %v1123_v51  ;;  %v925_v55 = vpop.f32.mrb[71].mxu0  ;;  %v1125_v56 = vpop.f32.mrb[71].mxu1  ;;  %v1217_v57 = vmax.f32 %v921_v46, 0.0  ;;  %v1267_v58 = vmax.f32 %v1121_v47, 0.0 }
 0x1a1   :  { %v1218_v59 = vmax.f32 %v924_v52, 0.0  ;;  %v1268_v60 = vmax.f32 %v1124_v54, 0.0 }
 0x1a3   :  { %v2192_v61 = vpack.c.bf16 %v1218_v59, %v1217_v57  ;;  %v2317_v62 = vpack.c.bf16 %v1268_v60, %v1267_v58 }
 0x1a4   :  { %v928_v63 = vpop.f32.mrb[72].mxu0  ;;  %v1128_v0 = vpop.f32.mrb[72].mxu1 }
 0x1a5   :  { %2370 = vst [vmem:[%s3261_s3 + $0x88] sm:$0xff] %v2192_v61   ;;  %2395 = vst [vmem:[%s3261_s3 + $0x150] sm:$0xff] %v2317_v62   ;;  %v929_v1 = vadd.f32 %v3006_v53, %v928_v63  ;;  %v1129_v2 = vadd.f32 %v3006_v53, %v1128_v0  ;;  %v930_v3 = vpop.f32.mrb[73].mxu0  ;;  %v1130_v4 = vpop.f32.mrb[73].mxu1 }
 0x1a6   :  { %v931_v5 = vpop.f32.mrb[74].mxu0  ;;  %v1131_v6 = vpop.f32.mrb[74].mxu1 }
 0x1a7   :  { %v932_v7 = vadd.f32 %v3006_v53, %v931_v5  ;;  %v1132_v8 = vadd.f32 %v3006_v53, %v1131_v6  ;;  %v933_v9 = vpop.f32.mrb[75].mxu0  ;;  %v1133_v10 = vpop.f32.mrb[75].mxu1  ;;  %v1219_v11 = vmax.f32 %v929_v1, 0.0  ;;  %v1269_v12 = vmax.f32 %v1129_v2, 0.0 }
 0x1a9   :  { %v1220_v13 = vmax.f32 %v932_v7, 0.0  ;;  %v1270_v14 = vmax.f32 %v1132_v8, 0.0 }
 0x1ab   :  { %v2197_v15 = vpack.c.bf16 %v1220_v13, %v1219_v11  ;;  %v2322_v16 = vpack.c.bf16 %v1270_v14, %v1269_v12 }
 0x1ac   :  { %v936_v17 = vpop.f32.mrb[76].mxu0  ;;  %v1136_v18 = vpop.f32.mrb[76].mxu1 }
 0x1ad   :  { %2371 = vst [vmem:[%s3261_s3 + $0x90] sm:$0xff] %v2197_v15   ;;  %2396 = vst [vmem:[%s3261_s3 + $0x158] sm:$0xff] %v2322_v16   ;;  %v937_v19 = vadd.f32 %v3006_v53, %v936_v17  ;;  %v1137_v20 = vadd.f32 %v3006_v53, %v1136_v18  ;;  %v938_v21 = vpop.f32.mrb[77].mxu0  ;;  %v1138_v22 = vpop.f32.mrb[77].mxu1 }
 0x1ae   :  { %v939_v23 = vpop.f32.mrb[78].mxu0  ;;  %v1139_v24 = vpop.f32.mrb[78].mxu1 }
 0x1af   :  { %v940_v25 = vadd.f32 %v3006_v53, %v939_v23  ;;  %v1140_v26 = vadd.f32 %v3006_v53, %v1139_v24  ;;  %v941_v27 = vpop.f32.mrb[79].mxu0  ;;  %v1141_v28 = vpop.f32.mrb[79].mxu1  ;;  %v1221_v29 = vmax.f32 %v937_v19, 0.0  ;;  %v1271_v30 = vmax.f32 %v1137_v20, 0.0 }
 0x1b1   :  { %v1222_v31 = vmax.f32 %v940_v25, 0.0  ;;  %v1272_v32 = vmax.f32 %v1140_v26, 0.0 }
 0x1b3   :  { %v2202_v33 = vpack.c.bf16 %v1222_v31, %v1221_v29  ;;  %v2327_v34 = vpack.c.bf16 %v1272_v32, %v1271_v30 }
 0x1b4   :  { %v944_v35 = vpop.f32.mrb[80].mxu0  ;;  %v1144_v36 = vpop.f32.mrb[80].mxu1 }
 0x1b5   :  { %2372 = vst [vmem:[%s3261_s3 + $0x98] sm:$0xff] %v2202_v33   ;;  %2397 = vst [vmem:[%s3261_s3 + $0x160] sm:$0xff] %v2327_v34   ;;  %v945_v37 = vadd.f32 %v3006_v53, %v944_v35  ;;  %v1145_v38 = vadd.f32 %v3006_v53, %v1144_v36  ;;  %v946_v39 = vpop.f32.mrb[81].mxu0  ;;  %v1146_v40 = vpop.f32.mrb[81].mxu1 }
 0x1b6   :  { %v947_v41 = vpop.f32.mrb[82].mxu0  ;;  %v1147_v42 = vpop.f32.mrb[82].mxu1 }
 0x1b7   :  { %v948_v43 = vadd.f32 %v3006_v53, %v947_v41  ;;  %v1148_v44 = vadd.f32 %v3006_v53, %v1147_v42  ;;  %v949_v45 = vpop.f32.mrb[83].mxu0  ;;  %v1149_v46 = vpop.f32.mrb[83].mxu1  ;;  %v1223_v47 = vmax.f32 %v945_v37, 0.0  ;;  %v1273_v48 = vmax.f32 %v1145_v38, 0.0 }
 0x1b9   :  { %v1224_v49 = vmax.f32 %v948_v43, 0.0  ;;  %v1274_v50 = vmax.f32 %v1148_v44, 0.0 }
 0x1bb   :  { %v2207_v51 = vpack.c.bf16 %v1224_v49, %v1223_v47  ;;  %v2332_v52 = vpack.c.bf16 %v1274_v50, %v1273_v48 }
 0x1bc   :  { %v952_v54 = vpop.f32.mrb[84].mxu0  ;;  %v1152_v55 = vpop.f32.mrb[84].mxu1 }
 0x1bd   :  { %2373 = vst [vmem:[%s3261_s3 + $0xa0] sm:$0xff] %v2207_v51   ;;  %2398 = vst [vmem:[%s3261_s3 + $0x168] sm:$0xff] %v2332_v52   ;;  %v953_v56 = vadd.f32 %v3006_v53, %v952_v54  ;;  %v1153_v57 = vadd.f32 %v3006_v53, %v1152_v55  ;;  %v954_v58 = vpop.f32.mrb[85].mxu0  ;;  %v1154_v59 = vpop.f32.mrb[85].mxu1 }
 0x1be   :  { %v955_v60 = vpop.f32.mrb[86].mxu0  ;;  %v1155_v61 = vpop.f32.mrb[86].mxu1 }
 0x1bf   :  { %v956_v62 = vadd.f32 %v3006_v53, %v955_v60  ;;  %v1156_v63 = vadd.f32 %v3006_v53, %v1155_v61  ;;  %v957_v0 = vpop.f32.mrb[87].mxu0  ;;  %v1157_v1 = vpop.f32.mrb[87].mxu1  ;;  %v1225_v2 = vmax.f32 %v953_v56, 0.0  ;;  %v1275_v3 = vmax.f32 %v1153_v57, 0.0 }
 0x1c1   :  { %v1226_v4 = vmax.f32 %v956_v62, 0.0  ;;  %v1276_v5 = vmax.f32 %v1156_v63, 0.0 }
 0x1c3   :  { %v2212_v6 = vpack.c.bf16 %v1226_v4, %v1225_v2  ;;  %v2337_v7 = vpack.c.bf16 %v1276_v5, %v1275_v3 }
 0x1c4   :  { %v960_v8 = vpop.f32.mrb[88].mxu0  ;;  %v1160_v9 = vpop.f32.mrb[88].mxu1 }
 0x1c5   :  { %2374 = vst [vmem:[%s3261_s3 + $0xa8] sm:$0xff] %v2212_v6   ;;  %2399 = vst [vmem:[%s3261_s3 + $0x170] sm:$0xff] %v2337_v7   ;;  %v961_v10 = vadd.f32 %v3006_v53, %v960_v8  ;;  %v1161_v11 = vadd.f32 %v3006_v53, %v1160_v9  ;;  %v962_v12 = vpop.f32.mrb[89].mxu0  ;;  %v1162_v13 = vpop.f32.mrb[89].mxu1 }
 0x1c6   :  { %v963_v14 = vpop.f32.mrb[90].mxu0  ;;  %v1163_v15 = vpop.f32.mrb[90].mxu1 }
 0x1c7   :  { %v964_v16 = vadd.f32 %v3006_v53, %v963_v14  ;;  %v1164_v17 = vadd.f32 %v3006_v53, %v1163_v15  ;;  %v965_v18 = vpop.f32.mrb[91].mxu0  ;;  %v1165_v19 = vpop.f32.mrb[91].mxu1  ;;  %v1227_v20 = vmax.f32 %v961_v10, 0.0  ;;  %v1277_v21 = vmax.f32 %v1161_v11, 0.0 }
 0x1c9   :  { %v1228_v22 = vmax.f32 %v964_v16, 0.0  ;;  %v1278_v23 = vmax.f32 %v1164_v17, 0.0 }
 0x1cb   :  { %v2217_v24 = vpack.c.bf16 %v1228_v22, %v1227_v20  ;;  %v2342_v25 = vpack.c.bf16 %v1278_v23, %v1277_v21 }
 0x1cc   :  { %v968_v26 = vpop.f32.mrb[92].mxu0  ;;  %v1168_v27 = vpop.f32.mrb[92].mxu1 }
 0x1cd   :  { %2375 = vst [vmem:[%s3261_s3 + $0xb0] sm:$0xff] %v2217_v24   ;;  %2400 = vst [vmem:[%s3261_s3 + $0x178] sm:$0xff] %v2342_v25   ;;  %v969_v28 = vadd.f32 %v3006_v53, %v968_v26  ;;  %v1169_v29 = vadd.f32 %v3006_v53, %v1168_v27  ;;  %v970_v30 = vpop.f32.mrb[93].mxu0  ;;  %v1170_v31 = vpop.f32.mrb[93].mxu1 }
 0x1ce   :  { %v971_v32 = vpop.f32.mrb[94].mxu0  ;;  %v1171_v33 = vpop.f32.mrb[94].mxu1 }
 0x1cf   :  { %v972_v34 = vadd.f32 %v3006_v53, %v971_v32  ;;  %v1172_v35 = vadd.f32 %v3006_v53, %v1171_v33  ;;  %v973_v36 = vpop.f32.mrb[95].mxu0  ;;  %v1173_v37 = vpop.f32.mrb[95].mxu1  ;;  %v1229_v38 = vmax.f32 %v969_v28, 0.0  ;;  %v1279_v39 = vmax.f32 %v1169_v29, 0.0 }
 0x1d1   :  { %v1230_v40 = vmax.f32 %v972_v34, 0.0  ;;  %v1280_v41 = vmax.f32 %v1172_v35, 0.0 }
 0x1d3   :  { %v2222_v42 = vpack.c.bf16 %v1230_v40, %v1229_v38  ;;  %v2347_v43 = vpack.c.bf16 %v1280_v41, %v1279_v39 }
 0x1d4   :  { %v976_v44 = vpop.f32.mrb[96].mxu0  ;;  %v1176_v45 = vpop.f32.mrb[96].mxu1 }
 0x1d5   :  { %2376 = vst [vmem:[%s3261_s3 + $0xb8] sm:$0xff] %v2222_v42   ;;  %2401 = vst [vmem:[%s3261_s3 + $0x180] sm:$0xff] %v2347_v43   ;;  %v977_v46 = vadd.f32 %v3006_v53, %v976_v44  ;;  %v1177_v47 = vadd.f32 %v3006_v53, %v1176_v45  ;;  %v978_v48 = vpop.f32.mrb[97].mxu0  ;;  %v1178_v49 = vpop.f32.mrb[97].mxu1 }
 0x1d6   :  { %v979_v50 = vpop.f32.mrb[98].mxu0  ;;  %v1179_v51 = vpop.f32.mrb[98].mxu1 }
 0x1d7   :  { %v980_v52 = vadd.f32 %v3006_v53, %v979_v50  ;;  %v1180_v54 = vadd.f32 %v3006_v53, %v1179_v51  ;;  %v981_v55 = vpop.f32.mrb[99].mxu0  ;;  %v1181_v56 = vpop.f32.mrb[99].mxu1  ;;  %v1231_v57 = vmax.f32 %v977_v46, 0.0  ;;  %v1281_v58 = vmax.f32 %v1177_v47, 0.0 }
 0x1d9   :  { %v1232_v59 = vmax.f32 %v980_v52, 0.0  ;;  %v1282_v60 = vmax.f32 %v1180_v54, 0.0 }
 0x1db   :  { %v2227_v61 = vpack.c.bf16 %v1232_v59, %v1231_v57  ;;  %v2352_v62 = vpack.c.bf16 %v1282_v60, %v1281_v58 }
 0x1dd   :  { %2377 = vst [vmem:[%s3261_s3 + $0xc0] sm:$0xff] %v2227_v61   ;;  %2402 = vst [vmem:[%s3261_s3 + $0x188] sm:$0xff] %v2352_v62  }

// kernel: dqn_forward.8
= control target key start
LH: loop header
LB: loop body
LE: loop exit
PB: predicated region body
PF: predicated region fallthrough
CT: control target
= control target key end

     0   :  { %s1644_s1 = inlined_call_operand.vmem [shape: bf16[512,128], index: 1, kind: input, shape index: {}]   ;;  %s1645_s0 = inlined_call_operand.vmem [shape: bf16[162,512], index: 0, kind: input, shape index: {}]   ;;  %s1646_s2 = inlined_call_operand.vmem [shape: f32[1,128], index: 2, kind: input, shape index: {}]   ;;  %s1647_s3 = inlined_call_operand.vmem [shape: bf16[162,128], index: 3, kind: output, shape index: {}]  }
   0x1   :  { %v1247_v0 = vld [vmem:[%s1644_s1 + $0x40] sm:$0xff]   ;;  %v1251_v4 = vld [vmem:[%s1644_s1 + $0x48] sm:$0xff]   ;;  %v1255_v8 = vld [vmem:[%s1644_s1 + $0x50] sm:$0xff]  }
   0x2   :  { %v1248_v1 = vld [vmem:[%s1644_s1 + $0xc0] sm:$0xff]   ;;  %1083 = vmatprep.subr.bf16.mxu0 %v1247_v0  ;;  %v1252_v5 = vld [vmem:[%s1644_s1 + $0xc8] sm:$0xff]   ;;  %v1256_v9 = vld [vmem:[%s1644_s1 + $0xd0] sm:$0xff]  }
   0x3   :  { %v1249_v2 = vld [vmem:[%s1644_s1] sm:$0xff]   ;;  %1165 = vmatprep.subr.bf16.mxu1 %v1248_v1  ;;  %v1253_v6 = vld [vmem:[%s1644_s1 + $0x8] sm:$0xff]   ;;  %v1257_v10 = vld [vmem:[%s1644_s1 + $0x10] sm:$0xff]  }
   0x4   :  { %v1250_v3 = vld [vmem:[%s1644_s1 + $0x80] sm:$0xff]   ;;  %1084 = vmatpush3.bf16.msra.mxu0 %v1249_v2  ;;  %v1254_v7 = vld [vmem:[%s1644_s1 + $0x88] sm:$0xff]   ;;  %v1258_v11 = vld [vmem:[%s1644_s1 + $0x90] sm:$0xff]  }
   0x5   :  { %1166 = vmatpush3.bf16.msra.mxu1 %v1250_v3  ;;  %1085 = vmatprep.subr.bf16.mxu0 %v1251_v4  ;;  %v1259_v12 = vld [vmem:[%s1644_s1 + $0x58] sm:$0xff]   ;;  %v1263_v16 = vld [vmem:[%s1644_s1 + $0x60] sm:$0xff]   ;;  %v1267_v20 = vld [vmem:[%s1644_s1 + $0x68] sm:$0xff]  }
   0x6   :  { %1167 = vmatprep.subr.bf16.mxu1 %v1252_v5  ;;  %v1260_v13 = vld [vmem:[%s1644_s1 + $0xd8] sm:$0xff]   ;;  %v1264_v17 = vld [vmem:[%s1644_s1 + $0xe0] sm:$0xff]   ;;  %v1268_v21 = vld [vmem:[%s1644_s1 + $0xe8] sm:$0xff]  }
   0x7   :  { %v1261_v14 = vld [vmem:[%s1644_s1 + $0x18] sm:$0xff]   ;;  %v1265_v18 = vld [vmem:[%s1644_s1 + $0x20] sm:$0xff]   ;;  %v1269_v22 = vld [vmem:[%s1644_s1 + $0x28] sm:$0xff]  }
   0x8   :  { %1086 = vmatpush3.bf16.msra.mxu0 %v1253_v6  ;;  %v1262_v15 = vld [vmem:[%s1644_s1 + $0x98] sm:$0xff]   ;;  %v1266_v19 = vld [vmem:[%s1644_s1 + $0xa0] sm:$0xff]   ;;  %v1270_v23 = vld [vmem:[%s1644_s1 + $0xa8] sm:$0xff]  }
   0x9   :  { %1168 = vmatpush3.bf16.msra.mxu1 %v1254_v7  ;;  %1087 = vmatprep.subr.bf16.mxu0 %v1255_v8  ;;  %v1271_v24 = vld [vmem:[%s1644_s1 + $0x70] sm:$0xff]   ;;  %v1275_v28 = vld [vmem:[%s1644_s1 + $0x78] sm:$0xff]   ;;  %v55_v6 = vld [vmem:[%s1645_s0 + $0x140] sm:$0x11] }
   0xa   :  { %1169 = vmatprep.subr.bf16.mxu1 %v1256_v9  ;;  %v1272_v25 = vld [vmem:[%s1644_s1 + $0xf0] sm:$0xff]   ;;  %v1276_v29 = vld [vmem:[%s1644_s1 + $0xf8] sm:$0xff]   ;;  %v56_v7 = vld [vmem:[%s1645_s0 + $0x148] sm:$0x11] }
   0xb   :  { %v1273_v26 = vld [vmem:[%s1644_s1 + $0x30] sm:$0xff]   ;;  %v1277_v30 = vld [vmem:[%s1644_s1 + $0x38] sm:$0xff]  }
   0xc   :  { %1088 = vmatpush3.bf16.msra.mxu0 %v1257_v10  ;;  %v1274_v27 = vld [vmem:[%s1644_s1 + $0xb0] sm:$0xff]   ;;  %v1278_v31 = vld [vmem:[%s1644_s1 + $0xb8] sm:$0xff]   ;;  %v947_v10 = vcombine.high %v55_v6, %v55_v6 }
   0xd   :  { %1170 = vmatpush3.bf16.msra.mxu1 %v1258_v11  ;;  %1089 = vmatprep.subr.bf16.mxu0 %v1259_v12  ;;  %v1279_v32 = vld [vmem:[%s1645_s0] ss:$16 sps:$4 sm:$0xff]   ;;  %v1281_v33 = vld [vmem:[%s1645_s0 + $0x4] ss:$16 sps:$4 sm:$0xff]   ;;  %v1282_v34 = vld [vmem:[%s1645_s0 + $0x8] ss:$16 sps:$4 sm:$0xff]   ;;  %v949_v11 = vcombine.high %v56_v7, %v56_v7  ;;  %v946_v12 = vcombine.low %v55_v6, %v55_v6 }
   0xe   :  { %1171 = vmatprep.subr.bf16.mxu1 %v1260_v13  ;;  %v1284_v35 = vld [vmem:[%s1645_s0 + $0xc] ss:$16 sps:$4 sm:$0xff]   ;;  %566 = vmatprep.mubr.bf16.mxu0 %v1281_v33  ;;  %v1285_v36 = vld [vmem:[%s1645_s0 + $0x24] ss:$16 sps:$4 sm:$0xff]   ;;  %v1289_v38 = vld [vmem:[%s1645_s0 + $0x20] ss:$16 sps:$4 sm:$0xff]   ;;  %v948_v13 = vcombine.low %v56_v7, %v56_v7 }
   0xf   :  { %686 = vmatprep.mubr.bf16.mxu1 %v1284_v35  ;;  %v1287_v37 = vld [vmem:[%s1645_s0 + $0x2c] ss:$16 sps:$4 sm:$0xff]   ;;  %v1290_v39 = vld [vmem:[%s1645_s0 + $0x28] ss:$16 sps:$4 sm:$0xff]   ;;  %v1291_v40 = vld [vmem:[%s1645_s0 + $0x44] ss:$16 sps:$4 sm:$0xff]  }
  0x10   :  { %1090 = vmatpush3.bf16.msra.mxu0 %v1261_v14  ;;  %v1293_v41 = vld [vmem:[%s1645_s0 + $0x4c] ss:$16 sps:$4 sm:$0xff]   ;;  %v1295_v42 = vld [vmem:[%s1645_s0 + $0x40] ss:$16 sps:$4 sm:$0xff]   ;;  %v1296_v43 = vld [vmem:[%s1645_s0 + $0x48] ss:$16 sps:$4 sm:$0xff]  }
  0x11   :  { %1172 = vmatpush3.bf16.msra.mxu1 %v1262_v15  ;;  %1091 = vmatprep.subr.bf16.mxu0 %v1263_v16  ;;  %v1297_v44 = vld [vmem:[%s1645_s0 + $0x64] ss:$16 sps:$4 sm:$0xff]   ;;  %v1299_v45 = vld [vmem:[%s1645_s0 + $0x6c] ss:$16 sps:$4 sm:$0xff]   ;;  %v1301_v46 = vld [vmem:[%s1645_s0 + $0x60] ss:$16 sps:$4 sm:$0xff]  }
  0x12   :  { %1173 = vmatprep.subr.bf16.mxu1 %v1264_v17  ;;  %v1302_v47 = vld [vmem:[%s1645_s0 + $0x68] ss:$16 sps:$4 sm:$0xff]   ;;  %v1303_v48 = vld [vmem:[%s1645_s0 + $0x84] ss:$16 sps:$4 sm:$0xff]   ;;  %v1305_v49 = vld [vmem:[%s1645_s0 + $0x8c] ss:$16 sps:$4 sm:$0xff]  }
  0x13   :  { %v1307_v50 = vld [vmem:[%s1645_s0 + $0x80] ss:$16 sps:$4 sm:$0xff]   ;;  %v1308_v51 = vld [vmem:[%s1645_s0 + $0x88] ss:$16 sps:$4 sm:$0xff]   ;;  %v1309_v52 = vld [vmem:[%s1645_s0 + $0xa4] ss:$16 sps:$4 sm:$0xff]  }
  0x14   :  { %1092 = vmatpush3.bf16.msra.mxu0 %v1265_v18  ;;  %v1311_v53 = vld [vmem:[%s1645_s0 + $0xac] ss:$16 sps:$4 sm:$0xff]   ;;  %v1313_v54 = vld [vmem:[%s1645_s0 + $0xa0] ss:$16 sps:$4 sm:$0xff]   ;;  %v1314_v55 = vld [vmem:[%s1645_s0 + $0xa8] ss:$16 sps:$4 sm:$0xff]  }
  0x15   :  { %1174 = vmatpush3.bf16.msra.mxu1 %v1266_v19  ;;  %1093 = vmatprep.subr.bf16.mxu0 %v1267_v20  ;;  %v1315_v56 = vld [vmem:[%s1645_s0 + $0xc4] ss:$16 sps:$4 sm:$0xff]   ;;  %v1317_v57 = vld [vmem:[%s1645_s0 + $0xcc] ss:$16 sps:$4 sm:$0xff]   ;;  %v1319_v58 = vld [vmem:[%s1645_s0 + $0xc0] ss:$16 sps:$4 sm:$0xff]  }
  0x16   :  { %1175 = vmatprep.subr.bf16.mxu1 %v1268_v21  ;;  %v1320_v59 = vld [vmem:[%s1645_s0 + $0xc8] ss:$16 sps:$4 sm:$0xff]   ;;  %v1321_v60 = vld [vmem:[%s1645_s0 + $0xe4] ss:$16 sps:$4 sm:$0xff]   ;;  %v1323_v61 = vld [vmem:[%s1645_s0 + $0xec] ss:$16 sps:$4 sm:$0xff]  }
  0x17   :  { %v1325_v62 = vld [vmem:[%s1645_s0 + $0xe0] ss:$16 sps:$4 sm:$0xff]   ;;  %v1326_v63 = vld [vmem:[%s1645_s0 + $0xe8] ss:$16 sps:$4 sm:$0xff]   ;;  %v1327_v0 = vld [vmem:[%s1645_s0 + $0x104] ss:$16 sps:$4 sm:$0xff]  }
  0x18   :  { %1094 = vmatpush3.bf16.msra.mxu0 %v1269_v22  ;;  %v1329_v1 = vld [vmem:[%s1645_s0 + $0x10c] ss:$16 sps:$4 sm:$0xff]   ;;  %v1331_v2 = vld [vmem:[%s1645_s0 + $0x100] ss:$16 sps:$4 sm:$0xff]   ;;  %v1332_v3 = vld [vmem:[%s1645_s0 + $0x108] ss:$16 sps:$4 sm:$0xff]  }
  0x19   :  { %1176 = vmatpush3.bf16.msra.mxu1 %v1270_v23  ;;  %1095 = vmatprep.subr.bf16.mxu0 %v1271_v24  ;;  %v1333_v4 = vld [vmem:[%s1645_s0 + $0x124] ss:$16 sps:$4 sm:$0xff]   ;;  %v1335_v5 = vld [vmem:[%s1645_s0 + $0x12c] ss:$16 sps:$4 sm:$0xff]   ;;  %v1337_v8 = vld [vmem:[%s1645_s0 + $0x120] ss:$16 sps:$4 sm:$0xff]  }
  0x1a   :  { %1177 = vmatprep.subr.bf16.mxu1 %v1272_v25  ;;  %v1338_v9 = vld [vmem:[%s1645_s0 + $0x128] ss:$16 sps:$4 sm:$0xff]   ;;  %v1588_v16 = vld [vmem:[%s1646_s2] ss:$0 sm:$0xff] }
  0x1c   :  { %1096 = vmatpush3.bf16.msra.mxu0 %v1273_v26 }
  0x1d   :  { %1178 = vmatpush3.bf16.msra.mxu1 %v1274_v27  ;;  %1097 = vmatprep.subr.bf16.mxu0 %v1275_v28 }
  0x1e   :  { %1179 = vmatprep.subr.bf16.mxu1 %v1276_v29 }
  0x20   :  { %1098 = vmatpush3.bf16.msra.mxu0 %v1277_v30 }
  0x21   :  { %1180 = vmatpush3.bf16.msra.mxu1 %v1278_v31 }
  0x23   :  { %567 = vmatmul.mubr.bf16.vlgmr.msra.gmra.mrb[0].mxu0 %v1279_v32 }
  0x24   :  { %687 = vmatmul.mubr.bf16.vlgmr.msra.gmra.mrb[0].mxu1 %v1282_v34  ;;  %574 = vmatprep.mubr.bf16.mxu0 %v1285_v36 }
  0x25   :  { %694 = vmatprep.mubr.bf16.mxu1 %v1287_v37 }
  0x2b   :  { %575 = vmatmul.mubr.bf16.gmra.mrb[4].mxu0 %v1289_v38 }
  0x2c   :  { %695 = vmatmul.mubr.bf16.gmra.mrb[4].mxu1 %v1290_v39  ;;  %582 = vmatprep.mubr.bf16.mxu0 %v1291_v40 }
  0x2d   :  { %702 = vmatprep.mubr.bf16.mxu1 %v1293_v41 }
  0x33   :  { %583 = vmatmul.mubr.bf16.gmra.mrb[8].mxu0 %v1295_v42 }
  0x34   :  { %703 = vmatmul.mubr.bf16.gmra.mrb[8].mxu1 %v1296_v43  ;;  %590 = vmatprep.mubr.bf16.mxu0 %v1297_v44 }
  0x35   :  { %710 = vmatprep.mubr.bf16.mxu1 %v1299_v45 }
  0x3b   :  { %591 = vmatmul.mubr.bf16.gmra.mrb[12].mxu0 %v1301_v46 }
  0x3c   :  { %711 = vmatmul.mubr.bf16.gmra.mrb[12].mxu1 %v1302_v47  ;;  %598 = vmatprep.mubr.bf16.mxu0 %v1303_v48 }
  0x3d   :  { %718 = vmatprep.mubr.bf16.mxu1 %v1305_v49 }
  0x43   :  { %599 = vmatmul.mubr.bf16.gmra.mrb[16].mxu0 %v1307_v50 }
  0x44   :  { %719 = vmatmul.mubr.bf16.gmra.mrb[16].mxu1 %v1308_v51  ;;  %606 = vmatprep.mubr.bf16.mxu0 %v1309_v52 }
  0x45   :  { %726 = vmatprep.mubr.bf16.mxu1 %v1311_v53 }
  0x4b   :  { %607 = vmatmul.mubr.bf16.gmra.mrb[20].mxu0 %v1313_v54 }
  0x4c   :  { %727 = vmatmul.mubr.bf16.gmra.mrb[20].mxu1 %v1314_v55  ;;  %614 = vmatprep.mubr.bf16.mxu0 %v1315_v56 }
  0x4d   :  { %734 = vmatprep.mubr.bf16.mxu1 %v1317_v57 }
  0x53   :  { %615 = vmatmul.mubr.bf16.gmra.mrb[24].mxu0 %v1319_v58 }
  0x54   :  { %735 = vmatmul.mubr.bf16.gmra.mrb[24].mxu1 %v1320_v59  ;;  %622 = vmatprep.mubr.bf16.mxu0 %v1321_v60 }
  0x55   :  { %742 = vmatprep.mubr.bf16.mxu1 %v1323_v61 }
  0x5b   :  { %623 = vmatmul.mubr.bf16.gmra.mrb[28].mxu0 %v1325_v62 }
  0x5c   :  { %743 = vmatmul.mubr.bf16.gmra.mrb[28].mxu1 %v1326_v63  ;;  %630 = vmatprep.mubr.bf16.mxu0 %v1327_v0 }
  0x5d   :  { %750 = vmatprep.mubr.bf16.mxu1 %v1329_v1 }
  0x63   :  { %631 = vmatmul.mubr.bf16.gmra.mrb[32].mxu0 %v1331_v2 }
  0x64   :  { %751 = vmatmul.mubr.bf16.gmra.mrb[32].mxu1 %v1332_v3  ;;  %638 = vmatprep.mubr.bf16.mxu0 %v1333_v4 }
  0x65   :  { %758 = vmatprep.mubr.bf16.mxu1 %v1335_v5 }
  0x6b   :  { %639 = vmatmul.mubr.bf16.gmra.mrb[36].mxu0 %v1337_v8 }
  0x6c   :  { %759 = vmatmul.mubr.bf16.gmra.mrb[36].mxu1 %v1338_v9  ;;  %646 = vmatprep.mubr.bf16.mxu0 %v947_v10 }
  0x6d   :  { %766 = vmatprep.mubr.bf16.mxu1 %v949_v11 }
  0x73   :  { %647 = vmatmul.mubr.bf16.gmra.mrb[40].mxu0 %v946_v12 }
  0x74   :  { %767 = vmatmul.mubr.bf16.gmra.mrb[40].mxu1 %v948_v13 }
  0xf6   :  { %v1099_v14 = vpop.f32.mrb[0].mxu0 }
  0xf7   :  { %v1181_v15 = vpop.f32.mrb[0].mxu1  ;;  %v1100_v17 = vpop.f32.mrb[1].mxu0 }
  0xf8   :  { %v1101_v18 = vadd.f32 %v1100_v17, %v1099_v14  ;;  %v1182_v19 = vpop.f32.mrb[1].mxu1  ;;  %v1102_v20 = vpop.f32.mrb[2].mxu0 }
  0xf9   :  { %v1183_v21 = vadd.f32 %v1182_v19, %v1181_v15  ;;  %v1184_v22 = vpop.f32.mrb[2].mxu1  ;;  %v1103_v23 = vpop.f32.mrb[3].mxu0 }
  0xfa   :  { %v569_v24 = vadd.f32 %v1101_v18, %v1588_v16  ;;  %v1104_v25 = vadd.f32 %v1103_v23, %v1102_v20  ;;  %v1185_v26 = vpop.f32.mrb[3].mxu1 }
  0xfb   :  { %v1186_v27 = vadd.f32 %v1185_v26, %v1184_v22 }
  0xfc   :  { %v689_v28 = vadd.f32 %v1183_v21, %v569_v24  ;;  %v572_v29 = vadd.f32 %v1104_v25, %v1588_v16 }
  0xfe   :  { %v692_v30 = vadd.f32 %v1186_v27, %v572_v29  ;;  %v1105_v31 = vpop.f32.mrb[4].mxu0  ;;  %v774_v34 = vmax.f32 %v689_v28, 0.0 }
  0xff   :  { %v1187_v32 = vpop.f32.mrb[4].mxu1  ;;  %v1106_v33 = vpop.f32.mrb[5].mxu0 }
 0x100   :  { %v775_v35 = vmax.f32 %v692_v30, 0.0  ;;  %v1107_v36 = vadd.f32 %v1106_v33, %v1105_v31  ;;  %v1188_v37 = vpop.f32.mrb[5].mxu1  ;;  %v1108_v38 = vpop.f32.mrb[6].mxu0 }
 0x101   :  { %v1189_v39 = vadd.f32 %v1188_v37, %v1187_v32  ;;  %v1190_v40 = vpop.f32.mrb[6].mxu1  ;;  %v1109_v41 = vpop.f32.mrb[7].mxu0 }
 0x102   :  { %v1027_v42 = vpack.c.bf16 %v775_v35, %v774_v34  ;;  %v577_v43 = vadd.f32 %v1107_v36, %v1588_v16  ;;  %v1110_v44 = vadd.f32 %v1109_v41, %v1108_v38  ;;  %v1191_v45 = vpop.f32.mrb[7].mxu1 }
 0x103   :  { %v1192_v46 = vadd.f32 %v1191_v45, %v1190_v40 }
 0x104   :  { %1028 = vst [vmem:[%s1647_s3] sm:$0xff] %v1027_v42   ;;  %v697_v47 = vadd.f32 %v1189_v39, %v577_v43  ;;  %v580_v48 = vadd.f32 %v1110_v44, %v1588_v16 }
 0x106   :  { %v700_v49 = vadd.f32 %v1192_v46, %v580_v48  ;;  %v1111_v50 = vpop.f32.mrb[8].mxu0  ;;  %v776_v53 = vmax.f32 %v697_v47, 0.0 }
 0x107   :  { %v1193_v51 = vpop.f32.mrb[8].mxu1  ;;  %v1112_v52 = vpop.f32.mrb[9].mxu0 }
 0x108   :  { %v777_v54 = vmax.f32 %v700_v49, 0.0  ;;  %v1113_v55 = vadd.f32 %v1112_v52, %v1111_v50  ;;  %v1194_v56 = vpop.f32.mrb[9].mxu1  ;;  %v1114_v57 = vpop.f32.mrb[10].mxu0 }
 0x109   :  { %v1195_v58 = vadd.f32 %v1194_v56, %v1193_v51  ;;  %v1196_v59 = vpop.f32.mrb[10].mxu1  ;;  %v1115_v60 = vpop.f32.mrb[11].mxu0 }
 0x10a   :  { %v1032_v61 = vpack.c.bf16 %v777_v54, %v776_v53  ;;  %v585_v62 = vadd.f32 %v1113_v55, %v1588_v16  ;;  %v1116_v63 = vadd.f32 %v1115_v60, %v1114_v57  ;;  %v1197_v0 = vpop.f32.mrb[11].mxu1 }
 0x10b   :  { %v1198_v1 = vadd.f32 %v1197_v0, %v1196_v59 }
 0x10c   :  { %1074 = vst [vmem:[%s1647_s3 + $0x8] sm:$0xff] %v1032_v61   ;;  %v705_v2 = vadd.f32 %v1195_v58, %v585_v62  ;;  %v588_v3 = vadd.f32 %v1116_v63, %v1588_v16 }
 0x10e   :  { %v708_v4 = vadd.f32 %v1198_v1, %v588_v3  ;;  %v1117_v5 = vpop.f32.mrb[12].mxu0  ;;  %v778_v8 = vmax.f32 %v705_v2, 0.0 }
 0x10f   :  { %v1199_v6 = vpop.f32.mrb[12].mxu1  ;;  %v1118_v7 = vpop.f32.mrb[13].mxu0 }
 0x110   :  { %v779_v9 = vmax.f32 %v708_v4, 0.0  ;;  %v1119_v10 = vadd.f32 %v1118_v7, %v1117_v5  ;;  %v1200_v11 = vpop.f32.mrb[13].mxu1  ;;  %v1120_v12 = vpop.f32.mrb[14].mxu0 }
 0x111   :  { %v1201_v13 = vadd.f32 %v1200_v11, %v1199_v6  ;;  %v1202_v14 = vpop.f32.mrb[14].mxu1  ;;  %v1121_v15 = vpop.f32.mrb[15].mxu0 }
 0x112   :  { %v1037_v17 = vpack.c.bf16 %v779_v9, %v778_v8  ;;  %v593_v18 = vadd.f32 %v1119_v10, %v1588_v16  ;;  %v1122_v19 = vadd.f32 %v1121_v15, %v1120_v12  ;;  %v1203_v20 = vpop.f32.mrb[15].mxu1 }
 0x113   :  { %v1204_v21 = vadd.f32 %v1203_v20, %v1202_v14 }
 0x114   :  { %1075 = vst [vmem:[%s1647_s3 + $0x10] sm:$0xff] %v1037_v17   ;;  %v713_v22 = vadd.f32 %v1201_v13, %v593_v18  ;;  %v596_v23 = vadd.f32 %v1122_v19, %v1588_v16 }
 0x116   :  { %v716_v24 = vadd.f32 %v1204_v21, %v596_v23  ;;  %v1123_v25 = vpop.f32.mrb[16].mxu0  ;;  %v780_v28 = vmax.f32 %v713_v22, 0.0 }
 0x117   :  { %v1205_v26 = vpop.f32.mrb[16].mxu1  ;;  %v1124_v27 = vpop.f32.mrb[17].mxu0 }
 0x118   :  { %v781_v29 = vmax.f32 %v716_v24, 0.0  ;;  %v1125_v30 = vadd.f32 %v1124_v27, %v1123_v25  ;;  %v1206_v31 = vpop.f32.mrb[17].mxu1  ;;  %v1126_v32 = vpop.f32.mrb[18].mxu0 }
 0x119   :  { %v1207_v33 = vadd.f32 %v1206_v31, %v1205_v26  ;;  %v1208_v34 = vpop.f32.mrb[18].mxu1  ;;  %v1127_v35 = vpop.f32.mrb[19].mxu0 }
 0x11a   :  { %v1042_v36 = vpack.c.bf16 %v781_v29, %v780_v28  ;;  %v601_v37 = vadd.f32 %v1125_v30, %v1588_v16  ;;  %v1128_v38 = vadd.f32 %v1127_v35, %v1126_v32  ;;  %v1209_v39 = vpop.f32.mrb[19].mxu1 }
 0x11b   :  { %v1210_v40 = vadd.f32 %v1209_v39, %v1208_v34 }
 0x11c   :  { %1076 = vst [vmem:[%s1647_s3 + $0x18] sm:$0xff] %v1042_v36   ;;  %v721_v41 = vadd.f32 %v1207_v33, %v601_v37  ;;  %v604_v42 = vadd.f32 %v1128_v38, %v1588_v16 }
 0x11e   :  { %v724_v43 = vadd.f32 %v1210_v40, %v604_v42  ;;  %v1129_v44 = vpop.f32.mrb[20].mxu0  ;;  %v782_v47 = vmax.f32 %v721_v41, 0.0 }
 0x11f   :  { %v1211_v45 = vpop.f32.mrb[20].mxu1  ;;  %v1130_v46 = vpop.f32.mrb[21].mxu0 }
 0x120   :  { %v783_v48 = vmax.f32 %v724_v43, 0.0  ;;  %v1131_v49 = vadd.f32 %v1130_v46, %v1129_v44  ;;  %v1212_v50 = vpop.f32.mrb[21].mxu1  ;;  %v1132_v51 = vpop.f32.mrb[22].mxu0 }
 0x121   :  { %v1213_v52 = vadd.f32 %v1212_v50, %v1211_v45  ;;  %v1214_v53 = vpop.f32.mrb[22].mxu1  ;;  %v1133_v54 = vpop.f32.mrb[23].mxu0 }
 0x122   :  { %v1047_v55 = vpack.c.bf16 %v783_v48, %v782_v47  ;;  %v609_v56 = vadd.f32 %v1131_v49, %v1588_v16  ;;  %v1134_v57 = vadd.f32 %v1133_v54, %v1132_v51  ;;  %v1215_v58 = vpop.f32.mrb[23].mxu1 }
 0x123   :  { %v1216_v59 = vadd.f32 %v1215_v58, %v1214_v53 }
 0x124   :  { %1077 = vst [vmem:[%s1647_s3 + $0x20] sm:$0xff] %v1047_v55   ;;  %v729_v60 = vadd.f32 %v1213_v52, %v609_v56  ;;  %v612_v61 = vadd.f32 %v1134_v57, %v1588_v16 }
 0x126   :  { %v732_v62 = vadd.f32 %v1216_v59, %v612_v61  ;;  %v1135_v63 = vpop.f32.mrb[24].mxu0  ;;  %v784_v2 = vmax.f32 %v729_v60, 0.0 }
 0x127   :  { %v1217_v0 = vpop.f32.mrb[24].mxu1  ;;  %v1136_v1 = vpop.f32.mrb[25].mxu0 }
 0x128   :  { %v785_v3 = vmax.f32 %v732_v62, 0.0  ;;  %v1137_v4 = vadd.f32 %v1136_v1, %v1135_v63  ;;  %v1218_v5 = vpop.f32.mrb[25].mxu1  ;;  %v1138_v6 = vpop.f32.mrb[26].mxu0 }
 0x129   :  { %v1219_v7 = vadd.f32 %v1218_v5, %v1217_v0  ;;  %v1220_v8 = vpop.f32.mrb[26].mxu1  ;;  %v1139_v9 = vpop.f32.mrb[27].mxu0 }
 0x12a   :  { %v1052_v10 = vpack.c.bf16 %v785_v3, %v784_v2  ;;  %v617_v11 = vadd.f32 %v1137_v4, %v1588_v16  ;;  %v1140_v12 = vadd.f32 %v1139_v9, %v1138_v6  ;;  %v1221_v13 = vpop.f32.mrb[27].mxu1 }
 0x12b   :  { %v1222_v14 = vadd.f32 %v1221_v13, %v1220_v8 }
 0x12c   :  { %1078 = vst [vmem:[%s1647_s3 + $0x28] sm:$0xff] %v1052_v10   ;;  %v737_v15 = vadd.f32 %v1219_v7, %v617_v11  ;;  %v620_v17 = vadd.f32 %v1140_v12, %v1588_v16 }
 0x12e   :  { %v740_v18 = vadd.f32 %v1222_v14, %v620_v17  ;;  %v1141_v19 = vpop.f32.mrb[28].mxu0  ;;  %v786_v22 = vmax.f32 %v737_v15, 0.0 }
 0x12f   :  { %v1223_v20 = vpop.f32.mrb[28].mxu1  ;;  %v1142_v21 = vpop.f32.mrb[29].mxu0 }
 0x130   :  { %v787_v23 = vmax.f32 %v740_v18, 0.0  ;;  %v1143_v24 = vadd.f32 %v1142_v21, %v1141_v19  ;;  %v1224_v25 = vpop.f32.mrb[29].mxu1  ;;  %v1144_v26 = vpop.f32.mrb[30].mxu0 }
 0x131   :  { %v1225_v27 = vadd.f32 %v1224_v25, %v1223_v20  ;;  %v1226_v28 = vpop.f32.mrb[30].mxu1  ;;  %v1145_v29 = vpop.f32.mrb[31].mxu0 }
 0x132   :  { %v1057_v30 = vpack.c.bf16 %v787_v23, %v786_v22  ;;  %v625_v31 = vadd.f32 %v1143_v24, %v1588_v16  ;;  %v1146_v32 = vadd.f32 %v1145_v29, %v1144_v26  ;;  %v1227_v33 = vpop.f32.mrb[31].mxu1 }
 0x133   :  { %v1228_v34 = vadd.f32 %v1227_v33, %v1226_v28 }
 0x134   :  { %1079 = vst [vmem:[%s1647_s3 + $0x30] sm:$0xff] %v1057_v30   ;;  %v745_v35 = vadd.f32 %v1225_v27, %v625_v31  ;;  %v628_v36 = vadd.f32 %v1146_v32, %v1588_v16 }
 0x136   :  { %v748_v37 = vadd.f32 %v1228_v34, %v628_v36  ;;  %v1147_v38 = vpop.f32.mrb[32].mxu0  ;;  %v788_v41 = vmax.f32 %v745_v35, 0.0 }
 0x137   :  { %v1229_v39 = vpop.f32.mrb[32].mxu1  ;;  %v1148_v40 = vpop.f32.mrb[33].mxu0 }
 0x138   :  { %v789_v42 = vmax.f32 %v748_v37, 0.0  ;;  %v1149_v43 = vadd.f32 %v1148_v40, %v1147_v38  ;;  %v1230_v44 = vpop.f32.mrb[33].mxu1  ;;  %v1150_v45 = vpop.f32.mrb[34].mxu0 }
 0x139   :  { %v1231_v46 = vadd.f32 %v1230_v44, %v1229_v39  ;;  %v1232_v47 = vpop.f32.mrb[34].mxu1  ;;  %v1151_v48 = vpop.f32.mrb[35].mxu0 }
 0x13a   :  { %v1062_v49 = vpack.c.bf16 %v789_v42, %v788_v41  ;;  %v633_v50 = vadd.f32 %v1149_v43, %v1588_v16  ;;  %v1152_v51 = vadd.f32 %v1151_v48, %v1150_v45  ;;  %v1233_v52 = vpop.f32.mrb[35].mxu1 }
 0x13b   :  { %v1234_v53 = vadd.f32 %v1233_v52, %v1232_v47 }
 0x13c   :  { %1080 = vst [vmem:[%s1647_s3 + $0x38] sm:$0xff] %v1062_v49   ;;  %v753_v54 = vadd.f32 %v1231_v46, %v633_v50  ;;  %v636_v55 = vadd.f32 %v1152_v51, %v1588_v16 }
 0x13e   :  { %v756_v56 = vadd.f32 %v1234_v53, %v636_v55  ;;  %v1153_v57 = vpop.f32.mrb[36].mxu0  ;;  %v790_v60 = vmax.f32 %v753_v54, 0.0 }
 0x13f   :  { %v1235_v58 = vpop.f32.mrb[36].mxu1  ;;  %v1154_v59 = vpop.f32.mrb[37].mxu0 }
 0x140   :  { %v791_v61 = vmax.f32 %v756_v56, 0.0  ;;  %v1155_v62 = vadd.f32 %v1154_v59, %v1153_v57  ;;  %v1236_v63 = vpop.f32.mrb[37].mxu1  ;;  %v1156_v0 = vpop.f32.mrb[38].mxu0 }
 0x141   :  { %v1237_v1 = vadd.f32 %v1236_v63, %v1235_v58  ;;  %v1238_v2 = vpop.f32.mrb[38].mxu1  ;;  %v1157_v3 = vpop.f32.mrb[39].mxu0 }
 0x142   :  { %v1067_v4 = vpack.c.bf16 %v791_v61, %v790_v60  ;;  %v641_v5 = vadd.f32 %v1155_v62, %v1588_v16  ;;  %v1158_v6 = vadd.f32 %v1157_v3, %v1156_v0  ;;  %v1239_v7 = vpop.f32.mrb[39].mxu1 }
 0x143   :  { %v1240_v8 = vadd.f32 %v1239_v7, %v1238_v2 }
 0x144   :  { %1081 = vst [vmem:[%s1647_s3 + $0x40] sm:$0xff] %v1067_v4   ;;  %v761_v9 = vadd.f32 %v1237_v1, %v641_v5  ;;  %v644_v10 = vadd.f32 %v1158_v6, %v1588_v16 }
 0x146   :  { %v764_v11 = vadd.f32 %v1240_v8, %v644_v10  ;;  %v1159_v12 = vpop.f32.mrb[40].mxu0  ;;  %v792_v15 = vmax.f32 %v761_v9, 0.0 }
 0x147   :  { %v1241_v13 = vpop.f32.mrb[40].mxu1  ;;  %v1160_v14 = vpop.f32.mrb[41].mxu0 }
 0x148   :  { %v793_v17 = vmax.f32 %v764_v11, 0.0  ;;  %v1161_v18 = vadd.f32 %v1160_v14, %v1159_v12  ;;  %v1242_v19 = vpop.f32.mrb[41].mxu1  ;;  %v1162_v20 = vpop.f32.mrb[42].mxu0 }
 0x149   :  { %v1243_v21 = vadd.f32 %v1242_v19, %v1241_v13  ;;  %v1244_v22 = vpop.f32.mrb[42].mxu1  ;;  %v1163_v23 = vpop.f32.mrb[43].mxu0 }
 0x14a   :  { %v1072_v24 = vpack.c.bf16 %v793_v17, %v792_v15  ;;  %v649_v25 = vadd.f32 %v1161_v18, %v1588_v16  ;;  %v1245_v26 = vpop.f32.mrb[43].mxu1 }
 0x14c   :  { %1082 = vst [vmem:[%s1647_s3 + $0x48] sm:$0xff] %v1072_v24   ;;  %v769_v27 = vadd.f32 %v1243_v21, %v649_v25 }
 0x14e   :  { %v794_v28 = vmax.f32 %v769_v27, 0.0 }
 0x150   :  { %v1023_v29 = vpack.c.bf16 %v794_v28, %v794_v28 }
 0x152   :  { %900 = vst [vmem:[%s1647_s3 + $0x50] sm:$0x1] %v1023_v29 }

// kernel: dqn_forward.9
= control target key start
LH: loop header
LB: loop body
LE: loop exit
PB: predicated region body
PF: predicated region fallthrough
CT: control target
= control target key end

     0   :  { %v1281_v34 = vmov 0.0   ;;  %vm1282_vm0 = vmmov 0   ;;  %vm516_vm1 = vcmask 523264   ;;  %s1602_s1 = inlined_call_operand.vmem [shape: bf16[576,128], index: 1, kind: input, shape index: {}]   ;;  %s1603_s0 = inlined_call_operand.vmem [shape: bf16[98,576], index: 0, kind: input, shape index: {}]   ;;  %s1604_s2 = inlined_call_operand.vmem [shape: f32[1,128], index: 2, kind: input, shape index: {}]   ;;  %s1605_s3 = inlined_call_operand.vmem [shape: bf16[98,128], index: 3, kind: output, shape index: {}]  }
   0x1   :  { %v1198_v0 = vld [vmem:[%s1602_s1 + $0x40] sm:$0xff]   ;;  %v1202_v4 = vld [vmem:[%s1602_s1 + $0x48] sm:$0xff]   ;;  %v1206_v8 = vld [vmem:[%s1602_s1 + $0x50] sm:$0xff]  }
   0x2   :  { %v1199_v1 = vld [vmem:[%s1602_s1 + $0xc0] sm:$0xff]   ;;  %1025 = vmatprep.subr.bf16.mxu0 %v1198_v0  ;;  %v1203_v5 = vld [vmem:[%s1602_s1 + $0xc8] sm:$0xff]   ;;  %v1207_v9 = vld [vmem:[%s1602_s1 + $0xd0] sm:$0xff]  }
   0x3   :  { %v1200_v2 = vld [vmem:[%s1602_s1] sm:$0xff]   ;;  %1083 = vmatprep.subr.bf16.mxu1 %v1199_v1  ;;  %v1204_v6 = vld [vmem:[%s1602_s1 + $0x8] sm:$0xff]   ;;  %v1208_v10 = vld [vmem:[%s1602_s1 + $0x10] sm:$0xff]  }
   0x4   :  { %v1201_v3 = vld [vmem:[%s1602_s1 + $0x80] sm:$0xff]   ;;  %1026 = vmatpush3.bf16.msra.mxu0 %v1200_v2  ;;  %v1205_v7 = vld [vmem:[%s1602_s1 + $0x88] sm:$0xff]   ;;  %v1209_v11 = vld [vmem:[%s1602_s1 + $0x90] sm:$0xff]  }
   0x5   :  { %1084 = vmatpush3.bf16.msra.mxu1 %v1201_v3  ;;  %1027 = vmatprep.subr.bf16.mxu0 %v1202_v4  ;;  %v1210_v12 = vld [vmem:[%s1602_s1 + $0x58] sm:$0xff]   ;;  %v1214_v16 = vld [vmem:[%s1602_s1 + $0x60] sm:$0xff]   ;;  %v1218_v20 = vld [vmem:[%s1602_s1 + $0x68] sm:$0xff]  }
   0x6   :  { %1085 = vmatprep.subr.bf16.mxu1 %v1203_v5  ;;  %v1211_v13 = vld [vmem:[%s1602_s1 + $0xd8] sm:$0xff]   ;;  %v1215_v17 = vld [vmem:[%s1602_s1 + $0xe0] sm:$0xff]   ;;  %v1219_v21 = vld [vmem:[%s1602_s1 + $0xe8] sm:$0xff]  }
   0x7   :  { %v1212_v14 = vld [vmem:[%s1602_s1 + $0x18] sm:$0xff]   ;;  %v1216_v18 = vld [vmem:[%s1602_s1 + $0x20] sm:$0xff]   ;;  %v1220_v22 = vld [vmem:[%s1602_s1 + $0x28] sm:$0xff]  }
   0x8   :  { %1028 = vmatpush3.bf16.msra.mxu0 %v1204_v6  ;;  %v1213_v15 = vld [vmem:[%s1602_s1 + $0x98] sm:$0xff]   ;;  %v1217_v19 = vld [vmem:[%s1602_s1 + $0xa0] sm:$0xff]   ;;  %v1221_v23 = vld [vmem:[%s1602_s1 + $0xa8] sm:$0xff]  }
   0x9   :  { %1086 = vmatpush3.bf16.msra.mxu1 %v1205_v7  ;;  %1029 = vmatprep.subr.bf16.mxu0 %v1206_v8  ;;  %v1222_v24 = vld [vmem:[%s1602_s1 + $0x70] sm:$0xff]   ;;  %v1226_v28 = vld [vmem:[%s1602_s1 + $0x78] sm:$0xff]   ;;  %v1235_v36 = vld [vmem:[%s1603_s0 + $0xc] ss:$20 sps:$4 sm:$0xff]  }
   0xa   :  { %1087 = vmatprep.subr.bf16.mxu1 %v1207_v9  ;;  %v1223_v25 = vld [vmem:[%s1602_s1 + $0xf0] sm:$0xff]   ;;  %v1227_v29 = vld [vmem:[%s1602_s1 + $0xf8] sm:$0xff]   ;;  %v1236_v37 = vld [vmem:[%s1602_s1 + $0x100] sm:$0xff]   ;;  %658 = vmatprep.mubr.bf16.mxu1 %v1235_v36 }
   0xb   :  { %v1224_v26 = vld [vmem:[%s1602_s1 + $0x30] sm:$0xff]   ;;  %v1228_v30 = vld [vmem:[%s1602_s1 + $0x38] sm:$0xff]   ;;  %v1237_v38 = vld [vmem:[%s1603_s0 + $0x2c] ss:$20 sps:$4 sm:$0xff]  }
   0xc   :  { %1030 = vmatpush3.bf16.msra.mxu0 %v1208_v10  ;;  %v1225_v27 = vld [vmem:[%s1602_s1 + $0xb0] sm:$0xff]   ;;  %v1229_v31 = vld [vmem:[%s1602_s1 + $0xb8] sm:$0xff]   ;;  %v1247_v43 = vld [vmem:[%s1602_s1 + $0x108] sm:$0xff]  }
   0xd   :  { %1088 = vmatpush3.bf16.msra.mxu1 %v1209_v11  ;;  %1031 = vmatprep.subr.bf16.mxu0 %v1210_v12  ;;  %v1230_v32 = vld [vmem:[%s1603_s0] ss:$20 sps:$4 sm:$0xff]   ;;  %v1232_v33 = vld [vmem:[%s1603_s0 + $0x4] ss:$20 sps:$4 sm:$0xff]   ;;  %v1233_v35 = vld [vmem:[%s1603_s0 + $0x8] ss:$20 sps:$4 sm:$0xff]  }
   0xe   :  { %1089 = vmatprep.subr.bf16.mxu1 %v1211_v13  ;;  %570 = vmatprep.mubr.bf16.mxu0 %v1232_v33  ;;  %v1239_v39 = vld [vmem:[%s1603_s0 + $0x34] ss:$20 sps:$4 sm:$0xff]   ;;  %v1242_v41 = vld [vmem:[%s1603_s0 + $0x30] ss:$20 sps:$4 sm:$0xff]   ;;  %v1249_v47 = vld [vmem:[%s1603_s0 + $0x58] ss:$20 sps:$4 sm:$0xff]  }
   0xf   :  { %v1241_v40 = vld [vmem:[%s1603_s0 + $0x28] ss:$20 sps:$4 sm:$0xff]   ;;  %v1256_v45 = vld [vmem:[%s1602_s1 + $0x110] sm:$0xff]   ;;  %v1252_v49 = vld [vmem:[%s1603_s0 + $0x84] ss:$20 sps:$4 sm:$0xff]  }
  0x10   :  { %1032 = vmatpush3.bf16.msra.mxu0 %v1212_v14  ;;  %v1243_v42 = vld [vmem:[%s1603_s0 + $0x54] ss:$20 sps:$4 sm:$0xff]   ;;  %v1245_v44 = vld [vmem:[%s1603_s0 + $0x5c] ss:$20 sps:$4 sm:$0xff]   ;;  %v1254_v51 = vld [vmem:[%s1603_s0 + $0x78] ss:$20 sps:$4 sm:$0xff]  }
  0x11   :  { %1090 = vmatpush3.bf16.msra.mxu1 %v1213_v15  ;;  %1033 = vmatprep.subr.bf16.mxu0 %v1214_v16  ;;  %v1248_v46 = vld [vmem:[%s1603_s0 + $0x50] ss:$20 sps:$4 sm:$0xff]   ;;  %v1269_v50 = vld [vmem:[%s1602_s1 + $0x118] sm:$0xff]   ;;  %v1255_v52 = vld [vmem:[%s1603_s0 + $0x80] ss:$20 sps:$4 sm:$0xff]  }
  0x12   :  { %1091 = vmatprep.subr.bf16.mxu1 %v1215_v17  ;;  %v1250_v48 = vld [vmem:[%s1603_s0 + $0x7c] ss:$20 sps:$4 sm:$0xff]   ;;  %v1257_v53 = vld [vmem:[%s1603_s0 + $0xa4] ss:$20 sps:$4 sm:$0xff]   ;;  %v1259_v54 = vld [vmem:[%s1603_s0 + $0xac] ss:$20 sps:$4 sm:$0xff]  }
  0x13   :  { %v1261_v55 = vld [vmem:[%s1603_s0 + $0xa0] ss:$20 sps:$4 sm:$0xff]   ;;  %v1262_v56 = vld [vmem:[%s1603_s0 + $0xa8] ss:$20 sps:$4 sm:$0xff]   ;;  %v1268_v62 = vld [vmem:[%s1603_s0 + $0xd0] ss:$20 sps:$4 sm:$0xff]  }
  0x14   :  { %1034 = vmatpush3.bf16.msra.mxu0 %v1216_v18  ;;  %v1263_v57 = vld [vmem:[%s1603_s0 + $0xcc] ss:$20 sps:$4 sm:$0xff]   ;;  %v1265_v58 = vld [vmem:[%s1603_s0 + $0xd4] ss:$20 sps:$4 sm:$0xff]   ;;  %v52_v60 = vld [vmem:[%s1603_s0 + $0xf8] sm:$0x11] }
  0x15   :  { %1092 = vmatpush3.bf16.msra.mxu1 %v1217_v19  ;;  %1035 = vmatprep.subr.bf16.mxu0 %v1218_v20  ;;  %v51_v59 = vld [vmem:[%s1603_s0 + $0xf0] sm:$0x11]  ;;  %v1267_v61 = vld [vmem:[%s1603_s0 + $0xc8] ss:$20 sps:$4 sm:$0xff]   ;;  %v919_v0 = vcombine.high %v52_v60, %v52_v60  ;;  %v918_v2 = vcombine.low %v52_v60, %v52_v60  ;;  %v1276_v5 = vld [vmem:[%s1603_s0 + $0x38] ss:$20 sps:$4 sm:$0xff]  }
  0x16   :  { %1093 = vmatprep.subr.bf16.mxu1 %v1219_v21  ;;  %v917_v63 = vcombine.high %v51_v59, %v51_v59  ;;  %v916_v1 = vcombine.low %v51_v59, %v51_v59  ;;  %v1274_v3 = vld [vmem:[%s1603_s0 + $0x10] ss:$20 sps:$4 sm:$0xff]   ;;  %v1277_v6 = vld [vmem:[%s1603_s0 + $0xd8] ss:$20 sps:$4 sm:$0xff]   ;;  %v1278_v7 = vld [vmem:[%s1603_s0 + $0x60] ss:$20 sps:$4 sm:$0xff]  }
  0x17   :  { %v1275_v4 = vld [vmem:[%s1603_s0 + $0xb0] ss:$20 sps:$4 sm:$0xff]   ;;  %v1279_v8 = vld [vmem:[%s1603_s0 + $0x100] ss:$0 sps:$4 sm:$0x11]  }
  0x18   :  { %1036 = vmatpush3.bf16.msra.mxu0 %v1220_v22  ;;  %v1280_v9 = vld [vmem:[%s1603_s0 + $0x88] ss:$20 sps:$4 sm:$0xff]   ;;  %v1542_v11 = vld [vmem:[%s1604_s2] ss:$0 sm:$0xff] }
  0x19   :  { %1094 = vmatpush3.bf16.msra.mxu1 %v1221_v23  ;;  %1037 = vmatprep.subr.bf16.mxu0 %v1222_v24 }
  0x1a   :  { %1095 = vmatprep.subr.bf16.mxu1 %v1223_v25 }
  0x1c   :  { %1038 = vmatpush3.bf16.msra.mxu0 %v1224_v26 }
  0x1d   :  { %1096 = vmatpush3.bf16.msra.mxu1 %v1225_v27  ;;  %1039 = vmatprep.subr.bf16.mxu0 %v1226_v28 }
  0x1e   :  { %1097 = vmatprep.subr.bf16.mxu1 %v1227_v29 }
  0x20   :  { %1040 = vmatpush3.bf16.msra.mxu0 %v1228_v30 }
  0x21   :  { %1098 = vmatpush3.bf16.msra.mxu1 %v1229_v31  ;;  %1152 = vmatprep.subr.bf16.mxu0 %v1281_v34 }
  0x22   :  { %1188 = vmatprep.subr.bf16.mxu1 %v1281_v34 }
  0x23   :  { %571 = vmatmul.mubr.bf16.vlgmr.msra.gmra.mrb[0].mxu0 %v1230_v32 }
  0x24   :  { %659 = vmatmul.mubr.bf16.vlgmr.msra.gmra.mrb[0].mxu1 %v1233_v35  ;;  %1153 = vmatpush3.bf16.msra.mxu0 %v1236_v37 }
  0x25   :  { %578 = vmatprep.mubr.bf16.mxu0 %v1237_v38  ;;  %1192 = vmatpush3.bf16.msra.mxu1 %v1236_v37 }
  0x26   :  { %666 = vmatprep.mubr.bf16.mxu1 %v1239_v39  ;;  %1154 = vmatprep.subr.bf16.mxu0 %v1281_v34 }
  0x27   :  { %1189 = vmatprep.subr.bf16.mxu1 %v1281_v34 }
  0x28   :  { %1155 = vmatpush3.bf16.msra.mxu0 %v1247_v43 }
  0x29   :  { %1193 = vmatpush3.bf16.msra.mxu1 %v1247_v43  ;;  %1156 = vmatprep.subr.bf16.mxu0 %v1281_v34 }
  0x2a   :  { %1190 = vmatprep.subr.bf16.mxu1 %v1281_v34 }
  0x2b   :  { %579 = vmatmul.mubr.bf16.gmra.mrb[4].mxu0 %v1241_v40 }
  0x2c   :  { %667 = vmatmul.mubr.bf16.gmra.mrb[4].mxu1 %v1242_v41  ;;  %586 = vmatprep.mubr.bf16.mxu0 %v1243_v42 }
  0x2d   :  { %674 = vmatprep.mubr.bf16.mxu1 %v1245_v44  ;;  %1157 = vmatpush3.bf16.msra.mxu0 %v1256_v45 }
  0x2e   :  { %1194 = vmatpush3.bf16.msra.mxu1 %v1256_v45  ;;  %1158 = vmatprep.subr.bf16.mxu0 %v1281_v34 }
  0x2f   :  { %1191 = vmatprep.subr.bf16.mxu1 %v1281_v34 }
  0x31   :  { %1159 = vmatpush3.bf16.msra.mxu0 %v1269_v50 }
  0x32   :  { %1195 = vmatpush3.bf16.msra.mxu1 %v1269_v50 }
  0x33   :  { %587 = vmatmul.mubr.bf16.gmra.mrb[8].mxu0 %v1248_v46 }
  0x34   :  { %675 = vmatmul.mubr.bf16.gmra.mrb[8].mxu1 %v1249_v47  ;;  %594 = vmatprep.mubr.bf16.mxu0 %v1250_v48 }
  0x35   :  { %682 = vmatprep.mubr.bf16.mxu1 %v1252_v49 }
  0x3b   :  { %595 = vmatmul.mubr.bf16.gmra.mrb[12].mxu0 %v1254_v51 }
  0x3c   :  { %683 = vmatmul.mubr.bf16.gmra.mrb[12].mxu1 %v1255_v52  ;;  %602 = vmatprep.mubr.bf16.mxu0 %v1257_v53 }
  0x3d   :  { %690 = vmatprep.mubr.bf16.mxu1 %v1259_v54 }
  0x43   :  { %603 = vmatmul.mubr.bf16.gmra.mrb[16].mxu0 %v1261_v55 }
  0x44   :  { %691 = vmatmul.mubr.bf16.gmra.mrb[16].mxu1 %v1262_v56  ;;  %610 = vmatprep.mubr.bf16.mxu0 %v1263_v57 }
  0x45   :  { %698 = vmatprep.mubr.bf16.mxu1 %v1265_v58 }
  0x4b   :  { %611 = vmatmul.mubr.bf16.gmra.mrb[20].mxu0 %v1267_v61 }
  0x4c   :  { %699 = vmatmul.mubr.bf16.gmra.mrb[20].mxu1 %v1268_v62  ;;  %618 = vmatprep.mubr.bf16.mxu0 %v917_v63 }
  0x4d   :  { %706 = vmatprep.mubr.bf16.mxu1 %v919_v0 }
  0x53   :  { %619 = vmatmul.mubr.bf16.gmra.mrb[24].mxu0 %v916_v1 }
  0x54   :  { %707 = vmatmul.mubr.bf16.gmra.mrb[24].mxu1 %v918_v2  ;;  %1160 = vmatprep.mubr.msk.bf16.mxu0 %vm1282_vm0, %v1281_v34 }
  0x55   :  { %1176 = vmatprep.mubr.msk.bf16.mxu1 %vm1282_vm0, %v1281_v34 }
  0x5b   :  { %1161 = vmatmul.mubr.msk.bf16.vlgmr.msra.gmra.mrb[28].mxu0 %vm516_vm1, %v1274_v3 }
  0x5c   :  { %1177 = vmatmul.mubr.msk.bf16.vlgmr.msra.gmra.mrb[28].mxu1 %vm516_vm1, %v1275_v4  ;;  %1164 = vmatprep.mubr.msk.bf16.mxu0 %vm1282_vm0, %v1281_v34 }
  0x5d   :  { %1180 = vmatprep.mubr.msk.bf16.mxu1 %vm1282_vm0, %v1281_v34 }
  0x63   :  { %1165 = vmatmul.mubr.msk.bf16.gmra.mrb[32].mxu0 %vm516_vm1, %v1276_v5 }
  0x64   :  { %1181 = vmatmul.mubr.msk.bf16.gmra.mrb[32].mxu1 %vm516_vm1, %v1277_v6  ;;  %1168 = vmatprep.mubr.msk.bf16.mxu0 %vm1282_vm0, %v1281_v34 }
  0x65   :  { %1184 = vmatprep.mubr.msk.bf16.mxu1 %vm1282_vm0, %v1281_v34 }
  0x6b   :  { %1169 = vmatmul.mubr.msk.bf16.gmra.mrb[36].mxu0 %vm516_vm1, %v1278_v7 }
  0x6c   :  { %1185 = vmatmul.mubr.msk.bf16.gmra.mrb[36].mxu1 %vm516_vm1, %v1279_v8  ;;  %1172 = vmatprep.mubr.msk.bf16.mxu0 %vm1282_vm0, %v1281_v34 }
  0x73   :  { %1173 = vmatmul.mubr.msk.bf16.gmra.mrb[40].mxu0 %vm516_vm1, %v1280_v9 }
  0xf6   :  { %v1041_v10 = vpop.f32.mrb[0].mxu0 }
  0xf7   :  { %v1042_v12 = vpop.f32.mrb[1].mxu0  ;;  %v1099_v13 = vpop.f32.mrb[0].mxu1 }
  0xf8   :  { %v1043_v14 = vadd.f32 %v1042_v12, %v1041_v10  ;;  %v1044_v15 = vpop.f32.mrb[2].mxu0  ;;  %v1100_v16 = vpop.f32.mrb[1].mxu1 }
  0xf9   :  { %v1045_v17 = vpop.f32.mrb[3].mxu0  ;;  %v1101_v18 = vadd.f32 %v1100_v16, %v1099_v13  ;;  %v1102_v19 = vpop.f32.mrb[2].mxu1 }
  0xfa   :  { %v573_v20 = vadd.f32 %v1043_v14, %v1542_v11  ;;  %v1046_v21 = vadd.f32 %v1045_v17, %v1044_v15  ;;  %v1103_v22 = vpop.f32.mrb[3].mxu1 }
  0xfb   :  { %v1104_v23 = vadd.f32 %v1103_v22, %v1102_v19 }
  0xfc   :  { %v576_v24 = vadd.f32 %v1046_v21, %v1542_v11  ;;  %v1546_v25 = vadd.f32 %v1101_v18, %v573_v20 }
  0xfe   :  { %v1047_v26 = vpop.f32.mrb[4].mxu0  ;;  %v1548_v27 = vadd.f32 %v1104_v23, %v576_v24 }
  0xff   :  { %v1048_v28 = vpop.f32.mrb[5].mxu0  ;;  %v1105_v29 = vpop.f32.mrb[4].mxu1 }
 0x100   :  { %v1049_v30 = vadd.f32 %v1048_v28, %v1047_v26  ;;  %v1050_v31 = vpop.f32.mrb[6].mxu0  ;;  %v1106_v32 = vpop.f32.mrb[5].mxu1 }
 0x101   :  { %v1051_v33 = vpop.f32.mrb[7].mxu0  ;;  %v1107_v34 = vadd.f32 %v1106_v32, %v1105_v29  ;;  %v1108_v35 = vpop.f32.mrb[6].mxu1 }
 0x102   :  { %v581_v36 = vadd.f32 %v1049_v30, %v1542_v11  ;;  %v1052_v37 = vadd.f32 %v1051_v33, %v1050_v31  ;;  %v1109_v38 = vpop.f32.mrb[7].mxu1 }
 0x103   :  { %v1110_v39 = vadd.f32 %v1109_v38, %v1108_v35 }
 0x104   :  { %v584_v40 = vadd.f32 %v1052_v37, %v1542_v11  ;;  %v1552_v41 = vadd.f32 %v1107_v34, %v581_v36 }
 0x106   :  { %v1053_v42 = vpop.f32.mrb[8].mxu0  ;;  %v1554_v43 = vadd.f32 %v1110_v39, %v584_v40 }
 0x107   :  { %v1054_v44 = vpop.f32.mrb[9].mxu0  ;;  %v1111_v45 = vpop.f32.mrb[8].mxu1 }
 0x108   :  { %v1055_v46 = vadd.f32 %v1054_v44, %v1053_v42  ;;  %v1056_v47 = vpop.f32.mrb[10].mxu0  ;;  %v1112_v48 = vpop.f32.mrb[9].mxu1 }
 0x109   :  { %v1057_v49 = vpop.f32.mrb[11].mxu0  ;;  %v1113_v50 = vadd.f32 %v1112_v48, %v1111_v45  ;;  %v1114_v51 = vpop.f32.mrb[10].mxu1 }
 0x10a   :  { %v589_v52 = vadd.f32 %v1055_v46, %v1542_v11  ;;  %v1058_v53 = vadd.f32 %v1057_v49, %v1056_v47  ;;  %v1115_v54 = vpop.f32.mrb[11].mxu1 }
 0x10b   :  { %v1116_v55 = vadd.f32 %v1115_v54, %v1114_v51 }
 0x10c   :  { %v592_v56 = vadd.f32 %v1058_v53, %v1542_v11  ;;  %v1558_v57 = vadd.f32 %v1113_v50, %v589_v52 }
 0x10e   :  { %v1059_v58 = vpop.f32.mrb[12].mxu0  ;;  %v1560_v59 = vadd.f32 %v1116_v55, %v592_v56 }
 0x10f   :  { %v1060_v60 = vpop.f32.mrb[13].mxu0  ;;  %v1117_v61 = vpop.f32.mrb[12].mxu1 }
 0x110   :  { %v1061_v62 = vadd.f32 %v1060_v60, %v1059_v58  ;;  %v1062_v63 = vpop.f32.mrb[14].mxu0  ;;  %v1118_v0 = vpop.f32.mrb[13].mxu1 }
 0x111   :  { %v1063_v1 = vpop.f32.mrb[15].mxu0  ;;  %v1119_v2 = vadd.f32 %v1118_v0, %v1117_v61  ;;  %v1120_v3 = vpop.f32.mrb[14].mxu1 }
 0x112   :  { %v597_v4 = vadd.f32 %v1061_v62, %v1542_v11  ;;  %v1064_v5 = vadd.f32 %v1063_v1, %v1062_v63  ;;  %v1121_v6 = vpop.f32.mrb[15].mxu1 }
 0x113   :  { %v1122_v7 = vadd.f32 %v1121_v6, %v1120_v3 }
 0x114   :  { %v600_v8 = vadd.f32 %v1064_v5, %v1542_v11  ;;  %v1564_v9 = vadd.f32 %v1119_v2, %v597_v4 }
 0x116   :  { %v1065_v10 = vpop.f32.mrb[16].mxu0  ;;  %v1566_v12 = vadd.f32 %v1122_v7, %v600_v8 }
 0x117   :  { %v1066_v13 = vpop.f32.mrb[17].mxu0  ;;  %v1123_v14 = vpop.f32.mrb[16].mxu1 }
 0x118   :  { %v1067_v15 = vadd.f32 %v1066_v13, %v1065_v10  ;;  %v1068_v16 = vpop.f32.mrb[18].mxu0  ;;  %v1124_v17 = vpop.f32.mrb[17].mxu1 }
 0x119   :  { %v1069_v18 = vpop.f32.mrb[19].mxu0  ;;  %v1125_v19 = vadd.f32 %v1124_v17, %v1123_v14  ;;  %v1126_v20 = vpop.f32.mrb[18].mxu1 }
 0x11a   :  { %v605_v21 = vadd.f32 %v1067_v15, %v1542_v11  ;;  %v1070_v22 = vadd.f32 %v1069_v18, %v1068_v16  ;;  %v1127_v23 = vpop.f32.mrb[19].mxu1 }
 0x11b   :  { %v1128_v24 = vadd.f32 %v1127_v23, %v1126_v20 }
 0x11c   :  { %v608_v26 = vadd.f32 %v1070_v22, %v1542_v11  ;;  %v693_v28 = vadd.f32 %v1125_v19, %v605_v21 }
 0x11e   :  { %v1071_v29 = vpop.f32.mrb[20].mxu0  ;;  %v696_v30 = vadd.f32 %v1128_v24, %v608_v26 }
 0x11f   :  { %v1072_v31 = vpop.f32.mrb[21].mxu0  ;;  %v1129_v32 = vpop.f32.mrb[20].mxu1 }
 0x120   :  { %v1073_v33 = vadd.f32 %v1072_v31, %v1071_v29  ;;  %v1074_v34 = vpop.f32.mrb[22].mxu0  ;;  %v1130_v35 = vpop.f32.mrb[21].mxu1 }
 0x121   :  { %v1075_v36 = vpop.f32.mrb[23].mxu0  ;;  %v1131_v37 = vadd.f32 %v1130_v35, %v1129_v32  ;;  %v1132_v38 = vpop.f32.mrb[22].mxu1 }
 0x122   :  { %v613_v39 = vadd.f32 %v1073_v33, %v1542_v11  ;;  %v1076_v40 = vadd.f32 %v1075_v36, %v1074_v34  ;;  %v1133_v42 = vpop.f32.mrb[23].mxu1 }
 0x123   :  { %v1134_v44 = vadd.f32 %v1133_v42, %v1132_v38 }
 0x124   :  { %v616_v45 = vadd.f32 %v1076_v40, %v1542_v11  ;;  %v701_v46 = vadd.f32 %v1131_v37, %v613_v39 }
 0x126   :  { %v1077_v47 = vpop.f32.mrb[24].mxu0  ;;  %v704_v48 = vadd.f32 %v1134_v44, %v616_v45 }
 0x127   :  { %v1078_v49 = vpop.f32.mrb[25].mxu0  ;;  %v1135_v50 = vpop.f32.mrb[24].mxu1 }
 0x128   :  { %v1079_v51 = vadd.f32 %v1078_v49, %v1077_v47  ;;  %v1080_v52 = vpop.f32.mrb[26].mxu0  ;;  %v1136_v53 = vpop.f32.mrb[25].mxu1 }
 0x129   :  { %v1081_v54 = vpop.f32.mrb[27].mxu0  ;;  %v1137_v55 = vadd.f32 %v1136_v53, %v1135_v50  ;;  %v1138_v56 = vpop.f32.mrb[26].mxu1 }
 0x12a   :  { %v621_v58 = vadd.f32 %v1079_v51, %v1542_v11  ;;  %v1139_v60 = vpop.f32.mrb[27].mxu1 }
 0x12c   :  { %v709_v61 = vadd.f32 %v1137_v55, %v621_v58 }
 0x12e   :  { %v748_v62 = vpop.f32.mrb[28].mxu0 }
 0x12f   :  { %v749_v63 = vadd.f32 %v748_v62, %v1546_v25  ;;  %v780_v0 = vpop.f32.mrb[28].mxu1  ;;  %v1162_v1 = vpop.f32.mrb[29].mxu0 }
 0x130   :  { %v781_v2 = vadd.f32 %v780_v0, %v693_v28  ;;  %v1178_v3 = vpop.f32.mrb[29].mxu1  ;;  %v751_v4 = vpop.f32.mrb[30].mxu0 }
 0x131   :  { %v752_v5 = vadd.f32 %v751_v4, %v1548_v27  ;;  %v783_v6 = vpop.f32.mrb[30].mxu1  ;;  %v1163_v7 = vpop.f32.mrb[31].mxu0  ;;  %v802_v13 = vmax.f32 %v749_v63, 0.0 }
 0x132   :  { %v784_v8 = vadd.f32 %v783_v6, %v696_v30  ;;  %v1179_v10 = vpop.f32.mrb[31].mxu1  ;;  %v810_v15 = vmax.f32 %v781_v2, 0.0 }
 0x133   :  { %v803_v14 = vmax.f32 %v752_v5, 0.0 }
 0x134   :  { %v811_v11 = vmax.f32 %v784_v8, 0.0 }
 0x135   :  { %v993_v16 = vpack.c.bf16 %v803_v14, %v802_v13 }
 0x136   :  { %v1013_v17 = vpack.c.bf16 %v811_v11, %v810_v15  ;;  %v756_v18 = vpop.f32.mrb[32].mxu0 }
 0x137   :  { %994 = vst [vmem:[%s1605_s3] sm:$0xff] %v993_v16   ;;  %v757_v25 = vadd.f32 %v756_v18, %v1552_v41  ;;  %v788_v19 = vpop.f32.mrb[32].mxu1  ;;  %v1166_v20 = vpop.f32.mrb[33].mxu0 }
 0x138   :  { %1023 = vst [vmem:[%s1605_s3 + $0x20] sm:$0xff] %v1013_v17   ;;  %v789_v27 = vadd.f32 %v788_v19, %v701_v46  ;;  %v1182_v21 = vpop.f32.mrb[33].mxu1  ;;  %v759_v22 = vpop.f32.mrb[34].mxu0 }
 0x139   :  { %v760_v23 = vadd.f32 %v759_v22, %v1554_v43  ;;  %v791_v24 = vpop.f32.mrb[34].mxu1  ;;  %v1167_v26 = vpop.f32.mrb[35].mxu0  ;;  %v804_v30 = vmax.f32 %v757_v25, 0.0 }
 0x13a   :  { %v792_v28 = vadd.f32 %v791_v24, %v704_v48  ;;  %v1183_v29 = vpop.f32.mrb[35].mxu1  ;;  %v812_v32 = vmax.f32 %v789_v27, 0.0 }
 0x13b   :  { %v805_v31 = vmax.f32 %v760_v23, 0.0 }
 0x13c   :  { %v813_v33 = vmax.f32 %v792_v28, 0.0 }
 0x13d   :  { %v998_v41 = vpack.c.bf16 %v805_v31, %v804_v30 }
 0x13e   :  { %v1018_v34 = vpack.c.bf16 %v813_v33, %v812_v32  ;;  %v764_v35 = vpop.f32.mrb[36].mxu0 }
 0x13f   :  { %1020 = vst [vmem:[%s1605_s3 + $0x8] sm:$0xff] %v998_v41   ;;  %v765_v36 = vadd.f32 %v764_v35, %v1558_v57  ;;  %v796_v37 = vpop.f32.mrb[36].mxu1  ;;  %v1170_v38 = vpop.f32.mrb[37].mxu0 }
 0x140   :  { %1024 = vst [vmem:[%s1605_s3 + $0x28] sm:$0xff] %v1018_v34   ;;  %v797_v43 = vadd.f32 %v796_v37, %v709_v61  ;;  %v767_v39 = vpop.f32.mrb[38].mxu0  ;;  %v1186_v40 = vpop.f32.mrb[37].mxu1 }
 0x141   :  { %v768_v42 = vadd.f32 %v767_v39, %v1560_v59  ;;  %v1171_v44 = vpop.f32.mrb[39].mxu0  ;;  %v799_v45 = vpop.f32.mrb[38].mxu1  ;;  %v806_v48 = vmax.f32 %v765_v36, 0.0 }
 0x142   :  { %v814_v46 = vmax.f32 %v797_v43, 0.0  ;;  %v1187_v47 = vpop.f32.mrb[39].mxu1 }
 0x143   :  { %v807_v49 = vmax.f32 %v768_v42, 0.0 }
 0x144   :  { %v989_v50 = vpack.c.bf16 %v814_v46, %v814_v46 }
 0x145   :  { %v1003_v51 = vpack.c.bf16 %v807_v49, %v806_v48 }
 0x146   :  { %880 = vst [vmem:[%s1605_s3 + $0x30] sm:$0x1] %v989_v50  ;;  %v772_v57 = vpop.f32.mrb[40].mxu0 }
 0x147   :  { %1021 = vst [vmem:[%s1605_s3 + $0x10] sm:$0xff] %v1003_v51   ;;  %v773_v52 = vadd.f32 %v772_v57, %v1564_v9  ;;  %v1174_v59 = vpop.f32.mrb[41].mxu0 }
 0x148   :  { %v775_v53 = vpop.f32.mrb[42].mxu0 }
 0x149   :  { %v776_v54 = vadd.f32 %v775_v53, %v1566_v12  ;;  %v1175_v55 = vpop.f32.mrb[43].mxu0  ;;  %v808_v56 = vmax.f32 %v773_v52, 0.0 }
 0x14b   :  { %v809_v58 = vmax.f32 %v776_v54, 0.0 }
 0x14d   :  { %v1008_v60 = vpack.c.bf16 %v809_v58, %v808_v56 }
 0x14f   :  { %1022 = vst [vmem:[%s1605_s3 + $0x18] sm:$0xff] %v1008_v60  }

// kernel: dqn_forward.11
= control target key start
LH: loop header
LB: loop body
LE: loop exit
PB: predicated region body
PF: predicated region fallthrough
CT: control target
= control target key end

     0   :  { %v1729_v24 = vmov 0.0   ;;  %vm1730_vm0 = vmmov 0   ;;  %vm640_vm1 = vcmask 523264   ;;  %s2177_s1 = inlined_call_operand.vmem [shape: bf16[576,128], index: 1, kind: input, shape index: {}]   ;;  %s2178_s0 = inlined_call_operand.vmem [shape: bf16[162,576], index: 0, kind: input, shape index: {}]   ;;  %s2179_s2 = inlined_call_operand.vmem [shape: f32[1,128], index: 2, kind: input, shape index: {}]   ;;  %s2180_s3 = inlined_call_operand.vmem [shape: bf16[162,128], index: 3, kind: output, shape index: {}]  }
   0x1   :  { %v1618_v0 = vld [vmem:[%s2177_s1 + $0x40] sm:$0xff]   ;;  %v1620_v2 = vld [vmem:[%s2177_s1 + $0x48] sm:$0xff]   ;;  %v1622_v4 = vld [vmem:[%s2177_s1 + $0x50] sm:$0xff]  }
   0x2   :  { %v1619_v1 = vld [vmem:[%s2177_s1] sm:$0xff]   ;;  %1369 = vmatprep.subr.bf16.mxu0 %v1618_v0  ;;  %1600 = vmatprep.subr.bf16.mxu1 %v1618_v0  ;;  %v1621_v3 = vld [vmem:[%s2177_s1 + $0x8] sm:$0xff]   ;;  %v1623_v5 = vld [vmem:[%s2177_s1 + $0x10] sm:$0xff]  }
   0x3   :  { %1370 = vmatpush3.bf16.msra.mxu0 %v1619_v1  ;;  %1608 = vmatpush3.bf16.msra.mxu1 %v1619_v1  ;;  %v1624_v6 = vld [vmem:[%s2177_s1 + $0x58] sm:$0xff]   ;;  %v1626_v8 = vld [vmem:[%s2177_s1 + $0x60] sm:$0xff]   ;;  %v1628_v10 = vld [vmem:[%s2177_s1 + $0x68] sm:$0xff]  }
   0x4   :  { %1371 = vmatprep.subr.bf16.mxu0 %v1620_v2  ;;  %1601 = vmatprep.subr.bf16.mxu1 %v1620_v2  ;;  %v1625_v7 = vld [vmem:[%s2177_s1 + $0x18] sm:$0xff]   ;;  %v1627_v9 = vld [vmem:[%s2177_s1 + $0x20] sm:$0xff]   ;;  %v1639_v12 = vld [vmem:[%s2178_s0 + $0xf4] ss:$20 sps:$4 sm:$0xff]  }
   0x5   :  { %v1636_v11 = vld [vmem:[%s2178_s0 + $0x4] ss:$20 sps:$4 sm:$0xff]   ;;  %v1629_v13 = vld [vmem:[%s2177_s1 + $0x28] sm:$0xff]   ;;  %v1630_v14 = vld [vmem:[%s2177_s1 + $0x70] sm:$0xff]   ;;  %754 = vmatprep.mubr.bf16.mxu1 %v1639_v12 }
   0x6   :  { %706 = vmatprep.mubr.bf16.mxu0 %v1636_v11  ;;  %v1631_v15 = vld [vmem:[%s2177_s1 + $0x30] sm:$0xff]   ;;  %v1632_v16 = vld [vmem:[%s2177_s1 + $0x78] sm:$0xff]   ;;  %v1641_v18 = vld [vmem:[%s2177_s1 + $0xc0] sm:$0xff]  }
   0x7   :  { %1372 = vmatpush3.bf16.msra.mxu0 %v1621_v3  ;;  %1609 = vmatpush3.bf16.msra.mxu1 %v1621_v3  ;;  %v1633_v17 = vld [vmem:[%s2177_s1 + $0x38] sm:$0xff]   ;;  %v1634_v19 = vld [vmem:[%s2178_s0] ss:$20 sps:$4 sm:$0xff]   ;;  %v1637_v20 = vld [vmem:[%s2178_s0 + $0xf0] ss:$20 sps:$4 sm:$0xff]  }
   0x8   :  { %1373 = vmatprep.subr.bf16.mxu0 %v1622_v4  ;;  %1602 = vmatprep.subr.bf16.mxu1 %v1622_v4  ;;  %v1640_v21 = vld [vmem:[%s2177_s1 + $0x100] sm:$0xff]   ;;  %v1645_v25 = vld [vmem:[%s2178_s0 + $0x11c] ss:$20 sps:$4 sm:$0xff]   ;;  %v1649_v26 = vld [vmem:[%s2177_s1 + $0xc8] sm:$0xff]  }
   0x9   :  { %v1642_v22 = vld [vmem:[%s2177_s1 + $0x80] sm:$0xff]   ;;  %v1650_v27 = vld [vmem:[%s2177_s1 + $0x88] sm:$0xff]   ;;  %v1651_v30 = vld [vmem:[%s2177_s1 + $0xd0] sm:$0xff]  }
   0xa   :  { %v1643_v23 = vld [vmem:[%s2178_s0 + $0x2c] ss:$20 sps:$4 sm:$0xff]   ;;  %v1647_v29 = vld [vmem:[%s2178_s0 + $0x28] ss:$20 sps:$4 sm:$0xff]   ;;  %v1653_v32 = vld [vmem:[%s2177_s1 + $0x90] sm:$0xff]  }
   0xb   :  { %1374 = vmatpush3.bf16.msra.mxu0 %v1623_v5  ;;  %1610 = vmatpush3.bf16.msra.mxu1 %v1623_v5  ;;  %v1652_v28 = vld [vmem:[%s2177_s1 + $0x108] sm:$0xff]   ;;  %v1656_v34 = vld [vmem:[%s2178_s0 + $0x144] ss:$20 sps:$4 sm:$0xff]   ;;  %v1670_v36 = vld [vmem:[%s2177_s1 + $0x110] sm:$0xff]  }
   0xc   :  { %1375 = vmatprep.subr.bf16.mxu0 %v1624_v6  ;;  %1603 = vmatprep.subr.bf16.mxu1 %v1624_v6  ;;  %v1648_v31 = vld [vmem:[%s2178_s0 + $0x118] ss:$20 sps:$4 sm:$0xff]   ;;  %v1654_v33 = vld [vmem:[%s2178_s0 + $0x54] ss:$20 sps:$4 sm:$0xff]   ;;  %v1658_v38 = vld [vmem:[%s2178_s0 + $0x50] ss:$20 sps:$4 sm:$0xff]  }
   0xd   :  { %v1660_v35 = vld [vmem:[%s2177_s1 + $0xd8] sm:$0xff]   ;;  %v1659_v39 = vld [vmem:[%s2178_s0 + $0x140] ss:$20 sps:$4 sm:$0xff]   ;;  %v1671_v45 = vld [vmem:[%s2177_s1 + $0xe8] sm:$0xff]  }
   0xe   :  { %v1661_v37 = vld [vmem:[%s2177_s1 + $0x98] sm:$0xff]   ;;  %v1666_v40 = vld [vmem:[%s2177_s1 + $0xe0] sm:$0xff]   ;;  %v1672_v46 = vld [vmem:[%s2177_s1 + $0xa8] sm:$0xff]  }
   0xf   :  { %1376 = vmatpush3.bf16.msra.mxu0 %v1625_v7  ;;  %1611 = vmatpush3.bf16.msra.mxu1 %v1625_v7  ;;  %v1662_v41 = vld [vmem:[%s2178_s0 + $0x7c] ss:$20 sps:$4 sm:$0xff]   ;;  %v1664_v42 = vld [vmem:[%s2178_s0 + $0x16c] ss:$20 sps:$4 sm:$0xff]   ;;  %v1673_v51 = vld [vmem:[%s2178_s0 + $0xa4] ss:$20 sps:$4 sm:$0xff]  }
  0x10   :  { %1377 = vmatprep.subr.bf16.mxu0 %v1626_v8  ;;  %1604 = vmatprep.subr.bf16.mxu1 %v1626_v8  ;;  %v1669_v43 = vld [vmem:[%s2177_s1 + $0xa0] sm:$0xff]   ;;  %v1682_v44 = vld [vmem:[%s2177_s1 + $0x118] sm:$0xff]   ;;  %v75_v47 = vld [vmem:[%s2178_s0 + $0x190] sm:$0x11] }
  0x11   :  { %v1678_v48 = vld [vmem:[%s2177_s1 + $0xf0] sm:$0xff]   ;;  %v1667_v49 = vld [vmem:[%s2178_s0 + $0x78] ss:$20 sps:$4 sm:$0xff]   ;;  %v1668_v50 = vld [vmem:[%s2178_s0 + $0x168] ss:$20 sps:$4 sm:$0xff]   ;;  %v1217_v52 = vcombine.high %v75_v47, %v75_v47  ;;  %v1216_v57 = vcombine.low %v75_v47, %v75_v47 }
  0x12   :  { %v1679_v53 = vld [vmem:[%s2177_s1 + $0xb0] sm:$0xff]   ;;  %v1680_v54 = vld [vmem:[%s2177_s1 + $0xf8] sm:$0xff]   ;;  %v1683_v58 = vld [vmem:[%s2178_s0 + $0xcc] ss:$20 sps:$4 sm:$0xff]  }
  0x13   :  { %1378 = vmatpush3.bf16.msra.mxu0 %v1627_v9  ;;  %1612 = vmatpush3.bf16.msra.mxu1 %v1627_v9  ;;  %v1681_v55 = vld [vmem:[%s2177_s1 + $0xb8] sm:$0xff]   ;;  %v1676_v56 = vld [vmem:[%s2178_s0 + $0xa0] ss:$20 sps:$4 sm:$0xff]   ;;  %v1691_v63 = vld [vmem:[%s2178_s0 + $0x30] ss:$20 sps:$4 sm:$0xff]  }
  0x14   :  { %1379 = vmatprep.subr.bf16.mxu0 %v1628_v10  ;;  %1605 = vmatprep.subr.bf16.mxu1 %v1628_v10  ;;  %v1687_v59 = vld [vmem:[%s2178_s0 + $0xc] ss:$20 sps:$4 sm:$0xff]   ;;  %v1685_v60 = vld [vmem:[%s2178_s0 + $0x8] ss:$20 sps:$4 sm:$0xff]   ;;  %v1692_v0 = vld [vmem:[%s2178_s0 + $0x10] ss:$20 sps:$4 sm:$0xff]  }
  0x15   :  { %v1688_v61 = vld [vmem:[%s2178_s0 + $0xc8] ss:$20 sps:$4 sm:$0xff]   ;;  %v1695_v2 = vld [vmem:[%s2178_s0 + $0x58] ss:$20 sps:$4 sm:$0xff]   ;;  %v1699_v5 = vld [vmem:[%s2178_s0 + $0x80] ss:$20 sps:$4 sm:$0xff]  }
  0x16   :  { %v1689_v62 = vld [vmem:[%s2178_s0 + $0x34] ss:$20 sps:$4 sm:$0xff]   ;;  %v1693_v1 = vld [vmem:[%s2178_s0 + $0x5c] ss:$20 sps:$4 sm:$0xff]   ;;  %v1696_v3 = vld [vmem:[%s2178_s0 + $0x38] ss:$20 sps:$4 sm:$0xff]  }
  0x17   :  { %1380 = vmatpush3.bf16.msra.mxu0 %v1629_v13  ;;  %1613 = vmatpush3.bf16.msra.mxu1 %v1629_v13  ;;  %v1697_v4 = vld [vmem:[%s2178_s0 + $0x84] ss:$20 sps:$4 sm:$0xff]   ;;  %v1700_v6 = vld [vmem:[%s2178_s0 + $0x60] ss:$20 sps:$4 sm:$0xff]   ;;  %v1703_v8 = vld [vmem:[%s2178_s0 + $0xa8] ss:$20 sps:$4 sm:$0xff]  }
  0x18   :  { %1381 = vmatprep.subr.bf16.mxu0 %v1630_v14  ;;  %1606 = vmatprep.subr.bf16.mxu1 %v1630_v14  ;;  %v1701_v7 = vld [vmem:[%s2178_s0 + $0xac] ss:$20 sps:$4 sm:$0xff]   ;;  %v1704_v9 = vld [vmem:[%s2178_s0 + $0x88] ss:$20 sps:$4 sm:$0xff]   ;;  %v1707_v11 = vld [vmem:[%s2178_s0 + $0xd0] ss:$20 sps:$4 sm:$0xff]  }
  0x19   :  { %v1705_v10 = vld [vmem:[%s2178_s0 + $0xd4] ss:$20 sps:$4 sm:$0xff]   ;;  %v1708_v12 = vld [vmem:[%s2178_s0 + $0xb0] ss:$20 sps:$4 sm:$0xff]   ;;  %v1711_v14 = vld [vmem:[%s2178_s0 + $0xf8] ss:$20 sps:$4 sm:$0xff]  }
  0x1a   :  { %v1709_v13 = vld [vmem:[%s2178_s0 + $0xfc] ss:$20 sps:$4 sm:$0xff]  }
  0x1b   :  { %1382 = vmatpush3.bf16.msra.mxu0 %v1631_v15  ;;  %1614 = vmatpush3.bf16.msra.mxu1 %v1631_v15  ;;  %v1712_v15 = vld [vmem:[%s2178_s0 + $0xd8] ss:$20 sps:$4 sm:$0xff]  }
  0x1c   :  { %1383 = vmatprep.subr.bf16.mxu0 %v1632_v16  ;;  %1607 = vmatprep.subr.bf16.mxu1 %v1632_v16  ;;  %v1713_v16 = vld [vmem:[%s2178_s0 + $0x124] ss:$20 sps:$4 sm:$0xff]  }
  0x1f   :  { %1384 = vmatpush3.bf16.msra.mxu0 %v1633_v17  ;;  %1615 = vmatpush3.bf16.msra.mxu1 %v1633_v17  ;;  %v1715_v17 = vld [vmem:[%s2178_s0 + $0x120] ss:$20 sps:$4 sm:$0xff]  }
  0x20   :  { %1548 = vmatprep.subr.bf16.mxu0 %v1729_v24  ;;  %1451 = vmatprep.subr.bf16.mxu1 %v1641_v18  ;;  %v1716_v18 = vld [vmem:[%s2178_s0 + $0x100] ss:$20 sps:$4 sm:$0xff]  }
  0x22   :  { %707 = vmatmul.mubr.bf16.vlgmr.msra.gmra.mrb[0].mxu0 %v1634_v19  ;;  %755 = vmatmul.mubr.bf16.vlgmr.msra.gmra.mrb[0].mxu1 %v1637_v20  ;;  %v1717_v19 = vld [vmem:[%s2178_s0 + $0x14c] ss:$20 sps:$4 sm:$0xff]   ;;  %v1719_v20 = vld [vmem:[%s2178_s0 + $0x148] ss:$20 sps:$4 sm:$0xff]  }
  0x23   :  { %1549 = vmatpush3.bf16.msra.mxu0 %v1640_v21  ;;  %1452 = vmatpush3.bf16.msra.mxu1 %v1642_v22  ;;  %v1720_v21 = vld [vmem:[%s2178_s0 + $0x128] ss:$20 sps:$4 sm:$0xff]  }
  0x24   :  { %714 = vmatprep.mubr.bf16.mxu0 %v1643_v23  ;;  %762 = vmatprep.mubr.bf16.mxu1 %v1645_v25  ;;  %v1721_v22 = vld [vmem:[%s2178_s0 + $0x174] ss:$20 sps:$4 sm:$0xff]   ;;  %v76_v23 = vld [vmem:[%s2178_s0 + $0x198] sm:$0x11]  ;;  %v1723_v25 = vld [vmem:[%s2178_s0 + $0x170] ss:$20 sps:$4 sm:$0xff]  }
  0x25   :  { %1453 = vmatprep.subr.bf16.mxu1 %v1649_v26  ;;  %1550 = vmatprep.subr.bf16.mxu0 %v1729_v24  ;;  %v1724_v26 = vld [vmem:[%s2178_s0 + $0x150] ss:$20 sps:$4 sm:$0xff]  }
  0x27   :  { %1454 = vmatpush3.bf16.msra.mxu1 %v1650_v27  ;;  %1551 = vmatpush3.bf16.msra.mxu0 %v1652_v28  ;;  %v1219_v27 = vcombine.high %v76_v23, %v76_v23  ;;  %v1218_v28 = vcombine.low %v76_v23, %v76_v23 }
  0x28   :  { %1455 = vmatprep.subr.bf16.mxu1 %v1651_v30  ;;  %1552 = vmatprep.subr.bf16.mxu0 %v1729_v24  ;;  %v1728_v30 = vld [vmem:[%s2178_s0 + $0x1a0] ss:$0 sps:$4 sm:$0x11]  }
  0x2a   :  { %715 = vmatmul.mubr.bf16.gmra.mrb[4].mxu0 %v1647_v29  ;;  %763 = vmatmul.mubr.bf16.gmra.mrb[4].mxu1 %v1648_v31  ;;  %v1727_v29 = vld [vmem:[%s2178_s0 + $0x178] ss:$20 sps:$4 sm:$0xff]  }
  0x2b   :  { %1456 = vmatpush3.bf16.msra.mxu1 %v1653_v32  ;;  %722 = vmatprep.mubr.bf16.mxu0 %v1654_v33 }
  0x2c   :  { %770 = vmatprep.mubr.bf16.mxu1 %v1656_v34  ;;  %1457 = vmatprep.subr.bf16.mxu1 %v1660_v35 }
  0x2d   :  { %1553 = vmatpush3.bf16.msra.mxu0 %v1670_v36 }
  0x2e   :  { %1554 = vmatprep.subr.bf16.mxu0 %v1729_v24 }
  0x2f   :  { %1458 = vmatpush3.bf16.msra.mxu1 %v1661_v37 }
  0x30   :  { %1459 = vmatprep.subr.bf16.mxu1 %v1666_v40 }
  0x31   :  { %1555 = vmatpush3.bf16.msra.mxu0 %v1682_v44 }
  0x32   :  { %723 = vmatmul.mubr.bf16.gmra.mrb[8].mxu0 %v1658_v38  ;;  %771 = vmatmul.mubr.bf16.gmra.mrb[8].mxu1 %v1659_v39 }
  0x33   :  { %730 = vmatprep.mubr.bf16.mxu0 %v1662_v41  ;;  %778 = vmatprep.mubr.bf16.mxu1 %v1664_v42 }
  0x34   :  { %1460 = vmatpush3.bf16.msra.mxu1 %v1669_v43 }
  0x35   :  { %1461 = vmatprep.subr.bf16.mxu1 %v1671_v45 }
  0x38   :  { %1462 = vmatpush3.bf16.msra.mxu1 %v1672_v46 }
  0x39   :  { %1463 = vmatprep.subr.bf16.mxu1 %v1678_v48 }
  0x3a   :  { %731 = vmatmul.mubr.bf16.gmra.mrb[12].mxu0 %v1667_v49  ;;  %779 = vmatmul.mubr.bf16.gmra.mrb[12].mxu1 %v1668_v50 }
  0x3b   :  { %738 = vmatprep.mubr.bf16.mxu0 %v1673_v51  ;;  %786 = vmatprep.mubr.bf16.mxu1 %v1217_v52 }
  0x3c   :  { %1464 = vmatpush3.bf16.msra.mxu1 %v1679_v53 }
  0x3d   :  { %1465 = vmatprep.subr.bf16.mxu1 %v1680_v54 }
  0x40   :  { %1466 = vmatpush3.bf16.msra.mxu1 %v1681_v55 }
  0x42   :  { %739 = vmatmul.mubr.bf16.gmra.mrb[16].mxu0 %v1676_v56  ;;  %787 = vmatmul.mubr.bf16.gmra.mrb[16].mxu1 %v1216_v57 }
  0x43   :  { %746 = vmatprep.mubr.bf16.mxu0 %v1683_v58  ;;  %826 = vmatprep.mubr.bf16.mxu1 %v1687_v59 }
  0x4a   :  { %747 = vmatmul.mubr.bf16.gmra.mrb[20].mxu0 %v1688_v61  ;;  %827 = vmatmul.mubr.bf16.vlgmr.msra.gmra.mrb[20].mxu1 %v1685_v60 }
  0x4b   :  { %834 = vmatprep.mubr.bf16.mxu1 %v1689_v62  ;;  %1556 = vmatprep.mubr.msk.bf16.mxu0 %vm1730_vm0, %v1729_v24  ;;  %v2076_v62 = vld [vmem:[%s2179_s2] ss:$0 sm:$0xff] }
  0x52   :  { %835 = vmatmul.mubr.bf16.gmra.mrb[24].mxu1 %v1691_v63  ;;  %1557 = vmatmul.mubr.msk.bf16.vlgmr.msra.gmra.mrb[24].mxu0 %vm640_vm1, %v1692_v0 }
  0x53   :  { %842 = vmatprep.mubr.bf16.mxu1 %v1693_v1  ;;  %1560 = vmatprep.mubr.msk.bf16.mxu0 %vm1730_vm0, %v1729_v24 }
  0x5a   :  { %843 = vmatmul.mubr.bf16.gmra.mrb[28].mxu1 %v1695_v2  ;;  %1561 = vmatmul.mubr.msk.bf16.gmra.mrb[28].mxu0 %vm640_vm1, %v1696_v3 }
  0x5b   :  { %850 = vmatprep.mubr.bf16.mxu1 %v1697_v4  ;;  %1564 = vmatprep.mubr.msk.bf16.mxu0 %vm1730_vm0, %v1729_v24 }
  0x62   :  { %851 = vmatmul.mubr.bf16.gmra.mrb[32].mxu1 %v1699_v5  ;;  %1565 = vmatmul.mubr.msk.bf16.gmra.mrb[32].mxu0 %vm640_vm1, %v1700_v6 }
  0x63   :  { %858 = vmatprep.mubr.bf16.mxu1 %v1701_v7  ;;  %1568 = vmatprep.mubr.msk.bf16.mxu0 %vm1730_vm0, %v1729_v24 }
  0x6a   :  { %859 = vmatmul.mubr.bf16.gmra.mrb[36].mxu1 %v1703_v8  ;;  %1569 = vmatmul.mubr.msk.bf16.gmra.mrb[36].mxu0 %vm640_vm1, %v1704_v9 }
  0x6b   :  { %866 = vmatprep.mubr.bf16.mxu1 %v1705_v10  ;;  %1572 = vmatprep.mubr.msk.bf16.mxu0 %vm1730_vm0, %v1729_v24 }
  0x72   :  { %867 = vmatmul.mubr.bf16.gmra.mrb[40].mxu1 %v1707_v11  ;;  %1573 = vmatmul.mubr.msk.bf16.gmra.mrb[40].mxu0 %vm640_vm1, %v1708_v12 }
  0x73   :  { %874 = vmatprep.mubr.bf16.mxu1 %v1709_v13  ;;  %1576 = vmatprep.mubr.msk.bf16.mxu0 %vm1730_vm0, %v1729_v24 }
  0x7a   :  { %875 = vmatmul.mubr.bf16.gmra.mrb[44].mxu1 %v1711_v14  ;;  %1577 = vmatmul.mubr.msk.bf16.gmra.mrb[44].mxu0 %vm640_vm1, %v1712_v15 }
  0x7b   :  { %882 = vmatprep.mubr.bf16.mxu1 %v1713_v16  ;;  %1580 = vmatprep.mubr.msk.bf16.mxu0 %vm1730_vm0, %v1729_v24 }
  0x82   :  { %883 = vmatmul.mubr.bf16.gmra.mrb[48].mxu1 %v1715_v17  ;;  %1581 = vmatmul.mubr.msk.bf16.gmra.mrb[48].mxu0 %vm640_vm1, %v1716_v18 }
  0x83   :  { %890 = vmatprep.mubr.bf16.mxu1 %v1717_v19  ;;  %1584 = vmatprep.mubr.msk.bf16.mxu0 %vm1730_vm0, %v1729_v24 }
  0x8a   :  { %891 = vmatmul.mubr.bf16.gmra.mrb[52].mxu1 %v1719_v20  ;;  %1585 = vmatmul.mubr.msk.bf16.gmra.mrb[52].mxu0 %vm640_vm1, %v1720_v21 }
  0x8b   :  { %898 = vmatprep.mubr.bf16.mxu1 %v1721_v22  ;;  %1588 = vmatprep.mubr.msk.bf16.mxu0 %vm1730_vm0, %v1729_v24 }
  0x92   :  { %899 = vmatmul.mubr.bf16.gmra.mrb[56].mxu1 %v1723_v25  ;;  %1589 = vmatmul.mubr.msk.bf16.gmra.mrb[56].mxu0 %vm640_vm1, %v1724_v26 }
  0x93   :  { %906 = vmatprep.mubr.bf16.mxu1 %v1219_v27  ;;  %1592 = vmatprep.mubr.msk.bf16.mxu0 %vm1730_vm0, %v1729_v24 }
  0x9a   :  { %907 = vmatmul.mubr.bf16.gmra.mrb[60].mxu1 %v1218_v28  ;;  %1593 = vmatmul.mubr.msk.bf16.gmra.mrb[60].mxu0 %vm640_vm1, %v1727_v29 }
  0x9b   :  { %1596 = vmatprep.mubr.msk.bf16.mxu0 %vm1730_vm0, %v1729_v24 }
  0xa2   :  { %1597 = vmatmul.mubr.msk.bf16.gmra.mrb[64].mxu0 %vm640_vm1, %v1728_v30 }
  0xf5   :  { %v1385_v31 = vpop.f32.mrb[0].mxu0  ;;  %v1421_v32 = vpop.f32.mrb[0].mxu1 }
  0xf6   :  { %v1386_v33 = vpop.f32.mrb[1].mxu0  ;;  %v1422_v34 = vpop.f32.mrb[1].mxu1 }
  0xf7   :  { %v2055_v35 = vadd.f32 %v1386_v33, %v1385_v31  ;;  %v1388_v36 = vpop.f32.mrb[2].mxu0  ;;  %v2057_v37 = vadd.f32 %v1422_v34, %v1421_v32  ;;  %v1424_v38 = vpop.f32.mrb[2].mxu1 }
  0xf8   :  { %v1389_v39 = vpop.f32.mrb[3].mxu0  ;;  %v1425_v40 = vpop.f32.mrb[3].mxu1 }
  0xf9   :  { %v2059_v41 = vadd.f32 %v1389_v39, %v1388_v36  ;;  %v2061_v24 = vadd.f32 %v1425_v40, %v1424_v38  ;;  %v709_v38 = vadd.f32 %v2055_v35, %v2076_v62 }
  0xfd   :  { %v1391_v42 = vpop.f32.mrb[4].mxu0  ;;  %v1427_v43 = vpop.f32.mrb[4].mxu1 }
  0xfe   :  { %v1392_v44 = vpop.f32.mrb[5].mxu0  ;;  %v1428_v45 = vpop.f32.mrb[5].mxu1 }
  0xff   :  { %v2063_v46 = vadd.f32 %v1392_v44, %v1391_v42  ;;  %v1394_v47 = vpop.f32.mrb[6].mxu0  ;;  %v2065_v48 = vadd.f32 %v1428_v45, %v1427_v43  ;;  %v1430_v49 = vpop.f32.mrb[6].mxu1 }
 0x100   :  { %v1395_v50 = vpop.f32.mrb[7].mxu0  ;;  %v1431_v51 = vpop.f32.mrb[7].mxu1 }
 0x101   :  { %v2067_v52 = vadd.f32 %v1395_v50, %v1394_v47  ;;  %v2069_v53 = vadd.f32 %v1431_v51, %v1430_v49  ;;  %v712_v47 = vadd.f32 %v2059_v41, %v2076_v62 }
 0x103   :  { %v720_v41 = vadd.f32 %v2067_v52, %v2076_v62 }
 0x105   :  { %v1397_v54 = vpop.f32.mrb[8].mxu0  ;;  %v1433_v55 = vpop.f32.mrb[8].mxu1 }
 0x106   :  { %v1398_v56 = vpop.f32.mrb[9].mxu0  ;;  %v1434_v57 = vpop.f32.mrb[9].mxu1 }
 0x107   :  { %v2071_v58 = vadd.f32 %v1398_v56, %v1397_v54  ;;  %v1400_v59 = vpop.f32.mrb[10].mxu0  ;;  %v1435_v60 = vadd.f32 %v1434_v57, %v1433_v55  ;;  %v1436_v61 = vpop.f32.mrb[10].mxu1 }
 0x108   :  { %v1401_v63 = vpop.f32.mrb[11].mxu0  ;;  %v1437_v0 = vpop.f32.mrb[11].mxu1 }
 0x109   :  { %v2079_v1 = vadd.f32 %v1435_v60, %v2076_v62  ;;  %v2081_v2 = vadd.f32 %v1401_v63, %v1400_v59  ;;  %v1438_v3 = vadd.f32 %v1437_v0, %v1436_v61  ;;  %v717_v60 = vadd.f32 %v2063_v46, %v2076_v62 }
 0x10b   :  { %v2084_v4 = vadd.f32 %v1438_v3, %v2076_v62 }
 0x10d   :  { %v1403_v5 = vpop.f32.mrb[12].mxu0  ;;  %v1439_v6 = vpop.f32.mrb[12].mxu1 }
 0x10e   :  { %v1404_v7 = vpop.f32.mrb[13].mxu0  ;;  %v1440_v8 = vpop.f32.mrb[13].mxu1 }
 0x10f   :  { %v2086_v9 = vadd.f32 %v1404_v7, %v1403_v5  ;;  %v1406_v10 = vpop.f32.mrb[14].mxu0  ;;  %v1441_v11 = vadd.f32 %v1440_v8, %v1439_v6  ;;  %v1442_v12 = vpop.f32.mrb[14].mxu1 }
 0x110   :  { %v1407_v13 = vpop.f32.mrb[15].mxu0  ;;  %v1443_v14 = vpop.f32.mrb[15].mxu1 }
 0x111   :  { %v2089_v15 = vadd.f32 %v1441_v11, %v2076_v62  ;;  %v2091_v16 = vadd.f32 %v1407_v13, %v1406_v10  ;;  %v1444_v17 = vadd.f32 %v1443_v14, %v1442_v12 }
 0x113   :  { %v2094_v18 = vadd.f32 %v1444_v17, %v2076_v62 }
 0x115   :  { %v1409_v19 = vpop.f32.mrb[16].mxu0  ;;  %v1445_v20 = vpop.f32.mrb[16].mxu1 }
 0x116   :  { %v1410_v21 = vpop.f32.mrb[17].mxu0  ;;  %v1446_v22 = vpop.f32.mrb[17].mxu1 }
 0x117   :  { %v2096_v23 = vadd.f32 %v1410_v21, %v1409_v19  ;;  %v1412_v25 = vpop.f32.mrb[18].mxu0  ;;  %v1447_v26 = vadd.f32 %v1446_v22, %v1445_v20  ;;  %v1448_v27 = vpop.f32.mrb[18].mxu1  ;;  %v725_v21 = vadd.f32 %v2071_v58, %v2076_v62 }
 0x118   :  { %v1413_v28 = vpop.f32.mrb[19].mxu0  ;;  %v1449_v29 = vpop.f32.mrb[19].mxu1 }
 0x119   :  { %v2099_v30 = vadd.f32 %v1447_v26, %v2076_v62  ;;  %v2101_v31 = vadd.f32 %v1413_v28, %v1412_v25  ;;  %v728_v29 = vadd.f32 %v2081_v2, %v2076_v62 }
 0x11d   :  { %v1415_v32 = vpop.f32.mrb[20].mxu0  ;;  %v1467_v33 = vpop.f32.mrb[20].mxu1 }
 0x11e   :  { %v1416_v34 = vpop.f32.mrb[21].mxu0  ;;  %v1468_v36 = vpop.f32.mrb[21].mxu1 }
 0x11f   :  { %v2105_v39 = vadd.f32 %v1416_v34, %v1415_v32  ;;  %v1469_v40 = vadd.f32 %v1468_v36, %v1467_v33  ;;  %v1418_v42 = vpop.f32.mrb[22].mxu0  ;;  %v1470_v43 = vpop.f32.mrb[22].mxu1 }
 0x120   :  { %v1419_v44 = vpop.f32.mrb[23].mxu0  ;;  %v1471_v45 = vpop.f32.mrb[23].mxu1 }
 0x121   :  { %v2109_v49 = vadd.f32 %v1419_v44, %v1418_v42  ;;  %v1472_v50 = vadd.f32 %v1471_v45, %v1470_v43  ;;  %v829_v51 = vadd.f32 %v1469_v40, %v709_v38 }
 0x123   :  { %v832_v54 = vadd.f32 %v1472_v50, %v712_v47  ;;  %v733_v47 = vadd.f32 %v2086_v9, %v2076_v62 }
 0x125   :  { %v1473_v55 = vpop.f32.mrb[24].mxu1  ;;  %v948_v56 = vpop.f32.mrb[24].mxu0 }
 0x126   :  { %v949_v57 = vadd.f32 %v948_v56, %v829_v51  ;;  %v1474_v59 = vpop.f32.mrb[25].mxu1  ;;  %v1558_v35 = vpop.f32.mrb[25].mxu0 }
 0x127   :  { %v1475_v61 = vadd.f32 %v1474_v59, %v1473_v55  ;;  %v1476_v63 = vpop.f32.mrb[26].mxu1  ;;  %v951_v0 = vpop.f32.mrb[26].mxu0 }
 0x128   :  { %v952_v3 = vadd.f32 %v951_v0, %v832_v54  ;;  %v1477_v5 = vpop.f32.mrb[27].mxu1  ;;  %v1559_v6 = vpop.f32.mrb[27].mxu0  ;;  %v1034_v10 = vmax.f32 %v949_v57, 0.0  ;;  %v736_v57 = vadd.f32 %v2091_v16, %v2076_v62 }
 0x129   :  { %v1478_v7 = vadd.f32 %v1477_v5, %v1476_v63  ;;  %v837_v8 = vadd.f32 %v1475_v61, %v717_v60 }
 0x12a   :  { %v1035_v11 = vmax.f32 %v952_v3, 0.0 }
 0x12b   :  { %v840_v12 = vadd.f32 %v1478_v7, %v720_v41  ;;  %v741_v7 = vadd.f32 %v2096_v23, %v2076_v62 }
 0x12c   :  { %v1313_v13 = vpack.c.bf16 %v1035_v11, %v1034_v10 }
 0x12d   :  { %v1479_v14 = vpop.f32.mrb[28].mxu1  ;;  %v956_v17 = vpop.f32.mrb[28].mxu0 }
 0x12e   :  { %1314 = vst [vmem:[%s2180_s3] sm:$0xff] %v1313_v13   ;;  %v957_v46 = vadd.f32 %v956_v17, %v837_v8  ;;  %v1480_v19 = vpop.f32.mrb[29].mxu1  ;;  %v1562_v20 = vpop.f32.mrb[29].mxu0 }
 0x12f   :  { %v1481_v22 = vadd.f32 %v1480_v19, %v1479_v14  ;;  %v1482_v52 = vpop.f32.mrb[30].mxu1  ;;  %v959_v25 = vpop.f32.mrb[30].mxu0  ;;  %v744_v14 = vadd.f32 %v2101_v31, %v2076_v62 }
 0x130   :  { %v960_v26 = vadd.f32 %v959_v25, %v840_v12  ;;  %v1483_v27 = vpop.f32.mrb[31].mxu1  ;;  %v1563_v28 = vpop.f32.mrb[31].mxu0  ;;  %v1036_v34 = vmax.f32 %v957_v46, 0.0 }
 0x131   :  { %v1484_v32 = vadd.f32 %v1483_v27, %v1482_v52  ;;  %v845_v33 = vadd.f32 %v1481_v22, %v725_v21  ;;  %v749_v28 = vadd.f32 %v2105_v39, %v2076_v62 }
 0x132   :  { %v1037_v36 = vmax.f32 %v960_v26, 0.0 }
 0x133   :  { %v848_v38 = vadd.f32 %v1484_v32, %v728_v29 }
 0x134   :  { %v1318_v40 = vpack.c.bf16 %v1037_v36, %v1036_v34 }
 0x135   :  { %v1485_v42 = vpop.f32.mrb[32].mxu1  ;;  %v964_v43 = vpop.f32.mrb[32].mxu0 }
 0x136   :  { %1360 = vst [vmem:[%s2180_s3 + $0x8] sm:$0xff] %v1318_v40   ;;  %v965_v58 = vadd.f32 %v964_v43, %v845_v33  ;;  %v1486_v44 = vpop.f32.mrb[33].mxu1  ;;  %v1566_v45 = vpop.f32.mrb[33].mxu0 }
 0x137   :  { %v1487_v50 = vadd.f32 %v1486_v44, %v1485_v42  ;;  %v1488_v2 = vpop.f32.mrb[34].mxu1  ;;  %v967_v51 = vpop.f32.mrb[34].mxu0 }
 0x138   :  { %v968_v54 = vadd.f32 %v967_v51, %v848_v38  ;;  %v1489_v55 = vpop.f32.mrb[35].mxu1  ;;  %v1567_v56 = vpop.f32.mrb[35].mxu0  ;;  %v1038_v60 = vmax.f32 %v965_v58, 0.0  ;;  %v752_v38 = vadd.f32 %v2109_v49, %v2076_v62 }
 0x139   :  { %v1490_v59 = vadd.f32 %v1489_v55, %v1488_v2  ;;  %v853_v35 = vadd.f32 %v1487_v50, %v733_v47 }
 0x13a   :  { %v1039_v61 = vmax.f32 %v968_v54, 0.0  ;;  %v757_v54 = vadd.f32 %v2057_v37, %v2076_v62 }
 0x13b   :  { %v856_v63 = vadd.f32 %v1490_v59, %v736_v57 }
 0x13c   :  { %v1323_v0 = vpack.c.bf16 %v1039_v61, %v1038_v60  ;;  %v760_v60 = vadd.f32 %v2061_v24, %v2076_v62 }
 0x13d   :  { %v1491_v3 = vpop.f32.mrb[36].mxu1  ;;  %v972_v5 = vpop.f32.mrb[36].mxu0 }
 0x13e   :  { %1361 = vst [vmem:[%s2180_s3 + $0x10] sm:$0xff] %v1323_v0   ;;  %v973_v9 = vadd.f32 %v972_v5, %v853_v35  ;;  %v1492_v6 = vpop.f32.mrb[37].mxu1  ;;  %v1570_v41 = vpop.f32.mrb[37].mxu0 }
 0x13f   :  { %v1493_v8 = vadd.f32 %v1492_v6, %v1491_v3  ;;  %v1494_v16 = vpop.f32.mrb[38].mxu1  ;;  %v975_v10 = vpop.f32.mrb[38].mxu0 }
 0x140   :  { %v976_v11 = vadd.f32 %v975_v10, %v856_v63  ;;  %v1495_v12 = vpop.f32.mrb[39].mxu1  ;;  %v1571_v13 = vpop.f32.mrb[39].mxu0  ;;  %v1040_v19 = vmax.f32 %v973_v9, 0.0 }
 0x141   :  { %v1496_v17 = vadd.f32 %v1495_v12, %v1494_v16  ;;  %v861_v46 = vadd.f32 %v1493_v8, %v741_v7  ;;  %v765_v16 = vadd.f32 %v2065_v48, %v2076_v62 }
 0x142   :  { %v1041_v20 = vmax.f32 %v976_v11, 0.0 }
 0x143   :  { %v864_v21 = vadd.f32 %v1496_v17, %v744_v14  ;;  %v768_v17 = vadd.f32 %v2069_v53, %v2076_v62 }
 0x144   :  { %v1328_v22 = vpack.c.bf16 %v1041_v20, %v1040_v19 }
 0x145   :  { %v1497_v52 = vpop.f32.mrb[40].mxu1  ;;  %v980_v25 = vpop.f32.mrb[40].mxu0 }
 0x146   :  { %1362 = vst [vmem:[%s2180_s3 + $0x18] sm:$0xff] %v1328_v22   ;;  %v981_v23 = vadd.f32 %v980_v25, %v861_v46  ;;  %v1498_v26 = vpop.f32.mrb[41].mxu1  ;;  %v1574_v27 = vpop.f32.mrb[41].mxu0 }
 0x147   :  { %v1499_v29 = vadd.f32 %v1498_v26, %v1497_v52  ;;  %v1500_v31 = vpop.f32.mrb[42].mxu1  ;;  %v983_v32 = vpop.f32.mrb[42].mxu0 }
 0x148   :  { %v984_v33 = vadd.f32 %v983_v32, %v864_v21  ;;  %v1501_v34 = vpop.f32.mrb[43].mxu1  ;;  %v1575_v36 = vpop.f32.mrb[43].mxu0  ;;  %v1042_v43 = vmax.f32 %v981_v23, 0.0 }
 0x149   :  { %v1502_v40 = vadd.f32 %v1501_v34, %v1500_v31  ;;  %v869_v42 = vadd.f32 %v1499_v29, %v749_v28 }
 0x14a   :  { %v1043_v58 = vmax.f32 %v984_v33, 0.0 }
 0x14b   :  { %v872_v44 = vadd.f32 %v1502_v40, %v752_v38 }
 0x14c   :  { %v1333_v45 = vpack.c.bf16 %v1043_v58, %v1042_v43 }
 0x14d   :  { %v1503_v47 = vpop.f32.mrb[44].mxu1  ;;  %v988_v50 = vpop.f32.mrb[44].mxu0 }
 0x14e   :  { %1363 = vst [vmem:[%s2180_s3 + $0x20] sm:$0xff] %v1333_v45   ;;  %v989_v39 = vadd.f32 %v988_v50, %v869_v42  ;;  %v1504_v2 = vpop.f32.mrb[45].mxu1  ;;  %v1578_v51 = vpop.f32.mrb[45].mxu0 }
 0x14f   :  { %v1505_v55 = vadd.f32 %v1504_v2, %v1503_v47  ;;  %v1506_v49 = vpop.f32.mrb[46].mxu1  ;;  %v991_v56 = vpop.f32.mrb[46].mxu0 }
 0x150   :  { %v992_v57 = vadd.f32 %v991_v56, %v872_v44  ;;  %v1507_v59 = vpop.f32.mrb[47].mxu1  ;;  %v1579_v35 = vpop.f32.mrb[47].mxu0  ;;  %v1044_v0 = vmax.f32 %v989_v39, 0.0 }
 0x151   :  { %v1508_v61 = vadd.f32 %v1507_v59, %v1506_v49  ;;  %v877_v63 = vadd.f32 %v1505_v55, %v757_v54 }
 0x152   :  { %v1045_v3 = vmax.f32 %v992_v57, 0.0 }
 0x153   :  { %v880_v5 = vadd.f32 %v1508_v61, %v760_v60 }
 0x154   :  { %v1338_v9 = vpack.c.bf16 %v1045_v3, %v1044_v0 }
 0x155   :  { %v1509_v6 = vpop.f32.mrb[48].mxu1  ;;  %v996_v41 = vpop.f32.mrb[48].mxu0 }
 0x156   :  { %1364 = vst [vmem:[%s2180_s3 + $0x28] sm:$0xff] %v1338_v9   ;;  %v997_v37 = vadd.f32 %v996_v41, %v877_v63  ;;  %v1510_v7 = vpop.f32.mrb[49].mxu1  ;;  %v1582_v8 = vpop.f32.mrb[49].mxu0 }
 0x157   :  { %v1511_v10 = vadd.f32 %v1510_v7, %v1509_v6  ;;  %v1512_v24 = vpop.f32.mrb[50].mxu1  ;;  %v999_v11 = vpop.f32.mrb[50].mxu0 }
 0x158   :  { %v1000_v12 = vadd.f32 %v999_v11, %v880_v5  ;;  %v1513_v13 = vpop.f32.mrb[51].mxu1  ;;  %v1583_v14 = vpop.f32.mrb[51].mxu0  ;;  %v1046_v20 = vmax.f32 %v997_v37, 0.0 }
 0x159   :  { %v1514_v46 = vadd.f32 %v1513_v13, %v1512_v24  ;;  %v885_v19 = vadd.f32 %v1511_v10, %v765_v16 }
 0x15a   :  { %v1047_v21 = vmax.f32 %v1000_v12, 0.0 }
 0x15b   :  { %v888_v22 = vadd.f32 %v1514_v46, %v768_v17 }
 0x15c   :  { %v1343_v52 = vpack.c.bf16 %v1047_v21, %v1046_v20 }
 0x15d   :  { %v1515_v25 = vpop.f32.mrb[52].mxu1  ;;  %v1004_v23 = vpop.f32.mrb[52].mxu0 }
 0x15e   :  { %1365 = vst [vmem:[%s2180_s3 + $0x30] sm:$0xff] %v1343_v52   ;;  %v1005_v48 = vadd.f32 %v1004_v23, %v885_v19  ;;  %v1516_v26 = vpop.f32.mrb[53].mxu1  ;;  %v1586_v27 = vpop.f32.mrb[53].mxu0 }
 0x15f   :  { %v1517_v28 = vadd.f32 %v1516_v26, %v1515_v25  ;;  %v1518_v29 = vpop.f32.mrb[54].mxu1  ;;  %v1007_v31 = vpop.f32.mrb[54].mxu0 }
 0x160   :  { %v1008_v32 = vadd.f32 %v1007_v31, %v888_v22  ;;  %v1519_v53 = vpop.f32.mrb[55].mxu1  ;;  %v1587_v62 = vpop.f32.mrb[55].mxu0  ;;  %v1048_v36 = vmax.f32 %v1005_v48, 0.0 }
 0x161   :  { %v1520_v33 = vadd.f32 %v1519_v53, %v1518_v29  ;;  %v893_v34 = vadd.f32 %v1517_v28, %v2079_v1 }
 0x162   :  { %v1049_v38 = vmax.f32 %v1008_v32, 0.0 }
 0x163   :  { %v896_v40 = vadd.f32 %v1520_v33, %v2084_v4 }
 0x164   :  { %v1348_v42 = vpack.c.bf16 %v1049_v38, %v1048_v36 }
 0x165   :  { %v1521_v43 = vpop.f32.mrb[56].mxu1  ;;  %v1012_v58 = vpop.f32.mrb[56].mxu0 }
 0x166   :  { %1366 = vst [vmem:[%s2180_s3 + $0x38] sm:$0xff] %v1348_v42   ;;  %v1013_v44 = vadd.f32 %v1012_v58, %v893_v34  ;;  %v1522_v45 = vpop.f32.mrb[57].mxu1  ;;  %v1590_v47 = vpop.f32.mrb[57].mxu0 }
 0x167   :  { %v1523_v50 = vadd.f32 %v1522_v45, %v1521_v43  ;;  %v1524_v39 = vpop.f32.mrb[58].mxu1  ;;  %v1015_v2 = vpop.f32.mrb[58].mxu0 }
 0x168   :  { %v1016_v51 = vadd.f32 %v1015_v2, %v896_v40  ;;  %v1525_v54 = vpop.f32.mrb[59].mxu1  ;;  %v1591_v1 = vpop.f32.mrb[59].mxu0  ;;  %v1050_v4 = vmax.f32 %v1013_v44, 0.0 }
 0x169   :  { %v1526_v55 = vadd.f32 %v1525_v54, %v1524_v39  ;;  %v901_v49 = vadd.f32 %v1523_v50, %v2089_v15 }
 0x16a   :  { %v1051_v56 = vmax.f32 %v1016_v51, 0.0 }
 0x16b   :  { %v904_v57 = vadd.f32 %v1526_v55, %v2094_v18 }
 0x16c   :  { %v1353_v59 = vpack.c.bf16 %v1051_v56, %v1050_v4 }
 0x16d   :  { %v1527_v35 = vpop.f32.mrb[60].mxu1  ;;  %v1020_v60 = vpop.f32.mrb[60].mxu0 }
 0x16e   :  { %1367 = vst [vmem:[%s2180_s3 + $0x40] sm:$0xff] %v1353_v59   ;;  %v1021_v61 = vadd.f32 %v1020_v60, %v901_v49  ;;  %v1528_v63 = vpop.f32.mrb[61].mxu1  ;;  %v1594_v0 = vpop.f32.mrb[61].mxu0 }
 0x16f   :  { %v1529_v3 = vadd.f32 %v1528_v63, %v1527_v35  ;;  %v1023_v5 = vpop.f32.mrb[62].mxu0  ;;  %v1530_v9 = vpop.f32.mrb[62].mxu1 }
 0x170   :  { %v1024_v6 = vadd.f32 %v1023_v5, %v904_v57  ;;  %v1595_v41 = vpop.f32.mrb[63].mxu0  ;;  %v1531_v15 = vpop.f32.mrb[63].mxu1  ;;  %v1052_v7 = vmax.f32 %v1021_v61, 0.0 }
 0x171   :  { %v909_v37 = vadd.f32 %v1529_v3, %v2099_v30 }
 0x172   :  { %v1053_v18 = vmax.f32 %v1024_v6, 0.0 }
 0x174   :  { %v1358_v8 = vpack.c.bf16 %v1053_v18, %v1052_v7 }
 0x175   :  { %v1028_v16 = vpop.f32.mrb[64].mxu0 }
 0x176   :  { %1368 = vst [vmem:[%s2180_s3 + $0x48] sm:$0xff] %v1358_v8   ;;  %v1029_v10 = vadd.f32 %v1028_v16, %v909_v37  ;;  %v1598_v24 = vpop.f32.mrb[65].mxu0 }
 0x177   :  { %v1031_v11 = vpop.f32.mrb[66].mxu0 }
 0x178   :  { %v1054_v12 = vmax.f32 %v1029_v10, 0.0  ;;  %v1599_v13 = vpop.f32.mrb[67].mxu0 }
 0x17a   :  { %v1309_v14 = vpack.c.bf16 %v1054_v12, %v1054_v12 }
 0x17c   :  { %1160 = vst [vmem:[%s2180_s3 + $0x50] sm:$0x1] %v1309_v14 }

// kernel: dqn_forward.10
= control target key start
LH: loop header
LB: loop body
LE: loop exit
PB: predicated region body
PF: predicated region fallthrough
CT: control target
= control target key end

     0   :  { %v820_v36 = vlaneseq  ;;  %v16989_v37 = vmov 1966171168   ;;  %vm4949_vm0 = vcmask 523264   ;;  %s22236_s0 = inlined_call_operand.vmem [shape: bf16[2,3136], index: 0, kind: input, shape index: {}]   ;;  %s22237_s1 = inlined_call_operand.vmem [shape: bf16[3136,512], index: 1, kind: input, shape index: {}]   ;;  %s22238_s2 = inlined_call_operand.vmem [shape: f32[1,512], index: 2, kind: input, shape index: {}]   ;;  %s22239_s3 = inlined_call_operand.vmem [shape: bf16[512,128], index: 3, kind: input, shape index: {}]   ;;  %s22240_s4 = inlined_call_operand.vmem [shape: f32[1,128], index: 4, kind: input, shape index: {}]   ;;  %s22241_s5 = inlined_call_operand.vmem [shape: bf16[512,3200], index: 5, kind: input, shape index: {}]   ;;  %s22242_s6 = inlined_call_operand.vmem [shape: f32[1,3200], index: 6, kind: input, shape index: {}]   ;;  %s22243_s7 = inlined_call_operand.hbm [shape: f32[2,128], index: 7, kind: output, shape index: {0}]   ;;  %s22244_s8 = inlined_call_operand.vmem [shape: bf16[2,3200], index: 8, kind: output, shape index: {1}]  }
   0x1   :  { %v14566_v0 = vld [vmem:[%s22237_s1 + $0x4] ss:$16 sps:$4 sm:$0xff]   ;;  %v14568_v1 = vld [vmem:[%s22237_s1 + $0xc] ss:$16 sps:$4 sm:$0xff]   ;;  %v14570_v2 = vld [vmem:[%s22237_s1] ss:$16 sps:$4 sm:$0xff]   ;;  %v846_v38 = vunpack.c.l.s4 %v16989_v37 }
   0x2   :  { %4953 = vmatprep.subr.bf16.mxu0 %v14566_v0  ;;  %v14571_v3 = vld [vmem:[%s22237_s1 + $0x8] ss:$16 sps:$4 sm:$0xff]   ;;  %5486 = vmatprep.subr.bf16.mxu1 %v14568_v1  ;;  %v14572_v4 = vld [vmem:[%s22237_s1 + $0x24] ss:$16 sps:$4 sm:$0xff]   ;;  %v14574_v5 = vld [vmem:[%s22237_s1 + $0x2c] ss:$16 sps:$4 sm:$0xff]  }
   0x3   :  { %4954 = vmatpush1.bf16.msra.mxu0 %v14570_v2  ;;  %5487 = vmatpush1.bf16.msra.mxu1 %v14571_v3  ;;  %v14576_v6 = vld [vmem:[%s22237_s1 + $0x20] ss:$16 sps:$4 sm:$0xff]   ;;  %v14577_v7 = vld [vmem:[%s22237_s1 + $0x28] ss:$16 sps:$4 sm:$0xff]   ;;  %v14578_v8 = vld [vmem:[%s22237_s1 + $0x44] ss:$16 sps:$4 sm:$0xff]   ;;  %v847_v43 = vunpack.c.0.s8 %v846_v38 }
   0x4   :  { %4955 = vmatprep.subr.bf16.mxu0 %v14572_v4  ;;  %5488 = vmatprep.subr.bf16.mxu1 %v14574_v5  ;;  %v14580_v9 = vld [vmem:[%s22237_s1 + $0x4c] ss:$16 sps:$4 sm:$0xff]   ;;  %v14582_v10 = vld [vmem:[%s22237_s1 + $0x40] ss:$16 sps:$4 sm:$0xff]   ;;  %v14583_v11 = vld [vmem:[%s22237_s1 + $0x48] ss:$16 sps:$4 sm:$0xff]  }
   0x5   :  { %v14584_v12 = vld [vmem:[%s22237_s1 + $0x64] ss:$16 sps:$4 sm:$0xff]   ;;  %v14586_v13 = vld [vmem:[%s22237_s1 + $0x6c] ss:$16 sps:$4 sm:$0xff]   ;;  %v14588_v14 = vld [vmem:[%s22237_s1 + $0x60] ss:$16 sps:$4 sm:$0xff]  }
   0x6   :  { %v14589_v15 = vld [vmem:[%s22237_s1 + $0x68] ss:$16 sps:$4 sm:$0xff]   ;;  %v14590_v16 = vld [vmem:[%s22237_s1 + $0x84] ss:$16 sps:$4 sm:$0xff]   ;;  %v14592_v17 = vld [vmem:[%s22237_s1 + $0x8c] ss:$16 sps:$4 sm:$0xff]  }
   0x7   :  { %4956 = vmatpush1.bf16.msra.mxu0 %v14576_v6  ;;  %5489 = vmatpush1.bf16.msra.mxu1 %v14577_v7  ;;  %v14594_v18 = vld [vmem:[%s22237_s1 + $0x80] ss:$16 sps:$4 sm:$0xff]   ;;  %v14595_v19 = vld [vmem:[%s22237_s1 + $0x88] ss:$16 sps:$4 sm:$0xff]   ;;  %v14596_v20 = vld [vmem:[%s22237_s1 + $0xa4] ss:$16 sps:$4 sm:$0xff]  }
   0x8   :  { %4957 = vmatprep.subr.bf16.mxu0 %v14578_v8  ;;  %5490 = vmatprep.subr.bf16.mxu1 %v14580_v9  ;;  %v14598_v21 = vld [vmem:[%s22237_s1 + $0xac] ss:$16 sps:$4 sm:$0xff]   ;;  %v14600_v22 = vld [vmem:[%s22237_s1 + $0xa0] ss:$16 sps:$4 sm:$0xff]   ;;  %v14601_v23 = vld [vmem:[%s22237_s1 + $0xa8] ss:$16 sps:$4 sm:$0xff]  }
   0x9   :  { %v14602_v24 = vld [vmem:[%s22237_s1 + $0xc4] ss:$16 sps:$4 sm:$0xff]   ;;  %v14604_v25 = vld [vmem:[%s22237_s1 + $0xcc] ss:$16 sps:$4 sm:$0xff]   ;;  %v14606_v26 = vld [vmem:[%s22237_s1 + $0xc0] ss:$16 sps:$4 sm:$0xff]  }
   0xa   :  { %v14607_v27 = vld [vmem:[%s22237_s1 + $0xc8] ss:$16 sps:$4 sm:$0xff]   ;;  %v14608_v28 = vld [vmem:[%s22237_s1 + $0xe4] ss:$16 sps:$4 sm:$0xff]   ;;  %v14610_v29 = vld [vmem:[%s22237_s1 + $0xec] ss:$16 sps:$4 sm:$0xff]  }
   0xb   :  { %4958 = vmatpush1.bf16.msra.mxu0 %v14582_v10  ;;  %5491 = vmatpush1.bf16.msra.mxu1 %v14583_v11  ;;  %v14612_v30 = vld [vmem:[%s22237_s1 + $0xe0] ss:$16 sps:$4 sm:$0xff]   ;;  %v14613_v31 = vld [vmem:[%s22237_s1 + $0xe8] ss:$16 sps:$4 sm:$0xff]   ;;  %v14614_v32 = vld [vmem:[%s22237_s1 + $0x104] ss:$16 sps:$4 sm:$0xff]  }
   0xc   :  { %4959 = vmatprep.subr.bf16.mxu0 %v14584_v12  ;;  %5492 = vmatprep.subr.bf16.mxu1 %v14586_v13  ;;  %v14616_v33 = vld [vmem:[%s22237_s1 + $0x10c] ss:$16 sps:$4 sm:$0xff]   ;;  %v14618_v34 = vld [vmem:[%s22237_s1 + $0x100] ss:$16 sps:$4 sm:$0xff]   ;;  %v14619_v35 = vld [vmem:[%s22237_s1 + $0x108] ss:$16 sps:$4 sm:$0xff]  }
   0xd   :  { %v14620_v39 = vld [vmem:[%s22237_s1 + $0x124] ss:$16 sps:$4 sm:$0xff]   ;;  %v14622_v40 = vld [vmem:[%s22237_s1 + $0x12c] ss:$16 sps:$4 sm:$0xff]   ;;  %v14624_v41 = vld [vmem:[%s22237_s1 + $0x120] ss:$16 sps:$4 sm:$0xff]  }
   0xe   :  { %v17154_v42 = vshrl.u32 %v820_v36, 7  ;;  %v14625_v44 = vld [vmem:[%s22237_s1 + $0x128] ss:$16 sps:$4 sm:$0xff]   ;;  %v14626_v45 = vld [vmem:[%s22237_s1 + $0x144] ss:$16 sps:$4 sm:$0xff]  }
   0xf   :  { %4960 = vmatpush1.bf16.msra.mxu0 %v14588_v14  ;;  %5493 = vmatpush1.bf16.msra.mxu1 %v14589_v15  ;;  %v14628_v46 = vld [vmem:[%s22237_s1 + $0x14c] ss:$16 sps:$4 sm:$0xff]   ;;  %v14630_v47 = vld [vmem:[%s22237_s1 + $0x140] ss:$16 sps:$4 sm:$0xff]   ;;  %v14631_v48 = vld [vmem:[%s22237_s1 + $0x148] ss:$16 sps:$4 sm:$0xff]  }
  0x10   :  { %4961 = vmatprep.subr.bf16.mxu0 %v14590_v16  ;;  %5494 = vmatprep.subr.bf16.mxu1 %v14592_v17  ;;  %v17172_v49 = vsub.s32 %v847_v43, %v17154_v42  ;;  %v14632_v50 = vld [vmem:[%s22237_s1 + $0x164] ss:$16 sps:$4 sm:$0xff]   ;;  %v14634_v51 = vld [vmem:[%s22237_s1 + $0x16c] ss:$16 sps:$4 sm:$0xff]   ;;  %v14636_v53 = vld [vmem:[%s22237_s1 + $0x160] ss:$16 sps:$4 sm:$0xff]  }
  0x11   :  { %v17183_v52 = vld [vmem:[%s22236_s0] sm:$0xff]  ;;  %v14637_v55 = vld [vmem:[%s22237_s1 + $0x168] ss:$16 sps:$4 sm:$0xff]   ;;  %v14640_v57 = vld [vmem:[%s22237_s1 + $0x18c] ss:$16 sps:$4 sm:$0xff]  }
  0x12   :  { %v851_v54 = vrot.slane %v17183_v52, %v17172_v49  ;;  %v14638_v56 = vld [vmem:[%s22237_s1 + $0x184] ss:$16 sps:$4 sm:$0xff]   ;;  %v14642_v59 = vld [vmem:[%s22237_s1 + $0x180] ss:$16 sps:$4 sm:$0xff]   ;;  %v14643_v61 = vld [vmem:[%s22237_s1 + $0x188] ss:$16 sps:$4 sm:$0xff]  }
  0x13   :  { %4962 = vmatpush1.bf16.msra.mxu0 %v14594_v18  ;;  %5495 = vmatpush1.bf16.msra.mxu1 %v14595_v19  ;;  %v14644_v62 = vld [vmem:[%s22237_s1 + $0x1a4] ss:$16 sps:$4 sm:$0xff]   ;;  %v14646_v63 = vld [vmem:[%s22237_s1 + $0x1ac] ss:$16 sps:$4 sm:$0xff]   ;;  %v14648_v0 = vld [vmem:[%s22237_s1 + $0x1a0] ss:$16 sps:$4 sm:$0xff]  }
  0x14   :  { %4963 = vmatprep.subr.bf16.mxu0 %v14596_v20  ;;  %5496 = vmatprep.subr.bf16.mxu1 %v14598_v21  ;;  %v859_v58 = vcombine.high %v851_v54, %v851_v54  ;;  %v14649_v1 = vld [vmem:[%s22237_s1 + $0x1a8] ss:$16 sps:$4 sm:$0xff]   ;;  %v14650_v2 = vld [vmem:[%s22237_s1 + $0x1c4] ss:$16 sps:$4 sm:$0xff]   ;;  %v14652_v3 = vld [vmem:[%s22237_s1 + $0x1cc] ss:$16 sps:$4 sm:$0xff]   ;;  %v17252_v13 = vrot.slane %v851_v54, %v17172_v49 }
  0x15   :  { %v14654_v4 = vld [vmem:[%s22237_s1 + $0x1c0] ss:$16 sps:$4 sm:$0xff]   ;;  %v14655_v5 = vld [vmem:[%s22237_s1 + $0x1c8] ss:$16 sps:$4 sm:$0xff]   ;;  %v14656_v6 = vld [vmem:[%s22237_s1 + $0x1e4] ss:$16 sps:$4 sm:$0xff]  }
  0x16   :  { %v881_v60 = vrot.slane %v859_v58, %v17172_v49  ;;  %v14658_v7 = vld [vmem:[%s22237_s1 + $0x1ec] ss:$16 sps:$4 sm:$0xff]   ;;  %v14660_v8 = vld [vmem:[%s22237_s1 + $0x1e0] ss:$16 sps:$4 sm:$0xff]   ;;  %v14661_v9 = vld [vmem:[%s22237_s1 + $0x1e8] ss:$16 sps:$4 sm:$0xff]  }
  0x17   :  { %4964 = vmatpush1.bf16.msra.mxu0 %v14600_v22  ;;  %5497 = vmatpush1.bf16.msra.mxu1 %v14601_v23  ;;  %v14664_v10 = vld [vmem:[%s22237_s1 + $0x204] ss:$16 sps:$4 sm:$0xff]   ;;  %v14667_v11 = vld [vmem:[%s22237_s1 + $0x20c] ss:$16 sps:$4 sm:$0xff]   ;;  %v14662_v12 = vld [vmem:[%s22237_s1 + $0x200] ss:$16 sps:$4 sm:$0xff]  }
  0x18   :  { %4965 = vmatprep.subr.bf16.mxu0 %v14602_v24  ;;  %5498 = vmatprep.subr.bf16.mxu1 %v14604_v25  ;;  %v14665_v14 = vld [vmem:[%s22237_s1 + $0x208] ss:$16 sps:$4 sm:$0xff]   ;;  %v14670_v15 = vld [vmem:[%s22237_s1 + $0x224] ss:$16 sps:$4 sm:$0xff]   ;;  %v14673_v16 = vld [vmem:[%s22237_s1 + $0x22c] ss:$16 sps:$4 sm:$0xff]   ;;  %v891_v17 = vcombine.high %v881_v60, %v881_v60 }
  0x19   :  { %4985 = vmatprep.mubr.bf16.mxu0 %v881_v60  ;;  %5518 = vmatprep.mubr.bf16.mxu1 %v881_v60  ;;  %v14668_v18 = vld [vmem:[%s22237_s1 + $0x220] ss:$16 sps:$4 sm:$0xff]   ;;  %v14671_v19 = vld [vmem:[%s22237_s1 + $0x228] ss:$16 sps:$4 sm:$0xff]   ;;  %v14676_v20 = vld [vmem:[%s22237_s1 + $0x244] ss:$16 sps:$4 sm:$0xff]  }
  0x1a   :  { %v14679_v21 = vld [vmem:[%s22237_s1 + $0x24c] ss:$16 sps:$4 sm:$0xff]   ;;  %v14674_v22 = vld [vmem:[%s22237_s1 + $0x240] ss:$16 sps:$4 sm:$0xff]   ;;  %v14677_v23 = vld [vmem:[%s22237_s1 + $0x248] ss:$16 sps:$4 sm:$0xff]  }
  0x1b   :  { %4966 = vmatpush1.bf16.msra.mxu0 %v14606_v26  ;;  %5499 = vmatpush1.bf16.msra.mxu1 %v14607_v27  ;;  %v14682_v24 = vld [vmem:[%s22237_s1 + $0x264] ss:$16 sps:$4 sm:$0xff]   ;;  %v14685_v25 = vld [vmem:[%s22237_s1 + $0x26c] ss:$16 sps:$4 sm:$0xff]   ;;  %v14680_v26 = vld [vmem:[%s22237_s1 + $0x260] ss:$16 sps:$4 sm:$0xff]  }
  0x1c   :  { %4967 = vmatprep.subr.bf16.mxu0 %v14608_v28  ;;  %5500 = vmatprep.subr.bf16.mxu1 %v14610_v29  ;;  %v14683_v27 = vld [vmem:[%s22237_s1 + $0x268] ss:$16 sps:$4 sm:$0xff]   ;;  %v14688_v28 = vld [vmem:[%s22237_s1 + $0x284] ss:$16 sps:$4 sm:$0xff]   ;;  %v14691_v29 = vld [vmem:[%s22237_s1 + $0x28c] ss:$16 sps:$4 sm:$0xff]  }
  0x1d   :  { %v14700_v36 = vld [vmem:[%s22237_s1 + $0x2c4] ss:$16 sps:$4 sm:$0xff]   ;;  %v14703_v37 = vld [vmem:[%s22237_s1 + $0x2cc] ss:$16 sps:$4 sm:$0xff]   ;;  %v14698_v38 = vld [vmem:[%s22237_s1 + $0x2c0] ss:$16 sps:$4 sm:$0xff]  }
  0x1e   :  { %v14704_v43 = vld [vmem:[%s22237_s1 + $0x2e0] ss:$16 sps:$4 sm:$0xff]   ;;  %v14719_v54 = vld [vmem:[%s22237_s1 + $0x328] ss:$16 sps:$4 sm:$0xff]   ;;  %v14733_v60 = vld [vmem:[%s22237_s1 + $0x36c] ss:$16 sps:$4 sm:$0xff]  }
  0x1f   :  { %4968 = vmatpush1.bf16.msra.mxu0 %v14612_v30  ;;  %5501 = vmatpush1.bf16.msra.mxu1 %v14613_v31  ;;  %v14686_v30 = vld [vmem:[%s22237_s1 + $0x280] ss:$16 sps:$4 sm:$0xff]   ;;  %v14689_v31 = vld [vmem:[%s22237_s1 + $0x288] ss:$16 sps:$4 sm:$0xff]  }
  0x20   :  { %4969 = vmatprep.subr.bf16.mxu0 %v14614_v32  ;;  %5502 = vmatprep.subr.bf16.mxu1 %v14616_v33  ;;  %v14694_v32 = vld [vmem:[%s22237_s1 + $0x2a4] ss:$16 sps:$4 sm:$0xff]   ;;  %v14697_v33 = vld [vmem:[%s22237_s1 + $0x2ac] ss:$16 sps:$4 sm:$0xff]   ;;  %v14725_v58 = vld [vmem:[%s22237_s1 + $0x348] ss:$16 sps:$4 sm:$0xff]  }
  0x23   :  { %4970 = vmatpush1.bf16.msra.mxu0 %v14618_v34  ;;  %5503 = vmatpush1.bf16.msra.mxu1 %v14619_v35  ;;  %v14692_v34 = vld [vmem:[%s22237_s1 + $0x2a0] ss:$16 sps:$4 sm:$0xff]   ;;  %v14695_v35 = vld [vmem:[%s22237_s1 + $0x2a8] ss:$16 sps:$4 sm:$0xff]  }
  0x24   :  { %4971 = vmatprep.subr.bf16.mxu0 %v14620_v39  ;;  %5504 = vmatprep.subr.bf16.mxu1 %v14622_v40  ;;  %v14701_v39 = vld [vmem:[%s22237_s1 + $0x2c8] ss:$16 sps:$4 sm:$0xff]   ;;  %v14706_v40 = vld [vmem:[%s22237_s1 + $0x2e4] ss:$16 sps:$4 sm:$0xff]  }
  0x27   :  { %4972 = vmatpush1.bf16.msra.mxu0 %v14624_v41  ;;  %5505 = vmatpush1.bf16.msra.mxu1 %v14625_v44  ;;  %v14709_v41 = vld [vmem:[%s22237_s1 + $0x2ec] ss:$16 sps:$4 sm:$0xff]   ;;  %v14707_v44 = vld [vmem:[%s22237_s1 + $0x2e8] ss:$16 sps:$4 sm:$0xff]  }
  0x28   :  { %4973 = vmatprep.subr.bf16.mxu0 %v14626_v45  ;;  %5506 = vmatprep.subr.bf16.mxu1 %v14628_v46  ;;  %v14712_v45 = vld [vmem:[%s22237_s1 + $0x304] ss:$16 sps:$4 sm:$0xff]   ;;  %v14715_v46 = vld [vmem:[%s22237_s1 + $0x30c] ss:$16 sps:$4 sm:$0xff]  }
  0x2b   :  { %4974 = vmatpush1.bf16.msra.mxu0 %v14630_v47  ;;  %5507 = vmatpush1.bf16.msra.mxu1 %v14631_v48  ;;  %v14710_v47 = vld [vmem:[%s22237_s1 + $0x300] ss:$16 sps:$4 sm:$0xff]   ;;  %v14713_v48 = vld [vmem:[%s22237_s1 + $0x308] ss:$16 sps:$4 sm:$0xff]  }
  0x2c   :  { %4975 = vmatprep.subr.bf16.mxu0 %v14632_v50  ;;  %5508 = vmatprep.subr.bf16.mxu1 %v14634_v51  ;;  %v14718_v50 = vld [vmem:[%s22237_s1 + $0x324] ss:$16 sps:$4 sm:$0xff]   ;;  %v14721_v51 = vld [vmem:[%s22237_s1 + $0x32c] ss:$16 sps:$4 sm:$0xff]  }
  0x2f   :  { %4976 = vmatpush1.bf16.msra.mxu0 %v14636_v53  ;;  %5509 = vmatpush1.bf16.msra.mxu1 %v14637_v55  ;;  %v14716_v53 = vld [vmem:[%s22237_s1 + $0x320] ss:$16 sps:$4 sm:$0xff]   ;;  %v14724_v55 = vld [vmem:[%s22237_s1 + $0x344] ss:$16 sps:$4 sm:$0xff]  }
  0x30   :  { %4977 = vmatprep.subr.bf16.mxu0 %v14638_v56  ;;  %5510 = vmatprep.subr.bf16.mxu1 %v14640_v57  ;;  %v14727_v56 = vld [vmem:[%s22237_s1 + $0x34c] ss:$16 sps:$4 sm:$0xff]   ;;  %v14722_v57 = vld [vmem:[%s22237_s1 + $0x340] ss:$16 sps:$4 sm:$0xff]  }
  0x33   :  { %4978 = vmatpush1.bf16.msra.mxu0 %v14642_v59  ;;  %5511 = vmatpush1.bf16.msra.mxu1 %v14643_v61  ;;  %v14730_v59 = vld [vmem:[%s22237_s1 + $0x364] ss:$16 sps:$4 sm:$0xff]   ;;  %v14728_v61 = vld [vmem:[%s22237_s1 + $0x360] ss:$16 sps:$4 sm:$0xff]  }
  0x34   :  { %4979 = vmatprep.subr.bf16.mxu0 %v14644_v62  ;;  %5512 = vmatprep.subr.bf16.mxu1 %v14646_v63  ;;  %v14731_v62 = vld [vmem:[%s22237_s1 + $0x368] ss:$16 sps:$4 sm:$0xff]   ;;  %v14736_v63 = vld [vmem:[%s22237_s1 + $0x384] ss:$16 sps:$4 sm:$0xff]  }
  0x37   :  { %4980 = vmatpush1.bf16.msra.mxu0 %v14648_v0  ;;  %5513 = vmatpush1.bf16.msra.mxu1 %v14649_v1  ;;  %v14739_v0 = vld [vmem:[%s22237_s1 + $0x38c] ss:$16 sps:$4 sm:$0xff]   ;;  %v14734_v1 = vld [vmem:[%s22237_s1 + $0x380] ss:$16 sps:$4 sm:$0xff]  }
  0x38   :  { %4981 = vmatprep.subr.bf16.mxu0 %v14650_v2  ;;  %5514 = vmatprep.subr.bf16.mxu1 %v14652_v3  ;;  %v14737_v2 = vld [vmem:[%s22237_s1 + $0x388] ss:$16 sps:$4 sm:$0xff]   ;;  %v14742_v3 = vld [vmem:[%s22237_s1 + $0x3a4] ss:$16 sps:$4 sm:$0xff]  }
  0x3b   :  { %4982 = vmatpush1.bf16.msra.mxu0 %v14654_v4  ;;  %5515 = vmatpush1.bf16.msra.mxu1 %v14655_v5  ;;  %v14745_v4 = vld [vmem:[%s22237_s1 + $0x3ac] ss:$16 sps:$4 sm:$0xff]   ;;  %v14740_v5 = vld [vmem:[%s22237_s1 + $0x3a0] ss:$16 sps:$4 sm:$0xff]  }
  0x3c   :  { %4983 = vmatprep.subr.bf16.mxu0 %v14656_v6  ;;  %5516 = vmatprep.subr.bf16.mxu1 %v14658_v7  ;;  %v14743_v6 = vld [vmem:[%s22237_s1 + $0x3a8] ss:$16 sps:$4 sm:$0xff]   ;;  %v14748_v7 = vld [vmem:[%s22237_s1 + $0x3c4] ss:$16 sps:$4 sm:$0xff]  }
  0x3f   :  { %4984 = vmatpush1.bf16.msra.mxu0 %v14660_v8  ;;  %5517 = vmatpush1.bf16.msra.mxu1 %v14661_v9  ;;  %v14751_v8 = vld [vmem:[%s22237_s1 + $0x3cc] ss:$16 sps:$4 sm:$0xff]   ;;  %v844_v9 = vcombine.high %v17183_v52, %v17183_v52 }
  0x40   :  { %4994 = vmatprep.subr.bf16.mxu0 %v14664_v10  ;;  %5527 = vmatprep.subr.bf16.mxu1 %v14667_v11  ;;  %v14746_v10 = vld [vmem:[%s22237_s1 + $0x3c0] ss:$16 sps:$4 sm:$0xff]   ;;  %v14749_v11 = vld [vmem:[%s22237_s1 + $0x3c8] ss:$16 sps:$4 sm:$0xff]   ;;  %v14757_v52 = vld [vmem:[%s22237_s1 + $0x3ec] ss:$16 sps:$4 sm:$0xff]  }
  0x42   :  { %4986 = vmatmul.mubr.bf16.vlgmr.msra.gmra.mrb[0].mxu0 %v17252_v13  ;;  %5519 = vmatmul.mubr.bf16.vlgmr.msra.gmra.mrb[0].mxu1 %v17252_v13 }
  0x43   :  { %4995 = vmatpush1.bf16.msra.mxu0 %v14662_v12  ;;  %5528 = vmatpush1.bf16.msra.mxu1 %v14665_v14  ;;  %v14754_v12 = vld [vmem:[%s22237_s1 + $0x3e4] ss:$16 sps:$4 sm:$0xff]   ;;  %v17436_v14 = vrot.slane %v844_v9, %v17172_v49  ;;  %v14833_v9 = vld [vmem:[%s22237_s1 + $0x588] ss:$16 sps:$4 sm:$0xff]  }
  0x44   :  { %4996 = vmatprep.subr.bf16.mxu0 %v14670_v15  ;;  %5529 = vmatprep.subr.bf16.mxu1 %v14673_v16  ;;  %v14752_v15 = vld [vmem:[%s22237_s1 + $0x3e0] ss:$16 sps:$4 sm:$0xff]   ;;  %v14755_v16 = vld [vmem:[%s22237_s1 + $0x3e8] ss:$16 sps:$4 sm:$0xff]  }
  0x45   :  { %5026 = vmatprep.mubr.bf16.mxu0 %v891_v17  ;;  %5559 = vmatprep.mubr.bf16.mxu1 %v891_v17  ;;  %v14760_v17 = vld [vmem:[%s22237_s1 + $0x404] ss:$16 sps:$4 sm:$0xff]  }
  0x47   :  { %4997 = vmatpush1.bf16.msra.mxu0 %v14668_v18  ;;  %5530 = vmatpush1.bf16.msra.mxu1 %v14671_v19  ;;  %v14763_v18 = vld [vmem:[%s22237_s1 + $0x40c] ss:$16 sps:$4 sm:$0xff]   ;;  %v860_v19 = vcombine.high %v17436_v14, %v17436_v14 }
  0x48   :  { %4998 = vmatprep.subr.bf16.mxu0 %v14676_v20  ;;  %5531 = vmatprep.subr.bf16.mxu1 %v14679_v21  ;;  %v14758_v20 = vld [vmem:[%s22237_s1 + $0x400] ss:$16 sps:$4 sm:$0xff]   ;;  %v889_v21 = vcombine.high %v17252_v13, %v17252_v13 }
  0x49   :  { %v14764_v13 = vld [vmem:[%s22237_s1 + $0x420] ss:$16 sps:$4 sm:$0xff]  }
  0x4b   :  { %4999 = vmatpush1.bf16.msra.mxu0 %v14674_v22  ;;  %5532 = vmatpush1.bf16.msra.mxu1 %v14677_v23  ;;  %v14761_v22 = vld [vmem:[%s22237_s1 + $0x408] ss:$16 sps:$4 sm:$0xff]   ;;  %v14766_v23 = vld [vmem:[%s22237_s1 + $0x424] ss:$16 sps:$4 sm:$0xff]  }
  0x4c   :  { %5000 = vmatprep.subr.bf16.mxu0 %v14682_v24  ;;  %5533 = vmatprep.subr.bf16.mxu1 %v14685_v25  ;;  %v14769_v24 = vld [vmem:[%s22237_s1 + $0x42c] ss:$16 sps:$4 sm:$0xff]   ;;  %v17467_v25 = vrot.slane %v860_v19, %v17172_v49  ;;  %v14850_v19 = vld [vmem:[%s22237_s1 + $0x5e4] ss:$16 sps:$4 sm:$0xff]  }
  0x4f   :  { %5001 = vmatpush1.bf16.msra.mxu0 %v14680_v26  ;;  %5534 = vmatpush1.bf16.msra.mxu1 %v14683_v27  ;;  %v14767_v26 = vld [vmem:[%s22237_s1 + $0x428] ss:$16 sps:$4 sm:$0xff]   ;;  %v14772_v27 = vld [vmem:[%s22237_s1 + $0x444] ss:$16 sps:$4 sm:$0xff]  }
  0x50   :  { %5002 = vmatprep.subr.bf16.mxu0 %v14688_v28  ;;  %5535 = vmatprep.subr.bf16.mxu1 %v14691_v29  ;;  %v14775_v28 = vld [vmem:[%s22237_s1 + $0x44c] ss:$16 sps:$4 sm:$0xff]   ;;  %v14770_v29 = vld [vmem:[%s22237_s1 + $0x440] ss:$16 sps:$4 sm:$0xff]  }
  0x53   :  { %5003 = vmatpush1.bf16.msra.mxu0 %v14686_v30  ;;  %5536 = vmatpush1.bf16.msra.mxu1 %v14689_v31  ;;  %v14773_v30 = vld [vmem:[%s22237_s1 + $0x448] ss:$16 sps:$4 sm:$0xff]   ;;  %v14778_v31 = vld [vmem:[%s22237_s1 + $0x464] ss:$16 sps:$4 sm:$0xff]  }
  0x54   :  { %5004 = vmatprep.subr.bf16.mxu0 %v14694_v32  ;;  %5537 = vmatprep.subr.bf16.mxu1 %v14697_v33  ;;  %v14781_v32 = vld [vmem:[%s22237_s1 + $0x46c] ss:$16 sps:$4 sm:$0xff]   ;;  %v14776_v33 = vld [vmem:[%s22237_s1 + $0x460] ss:$16 sps:$4 sm:$0xff]  }
  0x57   :  { %5005 = vmatpush1.bf16.msra.mxu0 %v14692_v34  ;;  %5538 = vmatpush1.bf16.msra.mxu1 %v14695_v35  ;;  %v14779_v34 = vld [vmem:[%s22237_s1 + $0x468] ss:$16 sps:$4 sm:$0xff]   ;;  %v14784_v35 = vld [vmem:[%s22237_s1 + $0x484] ss:$16 sps:$4 sm:$0xff]  }
  0x58   :  { %5006 = vmatprep.subr.bf16.mxu0 %v14700_v36  ;;  %5539 = vmatprep.subr.bf16.mxu1 %v14703_v37  ;;  %v14787_v36 = vld [vmem:[%s22237_s1 + $0x48c] ss:$16 sps:$4 sm:$0xff]   ;;  %v14782_v37 = vld [vmem:[%s22237_s1 + $0x480] ss:$16 sps:$4 sm:$0xff]  }
  0x5b   :  { %5007 = vmatpush1.bf16.msra.mxu0 %v14698_v38  ;;  %5540 = vmatpush1.bf16.msra.mxu1 %v14701_v39  ;;  %v14785_v38 = vld [vmem:[%s22237_s1 + $0x488] ss:$16 sps:$4 sm:$0xff]   ;;  %v14790_v39 = vld [vmem:[%s22237_s1 + $0x4a4] ss:$16 sps:$4 sm:$0xff]  }
  0x5c   :  { %5008 = vmatprep.subr.bf16.mxu0 %v14706_v40  ;;  %5541 = vmatprep.subr.bf16.mxu1 %v14709_v41  ;;  %v14793_v40 = vld [vmem:[%s22237_s1 + $0x4ac] ss:$16 sps:$4 sm:$0xff]   ;;  %v14788_v41 = vld [vmem:[%s22237_s1 + $0x4a0] ss:$16 sps:$4 sm:$0xff]  }
  0x5f   :  { %5009 = vmatpush1.bf16.msra.mxu0 %v14704_v43  ;;  %5542 = vmatpush1.bf16.msra.mxu1 %v14707_v44  ;;  %v14791_v43 = vld [vmem:[%s22237_s1 + $0x4a8] ss:$16 sps:$4 sm:$0xff]   ;;  %v14796_v44 = vld [vmem:[%s22237_s1 + $0x4c4] ss:$16 sps:$4 sm:$0xff]  }
  0x60   :  { %5010 = vmatprep.subr.bf16.mxu0 %v14712_v45  ;;  %5543 = vmatprep.subr.bf16.mxu1 %v14715_v46  ;;  %v14799_v45 = vld [vmem:[%s22237_s1 + $0x4cc] ss:$16 sps:$4 sm:$0xff]   ;;  %v14794_v46 = vld [vmem:[%s22237_s1 + $0x4c0] ss:$16 sps:$4 sm:$0xff]  }
  0x63   :  { %5011 = vmatpush1.bf16.msra.mxu0 %v14710_v47  ;;  %5544 = vmatpush1.bf16.msra.mxu1 %v14713_v48  ;;  %v14797_v47 = vld [vmem:[%s22237_s1 + $0x4c8] ss:$16 sps:$4 sm:$0xff]   ;;  %v14802_v48 = vld [vmem:[%s22237_s1 + $0x4e4] ss:$16 sps:$4 sm:$0xff]  }
  0x64   :  { %5012 = vmatprep.subr.bf16.mxu0 %v14718_v50  ;;  %5545 = vmatprep.subr.bf16.mxu1 %v14721_v51  ;;  %v14805_v50 = vld [vmem:[%s22237_s1 + $0x4ec] ss:$16 sps:$4 sm:$0xff]   ;;  %v14800_v51 = vld [vmem:[%s22237_s1 + $0x4e0] ss:$16 sps:$4 sm:$0xff]  }
  0x67   :  { %5013 = vmatpush1.bf16.msra.mxu0 %v14716_v53  ;;  %5546 = vmatpush1.bf16.msra.mxu1 %v14719_v54  ;;  %v14803_v53 = vld [vmem:[%s22237_s1 + $0x4e8] ss:$16 sps:$4 sm:$0xff]   ;;  %v14808_v54 = vld [vmem:[%s22237_s1 + $0x504] ss:$16 sps:$4 sm:$0xff]  }
  0x68   :  { %5014 = vmatprep.subr.bf16.mxu0 %v14724_v55  ;;  %5547 = vmatprep.subr.bf16.mxu1 %v14727_v56  ;;  %v14811_v55 = vld [vmem:[%s22237_s1 + $0x50c] ss:$16 sps:$4 sm:$0xff]   ;;  %v14806_v56 = vld [vmem:[%s22237_s1 + $0x500] ss:$16 sps:$4 sm:$0xff]  }
  0x6b   :  { %5015 = vmatpush1.bf16.msra.mxu0 %v14722_v57  ;;  %5548 = vmatpush1.bf16.msra.mxu1 %v14725_v58  ;;  %v14809_v57 = vld [vmem:[%s22237_s1 + $0x508] ss:$16 sps:$4 sm:$0xff]   ;;  %v14814_v58 = vld [vmem:[%s22237_s1 + $0x524] ss:$16 sps:$4 sm:$0xff]  }
  0x6c   :  { %5016 = vmatprep.subr.bf16.mxu0 %v14730_v59  ;;  %5549 = vmatprep.subr.bf16.mxu1 %v14733_v60  ;;  %v14817_v59 = vld [vmem:[%s22237_s1 + $0x52c] ss:$16 sps:$4 sm:$0xff]   ;;  %v14812_v60 = vld [vmem:[%s22237_s1 + $0x520] ss:$16 sps:$4 sm:$0xff]  }
  0x6f   :  { %5017 = vmatpush1.bf16.msra.mxu0 %v14728_v61  ;;  %5550 = vmatpush1.bf16.msra.mxu1 %v14731_v62  ;;  %v14815_v61 = vld [vmem:[%s22237_s1 + $0x528] ss:$16 sps:$4 sm:$0xff]   ;;  %v14820_v62 = vld [vmem:[%s22237_s1 + $0x544] ss:$16 sps:$4 sm:$0xff]  }
  0x70   :  { %5018 = vmatprep.subr.bf16.mxu0 %v14736_v63  ;;  %5551 = vmatprep.subr.bf16.mxu1 %v14739_v0  ;;  %v14823_v63 = vld [vmem:[%s22237_s1 + $0x54c] ss:$16 sps:$4 sm:$0xff]   ;;  %v14818_v0 = vld [vmem:[%s22237_s1 + $0x540] ss:$16 sps:$4 sm:$0xff]  }
  0x73   :  { %5019 = vmatpush1.bf16.msra.mxu0 %v14734_v1  ;;  %5552 = vmatpush1.bf16.msra.mxu1 %v14737_v2  ;;  %v14821_v1 = vld [vmem:[%s22237_s1 + $0x548] ss:$16 sps:$4 sm:$0xff]   ;;  %v14826_v2 = vld [vmem:[%s22237_s1 + $0x564] ss:$16 sps:$4 sm:$0xff]  }
  0x74   :  { %5020 = vmatprep.subr.bf16.mxu0 %v14742_v3  ;;  %5553 = vmatprep.subr.bf16.mxu1 %v14745_v4  ;;  %v14829_v3 = vld [vmem:[%s22237_s1 + $0x56c] ss:$16 sps:$4 sm:$0xff]   ;;  %v14824_v4 = vld [vmem:[%s22237_s1 + $0x560] ss:$16 sps:$4 sm:$0xff]  }
  0x77   :  { %5021 = vmatpush1.bf16.msra.mxu0 %v14740_v5  ;;  %5554 = vmatpush1.bf16.msra.mxu1 %v14743_v6  ;;  %v14827_v5 = vld [vmem:[%s22237_s1 + $0x568] ss:$16 sps:$4 sm:$0xff]   ;;  %v14832_v6 = vld [vmem:[%s22237_s1 + $0x584] ss:$16 sps:$4 sm:$0xff]  }
  0x78   :  { %5022 = vmatprep.subr.bf16.mxu0 %v14748_v7  ;;  %5555 = vmatprep.subr.bf16.mxu1 %v14751_v8  ;;  %v14835_v7 = vld [vmem:[%s22237_s1 + $0x58c] ss:$16 sps:$4 sm:$0xff]   ;;  %v14830_v8 = vld [vmem:[%s22237_s1 + $0x580] ss:$16 sps:$4 sm:$0xff]  }
  0x7b   :  { %5023 = vmatpush1.bf16.msra.mxu0 %v14746_v10  ;;  %5556 = vmatpush1.bf16.msra.mxu1 %v14749_v11  ;;  %v14838_v10 = vld [vmem:[%s22237_s1 + $0x5a4] ss:$16 sps:$4 sm:$0xff]   ;;  %v14841_v11 = vld [vmem:[%s22237_s1 + $0x5ac] ss:$16 sps:$4 sm:$0xff]  }
  0x7c   :  { %5024 = vmatprep.subr.bf16.mxu0 %v14754_v12  ;;  %5557 = vmatprep.subr.bf16.mxu1 %v14757_v52  ;;  %v14836_v12 = vld [vmem:[%s22237_s1 + $0x5a0] ss:$16 sps:$4 sm:$0xff]   ;;  %v14839_v52 = vld [vmem:[%s22237_s1 + $0x5a8] ss:$16 sps:$4 sm:$0xff]  }
  0x7f   :  { %5025 = vmatpush1.bf16.msra.mxu0 %v14752_v15  ;;  %5558 = vmatpush1.bf16.msra.mxu1 %v14755_v16  ;;  %v14844_v15 = vld [vmem:[%s22237_s1 + $0x5c4] ss:$16 sps:$4 sm:$0xff]   ;;  %v14847_v16 = vld [vmem:[%s22237_s1 + $0x5cc] ss:$16 sps:$4 sm:$0xff]  }
  0x80   :  { %5035 = vmatprep.subr.bf16.mxu0 %v14760_v17  ;;  %5568 = vmatprep.subr.bf16.mxu1 %v14763_v18  ;;  %v14842_v17 = vld [vmem:[%s22237_s1 + $0x5c0] ss:$16 sps:$4 sm:$0xff]   ;;  %v14845_v18 = vld [vmem:[%s22237_s1 + $0x5c8] ss:$16 sps:$4 sm:$0xff]  }
  0x82   :  { %5027 = vmatmul.mubr.bf16.vlgmr.msra.gmra.mrb[0].mxu0 %v889_v21  ;;  %5560 = vmatmul.mubr.bf16.vlgmr.msra.gmra.mrb[0].mxu1 %v889_v21  ;;  %v14848_v21 = vld [vmem:[%s22237_s1 + $0x5e0] ss:$16 sps:$4 sm:$0xff]  }
  0x83   :  { %5036 = vmatpush1.bf16.msra.mxu0 %v14758_v20  ;;  %5569 = vmatpush1.bf16.msra.mxu1 %v14761_v22  ;;  %v14853_v20 = vld [vmem:[%s22237_s1 + $0x5ec] ss:$16 sps:$4 sm:$0xff]   ;;  %v14851_v22 = vld [vmem:[%s22237_s1 + $0x5e8] ss:$16 sps:$4 sm:$0xff]  }
  0x84   :  { %5037 = vmatprep.subr.bf16.mxu0 %v14766_v23  ;;  %5570 = vmatprep.subr.bf16.mxu1 %v14769_v24  ;;  %v14857_v23 = vld [vmem:[%s22237_s1 + $0x604] ss:$16 sps:$4 sm:$0xff]   ;;  %v14860_v24 = vld [vmem:[%s22237_s1 + $0x60c] ss:$16 sps:$4 sm:$0xff]  }
  0x85   :  { %5067 = vmatprep.mubr.bf16.mxu0 %v17467_v25  ;;  %5600 = vmatprep.mubr.bf16.mxu1 %v17467_v25 }
  0x87   :  { %5038 = vmatpush1.bf16.msra.mxu0 %v14764_v13  ;;  %5571 = vmatpush1.bf16.msra.mxu1 %v14767_v26  ;;  %v14855_v13 = vld [vmem:[%s22237_s1 + $0x600] ss:$16 sps:$4 sm:$0xff]   ;;  %v17656_v26 = vrot.slane %v17436_v14, %v17172_v49  ;;  %v892_v14 = vcombine.high %v17467_v25, %v17467_v25  ;;  %v14869_v25 = vld [vmem:[%s22237_s1 + $0x644] ss:$16 sps:$4 sm:$0xff]  }
  0x88   :  { %5039 = vmatprep.subr.bf16.mxu0 %v14772_v27  ;;  %5572 = vmatprep.subr.bf16.mxu1 %v14775_v28  ;;  %v14858_v27 = vld [vmem:[%s22237_s1 + $0x608] ss:$16 sps:$4 sm:$0xff]   ;;  %v14863_v28 = vld [vmem:[%s22237_s1 + $0x624] ss:$16 sps:$4 sm:$0xff]  }
  0x8b   :  { %5040 = vmatpush1.bf16.msra.mxu0 %v14770_v29  ;;  %5573 = vmatpush1.bf16.msra.mxu1 %v14773_v30  ;;  %v14866_v29 = vld [vmem:[%s22237_s1 + $0x62c] ss:$16 sps:$4 sm:$0xff]   ;;  %v14861_v30 = vld [vmem:[%s22237_s1 + $0x620] ss:$16 sps:$4 sm:$0xff]  }
  0x8c   :  { %5041 = vmatprep.subr.bf16.mxu0 %v14778_v31  ;;  %5574 = vmatprep.subr.bf16.mxu1 %v14781_v32  ;;  %v14864_v31 = vld [vmem:[%s22237_s1 + $0x628] ss:$16 sps:$4 sm:$0xff]   ;;  %v14872_v32 = vld [vmem:[%s22237_s1 + $0x64c] ss:$16 sps:$4 sm:$0xff]  }
  0x8f   :  { %5042 = vmatpush1.bf16.msra.mxu0 %v14776_v33  ;;  %5575 = vmatpush1.bf16.msra.mxu1 %v14779_v34  ;;  %v14867_v33 = vld [vmem:[%s22237_s1 + $0x640] ss:$16 sps:$4 sm:$0xff]   ;;  %v14870_v34 = vld [vmem:[%s22237_s1 + $0x648] ss:$16 sps:$4 sm:$0xff]  }
  0x90   :  { %5043 = vmatprep.subr.bf16.mxu0 %v14784_v35  ;;  %5576 = vmatprep.subr.bf16.mxu1 %v14787_v36  ;;  %v14875_v35 = vld [vmem:[%s22237_s1 + $0x664] ss:$16 sps:$4 sm:$0xff]   ;;  %v14878_v36 = vld [vmem:[%s22237_s1 + $0x66c] ss:$16 sps:$4 sm:$0xff]  }
  0x93   :  { %5044 = vmatpush1.bf16.msra.mxu0 %v14782_v37  ;;  %5577 = vmatpush1.bf16.msra.mxu1 %v14785_v38  ;;  %v14873_v37 = vld [vmem:[%s22237_s1 + $0x660] ss:$16 sps:$4 sm:$0xff]   ;;  %v14876_v38 = vld [vmem:[%s22237_s1 + $0x668] ss:$16 sps:$4 sm:$0xff]  }
  0x94   :  { %5045 = vmatprep.subr.bf16.mxu0 %v14790_v39  ;;  %5578 = vmatprep.subr.bf16.mxu1 %v14793_v40  ;;  %v14881_v39 = vld [vmem:[%s22237_s1 + $0x684] ss:$16 sps:$4 sm:$0xff]   ;;  %v14884_v40 = vld [vmem:[%s22237_s1 + $0x68c] ss:$16 sps:$4 sm:$0xff]  }
  0x97   :  { %5046 = vmatpush1.bf16.msra.mxu0 %v14788_v41  ;;  %5579 = vmatpush1.bf16.msra.mxu1 %v14791_v43  ;;  %v14879_v41 = vld [vmem:[%s22237_s1 + $0x680] ss:$16 sps:$4 sm:$0xff]   ;;  %v14882_v43 = vld [vmem:[%s22237_s1 + $0x688] ss:$16 sps:$4 sm:$0xff]  }
  0x98   :  { %5047 = vmatprep.subr.bf16.mxu0 %v14796_v44  ;;  %5580 = vmatprep.subr.bf16.mxu1 %v14799_v45  ;;  %v14887_v44 = vld [vmem:[%s22237_s1 + $0x6a4] ss:$16 sps:$4 sm:$0xff]   ;;  %v14890_v45 = vld [vmem:[%s22237_s1 + $0x6ac] ss:$16 sps:$4 sm:$0xff]  }
  0x9b   :  { %5048 = vmatpush1.bf16.msra.mxu0 %v14794_v46  ;;  %5581 = vmatpush1.bf16.msra.mxu1 %v14797_v47  ;;  %v14885_v46 = vld [vmem:[%s22237_s1 + $0x6a0] ss:$16 sps:$4 sm:$0xff]   ;;  %v14888_v47 = vld [vmem:[%s22237_s1 + $0x6a8] ss:$16 sps:$4 sm:$0xff]  }
  0x9c   :  { %5049 = vmatprep.subr.bf16.mxu0 %v14802_v48  ;;  %5582 = vmatprep.subr.bf16.mxu1 %v14805_v50  ;;  %v14893_v48 = vld [vmem:[%s22237_s1 + $0x6c4] ss:$16 sps:$4 sm:$0xff]   ;;  %v14896_v50 = vld [vmem:[%s22237_s1 + $0x6cc] ss:$16 sps:$4 sm:$0xff]  }
  0x9f   :  { %5050 = vmatpush1.bf16.msra.mxu0 %v14800_v51  ;;  %5583 = vmatpush1.bf16.msra.mxu1 %v14803_v53  ;;  %v14891_v51 = vld [vmem:[%s22237_s1 + $0x6c0] ss:$16 sps:$4 sm:$0xff]   ;;  %v14894_v53 = vld [vmem:[%s22237_s1 + $0x6c8] ss:$16 sps:$4 sm:$0xff]  }
  0xa0   :  { %5051 = vmatprep.subr.bf16.mxu0 %v14808_v54  ;;  %5584 = vmatprep.subr.bf16.mxu1 %v14811_v55  ;;  %v14899_v54 = vld [vmem:[%s22237_s1 + $0x6e4] ss:$16 sps:$4 sm:$0xff]   ;;  %v14902_v55 = vld [vmem:[%s22237_s1 + $0x6ec] ss:$16 sps:$4 sm:$0xff]  }
  0xa3   :  { %5052 = vmatpush1.bf16.msra.mxu0 %v14806_v56  ;;  %5585 = vmatpush1.bf16.msra.mxu1 %v14809_v57  ;;  %v14897_v56 = vld [vmem:[%s22237_s1 + $0x6e0] ss:$16 sps:$4 sm:$0xff]   ;;  %v14900_v57 = vld [vmem:[%s22237_s1 + $0x6e8] ss:$16 sps:$4 sm:$0xff]  }
  0xa4   :  { %5053 = vmatprep.subr.bf16.mxu0 %v14814_v58  ;;  %5586 = vmatprep.subr.bf16.mxu1 %v14817_v59  ;;  %v14905_v58 = vld [vmem:[%s22237_s1 + $0x704] ss:$16 sps:$4 sm:$0xff]   ;;  %v14908_v59 = vld [vmem:[%s22237_s1 + $0x70c] ss:$16 sps:$4 sm:$0xff]  }
  0xa7   :  { %5054 = vmatpush1.bf16.msra.mxu0 %v14812_v60  ;;  %5587 = vmatpush1.bf16.msra.mxu1 %v14815_v61  ;;  %v14903_v60 = vld [vmem:[%s22237_s1 + $0x700] ss:$16 sps:$4 sm:$0xff]   ;;  %v14906_v61 = vld [vmem:[%s22237_s1 + $0x708] ss:$16 sps:$4 sm:$0xff]  }
  0xa8   :  { %5055 = vmatprep.subr.bf16.mxu0 %v14820_v62  ;;  %5588 = vmatprep.subr.bf16.mxu1 %v14823_v63  ;;  %v14911_v62 = vld [vmem:[%s22237_s1 + $0x724] ss:$16 sps:$4 sm:$0xff]   ;;  %v14914_v63 = vld [vmem:[%s22237_s1 + $0x72c] ss:$16 sps:$4 sm:$0xff]  }
  0xab   :  { %5056 = vmatpush1.bf16.msra.mxu0 %v14818_v0  ;;  %5589 = vmatpush1.bf16.msra.mxu1 %v14821_v1  ;;  %v14909_v0 = vld [vmem:[%s22237_s1 + $0x720] ss:$16 sps:$4 sm:$0xff]   ;;  %v14912_v1 = vld [vmem:[%s22237_s1 + $0x728] ss:$16 sps:$4 sm:$0xff]  }
  0xac   :  { %5057 = vmatprep.subr.bf16.mxu0 %v14826_v2  ;;  %5590 = vmatprep.subr.bf16.mxu1 %v14829_v3  ;;  %v14917_v2 = vld [vmem:[%s22237_s1 + $0x744] ss:$16 sps:$4 sm:$0xff]   ;;  %v14920_v3 = vld [vmem:[%s22237_s1 + $0x74c] ss:$16 sps:$4 sm:$0xff]  }
  0xaf   :  { %5058 = vmatpush1.bf16.msra.mxu0 %v14824_v4  ;;  %5591 = vmatpush1.bf16.msra.mxu1 %v14827_v5  ;;  %v14915_v4 = vld [vmem:[%s22237_s1 + $0x740] ss:$16 sps:$4 sm:$0xff]   ;;  %v14918_v5 = vld [vmem:[%s22237_s1 + $0x748] ss:$16 sps:$4 sm:$0xff]  }
  0xb0   :  { %5059 = vmatprep.subr.bf16.mxu0 %v14832_v6  ;;  %5592 = vmatprep.subr.bf16.mxu1 %v14835_v7  ;;  %v14923_v6 = vld [vmem:[%s22237_s1 + $0x764] ss:$16 sps:$4 sm:$0xff]   ;;  %v14926_v7 = vld [vmem:[%s22237_s1 + $0x76c] ss:$16 sps:$4 sm:$0xff]  }
  0xb3   :  { %5060 = vmatpush1.bf16.msra.mxu0 %v14830_v8  ;;  %5593 = vmatpush1.bf16.msra.mxu1 %v14833_v9  ;;  %v14921_v8 = vld [vmem:[%s22237_s1 + $0x760] ss:$16 sps:$4 sm:$0xff]   ;;  %v14924_v9 = vld [vmem:[%s22237_s1 + $0x768] ss:$16 sps:$4 sm:$0xff]  }
  0xb4   :  { %5061 = vmatprep.subr.bf16.mxu0 %v14838_v10  ;;  %5594 = vmatprep.subr.bf16.mxu1 %v14841_v11  ;;  %v14929_v10 = vld [vmem:[%s22237_s1 + $0x784] ss:$16 sps:$4 sm:$0xff]   ;;  %v14932_v11 = vld [vmem:[%s22237_s1 + $0x78c] ss:$16 sps:$4 sm:$0xff]  }
  0xb7   :  { %5062 = vmatpush1.bf16.msra.mxu0 %v14836_v12  ;;  %5595 = vmatpush1.bf16.msra.mxu1 %v14839_v52  ;;  %v14927_v12 = vld [vmem:[%s22237_s1 + $0x780] ss:$16 sps:$4 sm:$0xff]   ;;  %v14930_v52 = vld [vmem:[%s22237_s1 + $0x788] ss:$16 sps:$4 sm:$0xff]  }
  0xb8   :  { %5063 = vmatprep.subr.bf16.mxu0 %v14844_v15  ;;  %5596 = vmatprep.subr.bf16.mxu1 %v14847_v16  ;;  %v14935_v15 = vld [vmem:[%s22237_s1 + $0x7a4] ss:$16 sps:$4 sm:$0xff]   ;;  %v14938_v16 = vld [vmem:[%s22237_s1 + $0x7ac] ss:$16 sps:$4 sm:$0xff]  }
  0xbb   :  { %5064 = vmatpush1.bf16.msra.mxu0 %v14842_v17  ;;  %5597 = vmatpush1.bf16.msra.mxu1 %v14845_v18  ;;  %v14933_v17 = vld [vmem:[%s22237_s1 + $0x7a0] ss:$16 sps:$4 sm:$0xff]   ;;  %v14936_v18 = vld [vmem:[%s22237_s1 + $0x7a8] ss:$16 sps:$4 sm:$0xff]  }
  0xbc   :  { %5065 = vmatprep.subr.bf16.mxu0 %v14850_v19  ;;  %5598 = vmatprep.subr.bf16.mxu1 %v14853_v20  ;;  %v14941_v19 = vld [vmem:[%s22237_s1 + $0x7c4] ss:$16 sps:$4 sm:$0xff]   ;;  %v14944_v20 = vld [vmem:[%s22237_s1 + $0x7cc] ss:$16 sps:$4 sm:$0xff]  }
  0xbf   :  { %5066 = vmatpush1.bf16.msra.mxu0 %v14848_v21  ;;  %5599 = vmatpush1.bf16.msra.mxu1 %v14851_v22  ;;  %v17830_v21 = vld.sshfl [vmem:[%s22236_s0 + $0x8] sm:$0xff pattern:$0x75316420]  ;;  %v14939_v22 = vld [vmem:[%s22237_s1 + $0x7c0] ss:$16 sps:$4 sm:$0xff]  }
  0xc0   :  { %5076 = vmatprep.subr.bf16.mxu0 %v14857_v23  ;;  %5609 = vmatprep.subr.bf16.mxu1 %v14860_v24  ;;  %v14942_v23 = vld [vmem:[%s22237_s1 + $0x7c8] ss:$16 sps:$4 sm:$0xff]   ;;  %v14947_v24 = vld [vmem:[%s22237_s1 + $0x7e4] ss:$16 sps:$4 sm:$0xff]  }
  0xc2   :  { %5068 = vmatmul.mubr.bf16.vlgmr.msra.gmra.mrb[0].mxu0 %v17656_v26  ;;  %5601 = vmatmul.mubr.bf16.vlgmr.msra.gmra.mrb[0].mxu1 %v17656_v26 }
  0xc3   :  { %5077 = vmatpush1.bf16.msra.mxu0 %v14855_v13  ;;  %5610 = vmatpush1.bf16.msra.mxu1 %v14858_v27  ;;  %v14950_v13 = vld [vmem:[%s22237_s1 + $0x7ec] ss:$16 sps:$4 sm:$0xff]   ;;  %v14945_v27 = vld [vmem:[%s22237_s1 + $0x7e0] ss:$16 sps:$4 sm:$0xff]  }
  0xc4   :  { %5078 = vmatprep.subr.bf16.mxu0 %v14863_v28  ;;  %5611 = vmatprep.subr.bf16.mxu1 %v14866_v29  ;;  %v14948_v28 = vld [vmem:[%s22237_s1 + $0x7e8] ss:$16 sps:$4 sm:$0xff]   ;;  %v14953_v29 = vld [vmem:[%s22237_s1 + $0x804] ss:$16 sps:$4 sm:$0xff]  }
  0xc5   :  { %5108 = vmatprep.mubr.bf16.mxu0 %v892_v14  ;;  %5641 = vmatprep.mubr.bf16.mxu1 %v892_v14  ;;  %v14956_v14 = vld [vmem:[%s22237_s1 + $0x80c] ss:$16 sps:$4 sm:$0xff]  }
  0xc7   :  { %5079 = vmatpush1.bf16.msra.mxu0 %v14861_v30  ;;  %5612 = vmatpush1.bf16.msra.mxu1 %v14864_v31  ;;  %v908_v30 = vcombine.high %v17830_v21, %v17830_v21  ;;  %v890_v31 = vcombine.high %v17656_v26, %v17656_v26  ;;  %v14962_v26 = vld [vmem:[%s22237_s1 + $0x82c] ss:$16 sps:$4 sm:$0xff]  }
  0xc8   :  { %5080 = vmatprep.subr.bf16.mxu0 %v14869_v25  ;;  %5613 = vmatprep.subr.bf16.mxu1 %v14872_v32  ;;  %v14951_v25 = vld [vmem:[%s22237_s1 + $0x800] ss:$16 sps:$4 sm:$0xff]   ;;  %v14954_v32 = vld [vmem:[%s22237_s1 + $0x808] ss:$16 sps:$4 sm:$0xff]  }
  0xcb   :  { %5081 = vmatpush1.bf16.msra.mxu0 %v14867_v33  ;;  %5614 = vmatpush1.bf16.msra.mxu1 %v14870_v34  ;;  %v14959_v33 = vld [vmem:[%s22237_s1 + $0x824] ss:$16 sps:$4 sm:$0xff]   ;;  %v17873_v34 = vrot.slane %v908_v30, %v17172_v49 }
  0xcc   :  { %5082 = vmatprep.subr.bf16.mxu0 %v14875_v35  ;;  %5615 = vmatprep.subr.bf16.mxu1 %v14878_v36  ;;  %v14957_v35 = vld [vmem:[%s22237_s1 + $0x820] ss:$16 sps:$4 sm:$0xff]   ;;  %v14960_v36 = vld [vmem:[%s22237_s1 + $0x828] ss:$16 sps:$4 sm:$0xff]   ;;  %v15043_v30 = vld [vmem:[%s22237_s1 + $0x9e4] ss:$16 sps:$4 sm:$0xff]  }
  0xcf   :  { %5083 = vmatpush1.bf16.msra.mxu0 %v14873_v37  ;;  %5616 = vmatpush1.bf16.msra.mxu1 %v14876_v38  ;;  %v14965_v37 = vld [vmem:[%s22237_s1 + $0x844] ss:$16 sps:$4 sm:$0xff]   ;;  %v14968_v38 = vld [vmem:[%s22237_s1 + $0x84c] ss:$16 sps:$4 sm:$0xff]  }
  0xd0   :  { %5084 = vmatprep.subr.bf16.mxu0 %v14881_v39  ;;  %5617 = vmatprep.subr.bf16.mxu1 %v14884_v40  ;;  %v14963_v39 = vld [vmem:[%s22237_s1 + $0x840] ss:$16 sps:$4 sm:$0xff]   ;;  %v14966_v40 = vld [vmem:[%s22237_s1 + $0x848] ss:$16 sps:$4 sm:$0xff]  }
  0xd3   :  { %5085 = vmatpush1.bf16.msra.mxu0 %v14879_v41  ;;  %5618 = vmatpush1.bf16.msra.mxu1 %v14882_v43  ;;  %v14971_v41 = vld [vmem:[%s22237_s1 + $0x864] ss:$16 sps:$4 sm:$0xff]   ;;  %v14974_v43 = vld [vmem:[%s22237_s1 + $0x86c] ss:$16 sps:$4 sm:$0xff]  }
  0xd4   :  { %5086 = vmatprep.subr.bf16.mxu0 %v14887_v44  ;;  %5619 = vmatprep.subr.bf16.mxu1 %v14890_v45  ;;  %v14969_v44 = vld [vmem:[%s22237_s1 + $0x860] ss:$16 sps:$4 sm:$0xff]   ;;  %v14972_v45 = vld [vmem:[%s22237_s1 + $0x868] ss:$16 sps:$4 sm:$0xff]  }
  0xd7   :  { %5087 = vmatpush1.bf16.msra.mxu0 %v14885_v46  ;;  %5620 = vmatpush1.bf16.msra.mxu1 %v14888_v47  ;;  %v14977_v46 = vld [vmem:[%s22237_s1 + $0x884] ss:$16 sps:$4 sm:$0xff]   ;;  %v14980_v47 = vld [vmem:[%s22237_s1 + $0x88c] ss:$16 sps:$4 sm:$0xff]  }
  0xd8   :  { %5088 = vmatprep.subr.bf16.mxu0 %v14893_v48  ;;  %5621 = vmatprep.subr.bf16.mxu1 %v14896_v50  ;;  %v14975_v48 = vld [vmem:[%s22237_s1 + $0x880] ss:$16 sps:$4 sm:$0xff]   ;;  %v14978_v50 = vld [vmem:[%s22237_s1 + $0x888] ss:$16 sps:$4 sm:$0xff]  }
  0xdb   :  { %5089 = vmatpush1.bf16.msra.mxu0 %v14891_v51  ;;  %5622 = vmatpush1.bf16.msra.mxu1 %v14894_v53  ;;  %v14983_v51 = vld [vmem:[%s22237_s1 + $0x8a4] ss:$16 sps:$4 sm:$0xff]   ;;  %v14986_v53 = vld [vmem:[%s22237_s1 + $0x8ac] ss:$16 sps:$4 sm:$0xff]  }
  0xdc   :  { %5090 = vmatprep.subr.bf16.mxu0 %v14899_v54  ;;  %5623 = vmatprep.subr.bf16.mxu1 %v14902_v55  ;;  %v14981_v54 = vld [vmem:[%s22237_s1 + $0x8a0] ss:$16 sps:$4 sm:$0xff]   ;;  %v14984_v55 = vld [vmem:[%s22237_s1 + $0x8a8] ss:$16 sps:$4 sm:$0xff]  }
  0xdf   :  { %5091 = vmatpush1.bf16.msra.mxu0 %v14897_v56  ;;  %5624 = vmatpush1.bf16.msra.mxu1 %v14900_v57  ;;  %v14989_v56 = vld [vmem:[%s22237_s1 + $0x8c4] ss:$16 sps:$4 sm:$0xff]   ;;  %v14992_v57 = vld [vmem:[%s22237_s1 + $0x8cc] ss:$16 sps:$4 sm:$0xff]  }
  0xe0   :  { %5092 = vmatprep.subr.bf16.mxu0 %v14905_v58  ;;  %5625 = vmatprep.subr.bf16.mxu1 %v14908_v59  ;;  %v14987_v58 = vld [vmem:[%s22237_s1 + $0x8c0] ss:$16 sps:$4 sm:$0xff]   ;;  %v14990_v59 = vld [vmem:[%s22237_s1 + $0x8c8] ss:$16 sps:$4 sm:$0xff]  }
  0xe3   :  { %5093 = vmatpush1.bf16.msra.mxu0 %v14903_v60  ;;  %5626 = vmatpush1.bf16.msra.mxu1 %v14906_v61  ;;  %v14995_v60 = vld [vmem:[%s22237_s1 + $0x8e4] ss:$16 sps:$4 sm:$0xff]   ;;  %v14998_v61 = vld [vmem:[%s22237_s1 + $0x8ec] ss:$16 sps:$4 sm:$0xff]  }
  0xe4   :  { %5094 = vmatprep.subr.bf16.mxu0 %v14911_v62  ;;  %5627 = vmatprep.subr.bf16.mxu1 %v14914_v63  ;;  %v14993_v62 = vld [vmem:[%s22237_s1 + $0x8e0] ss:$16 sps:$4 sm:$0xff]   ;;  %v14996_v63 = vld [vmem:[%s22237_s1 + $0x8e8] ss:$16 sps:$4 sm:$0xff]  }
  0xe7   :  { %5095 = vmatpush1.bf16.msra.mxu0 %v14909_v0  ;;  %5628 = vmatpush1.bf16.msra.mxu1 %v14912_v1  ;;  %v15001_v0 = vld [vmem:[%s22237_s1 + $0x904] ss:$16 sps:$4 sm:$0xff]   ;;  %v15004_v1 = vld [vmem:[%s22237_s1 + $0x90c] ss:$16 sps:$4 sm:$0xff]  }
  0xe8   :  { %5096 = vmatprep.subr.bf16.mxu0 %v14917_v2  ;;  %5629 = vmatprep.subr.bf16.mxu1 %v14920_v3  ;;  %v14999_v2 = vld [vmem:[%s22237_s1 + $0x900] ss:$16 sps:$4 sm:$0xff]   ;;  %v15002_v3 = vld [vmem:[%s22237_s1 + $0x908] ss:$16 sps:$4 sm:$0xff]  }
  0xeb   :  { %5097 = vmatpush1.bf16.msra.mxu0 %v14915_v4  ;;  %5630 = vmatpush1.bf16.msra.mxu1 %v14918_v5  ;;  %v15007_v4 = vld [vmem:[%s22237_s1 + $0x924] ss:$16 sps:$4 sm:$0xff]   ;;  %v15010_v5 = vld [vmem:[%s22237_s1 + $0x92c] ss:$16 sps:$4 sm:$0xff]  }
  0xec   :  { %5098 = vmatprep.subr.bf16.mxu0 %v14923_v6  ;;  %5631 = vmatprep.subr.bf16.mxu1 %v14926_v7  ;;  %v15005_v6 = vld [vmem:[%s22237_s1 + $0x920] ss:$16 sps:$4 sm:$0xff]   ;;  %v15008_v7 = vld [vmem:[%s22237_s1 + $0x928] ss:$16 sps:$4 sm:$0xff]  }
  0xef   :  { %5099 = vmatpush1.bf16.msra.mxu0 %v14921_v8  ;;  %5632 = vmatpush1.bf16.msra.mxu1 %v14924_v9  ;;  %v15013_v8 = vld [vmem:[%s22237_s1 + $0x944] ss:$16 sps:$4 sm:$0xff]   ;;  %v15016_v9 = vld [vmem:[%s22237_s1 + $0x94c] ss:$16 sps:$4 sm:$0xff]  }
  0xf0   :  { %5100 = vmatprep.subr.bf16.mxu0 %v14929_v10  ;;  %5633 = vmatprep.subr.bf16.mxu1 %v14932_v11  ;;  %v15011_v10 = vld [vmem:[%s22237_s1 + $0x940] ss:$16 sps:$4 sm:$0xff]   ;;  %v15014_v11 = vld [vmem:[%s22237_s1 + $0x948] ss:$16 sps:$4 sm:$0xff]  }
  0xf3   :  { %5101 = vmatpush1.bf16.msra.mxu0 %v14927_v12  ;;  %5634 = vmatpush1.bf16.msra.mxu1 %v14930_v52  ;;  %v15019_v12 = vld [vmem:[%s22237_s1 + $0x964] ss:$16 sps:$4 sm:$0xff]   ;;  %v15022_v52 = vld [vmem:[%s22237_s1 + $0x96c] ss:$16 sps:$4 sm:$0xff]  }
  0xf4   :  { %5102 = vmatprep.subr.bf16.mxu0 %v14935_v15  ;;  %5635 = vmatprep.subr.bf16.mxu1 %v14938_v16  ;;  %v15017_v15 = vld [vmem:[%s22237_s1 + $0x960] ss:$16 sps:$4 sm:$0xff]   ;;  %v15020_v16 = vld [vmem:[%s22237_s1 + $0x968] ss:$16 sps:$4 sm:$0xff]  }
  0xf7   :  { %5103 = vmatpush1.bf16.msra.mxu0 %v14933_v17  ;;  %5636 = vmatpush1.bf16.msra.mxu1 %v14936_v18  ;;  %v15025_v17 = vld [vmem:[%s22237_s1 + $0x984] ss:$16 sps:$4 sm:$0xff]   ;;  %v15028_v18 = vld [vmem:[%s22237_s1 + $0x98c] ss:$16 sps:$4 sm:$0xff]  }
  0xf8   :  { %5104 = vmatprep.subr.bf16.mxu0 %v14941_v19  ;;  %5637 = vmatprep.subr.bf16.mxu1 %v14944_v20  ;;  %v15023_v19 = vld [vmem:[%s22237_s1 + $0x980] ss:$16 sps:$4 sm:$0xff]   ;;  %v15026_v20 = vld [vmem:[%s22237_s1 + $0x988] ss:$16 sps:$4 sm:$0xff]  }
  0xfb   :  { %5105 = vmatpush1.bf16.msra.mxu0 %v14939_v22  ;;  %5638 = vmatpush1.bf16.msra.mxu1 %v14942_v23  ;;  %v15031_v22 = vld [vmem:[%s22237_s1 + $0x9a4] ss:$16 sps:$4 sm:$0xff]   ;;  %v15034_v23 = vld [vmem:[%s22237_s1 + $0x9ac] ss:$16 sps:$4 sm:$0xff]  }
  0xfc   :  { %5106 = vmatprep.subr.bf16.mxu0 %v14947_v24  ;;  %5639 = vmatprep.subr.bf16.mxu1 %v14950_v13  ;;  %v15029_v24 = vld [vmem:[%s22237_s1 + $0x9a0] ss:$16 sps:$4 sm:$0xff]   ;;  %v15032_v13 = vld [vmem:[%s22237_s1 + $0x9a8] ss:$16 sps:$4 sm:$0xff]  }
  0xff   :  { %5107 = vmatpush1.bf16.msra.mxu0 %v14945_v27  ;;  %5640 = vmatpush1.bf16.msra.mxu1 %v14948_v28  ;;  %v15037_v27 = vld [vmem:[%s22237_s1 + $0x9c4] ss:$16 sps:$4 sm:$0xff]   ;;  %v15040_v28 = vld [vmem:[%s22237_s1 + $0x9cc] ss:$16 sps:$4 sm:$0xff]  }
 0x100   :  { %5117 = vmatprep.subr.bf16.mxu0 %v14953_v29  ;;  %5650 = vmatprep.subr.bf16.mxu1 %v14956_v14  ;;  %v15035_v29 = vld [vmem:[%s22237_s1 + $0x9c0] ss:$16 sps:$4 sm:$0xff]   ;;  %v15038_v14 = vld [vmem:[%s22237_s1 + $0x9c8] ss:$16 sps:$4 sm:$0xff]  }
 0x102   :  { %5109 = vmatmul.mubr.bf16.vlgmr.msra.gmra.mrb[0].mxu0 %v890_v31  ;;  %5642 = vmatmul.mubr.bf16.vlgmr.msra.gmra.mrb[0].mxu1 %v890_v31  ;;  %v15046_v31 = vld [vmem:[%s22237_s1 + $0x9ec] ss:$16 sps:$4 sm:$0xff]  }
 0x103   :  { %5118 = vmatpush1.bf16.msra.mxu0 %v14951_v25  ;;  %5651 = vmatpush1.bf16.msra.mxu1 %v14954_v32  ;;  %v15041_v25 = vld [vmem:[%s22237_s1 + $0x9e0] ss:$16 sps:$4 sm:$0xff]   ;;  %v15044_v32 = vld [vmem:[%s22237_s1 + $0x9e8] ss:$16 sps:$4 sm:$0xff]  }
 0x104   :  { %5119 = vmatprep.subr.bf16.mxu0 %v14959_v33  ;;  %5652 = vmatprep.subr.bf16.mxu1 %v14962_v26  ;;  %v15049_v33 = vld [vmem:[%s22237_s1 + $0xa04] ss:$16 sps:$4 sm:$0xff]   ;;  %v15052_v26 = vld [vmem:[%s22237_s1 + $0xa0c] ss:$16 sps:$4 sm:$0xff]  }
 0x105   :  { %5149 = vmatprep.mubr.bf16.mxu0 %v17873_v34  ;;  %5682 = vmatprep.mubr.bf16.mxu1 %v17873_v34 }
 0x107   :  { %5120 = vmatpush1.bf16.msra.mxu0 %v14957_v35  ;;  %5653 = vmatpush1.bf16.msra.mxu1 %v14960_v36  ;;  %v18059_v35 = vrot.slane %v17830_v21, %v17172_v49  ;;  %v15047_v36 = vld [vmem:[%s22237_s1 + $0xa00] ss:$16 sps:$4 sm:$0xff]   ;;  %v15058_v21 = vld [vmem:[%s22237_s1 + $0xa2c] ss:$16 sps:$4 sm:$0xff]  }
 0x108   :  { %5121 = vmatprep.subr.bf16.mxu0 %v14965_v37  ;;  %5654 = vmatprep.subr.bf16.mxu1 %v14968_v38  ;;  %v15050_v37 = vld [vmem:[%s22237_s1 + $0xa08] ss:$16 sps:$4 sm:$0xff]   ;;  %v15055_v38 = vld [vmem:[%s22237_s1 + $0xa24] ss:$16 sps:$4 sm:$0xff]  }
 0x10b   :  { %5122 = vmatpush1.bf16.msra.mxu0 %v14963_v39  ;;  %5655 = vmatpush1.bf16.msra.mxu1 %v14966_v40  ;;  %v940_v39 = vcombine.high %v17873_v34, %v17873_v34  ;;  %v15053_v40 = vld [vmem:[%s22237_s1 + $0xa20] ss:$16 sps:$4 sm:$0xff]   ;;  %v15061_v34 = vld [vmem:[%s22237_s1 + $0xa44] ss:$16 sps:$4 sm:$0xff]  }
 0x10c   :  { %5123 = vmatprep.subr.bf16.mxu0 %v14971_v41  ;;  %5656 = vmatprep.subr.bf16.mxu1 %v14974_v43  ;;  %v15056_v41 = vld [vmem:[%s22237_s1 + $0xa28] ss:$16 sps:$4 sm:$0xff]   ;;  %v15064_v43 = vld [vmem:[%s22237_s1 + $0xa4c] ss:$16 sps:$4 sm:$0xff]  }
 0x10f   :  { %5124 = vmatpush1.bf16.msra.mxu0 %v14969_v44  ;;  %5657 = vmatpush1.bf16.msra.mxu1 %v14972_v45  ;;  %v15059_v44 = vld [vmem:[%s22237_s1 + $0xa40] ss:$16 sps:$4 sm:$0xff]   ;;  %v15062_v45 = vld [vmem:[%s22237_s1 + $0xa48] ss:$16 sps:$4 sm:$0xff]  }
 0x110   :  { %5125 = vmatprep.subr.bf16.mxu0 %v14977_v46  ;;  %5658 = vmatprep.subr.bf16.mxu1 %v14980_v47  ;;  %v15067_v46 = vld [vmem:[%s22237_s1 + $0xa64] ss:$16 sps:$4 sm:$0xff]   ;;  %v15070_v47 = vld [vmem:[%s22237_s1 + $0xa6c] ss:$16 sps:$4 sm:$0xff]  }
 0x113   :  { %5126 = vmatpush1.bf16.msra.mxu0 %v14975_v48  ;;  %5659 = vmatpush1.bf16.msra.mxu1 %v14978_v50  ;;  %v15065_v48 = vld [vmem:[%s22237_s1 + $0xa60] ss:$16 sps:$4 sm:$0xff]   ;;  %v15068_v50 = vld [vmem:[%s22237_s1 + $0xa68] ss:$16 sps:$4 sm:$0xff]  }
 0x114   :  { %5127 = vmatprep.subr.bf16.mxu0 %v14983_v51  ;;  %5660 = vmatprep.subr.bf16.mxu1 %v14986_v53  ;;  %v15073_v51 = vld [vmem:[%s22237_s1 + $0xa84] ss:$16 sps:$4 sm:$0xff]   ;;  %v15076_v53 = vld [vmem:[%s22237_s1 + $0xa8c] ss:$16 sps:$4 sm:$0xff]  }
 0x117   :  { %5128 = vmatpush1.bf16.msra.mxu0 %v14981_v54  ;;  %5661 = vmatpush1.bf16.msra.mxu1 %v14984_v55  ;;  %v15071_v54 = vld [vmem:[%s22237_s1 + $0xa80] ss:$16 sps:$4 sm:$0xff]   ;;  %v15074_v55 = vld [vmem:[%s22237_s1 + $0xa88] ss:$16 sps:$4 sm:$0xff]  }
 0x118   :  { %5129 = vmatprep.subr.bf16.mxu0 %v14989_v56  ;;  %5662 = vmatprep.subr.bf16.mxu1 %v14992_v57  ;;  %v15079_v56 = vld [vmem:[%s22237_s1 + $0xaa4] ss:$16 sps:$4 sm:$0xff]   ;;  %v15082_v57 = vld [vmem:[%s22237_s1 + $0xaac] ss:$16 sps:$4 sm:$0xff]  }
 0x11b   :  { %5130 = vmatpush1.bf16.msra.mxu0 %v14987_v58  ;;  %5663 = vmatpush1.bf16.msra.mxu1 %v14990_v59  ;;  %v15077_v58 = vld [vmem:[%s22237_s1 + $0xaa0] ss:$16 sps:$4 sm:$0xff]   ;;  %v15080_v59 = vld [vmem:[%s22237_s1 + $0xaa8] ss:$16 sps:$4 sm:$0xff]  }
 0x11c   :  { %5131 = vmatprep.subr.bf16.mxu0 %v14995_v60  ;;  %5664 = vmatprep.subr.bf16.mxu1 %v14998_v61  ;;  %v15085_v60 = vld [vmem:[%s22237_s1 + $0xac4] ss:$16 sps:$4 sm:$0xff]   ;;  %v15088_v61 = vld [vmem:[%s22237_s1 + $0xacc] ss:$16 sps:$4 sm:$0xff]  }
 0x11f   :  { %5132 = vmatpush1.bf16.msra.mxu0 %v14993_v62  ;;  %5665 = vmatpush1.bf16.msra.mxu1 %v14996_v63  ;;  %v15083_v62 = vld [vmem:[%s22237_s1 + $0xac0] ss:$16 sps:$4 sm:$0xff]   ;;  %v15086_v63 = vld [vmem:[%s22237_s1 + $0xac8] ss:$16 sps:$4 sm:$0xff]  }
 0x120   :  { %5133 = vmatprep.subr.bf16.mxu0 %v15001_v0  ;;  %5666 = vmatprep.subr.bf16.mxu1 %v15004_v1  ;;  %v15091_v0 = vld [vmem:[%s22237_s1 + $0xae4] ss:$16 sps:$4 sm:$0xff]   ;;  %v15094_v1 = vld [vmem:[%s22237_s1 + $0xaec] ss:$16 sps:$4 sm:$0xff]  }
 0x123   :  { %5134 = vmatpush1.bf16.msra.mxu0 %v14999_v2  ;;  %5667 = vmatpush1.bf16.msra.mxu1 %v15002_v3  ;;  %v15089_v2 = vld [vmem:[%s22237_s1 + $0xae0] ss:$16 sps:$4 sm:$0xff]   ;;  %v15092_v3 = vld [vmem:[%s22237_s1 + $0xae8] ss:$16 sps:$4 sm:$0xff]  }
 0x124   :  { %5135 = vmatprep.subr.bf16.mxu0 %v15007_v4  ;;  %5668 = vmatprep.subr.bf16.mxu1 %v15010_v5  ;;  %v15097_v4 = vld [vmem:[%s22237_s1 + $0xb04] ss:$16 sps:$4 sm:$0xff]   ;;  %v15100_v5 = vld [vmem:[%s22237_s1 + $0xb0c] ss:$16 sps:$4 sm:$0xff]  }
 0x127   :  { %5136 = vmatpush1.bf16.msra.mxu0 %v15005_v6  ;;  %5669 = vmatpush1.bf16.msra.mxu1 %v15008_v7  ;;  %v15095_v6 = vld [vmem:[%s22237_s1 + $0xb00] ss:$16 sps:$4 sm:$0xff]   ;;  %v15098_v7 = vld [vmem:[%s22237_s1 + $0xb08] ss:$16 sps:$4 sm:$0xff]  }
 0x128   :  { %5137 = vmatprep.subr.bf16.mxu0 %v15013_v8  ;;  %5670 = vmatprep.subr.bf16.mxu1 %v15016_v9  ;;  %v15103_v8 = vld [vmem:[%s22237_s1 + $0xb24] ss:$16 sps:$4 sm:$0xff]   ;;  %v15106_v9 = vld [vmem:[%s22237_s1 + $0xb2c] ss:$16 sps:$4 sm:$0xff]  }
 0x12b   :  { %5138 = vmatpush1.bf16.msra.mxu0 %v15011_v10  ;;  %5671 = vmatpush1.bf16.msra.mxu1 %v15014_v11  ;;  %v15101_v10 = vld [vmem:[%s22237_s1 + $0xb20] ss:$16 sps:$4 sm:$0xff]   ;;  %v15104_v11 = vld [vmem:[%s22237_s1 + $0xb28] ss:$16 sps:$4 sm:$0xff]  }
 0x12c   :  { %5139 = vmatprep.subr.bf16.mxu0 %v15019_v12  ;;  %5672 = vmatprep.subr.bf16.mxu1 %v15022_v52  ;;  %v15109_v12 = vld [vmem:[%s22237_s1 + $0xb44] ss:$16 sps:$4 sm:$0xff]   ;;  %v15112_v52 = vld [vmem:[%s22237_s1 + $0xb4c] ss:$16 sps:$4 sm:$0xff]  }
 0x12f   :  { %5140 = vmatpush1.bf16.msra.mxu0 %v15017_v15  ;;  %5673 = vmatpush1.bf16.msra.mxu1 %v15020_v16  ;;  %v15107_v15 = vld [vmem:[%s22237_s1 + $0xb40] ss:$16 sps:$4 sm:$0xff]   ;;  %v15110_v16 = vld [vmem:[%s22237_s1 + $0xb48] ss:$16 sps:$4 sm:$0xff]  }
 0x130   :  { %5141 = vmatprep.subr.bf16.mxu0 %v15025_v17  ;;  %5674 = vmatprep.subr.bf16.mxu1 %v15028_v18  ;;  %v15115_v17 = vld [vmem:[%s22237_s1 + $0xb64] ss:$16 sps:$4 sm:$0xff]   ;;  %v15118_v18 = vld [vmem:[%s22237_s1 + $0xb6c] ss:$16 sps:$4 sm:$0xff]  }
 0x133   :  { %5142 = vmatpush1.bf16.msra.mxu0 %v15023_v19  ;;  %5675 = vmatpush1.bf16.msra.mxu1 %v15026_v20  ;;  %v15113_v19 = vld [vmem:[%s22237_s1 + $0xb60] ss:$16 sps:$4 sm:$0xff]   ;;  %v15116_v20 = vld [vmem:[%s22237_s1 + $0xb68] ss:$16 sps:$4 sm:$0xff]  }
 0x134   :  { %5143 = vmatprep.subr.bf16.mxu0 %v15031_v22  ;;  %5676 = vmatprep.subr.bf16.mxu1 %v15034_v23  ;;  %v15121_v22 = vld [vmem:[%s22237_s1 + $0xb84] ss:$16 sps:$4 sm:$0xff]   ;;  %v15124_v23 = vld [vmem:[%s22237_s1 + $0xb8c] ss:$16 sps:$4 sm:$0xff]  }
 0x137   :  { %5144 = vmatpush1.bf16.msra.mxu0 %v15029_v24  ;;  %5677 = vmatpush1.bf16.msra.mxu1 %v15032_v13  ;;  %v15119_v24 = vld [vmem:[%s22237_s1 + $0xb80] ss:$16 sps:$4 sm:$0xff]   ;;  %v15122_v13 = vld [vmem:[%s22237_s1 + $0xb88] ss:$16 sps:$4 sm:$0xff]  }
 0x138   :  { %5145 = vmatprep.subr.bf16.mxu0 %v15037_v27  ;;  %5678 = vmatprep.subr.bf16.mxu1 %v15040_v28  ;;  %v15127_v27 = vld [vmem:[%s22237_s1 + $0xba4] ss:$16 sps:$4 sm:$0xff]   ;;  %v15130_v28 = vld [vmem:[%s22237_s1 + $0xbac] ss:$16 sps:$4 sm:$0xff]  }
 0x13b   :  { %5146 = vmatpush1.bf16.msra.mxu0 %v15035_v29  ;;  %5679 = vmatpush1.bf16.msra.mxu1 %v15038_v14  ;;  %v15125_v29 = vld [vmem:[%s22237_s1 + $0xba0] ss:$16 sps:$4 sm:$0xff]   ;;  %v15128_v14 = vld [vmem:[%s22237_s1 + $0xba8] ss:$16 sps:$4 sm:$0xff]  }
 0x13c   :  { %5147 = vmatprep.subr.bf16.mxu0 %v15043_v30  ;;  %5680 = vmatprep.subr.bf16.mxu1 %v15046_v31  ;;  %v15133_v30 = vld [vmem:[%s22237_s1 + $0xbc4] ss:$16 sps:$4 sm:$0xff]   ;;  %v15136_v31 = vld [vmem:[%s22237_s1 + $0xbcc] ss:$16 sps:$4 sm:$0xff]  }
 0x13f   :  { %5148 = vmatpush1.bf16.msra.mxu0 %v15041_v25  ;;  %5681 = vmatpush1.bf16.msra.mxu1 %v15044_v32  ;;  %v16961_v25 = vld [vmem:[%s22236_s0 + $0x8] sm:$0xff] }
 0x140   :  { %5158 = vmatprep.subr.bf16.mxu0 %v15049_v33  ;;  %5691 = vmatprep.subr.bf16.mxu1 %v15052_v26  ;;  %v893_v32 = vcombine.high %v16961_v25, %v16961_v25  ;;  %v15131_v33 = vld [vmem:[%s22237_s1 + $0xbc0] ss:$16 sps:$4 sm:$0xff]   ;;  %v15134_v26 = vld [vmem:[%s22237_s1 + $0xbc8] ss:$16 sps:$4 sm:$0xff]  }
 0x141   :  { %v15215_v25 = vld [vmem:[%s22237_s1 + $0xd80] ss:$16 sps:$4 sm:$0xff]  }
 0x142   :  { %5150 = vmatmul.mubr.bf16.vlgmr.msra.gmra.mrb[0].mxu0 %v18059_v35  ;;  %5683 = vmatmul.mubr.bf16.vlgmr.msra.gmra.mrb[0].mxu1 %v18059_v35 }
 0x143   :  { %5159 = vmatpush1.bf16.msra.mxu0 %v15047_v36  ;;  %5692 = vmatpush1.bf16.msra.mxu1 %v15050_v37  ;;  %v15139_v36 = vld [vmem:[%s22237_s1 + $0xbe4] ss:$16 sps:$4 sm:$0xff]   ;;  %v15142_v37 = vld [vmem:[%s22237_s1 + $0xbec] ss:$16 sps:$4 sm:$0xff]  }
 0x144   :  { %5160 = vmatprep.subr.bf16.mxu0 %v15055_v38  ;;  %5693 = vmatprep.subr.bf16.mxu1 %v15058_v21  ;;  %v18249_v38 = vrot.slane %v893_v32, %v17172_v49  ;;  %v15137_v21 = vld [vmem:[%s22237_s1 + $0xbe0] ss:$16 sps:$4 sm:$0xff]   ;;  %v15218_v32 = vld [vmem:[%s22237_s1 + $0xd88] ss:$16 sps:$4 sm:$0xff]  }
 0x145   :  { %5190 = vmatprep.mubr.bf16.mxu0 %v940_v39  ;;  %5723 = vmatprep.mubr.bf16.mxu1 %v940_v39  ;;  %v15140_v39 = vld [vmem:[%s22237_s1 + $0xbe8] ss:$16 sps:$4 sm:$0xff]  }
 0x147   :  { %5161 = vmatpush1.bf16.msra.mxu0 %v15053_v40  ;;  %5694 = vmatpush1.bf16.msra.mxu1 %v15056_v41  ;;  %v15145_v40 = vld [vmem:[%s22237_s1 + $0xc04] ss:$16 sps:$4 sm:$0xff]   ;;  %v15148_v41 = vld [vmem:[%s22237_s1 + $0xc0c] ss:$16 sps:$4 sm:$0xff]  }
 0x148   :  { %5162 = vmatprep.subr.bf16.mxu0 %v15061_v34  ;;  %5695 = vmatprep.subr.bf16.mxu1 %v15064_v43  ;;  %v909_v34 = vcombine.high %v18249_v38, %v18249_v38  ;;  %v938_v43 = vcombine.high %v18059_v35, %v18059_v35  ;;  %v15154_v35 = vld [vmem:[%s22237_s1 + $0xc2c] ss:$16 sps:$4 sm:$0xff]  }
 0x14b   :  { %5163 = vmatpush1.bf16.msra.mxu0 %v15059_v44  ;;  %5696 = vmatpush1.bf16.msra.mxu1 %v15062_v45  ;;  %v15143_v44 = vld [vmem:[%s22237_s1 + $0xc00] ss:$16 sps:$4 sm:$0xff]   ;;  %v15146_v45 = vld [vmem:[%s22237_s1 + $0xc08] ss:$16 sps:$4 sm:$0xff]  }
 0x14c   :  { %5164 = vmatprep.subr.bf16.mxu0 %v15067_v46  ;;  %5697 = vmatprep.subr.bf16.mxu1 %v15070_v47  ;;  %v15151_v46 = vld [vmem:[%s22237_s1 + $0xc24] ss:$16 sps:$4 sm:$0xff]   ;;  %v18280_v47 = vrot.slane %v909_v34, %v17172_v49 }
 0x14d   :  { %v15235_v34 = vld [vmem:[%s22237_s1 + $0xde4] ss:$16 sps:$4 sm:$0xff]  }
 0x14f   :  { %5165 = vmatpush1.bf16.msra.mxu0 %v15065_v48  ;;  %5698 = vmatpush1.bf16.msra.mxu1 %v15068_v50  ;;  %v15149_v48 = vld [vmem:[%s22237_s1 + $0xc20] ss:$16 sps:$4 sm:$0xff]   ;;  %v15152_v50 = vld [vmem:[%s22237_s1 + $0xc28] ss:$16 sps:$4 sm:$0xff]  }
 0x150   :  { %5166 = vmatprep.subr.bf16.mxu0 %v15073_v51  ;;  %5699 = vmatprep.subr.bf16.mxu1 %v15076_v53  ;;  %v15157_v51 = vld [vmem:[%s22237_s1 + $0xc44] ss:$16 sps:$4 sm:$0xff]   ;;  %v15160_v53 = vld [vmem:[%s22237_s1 + $0xc4c] ss:$16 sps:$4 sm:$0xff]  }
 0x153   :  { %5167 = vmatpush1.bf16.msra.mxu0 %v15071_v54  ;;  %5700 = vmatpush1.bf16.msra.mxu1 %v15074_v55  ;;  %v15155_v54 = vld [vmem:[%s22237_s1 + $0xc40] ss:$16 sps:$4 sm:$0xff]   ;;  %v15158_v55 = vld [vmem:[%s22237_s1 + $0xc48] ss:$16 sps:$4 sm:$0xff]  }
 0x154   :  { %5168 = vmatprep.subr.bf16.mxu0 %v15079_v56  ;;  %5701 = vmatprep.subr.bf16.mxu1 %v15082_v57  ;;  %v15163_v56 = vld [vmem:[%s22237_s1 + $0xc64] ss:$16 sps:$4 sm:$0xff]   ;;  %v15166_v57 = vld [vmem:[%s22237_s1 + $0xc6c] ss:$16 sps:$4 sm:$0xff]  }
 0x157   :  { %5169 = vmatpush1.bf16.msra.mxu0 %v15077_v58  ;;  %5702 = vmatpush1.bf16.msra.mxu1 %v15080_v59  ;;  %v15161_v58 = vld [vmem:[%s22237_s1 + $0xc60] ss:$16 sps:$4 sm:$0xff]   ;;  %v15164_v59 = vld [vmem:[%s22237_s1 + $0xc68] ss:$16 sps:$4 sm:$0xff]  }
 0x158   :  { %5170 = vmatprep.subr.bf16.mxu0 %v15085_v60  ;;  %5703 = vmatprep.subr.bf16.mxu1 %v15088_v61  ;;  %v15169_v60 = vld [vmem:[%s22237_s1 + $0xc84] ss:$16 sps:$4 sm:$0xff]   ;;  %v15172_v61 = vld [vmem:[%s22237_s1 + $0xc8c] ss:$16 sps:$4 sm:$0xff]  }
 0x15b   :  { %5171 = vmatpush1.bf16.msra.mxu0 %v15083_v62  ;;  %5704 = vmatpush1.bf16.msra.mxu1 %v15086_v63  ;;  %v15167_v62 = vld [vmem:[%s22237_s1 + $0xc80] ss:$16 sps:$4 sm:$0xff]   ;;  %v15170_v63 = vld [vmem:[%s22237_s1 + $0xc88] ss:$16 sps:$4 sm:$0xff]  }
 0x15c   :  { %5172 = vmatprep.subr.bf16.mxu0 %v15091_v0  ;;  %5705 = vmatprep.subr.bf16.mxu1 %v15094_v1  ;;  %v15175_v0 = vld [vmem:[%s22237_s1 + $0xca4] ss:$16 sps:$4 sm:$0xff]   ;;  %v15178_v1 = vld [vmem:[%s22237_s1 + $0xcac] ss:$16 sps:$4 sm:$0xff]  }
 0x15f   :  { %5173 = vmatpush1.bf16.msra.mxu0 %v15089_v2  ;;  %5706 = vmatpush1.bf16.msra.mxu1 %v15092_v3  ;;  %v15173_v2 = vld [vmem:[%s22237_s1 + $0xca0] ss:$16 sps:$4 sm:$0xff]   ;;  %v15176_v3 = vld [vmem:[%s22237_s1 + $0xca8] ss:$16 sps:$4 sm:$0xff]  }
 0x160   :  { %5174 = vmatprep.subr.bf16.mxu0 %v15097_v4  ;;  %5707 = vmatprep.subr.bf16.mxu1 %v15100_v5  ;;  %v15181_v4 = vld [vmem:[%s22237_s1 + $0xcc4] ss:$16 sps:$4 sm:$0xff]   ;;  %v15184_v5 = vld [vmem:[%s22237_s1 + $0xccc] ss:$16 sps:$4 sm:$0xff]  }
 0x163   :  { %5175 = vmatpush1.bf16.msra.mxu0 %v15095_v6  ;;  %5708 = vmatpush1.bf16.msra.mxu1 %v15098_v7  ;;  %v15179_v6 = vld [vmem:[%s22237_s1 + $0xcc0] ss:$16 sps:$4 sm:$0xff]   ;;  %v15182_v7 = vld [vmem:[%s22237_s1 + $0xcc8] ss:$16 sps:$4 sm:$0xff]  }
 0x164   :  { %5176 = vmatprep.subr.bf16.mxu0 %v15103_v8  ;;  %5709 = vmatprep.subr.bf16.mxu1 %v15106_v9  ;;  %v15187_v8 = vld [vmem:[%s22237_s1 + $0xce4] ss:$16 sps:$4 sm:$0xff]   ;;  %v15190_v9 = vld [vmem:[%s22237_s1 + $0xcec] ss:$16 sps:$4 sm:$0xff]  }
 0x167   :  { %5177 = vmatpush1.bf16.msra.mxu0 %v15101_v10  ;;  %5710 = vmatpush1.bf16.msra.mxu1 %v15104_v11  ;;  %v15185_v10 = vld [vmem:[%s22237_s1 + $0xce0] ss:$16 sps:$4 sm:$0xff]   ;;  %v15188_v11 = vld [vmem:[%s22237_s1 + $0xce8] ss:$16 sps:$4 sm:$0xff]  }
 0x168   :  { %5178 = vmatprep.subr.bf16.mxu0 %v15109_v12  ;;  %5711 = vmatprep.subr.bf16.mxu1 %v15112_v52  ;;  %v15193_v12 = vld [vmem:[%s22237_s1 + $0xd04] ss:$16 sps:$4 sm:$0xff]   ;;  %v15196_v52 = vld [vmem:[%s22237_s1 + $0xd0c] ss:$16 sps:$4 sm:$0xff]  }
 0x16b   :  { %5179 = vmatpush1.bf16.msra.mxu0 %v15107_v15  ;;  %5712 = vmatpush1.bf16.msra.mxu1 %v15110_v16  ;;  %v15191_v15 = vld [vmem:[%s22237_s1 + $0xd00] ss:$16 sps:$4 sm:$0xff]   ;;  %v15194_v16 = vld [vmem:[%s22237_s1 + $0xd08] ss:$16 sps:$4 sm:$0xff]  }
 0x16c   :  { %5180 = vmatprep.subr.bf16.mxu0 %v15115_v17  ;;  %5713 = vmatprep.subr.bf16.mxu1 %v15118_v18  ;;  %v15199_v17 = vld [vmem:[%s22237_s1 + $0xd24] ss:$16 sps:$4 sm:$0xff]   ;;  %v15202_v18 = vld [vmem:[%s22237_s1 + $0xd2c] ss:$16 sps:$4 sm:$0xff]  }
 0x16f   :  { %5181 = vmatpush1.bf16.msra.mxu0 %v15113_v19  ;;  %5714 = vmatpush1.bf16.msra.mxu1 %v15116_v20  ;;  %v15197_v19 = vld [vmem:[%s22237_s1 + $0xd20] ss:$16 sps:$4 sm:$0xff]   ;;  %v15200_v20 = vld [vmem:[%s22237_s1 + $0xd28] ss:$16 sps:$4 sm:$0xff]  }
 0x170   :  { %5182 = vmatprep.subr.bf16.mxu0 %v15121_v22  ;;  %5715 = vmatprep.subr.bf16.mxu1 %v15124_v23  ;;  %v15205_v22 = vld [vmem:[%s22237_s1 + $0xd44] ss:$16 sps:$4 sm:$0xff]   ;;  %v15208_v23 = vld [vmem:[%s22237_s1 + $0xd4c] ss:$16 sps:$4 sm:$0xff]  }
 0x173   :  { %5183 = vmatpush1.bf16.msra.mxu0 %v15119_v24  ;;  %5716 = vmatpush1.bf16.msra.mxu1 %v15122_v13  ;;  %v15203_v24 = vld [vmem:[%s22237_s1 + $0xd40] ss:$16 sps:$4 sm:$0xff]   ;;  %v15206_v13 = vld [vmem:[%s22237_s1 + $0xd48] ss:$16 sps:$4 sm:$0xff]  }
 0x174   :  { %5184 = vmatprep.subr.bf16.mxu0 %v15127_v27  ;;  %5717 = vmatprep.subr.bf16.mxu1 %v15130_v28  ;;  %v15211_v27 = vld [vmem:[%s22237_s1 + $0xd64] ss:$16 sps:$4 sm:$0xff]   ;;  %v15214_v28 = vld [vmem:[%s22237_s1 + $0xd6c] ss:$16 sps:$4 sm:$0xff]  }
 0x177   :  { %5185 = vmatpush1.bf16.msra.mxu0 %v15125_v29  ;;  %5718 = vmatpush1.bf16.msra.mxu1 %v15128_v14  ;;  %v15209_v29 = vld [vmem:[%s22237_s1 + $0xd60] ss:$16 sps:$4 sm:$0xff]   ;;  %v15212_v14 = vld [vmem:[%s22237_s1 + $0xd68] ss:$16 sps:$4 sm:$0xff]  }
 0x178   :  { %5186 = vmatprep.subr.bf16.mxu0 %v15133_v30  ;;  %5719 = vmatprep.subr.bf16.mxu1 %v15136_v31  ;;  %v15217_v30 = vld [vmem:[%s22237_s1 + $0xd84] ss:$16 sps:$4 sm:$0xff]   ;;  %v15220_v31 = vld [vmem:[%s22237_s1 + $0xd8c] ss:$16 sps:$4 sm:$0xff]  }
 0x17b   :  { %5187 = vmatpush1.bf16.msra.mxu0 %v15131_v33  ;;  %5720 = vmatpush1.bf16.msra.mxu1 %v15134_v26  ;;  %v15223_v33 = vld [vmem:[%s22237_s1 + $0xda4] ss:$16 sps:$4 sm:$0xff]   ;;  %v15226_v26 = vld [vmem:[%s22237_s1 + $0xdac] ss:$16 sps:$4 sm:$0xff]  }
 0x17c   :  { %5188 = vmatprep.subr.bf16.mxu0 %v15139_v36  ;;  %5721 = vmatprep.subr.bf16.mxu1 %v15142_v37  ;;  %v15221_v36 = vld [vmem:[%s22237_s1 + $0xda0] ss:$16 sps:$4 sm:$0xff]   ;;  %v15224_v37 = vld [vmem:[%s22237_s1 + $0xda8] ss:$16 sps:$4 sm:$0xff]  }
 0x17f   :  { %5189 = vmatpush1.bf16.msra.mxu0 %v15137_v21  ;;  %5722 = vmatpush1.bf16.msra.mxu1 %v15140_v39  ;;  %v15229_v21 = vld [vmem:[%s22237_s1 + $0xdc4] ss:$16 sps:$4 sm:$0xff]   ;;  %v15232_v39 = vld [vmem:[%s22237_s1 + $0xdcc] ss:$16 sps:$4 sm:$0xff]  }
 0x180   :  { %5199 = vmatprep.subr.bf16.mxu0 %v15145_v40  ;;  %5732 = vmatprep.subr.bf16.mxu1 %v15148_v41  ;;  %v15227_v40 = vld [vmem:[%s22237_s1 + $0xdc0] ss:$16 sps:$4 sm:$0xff]   ;;  %v15230_v41 = vld [vmem:[%s22237_s1 + $0xdc8] ss:$16 sps:$4 sm:$0xff]  }
 0x182   :  { %5191 = vmatmul.mubr.bf16.vlgmr.msra.gmra.mrb[0].mxu0 %v938_v43  ;;  %5724 = vmatmul.mubr.bf16.vlgmr.msra.gmra.mrb[0].mxu1 %v938_v43  ;;  %v15238_v43 = vld [vmem:[%s22237_s1 + $0xdec] ss:$16 sps:$4 sm:$0xff]  }
 0x183   :  { %5200 = vmatpush1.bf16.msra.mxu0 %v15143_v44  ;;  %5733 = vmatpush1.bf16.msra.mxu1 %v15146_v45  ;;  %v15233_v44 = vld [vmem:[%s22237_s1 + $0xde0] ss:$16 sps:$4 sm:$0xff]   ;;  %v15236_v45 = vld [vmem:[%s22237_s1 + $0xde8] ss:$16 sps:$4 sm:$0xff]  }
 0x184   :  { %5201 = vmatprep.subr.bf16.mxu0 %v15151_v46  ;;  %5734 = vmatprep.subr.bf16.mxu1 %v15154_v35  ;;  %v15242_v46 = vld [vmem:[%s22237_s1 + $0xe04] ss:$16 sps:$4 sm:$0xff]   ;;  %v15245_v35 = vld [vmem:[%s22237_s1 + $0xe0c] ss:$16 sps:$4 sm:$0xff]  }
 0x185   :  { %5231 = vmatprep.mubr.bf16.mxu0 %v18280_v47  ;;  %5764 = vmatprep.mubr.bf16.mxu1 %v18280_v47 }
 0x187   :  { %5202 = vmatpush1.bf16.msra.mxu0 %v15149_v48  ;;  %5735 = vmatpush1.bf16.msra.mxu1 %v15152_v50  ;;  %v18466_v48 = vrot.slane %v18249_v38, %v17172_v49  ;;  %v15240_v50 = vld [vmem:[%s22237_s1 + $0xe00] ss:$16 sps:$4 sm:$0xff]   ;;  %v15251_v38 = vld [vmem:[%s22237_s1 + $0xe2c] ss:$16 sps:$4 sm:$0xff]  }
 0x188   :  { %5203 = vmatprep.subr.bf16.mxu0 %v15157_v51  ;;  %5736 = vmatprep.subr.bf16.mxu1 %v15160_v53  ;;  %v15243_v51 = vld [vmem:[%s22237_s1 + $0xe08] ss:$16 sps:$4 sm:$0xff]   ;;  %v15248_v53 = vld [vmem:[%s22237_s1 + $0xe24] ss:$16 sps:$4 sm:$0xff]  }
 0x18b   :  { %5204 = vmatpush1.bf16.msra.mxu0 %v15155_v54  ;;  %5737 = vmatpush1.bf16.msra.mxu1 %v15158_v55  ;;  %v941_v54 = vcombine.high %v18280_v47, %v18280_v47  ;;  %v15246_v55 = vld [vmem:[%s22237_s1 + $0xe20] ss:$16 sps:$4 sm:$0xff]   ;;  %v15254_v47 = vld [vmem:[%s22237_s1 + $0xe44] ss:$16 sps:$4 sm:$0xff]  }
 0x18c   :  { %5205 = vmatprep.subr.bf16.mxu0 %v15163_v56  ;;  %5738 = vmatprep.subr.bf16.mxu1 %v15166_v57  ;;  %v15249_v56 = vld [vmem:[%s22237_s1 + $0xe28] ss:$16 sps:$4 sm:$0xff]   ;;  %v15257_v57 = vld [vmem:[%s22237_s1 + $0xe4c] ss:$16 sps:$4 sm:$0xff]  }
 0x18f   :  { %5206 = vmatpush1.bf16.msra.mxu0 %v15161_v58  ;;  %5739 = vmatpush1.bf16.msra.mxu1 %v15164_v59  ;;  %v15252_v58 = vld [vmem:[%s22237_s1 + $0xe40] ss:$16 sps:$4 sm:$0xff]   ;;  %v15255_v59 = vld [vmem:[%s22237_s1 + $0xe48] ss:$16 sps:$4 sm:$0xff]  }
 0x190   :  { %5207 = vmatprep.subr.bf16.mxu0 %v15169_v60  ;;  %5740 = vmatprep.subr.bf16.mxu1 %v15172_v61  ;;  %v15260_v60 = vld [vmem:[%s22237_s1 + $0xe64] ss:$16 sps:$4 sm:$0xff]   ;;  %v15263_v61 = vld [vmem:[%s22237_s1 + $0xe6c] ss:$16 sps:$4 sm:$0xff]  }
 0x193   :  { %5208 = vmatpush1.bf16.msra.mxu0 %v15167_v62  ;;  %5741 = vmatpush1.bf16.msra.mxu1 %v15170_v63  ;;  %v15258_v62 = vld [vmem:[%s22237_s1 + $0xe60] ss:$16 sps:$4 sm:$0xff]   ;;  %v15261_v63 = vld [vmem:[%s22237_s1 + $0xe68] ss:$16 sps:$4 sm:$0xff]  }
 0x194   :  { %5209 = vmatprep.subr.bf16.mxu0 %v15175_v0  ;;  %5742 = vmatprep.subr.bf16.mxu1 %v15178_v1  ;;  %v15266_v0 = vld [vmem:[%s22237_s1 + $0xe84] ss:$16 sps:$4 sm:$0xff]   ;;  %v15269_v1 = vld [vmem:[%s22237_s1 + $0xe8c] ss:$16 sps:$4 sm:$0xff]  }
 0x197   :  { %5210 = vmatpush1.bf16.msra.mxu0 %v15173_v2  ;;  %5743 = vmatpush1.bf16.msra.mxu1 %v15176_v3  ;;  %v15264_v2 = vld [vmem:[%s22237_s1 + $0xe80] ss:$16 sps:$4 sm:$0xff]   ;;  %v15267_v3 = vld [vmem:[%s22237_s1 + $0xe88] ss:$16 sps:$4 sm:$0xff]  }
 0x198   :  { %5211 = vmatprep.subr.bf16.mxu0 %v15181_v4  ;;  %5744 = vmatprep.subr.bf16.mxu1 %v15184_v5  ;;  %v15272_v4 = vld [vmem:[%s22237_s1 + $0xea4] ss:$16 sps:$4 sm:$0xff]   ;;  %v15275_v5 = vld [vmem:[%s22237_s1 + $0xeac] ss:$16 sps:$4 sm:$0xff]  }
 0x19b   :  { %5212 = vmatpush1.bf16.msra.mxu0 %v15179_v6  ;;  %5745 = vmatpush1.bf16.msra.mxu1 %v15182_v7  ;;  %v15270_v6 = vld [vmem:[%s22237_s1 + $0xea0] ss:$16 sps:$4 sm:$0xff]   ;;  %v15273_v7 = vld [vmem:[%s22237_s1 + $0xea8] ss:$16 sps:$4 sm:$0xff]  }
 0x19c   :  { %5213 = vmatprep.subr.bf16.mxu0 %v15187_v8  ;;  %5746 = vmatprep.subr.bf16.mxu1 %v15190_v9  ;;  %v15278_v8 = vld [vmem:[%s22237_s1 + $0xec4] ss:$16 sps:$4 sm:$0xff]   ;;  %v15281_v9 = vld [vmem:[%s22237_s1 + $0xecc] ss:$16 sps:$4 sm:$0xff]  }
 0x19f   :  { %5214 = vmatpush1.bf16.msra.mxu0 %v15185_v10  ;;  %5747 = vmatpush1.bf16.msra.mxu1 %v15188_v11  ;;  %v15276_v10 = vld [vmem:[%s22237_s1 + $0xec0] ss:$16 sps:$4 sm:$0xff]   ;;  %v15279_v11 = vld [vmem:[%s22237_s1 + $0xec8] ss:$16 sps:$4 sm:$0xff]  }
 0x1a0   :  { %5215 = vmatprep.subr.bf16.mxu0 %v15193_v12  ;;  %5748 = vmatprep.subr.bf16.mxu1 %v15196_v52  ;;  %v15284_v12 = vld [vmem:[%s22237_s1 + $0xee4] ss:$16 sps:$4 sm:$0xff]   ;;  %v15287_v52 = vld [vmem:[%s22237_s1 + $0xeec] ss:$16 sps:$4 sm:$0xff]  }
 0x1a3   :  { %5216 = vmatpush1.bf16.msra.mxu0 %v15191_v15  ;;  %5749 = vmatpush1.bf16.msra.mxu1 %v15194_v16  ;;  %v15282_v15 = vld [vmem:[%s22237_s1 + $0xee0] ss:$16 sps:$4 sm:$0xff]   ;;  %v15285_v16 = vld [vmem:[%s22237_s1 + $0xee8] ss:$16 sps:$4 sm:$0xff]  }
 0x1a4   :  { %5217 = vmatprep.subr.bf16.mxu0 %v15199_v17  ;;  %5750 = vmatprep.subr.bf16.mxu1 %v15202_v18  ;;  %v15290_v17 = vld [vmem:[%s22237_s1 + $0xf04] ss:$16 sps:$4 sm:$0xff]   ;;  %v15293_v18 = vld [vmem:[%s22237_s1 + $0xf0c] ss:$16 sps:$4 sm:$0xff]  }
 0x1a7   :  { %5218 = vmatpush1.bf16.msra.mxu0 %v15197_v19  ;;  %5751 = vmatpush1.bf16.msra.mxu1 %v15200_v20  ;;  %v15288_v19 = vld [vmem:[%s22237_s1 + $0xf00] ss:$16 sps:$4 sm:$0xff]   ;;  %v15291_v20 = vld [vmem:[%s22237_s1 + $0xf08] ss:$16 sps:$4 sm:$0xff]  }
 0x1a8   :  { %5219 = vmatprep.subr.bf16.mxu0 %v15205_v22  ;;  %5752 = vmatprep.subr.bf16.mxu1 %v15208_v23  ;;  %v15296_v22 = vld [vmem:[%s22237_s1 + $0xf24] ss:$16 sps:$4 sm:$0xff]   ;;  %v15299_v23 = vld [vmem:[%s22237_s1 + $0xf2c] ss:$16 sps:$4 sm:$0xff]  }
 0x1ab   :  { %5220 = vmatpush1.bf16.msra.mxu0 %v15203_v24  ;;  %5753 = vmatpush1.bf16.msra.mxu1 %v15206_v13  ;;  %v15294_v24 = vld [vmem:[%s22237_s1 + $0xf20] ss:$16 sps:$4 sm:$0xff]   ;;  %v15297_v13 = vld [vmem:[%s22237_s1 + $0xf28] ss:$16 sps:$4 sm:$0xff]  }
 0x1ac   :  { %5221 = vmatprep.subr.bf16.mxu0 %v15211_v27  ;;  %5754 = vmatprep.subr.bf16.mxu1 %v15214_v28  ;;  %v15302_v27 = vld [vmem:[%s22237_s1 + $0xf44] ss:$16 sps:$4 sm:$0xff]   ;;  %v15305_v28 = vld [vmem:[%s22237_s1 + $0xf4c] ss:$16 sps:$4 sm:$0xff]  }
 0x1af   :  { %5222 = vmatpush1.bf16.msra.mxu0 %v15209_v29  ;;  %5755 = vmatpush1.bf16.msra.mxu1 %v15212_v14  ;;  %v15300_v29 = vld [vmem:[%s22237_s1 + $0xf40] ss:$16 sps:$4 sm:$0xff]   ;;  %v15303_v14 = vld [vmem:[%s22237_s1 + $0xf48] ss:$16 sps:$4 sm:$0xff]  }
 0x1b0   :  { %5223 = vmatprep.subr.bf16.mxu0 %v15217_v30  ;;  %5756 = vmatprep.subr.bf16.mxu1 %v15220_v31  ;;  %v15308_v30 = vld [vmem:[%s22237_s1 + $0xf64] ss:$16 sps:$4 sm:$0xff]   ;;  %v15311_v31 = vld [vmem:[%s22237_s1 + $0xf6c] ss:$16 sps:$4 sm:$0xff]  }
 0x1b3   :  { %5224 = vmatpush1.bf16.msra.mxu0 %v15215_v25  ;;  %5757 = vmatpush1.bf16.msra.mxu1 %v15218_v32  ;;  %v15306_v25 = vld [vmem:[%s22237_s1 + $0xf60] ss:$16 sps:$4 sm:$0xff]   ;;  %v15309_v32 = vld [vmem:[%s22237_s1 + $0xf68] ss:$16 sps:$4 sm:$0xff]  }
 0x1b4   :  { %5225 = vmatprep.subr.bf16.mxu0 %v15223_v33  ;;  %5758 = vmatprep.subr.bf16.mxu1 %v15226_v26  ;;  %v15314_v33 = vld [vmem:[%s22237_s1 + $0xf84] ss:$16 sps:$4 sm:$0xff]   ;;  %v15317_v26 = vld [vmem:[%s22237_s1 + $0xf8c] ss:$16 sps:$4 sm:$0xff]  }
 0x1b7   :  { %5226 = vmatpush1.bf16.msra.mxu0 %v15221_v36  ;;  %5759 = vmatpush1.bf16.msra.mxu1 %v15224_v37  ;;  %v15312_v36 = vld [vmem:[%s22237_s1 + $0xf80] ss:$16 sps:$4 sm:$0xff]   ;;  %v15315_v37 = vld [vmem:[%s22237_s1 + $0xf88] ss:$16 sps:$4 sm:$0xff]  }
 0x1b8   :  { %5227 = vmatprep.subr.bf16.mxu0 %v15229_v21  ;;  %5760 = vmatprep.subr.bf16.mxu1 %v15232_v39  ;;  %v15320_v21 = vld [vmem:[%s22237_s1 + $0xfa4] ss:$16 sps:$4 sm:$0xff]   ;;  %v15323_v39 = vld [vmem:[%s22237_s1 + $0xfac] ss:$16 sps:$4 sm:$0xff]  }
 0x1bb   :  { %5228 = vmatpush1.bf16.msra.mxu0 %v15227_v40  ;;  %5761 = vmatpush1.bf16.msra.mxu1 %v15230_v41  ;;  %v15318_v40 = vld [vmem:[%s22237_s1 + $0xfa0] ss:$16 sps:$4 sm:$0xff]   ;;  %v15321_v41 = vld [vmem:[%s22237_s1 + $0xfa8] ss:$16 sps:$4 sm:$0xff]  }
 0x1bc   :  { %5229 = vmatprep.subr.bf16.mxu0 %v15235_v34  ;;  %5762 = vmatprep.subr.bf16.mxu1 %v15238_v43  ;;  %v15326_v34 = vld [vmem:[%s22237_s1 + $0xfc4] ss:$16 sps:$4 sm:$0xff]   ;;  %v15329_v43 = vld [vmem:[%s22237_s1 + $0xfcc] ss:$16 sps:$4 sm:$0xff]  }
 0x1bf   :  { %5230 = vmatpush1.bf16.msra.mxu0 %v15233_v44  ;;  %5763 = vmatpush1.bf16.msra.mxu1 %v15236_v45  ;;  %v18643_v44 = vld.sshfl [vmem:[%s22236_s0 + $0x10] sm:$0xff pattern:$0x75316420] }
 0x1c0   :  { %5240 = vmatprep.subr.bf16.mxu0 %v15242_v46  ;;  %5773 = vmatprep.subr.bf16.mxu1 %v15245_v35  ;;  %v15324_v45 = vld [vmem:[%s22237_s1 + $0xfc0] ss:$16 sps:$4 sm:$0xff]   ;;  %v15327_v46 = vld [vmem:[%s22237_s1 + $0xfc8] ss:$16 sps:$4 sm:$0xff]   ;;  %v15332_v35 = vld [vmem:[%s22237_s1 + $0xfe4] ss:$16 sps:$4 sm:$0xff]  }
 0x1c2   :  { %5232 = vmatmul.mubr.bf16.vlgmr.msra.gmra.mrb[0].mxu0 %v18466_v48  ;;  %5765 = vmatmul.mubr.bf16.vlgmr.msra.gmra.mrb[0].mxu1 %v18466_v48 }
 0x1c3   :  { %5241 = vmatpush1.bf16.msra.mxu0 %v15240_v50  ;;  %5774 = vmatpush1.bf16.msra.mxu1 %v15243_v51  ;;  %v15335_v50 = vld [vmem:[%s22237_s1 + $0xfec] ss:$16 sps:$4 sm:$0xff]   ;;  %v15330_v51 = vld [vmem:[%s22237_s1 + $0xfe0] ss:$16 sps:$4 sm:$0xff]  }
 0x1c4   :  { %5242 = vmatprep.subr.bf16.mxu0 %v15248_v53  ;;  %5775 = vmatprep.subr.bf16.mxu1 %v15251_v38  ;;  %v15333_v53 = vld [vmem:[%s22237_s1 + $0xfe8] ss:$16 sps:$4 sm:$0xff]   ;;  %v15338_v38 = vld [vmem:[%s22237_s1 + $0x1004] ss:$16 sps:$4 sm:$0xff]  }
 0x1c5   :  { %5272 = vmatprep.mubr.bf16.mxu0 %v941_v54  ;;  %5805 = vmatprep.mubr.bf16.mxu1 %v941_v54  ;;  %v15341_v54 = vld [vmem:[%s22237_s1 + $0x100c] ss:$16 sps:$4 sm:$0xff]  }
 0x1c7   :  { %5243 = vmatpush1.bf16.msra.mxu0 %v15246_v55  ;;  %5776 = vmatpush1.bf16.msra.mxu1 %v15249_v56  ;;  %v957_v55 = vcombine.high %v18643_v44, %v18643_v44  ;;  %v939_v56 = vcombine.high %v18466_v48, %v18466_v48  ;;  %v15347_v48 = vld [vmem:[%s22237_s1 + $0x102c] ss:$16 sps:$4 sm:$0xff]  }
 0x1c8   :  { %5244 = vmatprep.subr.bf16.mxu0 %v15254_v47  ;;  %5777 = vmatprep.subr.bf16.mxu1 %v15257_v57  ;;  %v15336_v47 = vld [vmem:[%s22237_s1 + $0x1000] ss:$16 sps:$4 sm:$0xff]   ;;  %v15339_v57 = vld [vmem:[%s22237_s1 + $0x1008] ss:$16 sps:$4 sm:$0xff]  }
 0x1cb   :  { %5245 = vmatpush1.bf16.msra.mxu0 %v15252_v58  ;;  %5778 = vmatpush1.bf16.msra.mxu1 %v15255_v59  ;;  %v15344_v58 = vld [vmem:[%s22237_s1 + $0x1024] ss:$16 sps:$4 sm:$0xff]   ;;  %v18686_v59 = vrot.slane %v957_v55, %v17172_v49 }
 0x1cc   :  { %5246 = vmatprep.subr.bf16.mxu0 %v15260_v60  ;;  %5779 = vmatprep.subr.bf16.mxu1 %v15263_v61  ;;  %v15342_v60 = vld [vmem:[%s22237_s1 + $0x1020] ss:$16 sps:$4 sm:$0xff]   ;;  %v15345_v61 = vld [vmem:[%s22237_s1 + $0x1028] ss:$16 sps:$4 sm:$0xff]   ;;  %v15428_v55 = vld [vmem:[%s22237_s1 + $0x11e4] ss:$16 sps:$4 sm:$0xff]  }
 0x1cf   :  { %5247 = vmatpush1.bf16.msra.mxu0 %v15258_v62  ;;  %5780 = vmatpush1.bf16.msra.mxu1 %v15261_v63  ;;  %v15350_v62 = vld [vmem:[%s22237_s1 + $0x1044] ss:$16 sps:$4 sm:$0xff]   ;;  %v15353_v63 = vld [vmem:[%s22237_s1 + $0x104c] ss:$16 sps:$4 sm:$0xff]  }
 0x1d0   :  { %5248 = vmatprep.subr.bf16.mxu0 %v15266_v0  ;;  %5781 = vmatprep.subr.bf16.mxu1 %v15269_v1  ;;  %v15348_v0 = vld [vmem:[%s22237_s1 + $0x1040] ss:$16 sps:$4 sm:$0xff]   ;;  %v15351_v1 = vld [vmem:[%s22237_s1 + $0x1048] ss:$16 sps:$4 sm:$0xff]  }
 0x1d3   :  { %5249 = vmatpush1.bf16.msra.mxu0 %v15264_v2  ;;  %5782 = vmatpush1.bf16.msra.mxu1 %v15267_v3  ;;  %v15356_v2 = vld [vmem:[%s22237_s1 + $0x1064] ss:$16 sps:$4 sm:$0xff]   ;;  %v15359_v3 = vld [vmem:[%s22237_s1 + $0x106c] ss:$16 sps:$4 sm:$0xff]  }
 0x1d4   :  { %5250 = vmatprep.subr.bf16.mxu0 %v15272_v4  ;;  %5783 = vmatprep.subr.bf16.mxu1 %v15275_v5  ;;  %v15354_v4 = vld [vmem:[%s22237_s1 + $0x1060] ss:$16 sps:$4 sm:$0xff]   ;;  %v15357_v5 = vld [vmem:[%s22237_s1 + $0x1068] ss:$16 sps:$4 sm:$0xff]  }
 0x1d7   :  { %5251 = vmatpush1.bf16.msra.mxu0 %v15270_v6  ;;  %5784 = vmatpush1.bf16.msra.mxu1 %v15273_v7  ;;  %v15362_v6 = vld [vmem:[%s22237_s1 + $0x1084] ss:$16 sps:$4 sm:$0xff]   ;;  %v15365_v7 = vld [vmem:[%s22237_s1 + $0x108c] ss:$16 sps:$4 sm:$0xff]  }
 0x1d8   :  { %5252 = vmatprep.subr.bf16.mxu0 %v15278_v8  ;;  %5785 = vmatprep.subr.bf16.mxu1 %v15281_v9  ;;  %v15360_v8 = vld [vmem:[%s22237_s1 + $0x1080] ss:$16 sps:$4 sm:$0xff]   ;;  %v15363_v9 = vld [vmem:[%s22237_s1 + $0x1088] ss:$16 sps:$4 sm:$0xff]  }
 0x1db   :  { %5253 = vmatpush1.bf16.msra.mxu0 %v15276_v10  ;;  %5786 = vmatpush1.bf16.msra.mxu1 %v15279_v11  ;;  %v15368_v10 = vld [vmem:[%s22237_s1 + $0x10a4] ss:$16 sps:$4 sm:$0xff]   ;;  %v15371_v11 = vld [vmem:[%s22237_s1 + $0x10ac] ss:$16 sps:$4 sm:$0xff]  }
 0x1dc   :  { %5254 = vmatprep.subr.bf16.mxu0 %v15284_v12  ;;  %5787 = vmatprep.subr.bf16.mxu1 %v15287_v52  ;;  %v15366_v12 = vld [vmem:[%s22237_s1 + $0x10a0] ss:$16 sps:$4 sm:$0xff]   ;;  %v15369_v52 = vld [vmem:[%s22237_s1 + $0x10a8] ss:$16 sps:$4 sm:$0xff]  }
 0x1df   :  { %5255 = vmatpush1.bf16.msra.mxu0 %v15282_v15  ;;  %5788 = vmatpush1.bf16.msra.mxu1 %v15285_v16  ;;  %v15374_v15 = vld [vmem:[%s22237_s1 + $0x10c4] ss:$16 sps:$4 sm:$0xff]   ;;  %v15377_v16 = vld [vmem:[%s22237_s1 + $0x10cc] ss:$16 sps:$4 sm:$0xff]  }
 0x1e0   :  { %5256 = vmatprep.subr.bf16.mxu0 %v15290_v17  ;;  %5789 = vmatprep.subr.bf16.mxu1 %v15293_v18  ;;  %v15372_v17 = vld [vmem:[%s22237_s1 + $0x10c0] ss:$16 sps:$4 sm:$0xff]   ;;  %v15375_v18 = vld [vmem:[%s22237_s1 + $0x10c8] ss:$16 sps:$4 sm:$0xff]  }
 0x1e3   :  { %5257 = vmatpush1.bf16.msra.mxu0 %v15288_v19  ;;  %5790 = vmatpush1.bf16.msra.mxu1 %v15291_v20  ;;  %v15380_v19 = vld [vmem:[%s22237_s1 + $0x10e4] ss:$16 sps:$4 sm:$0xff]   ;;  %v15383_v20 = vld [vmem:[%s22237_s1 + $0x10ec] ss:$16 sps:$4 sm:$0xff]  }
 0x1e4   :  { %5258 = vmatprep.subr.bf16.mxu0 %v15296_v22  ;;  %5791 = vmatprep.subr.bf16.mxu1 %v15299_v23  ;;  %v15378_v22 = vld [vmem:[%s22237_s1 + $0x10e0] ss:$16 sps:$4 sm:$0xff]   ;;  %v15381_v23 = vld [vmem:[%s22237_s1 + $0x10e8] ss:$16 sps:$4 sm:$0xff]  }
 0x1e7   :  { %5259 = vmatpush1.bf16.msra.mxu0 %v15294_v24  ;;  %5792 = vmatpush1.bf16.msra.mxu1 %v15297_v13  ;;  %v15386_v24 = vld [vmem:[%s22237_s1 + $0x1104] ss:$16 sps:$4 sm:$0xff]   ;;  %v15389_v13 = vld [vmem:[%s22237_s1 + $0x110c] ss:$16 sps:$4 sm:$0xff]  }
 0x1e8   :  { %5260 = vmatprep.subr.bf16.mxu0 %v15302_v27  ;;  %5793 = vmatprep.subr.bf16.mxu1 %v15305_v28  ;;  %v15384_v27 = vld [vmem:[%s22237_s1 + $0x1100] ss:$16 sps:$4 sm:$0xff]   ;;  %v15387_v28 = vld [vmem:[%s22237_s1 + $0x1108] ss:$16 sps:$4 sm:$0xff]  }
 0x1eb   :  { %5261 = vmatpush1.bf16.msra.mxu0 %v15300_v29  ;;  %5794 = vmatpush1.bf16.msra.mxu1 %v15303_v14  ;;  %v15392_v29 = vld [vmem:[%s22237_s1 + $0x1124] ss:$16 sps:$4 sm:$0xff]   ;;  %v15395_v14 = vld [vmem:[%s22237_s1 + $0x112c] ss:$16 sps:$4 sm:$0xff]  }
 0x1ec   :  { %5262 = vmatprep.subr.bf16.mxu0 %v15308_v30  ;;  %5795 = vmatprep.subr.bf16.mxu1 %v15311_v31  ;;  %v15390_v30 = vld [vmem:[%s22237_s1 + $0x1120] ss:$16 sps:$4 sm:$0xff]   ;;  %v15393_v31 = vld [vmem:[%s22237_s1 + $0x1128] ss:$16 sps:$4 sm:$0xff]  }
 0x1ef   :  { %5263 = vmatpush1.bf16.msra.mxu0 %v15306_v25  ;;  %5796 = vmatpush1.bf16.msra.mxu1 %v15309_v32  ;;  %v15398_v25 = vld [vmem:[%s22237_s1 + $0x1144] ss:$16 sps:$4 sm:$0xff]   ;;  %v15401_v32 = vld [vmem:[%s22237_s1 + $0x114c] ss:$16 sps:$4 sm:$0xff]  }
 0x1f0   :  { %5264 = vmatprep.subr.bf16.mxu0 %v15314_v33  ;;  %5797 = vmatprep.subr.bf16.mxu1 %v15317_v26  ;;  %v15396_v33 = vld [vmem:[%s22237_s1 + $0x1140] ss:$16 sps:$4 sm:$0xff]   ;;  %v15399_v26 = vld [vmem:[%s22237_s1 + $0x1148] ss:$16 sps:$4 sm:$0xff]  }
 0x1f3   :  { %5265 = vmatpush1.bf16.msra.mxu0 %v15312_v36  ;;  %5798 = vmatpush1.bf16.msra.mxu1 %v15315_v37  ;;  %v15404_v36 = vld [vmem:[%s22237_s1 + $0x1164] ss:$16 sps:$4 sm:$0xff]   ;;  %v15407_v37 = vld [vmem:[%s22237_s1 + $0x116c] ss:$16 sps:$4 sm:$0xff]  }
 0x1f4   :  { %5266 = vmatprep.subr.bf16.mxu0 %v15320_v21  ;;  %5799 = vmatprep.subr.bf16.mxu1 %v15323_v39  ;;  %v15402_v21 = vld [vmem:[%s22237_s1 + $0x1160] ss:$16 sps:$4 sm:$0xff]   ;;  %v15405_v39 = vld [vmem:[%s22237_s1 + $0x1168] ss:$16 sps:$4 sm:$0xff]  }
 0x1f7   :  { %5267 = vmatpush1.bf16.msra.mxu0 %v15318_v40  ;;  %5800 = vmatpush1.bf16.msra.mxu1 %v15321_v41  ;;  %v15410_v40 = vld [vmem:[%s22237_s1 + $0x1184] ss:$16 sps:$4 sm:$0xff]   ;;  %v15413_v41 = vld [vmem:[%s22237_s1 + $0x118c] ss:$16 sps:$4 sm:$0xff]  }
 0x1f8   :  { %5268 = vmatprep.subr.bf16.mxu0 %v15326_v34  ;;  %5801 = vmatprep.subr.bf16.mxu1 %v15329_v43  ;;  %v15408_v34 = vld [vmem:[%s22237_s1 + $0x1180] ss:$16 sps:$4 sm:$0xff]   ;;  %v15411_v43 = vld [vmem:[%s22237_s1 + $0x1188] ss:$16 sps:$4 sm:$0xff]  }
 0x1fb   :  { %5269 = vmatpush1.bf16.msra.mxu0 %v15324_v45  ;;  %5802 = vmatpush1.bf16.msra.mxu1 %v15327_v46  ;;  %v15416_v45 = vld [vmem:[%s22237_s1 + $0x11a4] ss:$16 sps:$4 sm:$0xff]   ;;  %v15419_v46 = vld [vmem:[%s22237_s1 + $0x11ac] ss:$16 sps:$4 sm:$0xff]  }
 0x1fc   :  { %5270 = vmatprep.subr.bf16.mxu0 %v15332_v35  ;;  %5803 = vmatprep.subr.bf16.mxu1 %v15335_v50  ;;  %v15414_v35 = vld [vmem:[%s22237_s1 + $0x11a0] ss:$16 sps:$4 sm:$0xff]   ;;  %v15417_v50 = vld [vmem:[%s22237_s1 + $0x11a8] ss:$16 sps:$4 sm:$0xff]  }
 0x1ff   :  { %5271 = vmatpush1.bf16.msra.mxu0 %v15330_v51  ;;  %5804 = vmatpush1.bf16.msra.mxu1 %v15333_v53  ;;  %v15422_v51 = vld [vmem:[%s22237_s1 + $0x11c4] ss:$16 sps:$4 sm:$0xff]   ;;  %v15425_v53 = vld [vmem:[%s22237_s1 + $0x11cc] ss:$16 sps:$4 sm:$0xff]  }
 0x200   :  { %5281 = vmatprep.subr.bf16.mxu0 %v15338_v38  ;;  %5814 = vmatprep.subr.bf16.mxu1 %v15341_v54  ;;  %v15420_v38 = vld [vmem:[%s22237_s1 + $0x11c0] ss:$16 sps:$4 sm:$0xff]   ;;  %v15423_v54 = vld [vmem:[%s22237_s1 + $0x11c8] ss:$16 sps:$4 sm:$0xff]  }
 0x202   :  { %5273 = vmatmul.mubr.bf16.vlgmr.msra.gmra.mrb[0].mxu0 %v939_v56  ;;  %5806 = vmatmul.mubr.bf16.vlgmr.msra.gmra.mrb[0].mxu1 %v939_v56  ;;  %v15431_v56 = vld [vmem:[%s22237_s1 + $0x11ec] ss:$16 sps:$4 sm:$0xff]  }
 0x203   :  { %5282 = vmatpush1.bf16.msra.mxu0 %v15336_v47  ;;  %5815 = vmatpush1.bf16.msra.mxu1 %v15339_v57  ;;  %v15426_v47 = vld [vmem:[%s22237_s1 + $0x11e0] ss:$16 sps:$4 sm:$0xff]   ;;  %v15429_v57 = vld [vmem:[%s22237_s1 + $0x11e8] ss:$16 sps:$4 sm:$0xff]  }
 0x204   :  { %5283 = vmatprep.subr.bf16.mxu0 %v15344_v58  ;;  %5816 = vmatprep.subr.bf16.mxu1 %v15347_v48  ;;  %v15434_v58 = vld [vmem:[%s22237_s1 + $0x1204] ss:$16 sps:$4 sm:$0xff]   ;;  %v15437_v48 = vld [vmem:[%s22237_s1 + $0x120c] ss:$16 sps:$4 sm:$0xff]  }
 0x205   :  { %5313 = vmatprep.mubr.bf16.mxu0 %v18686_v59  ;;  %5846 = vmatprep.mubr.bf16.mxu1 %v18686_v59 }
 0x207   :  { %5284 = vmatpush1.bf16.msra.mxu0 %v15342_v60  ;;  %5817 = vmatpush1.bf16.msra.mxu1 %v15345_v61  ;;  %v18872_v60 = vrot.slane %v18643_v44, %v17172_v49  ;;  %v15432_v61 = vld [vmem:[%s22237_s1 + $0x1200] ss:$16 sps:$4 sm:$0xff]   ;;  %v15443_v44 = vld [vmem:[%s22237_s1 + $0x122c] ss:$16 sps:$4 sm:$0xff]  }
 0x208   :  { %5285 = vmatprep.subr.bf16.mxu0 %v15350_v62  ;;  %5818 = vmatprep.subr.bf16.mxu1 %v15353_v63  ;;  %v15435_v62 = vld [vmem:[%s22237_s1 + $0x1208] ss:$16 sps:$4 sm:$0xff]   ;;  %v15440_v63 = vld [vmem:[%s22237_s1 + $0x1224] ss:$16 sps:$4 sm:$0xff]  }
 0x20b   :  { %5286 = vmatpush1.bf16.msra.mxu0 %v15348_v0  ;;  %5819 = vmatpush1.bf16.msra.mxu1 %v15351_v1  ;;  %v989_v0 = vcombine.high %v18686_v59, %v18686_v59  ;;  %v15438_v1 = vld [vmem:[%s22237_s1 + $0x1220] ss:$16 sps:$4 sm:$0xff]   ;;  %v15446_v59 = vld [vmem:[%s22237_s1 + $0x1244] ss:$16 sps:$4 sm:$0xff]  }
 0x20c   :  { %5287 = vmatprep.subr.bf16.mxu0 %v15356_v2  ;;  %5820 = vmatprep.subr.bf16.mxu1 %v15359_v3  ;;  %v15441_v2 = vld [vmem:[%s22237_s1 + $0x1228] ss:$16 sps:$4 sm:$0xff]   ;;  %v15449_v3 = vld [vmem:[%s22237_s1 + $0x124c] ss:$16 sps:$4 sm:$0xff]  }
 0x20f   :  { %5288 = vmatpush1.bf16.msra.mxu0 %v15354_v4  ;;  %5821 = vmatpush1.bf16.msra.mxu1 %v15357_v5  ;;  %v15444_v4 = vld [vmem:[%s22237_s1 + $0x1240] ss:$16 sps:$4 sm:$0xff]   ;;  %v15447_v5 = vld [vmem:[%s22237_s1 + $0x1248] ss:$16 sps:$4 sm:$0xff]  }
 0x210   :  { %5289 = vmatprep.subr.bf16.mxu0 %v15362_v6  ;;  %5822 = vmatprep.subr.bf16.mxu1 %v15365_v7  ;;  %v15452_v6 = vld [vmem:[%s22237_s1 + $0x1264] ss:$16 sps:$4 sm:$0xff]   ;;  %v15455_v7 = vld [vmem:[%s22237_s1 + $0x126c] ss:$16 sps:$4 sm:$0xff]  }
 0x213   :  { %5290 = vmatpush1.bf16.msra.mxu0 %v15360_v8  ;;  %5823 = vmatpush1.bf16.msra.mxu1 %v15363_v9  ;;  %v15450_v8 = vld [vmem:[%s22237_s1 + $0x1260] ss:$16 sps:$4 sm:$0xff]   ;;  %v15453_v9 = vld [vmem:[%s22237_s1 + $0x1268] ss:$16 sps:$4 sm:$0xff]  }
 0x214   :  { %5291 = vmatprep.subr.bf16.mxu0 %v15368_v10  ;;  %5824 = vmatprep.subr.bf16.mxu1 %v15371_v11  ;;  %v15458_v10 = vld [vmem:[%s22237_s1 + $0x1284] ss:$16 sps:$4 sm:$0xff]   ;;  %v15461_v11 = vld [vmem:[%s22237_s1 + $0x128c] ss:$16 sps:$4 sm:$0xff]  }
 0x217   :  { %5292 = vmatpush1.bf16.msra.mxu0 %v15366_v12  ;;  %5825 = vmatpush1.bf16.msra.mxu1 %v15369_v52  ;;  %v15456_v12 = vld [vmem:[%s22237_s1 + $0x1280] ss:$16 sps:$4 sm:$0xff]   ;;  %v15459_v52 = vld [vmem:[%s22237_s1 + $0x1288] ss:$16 sps:$4 sm:$0xff]  }
 0x218   :  { %5293 = vmatprep.subr.bf16.mxu0 %v15374_v15  ;;  %5826 = vmatprep.subr.bf16.mxu1 %v15377_v16  ;;  %v15464_v15 = vld [vmem:[%s22237_s1 + $0x12a4] ss:$16 sps:$4 sm:$0xff]   ;;  %v15467_v16 = vld [vmem:[%s22237_s1 + $0x12ac] ss:$16 sps:$4 sm:$0xff]  }
 0x21b   :  { %5294 = vmatpush1.bf16.msra.mxu0 %v15372_v17  ;;  %5827 = vmatpush1.bf16.msra.mxu1 %v15375_v18  ;;  %v15462_v17 = vld [vmem:[%s22237_s1 + $0x12a0] ss:$16 sps:$4 sm:$0xff]   ;;  %v15465_v18 = vld [vmem:[%s22237_s1 + $0x12a8] ss:$16 sps:$4 sm:$0xff]  }
 0x21c   :  { %5295 = vmatprep.subr.bf16.mxu0 %v15380_v19  ;;  %5828 = vmatprep.subr.bf16.mxu1 %v15383_v20  ;;  %v15470_v19 = vld [vmem:[%s22237_s1 + $0x12c4] ss:$16 sps:$4 sm:$0xff]   ;;  %v15473_v20 = vld [vmem:[%s22237_s1 + $0x12cc] ss:$16 sps:$4 sm:$0xff]  }
 0x21f   :  { %5296 = vmatpush1.bf16.msra.mxu0 %v15378_v22  ;;  %5829 = vmatpush1.bf16.msra.mxu1 %v15381_v23  ;;  %v15468_v22 = vld [vmem:[%s22237_s1 + $0x12c0] ss:$16 sps:$4 sm:$0xff]   ;;  %v15471_v23 = vld [vmem:[%s22237_s1 + $0x12c8] ss:$16 sps:$4 sm:$0xff]  }
 0x220   :  { %5297 = vmatprep.subr.bf16.mxu0 %v15386_v24  ;;  %5830 = vmatprep.subr.bf16.mxu1 %v15389_v13  ;;  %v15476_v24 = vld [vmem:[%s22237_s1 + $0x12e4] ss:$16 sps:$4 sm:$0xff]   ;;  %v15479_v13 = vld [vmem:[%s22237_s1 + $0x12ec] ss:$16 sps:$4 sm:$0xff]  }
 0x223   :  { %5298 = vmatpush1.bf16.msra.mxu0 %v15384_v27  ;;  %5831 = vmatpush1.bf16.msra.mxu1 %v15387_v28  ;;  %v15474_v27 = vld [vmem:[%s22237_s1 + $0x12e0] ss:$16 sps:$4 sm:$0xff]   ;;  %v15477_v28 = vld [vmem:[%s22237_s1 + $0x12e8] ss:$16 sps:$4 sm:$0xff]  }
 0x224   :  { %5299 = vmatprep.subr.bf16.mxu0 %v15392_v29  ;;  %5832 = vmatprep.subr.bf16.mxu1 %v15395_v14  ;;  %v15482_v29 = vld [vmem:[%s22237_s1 + $0x1304] ss:$16 sps:$4 sm:$0xff]   ;;  %v15485_v14 = vld [vmem:[%s22237_s1 + $0x130c] ss:$16 sps:$4 sm:$0xff]  }
 0x227   :  { %5300 = vmatpush1.bf16.msra.mxu0 %v15390_v30  ;;  %5833 = vmatpush1.bf16.msra.mxu1 %v15393_v31  ;;  %v15480_v30 = vld [vmem:[%s22237_s1 + $0x1300] ss:$16 sps:$4 sm:$0xff]   ;;  %v15483_v31 = vld [vmem:[%s22237_s1 + $0x1308] ss:$16 sps:$4 sm:$0xff]  }
 0x228   :  { %5301 = vmatprep.subr.bf16.mxu0 %v15398_v25  ;;  %5834 = vmatprep.subr.bf16.mxu1 %v15401_v32  ;;  %v15488_v25 = vld [vmem:[%s22237_s1 + $0x1324] ss:$16 sps:$4 sm:$0xff]   ;;  %v15491_v32 = vld [vmem:[%s22237_s1 + $0x132c] ss:$16 sps:$4 sm:$0xff]  }
 0x22b   :  { %5302 = vmatpush1.bf16.msra.mxu0 %v15396_v33  ;;  %5835 = vmatpush1.bf16.msra.mxu1 %v15399_v26  ;;  %v15486_v33 = vld [vmem:[%s22237_s1 + $0x1320] ss:$16 sps:$4 sm:$0xff]   ;;  %v15489_v26 = vld [vmem:[%s22237_s1 + $0x1328] ss:$16 sps:$4 sm:$0xff]  }
 0x22c   :  { %5303 = vmatprep.subr.bf16.mxu0 %v15404_v36  ;;  %5836 = vmatprep.subr.bf16.mxu1 %v15407_v37  ;;  %v15494_v36 = vld [vmem:[%s22237_s1 + $0x1344] ss:$16 sps:$4 sm:$0xff]   ;;  %v15497_v37 = vld [vmem:[%s22237_s1 + $0x134c] ss:$16 sps:$4 sm:$0xff]  }
 0x22f   :  { %5304 = vmatpush1.bf16.msra.mxu0 %v15402_v21  ;;  %5837 = vmatpush1.bf16.msra.mxu1 %v15405_v39  ;;  %v15492_v21 = vld [vmem:[%s22237_s1 + $0x1340] ss:$16 sps:$4 sm:$0xff]   ;;  %v15495_v39 = vld [vmem:[%s22237_s1 + $0x1348] ss:$16 sps:$4 sm:$0xff]  }
 0x230   :  { %5305 = vmatprep.subr.bf16.mxu0 %v15410_v40  ;;  %5838 = vmatprep.subr.bf16.mxu1 %v15413_v41  ;;  %v15500_v40 = vld [vmem:[%s22237_s1 + $0x1364] ss:$16 sps:$4 sm:$0xff]   ;;  %v15503_v41 = vld [vmem:[%s22237_s1 + $0x136c] ss:$16 sps:$4 sm:$0xff]  }
 0x233   :  { %5306 = vmatpush1.bf16.msra.mxu0 %v15408_v34  ;;  %5839 = vmatpush1.bf16.msra.mxu1 %v15411_v43  ;;  %v15498_v34 = vld [vmem:[%s22237_s1 + $0x1360] ss:$16 sps:$4 sm:$0xff]   ;;  %v15501_v43 = vld [vmem:[%s22237_s1 + $0x1368] ss:$16 sps:$4 sm:$0xff]  }
 0x234   :  { %5307 = vmatprep.subr.bf16.mxu0 %v15416_v45  ;;  %5840 = vmatprep.subr.bf16.mxu1 %v15419_v46  ;;  %v15506_v45 = vld [vmem:[%s22237_s1 + $0x1384] ss:$16 sps:$4 sm:$0xff]   ;;  %v15509_v46 = vld [vmem:[%s22237_s1 + $0x138c] ss:$16 sps:$4 sm:$0xff]  }
 0x237   :  { %5308 = vmatpush1.bf16.msra.mxu0 %v15414_v35  ;;  %5841 = vmatpush1.bf16.msra.mxu1 %v15417_v50  ;;  %v15504_v35 = vld [vmem:[%s22237_s1 + $0x1380] ss:$16 sps:$4 sm:$0xff]   ;;  %v15507_v50 = vld [vmem:[%s22237_s1 + $0x1388] ss:$16 sps:$4 sm:$0xff]  }
 0x238   :  { %5309 = vmatprep.subr.bf16.mxu0 %v15422_v51  ;;  %5842 = vmatprep.subr.bf16.mxu1 %v15425_v53  ;;  %v15512_v51 = vld [vmem:[%s22237_s1 + $0x13a4] ss:$16 sps:$4 sm:$0xff]   ;;  %v15515_v53 = vld [vmem:[%s22237_s1 + $0x13ac] ss:$16 sps:$4 sm:$0xff]  }
 0x23b   :  { %5310 = vmatpush1.bf16.msra.mxu0 %v15420_v38  ;;  %5843 = vmatpush1.bf16.msra.mxu1 %v15423_v54  ;;  %v15510_v38 = vld [vmem:[%s22237_s1 + $0x13a0] ss:$16 sps:$4 sm:$0xff]   ;;  %v15513_v54 = vld [vmem:[%s22237_s1 + $0x13a8] ss:$16 sps:$4 sm:$0xff]  }
 0x23c   :  { %5311 = vmatprep.subr.bf16.mxu0 %v15428_v55  ;;  %5844 = vmatprep.subr.bf16.mxu1 %v15431_v56  ;;  %v15518_v55 = vld [vmem:[%s22237_s1 + $0x13c4] ss:$16 sps:$4 sm:$0xff]   ;;  %v15521_v56 = vld [vmem:[%s22237_s1 + $0x13cc] ss:$16 sps:$4 sm:$0xff]  }
 0x23f   :  { %5312 = vmatpush1.bf16.msra.mxu0 %v15426_v47  ;;  %5845 = vmatpush1.bf16.msra.mxu1 %v15429_v57  ;;  %v16962_v47 = vld [vmem:[%s22236_s0 + $0x10] sm:$0xff] }
 0x240   :  { %5322 = vmatprep.subr.bf16.mxu0 %v15434_v58  ;;  %5855 = vmatprep.subr.bf16.mxu1 %v15437_v48  ;;  %v942_v57 = vcombine.high %v16962_v47, %v16962_v47  ;;  %v15516_v58 = vld [vmem:[%s22237_s1 + $0x13c0] ss:$16 sps:$4 sm:$0xff]   ;;  %v15519_v48 = vld [vmem:[%s22237_s1 + $0x13c8] ss:$16 sps:$4 sm:$0xff]  }
 0x241   :  { %v15600_v47 = vld [vmem:[%s22237_s1 + $0x1580] ss:$16 sps:$4 sm:$0xff]  }
 0x242   :  { %5314 = vmatmul.mubr.bf16.vlgmr.msra.gmra.mrb[0].mxu0 %v18872_v60  ;;  %5847 = vmatmul.mubr.bf16.vlgmr.msra.gmra.mrb[0].mxu1 %v18872_v60 }
 0x243   :  { %5323 = vmatpush1.bf16.msra.mxu0 %v15432_v61  ;;  %5856 = vmatpush1.bf16.msra.mxu1 %v15435_v62  ;;  %v15524_v61 = vld [vmem:[%s22237_s1 + $0x13e4] ss:$16 sps:$4 sm:$0xff]   ;;  %v15527_v62 = vld [vmem:[%s22237_s1 + $0x13ec] ss:$16 sps:$4 sm:$0xff]  }
 0x244   :  { %5324 = vmatprep.subr.bf16.mxu0 %v15440_v63  ;;  %5857 = vmatprep.subr.bf16.mxu1 %v15443_v44  ;;  %v19062_v63 = vrot.slane %v942_v57, %v17172_v49  ;;  %v15522_v44 = vld [vmem:[%s22237_s1 + $0x13e0] ss:$16 sps:$4 sm:$0xff]   ;;  %v15603_v57 = vld [vmem:[%s22237_s1 + $0x1588] ss:$16 sps:$4 sm:$0xff]  }
 0x245   :  { %5354 = vmatprep.mubr.bf16.mxu0 %v989_v0  ;;  %5887 = vmatprep.mubr.bf16.mxu1 %v989_v0  ;;  %v15525_v0 = vld [vmem:[%s22237_s1 + $0x13e8] ss:$16 sps:$4 sm:$0xff]  }
 0x247   :  { %5325 = vmatpush1.bf16.msra.mxu0 %v15438_v1  ;;  %5858 = vmatpush1.bf16.msra.mxu1 %v15441_v2  ;;  %v15530_v1 = vld [vmem:[%s22237_s1 + $0x1404] ss:$16 sps:$4 sm:$0xff]   ;;  %v15533_v2 = vld [vmem:[%s22237_s1 + $0x140c] ss:$16 sps:$4 sm:$0xff]  }
 0x248   :  { %5326 = vmatprep.subr.bf16.mxu0 %v15446_v59  ;;  %5859 = vmatprep.subr.bf16.mxu1 %v15449_v3  ;;  %v958_v59 = vcombine.high %v19062_v63, %v19062_v63  ;;  %v987_v3 = vcombine.high %v18872_v60, %v18872_v60  ;;  %v15539_v60 = vld [vmem:[%s22237_s1 + $0x142c] ss:$16 sps:$4 sm:$0xff]  }
 0x24b   :  { %5327 = vmatpush1.bf16.msra.mxu0 %v15444_v4  ;;  %5860 = vmatpush1.bf16.msra.mxu1 %v15447_v5  ;;  %v15528_v4 = vld [vmem:[%s22237_s1 + $0x1400] ss:$16 sps:$4 sm:$0xff]   ;;  %v15531_v5 = vld [vmem:[%s22237_s1 + $0x1408] ss:$16 sps:$4 sm:$0xff]  }
 0x24c   :  { %5328 = vmatprep.subr.bf16.mxu0 %v15452_v6  ;;  %5861 = vmatprep.subr.bf16.mxu1 %v15455_v7  ;;  %v15536_v6 = vld [vmem:[%s22237_s1 + $0x1424] ss:$16 sps:$4 sm:$0xff]   ;;  %v19093_v7 = vrot.slane %v958_v59, %v17172_v49 }
 0x24d   :  { %v15620_v59 = vld [vmem:[%s22237_s1 + $0x15e4] ss:$16 sps:$4 sm:$0xff]  }
 0x24f   :  { %5329 = vmatpush1.bf16.msra.mxu0 %v15450_v8  ;;  %5862 = vmatpush1.bf16.msra.mxu1 %v15453_v9  ;;  %v15534_v8 = vld [vmem:[%s22237_s1 + $0x1420] ss:$16 sps:$4 sm:$0xff]   ;;  %v15537_v9 = vld [vmem:[%s22237_s1 + $0x1428] ss:$16 sps:$4 sm:$0xff]  }
 0x250   :  { %5330 = vmatprep.subr.bf16.mxu0 %v15458_v10  ;;  %5863 = vmatprep.subr.bf16.mxu1 %v15461_v11  ;;  %v15542_v10 = vld [vmem:[%s22237_s1 + $0x1444] ss:$16 sps:$4 sm:$0xff]   ;;  %v15545_v11 = vld [vmem:[%s22237_s1 + $0x144c] ss:$16 sps:$4 sm:$0xff]  }
 0x253   :  { %5331 = vmatpush1.bf16.msra.mxu0 %v15456_v12  ;;  %5864 = vmatpush1.bf16.msra.mxu1 %v15459_v52  ;;  %v15540_v12 = vld [vmem:[%s22237_s1 + $0x1440] ss:$16 sps:$4 sm:$0xff]   ;;  %v15543_v52 = vld [vmem:[%s22237_s1 + $0x1448] ss:$16 sps:$4 sm:$0xff]  }
 0x254   :  { %5332 = vmatprep.subr.bf16.mxu0 %v15464_v15  ;;  %5865 = vmatprep.subr.bf16.mxu1 %v15467_v16  ;;  %v15548_v15 = vld [vmem:[%s22237_s1 + $0x1464] ss:$16 sps:$4 sm:$0xff]   ;;  %v15551_v16 = vld [vmem:[%s22237_s1 + $0x146c] ss:$16 sps:$4 sm:$0xff]  }
 0x257   :  { %5333 = vmatpush1.bf16.msra.mxu0 %v15462_v17  ;;  %5866 = vmatpush1.bf16.msra.mxu1 %v15465_v18  ;;  %v15546_v17 = vld [vmem:[%s22237_s1 + $0x1460] ss:$16 sps:$4 sm:$0xff]   ;;  %v15549_v18 = vld [vmem:[%s22237_s1 + $0x1468] ss:$16 sps:$4 sm:$0xff]  }
 0x258   :  { %5334 = vmatprep.subr.bf16.mxu0 %v15470_v19  ;;  %5867 = vmatprep.subr.bf16.mxu1 %v15473_v20  ;;  %v15554_v19 = vld [vmem:[%s22237_s1 + $0x1484] ss:$16 sps:$4 sm:$0xff]   ;;  %v15557_v20 = vld [vmem:[%s22237_s1 + $0x148c] ss:$16 sps:$4 sm:$0xff]  }
 0x25b   :  { %5335 = vmatpush1.bf16.msra.mxu0 %v15468_v22  ;;  %5868 = vmatpush1.bf16.msra.mxu1 %v15471_v23  ;;  %v15552_v22 = vld [vmem:[%s22237_s1 + $0x1480] ss:$16 sps:$4 sm:$0xff]   ;;  %v15555_v23 = vld [vmem:[%s22237_s1 + $0x1488] ss:$16 sps:$4 sm:$0xff]  }
 0x25c   :  { %5336 = vmatprep.subr.bf16.mxu0 %v15476_v24  ;;  %5869 = vmatprep.subr.bf16.mxu1 %v15479_v13  ;;  %v15560_v24 = vld [vmem:[%s22237_s1 + $0x14a4] ss:$16 sps:$4 sm:$0xff]   ;;  %v15563_v13 = vld [vmem:[%s22237_s1 + $0x14ac] ss:$16 sps:$4 sm:$0xff]  }
 0x25f   :  { %5337 = vmatpush1.bf16.msra.mxu0 %v15474_v27  ;;  %5870 = vmatpush1.bf16.msra.mxu1 %v15477_v28  ;;  %v15558_v27 = vld [vmem:[%s22237_s1 + $0x14a0] ss:$16 sps:$4 sm:$0xff]   ;;  %v15561_v28 = vld [vmem:[%s22237_s1 + $0x14a8] ss:$16 sps:$4 sm:$0xff]  }
 0x260   :  { %5338 = vmatprep.subr.bf16.mxu0 %v15482_v29  ;;  %5871 = vmatprep.subr.bf16.mxu1 %v15485_v14  ;;  %v15566_v29 = vld [vmem:[%s22237_s1 + $0x14c4] ss:$16 sps:$4 sm:$0xff]   ;;  %v15569_v14 = vld [vmem:[%s22237_s1 + $0x14cc] ss:$16 sps:$4 sm:$0xff]  }
 0x263   :  { %5339 = vmatpush1.bf16.msra.mxu0 %v15480_v30  ;;  %5872 = vmatpush1.bf16.msra.mxu1 %v15483_v31  ;;  %v15564_v30 = vld [vmem:[%s22237_s1 + $0x14c0] ss:$16 sps:$4 sm:$0xff]   ;;  %v15567_v31 = vld [vmem:[%s22237_s1 + $0x14c8] ss:$16 sps:$4 sm:$0xff]  }
 0x264   :  { %5340 = vmatprep.subr.bf16.mxu0 %v15488_v25  ;;  %5873 = vmatprep.subr.bf16.mxu1 %v15491_v32  ;;  %v15572_v25 = vld [vmem:[%s22237_s1 + $0x14e4] ss:$16 sps:$4 sm:$0xff]   ;;  %v15575_v32 = vld [vmem:[%s22237_s1 + $0x14ec] ss:$16 sps:$4 sm:$0xff]  }
 0x267   :  { %5341 = vmatpush1.bf16.msra.mxu0 %v15486_v33  ;;  %5874 = vmatpush1.bf16.msra.mxu1 %v15489_v26  ;;  %v15570_v33 = vld [vmem:[%s22237_s1 + $0x14e0] ss:$16 sps:$4 sm:$0xff]   ;;  %v15573_v26 = vld [vmem:[%s22237_s1 + $0x14e8] ss:$16 sps:$4 sm:$0xff]  }
 0x268   :  { %5342 = vmatprep.subr.bf16.mxu0 %v15494_v36  ;;  %5875 = vmatprep.subr.bf16.mxu1 %v15497_v37  ;;  %v15578_v36 = vld [vmem:[%s22237_s1 + $0x1504] ss:$16 sps:$4 sm:$0xff]   ;;  %v15581_v37 = vld [vmem:[%s22237_s1 + $0x150c] ss:$16 sps:$4 sm:$0xff]  }
 0x26b   :  { %5343 = vmatpush1.bf16.msra.mxu0 %v15492_v21  ;;  %5876 = vmatpush1.bf16.msra.mxu1 %v15495_v39  ;;  %v15576_v21 = vld [vmem:[%s22237_s1 + $0x1500] ss:$16 sps:$4 sm:$0xff]   ;;  %v15579_v39 = vld [vmem:[%s22237_s1 + $0x1508] ss:$16 sps:$4 sm:$0xff]  }
 0x26c   :  { %5344 = vmatprep.subr.bf16.mxu0 %v15500_v40  ;;  %5877 = vmatprep.subr.bf16.mxu1 %v15503_v41  ;;  %v15584_v40 = vld [vmem:[%s22237_s1 + $0x1524] ss:$16 sps:$4 sm:$0xff]   ;;  %v15587_v41 = vld [vmem:[%s22237_s1 + $0x152c] ss:$16 sps:$4 sm:$0xff]  }
 0x26f   :  { %5345 = vmatpush1.bf16.msra.mxu0 %v15498_v34  ;;  %5878 = vmatpush1.bf16.msra.mxu1 %v15501_v43  ;;  %v15582_v34 = vld [vmem:[%s22237_s1 + $0x1520] ss:$16 sps:$4 sm:$0xff]   ;;  %v15585_v43 = vld [vmem:[%s22237_s1 + $0x1528] ss:$16 sps:$4 sm:$0xff]  }
 0x270   :  { %5346 = vmatprep.subr.bf16.mxu0 %v15506_v45  ;;  %5879 = vmatprep.subr.bf16.mxu1 %v15509_v46  ;;  %v15590_v45 = vld [vmem:[%s22237_s1 + $0x1544] ss:$16 sps:$4 sm:$0xff]   ;;  %v15593_v46 = vld [vmem:[%s22237_s1 + $0x154c] ss:$16 sps:$4 sm:$0xff]  }
 0x273   :  { %5347 = vmatpush1.bf16.msra.mxu0 %v15504_v35  ;;  %5880 = vmatpush1.bf16.msra.mxu1 %v15507_v50  ;;  %v15588_v35 = vld [vmem:[%s22237_s1 + $0x1540] ss:$16 sps:$4 sm:$0xff]   ;;  %v15591_v50 = vld [vmem:[%s22237_s1 + $0x1548] ss:$16 sps:$4 sm:$0xff]  }
 0x274   :  { %5348 = vmatprep.subr.bf16.mxu0 %v15512_v51  ;;  %5881 = vmatprep.subr.bf16.mxu1 %v15515_v53  ;;  %v15596_v51 = vld [vmem:[%s22237_s1 + $0x1564] ss:$16 sps:$4 sm:$0xff]   ;;  %v15599_v53 = vld [vmem:[%s22237_s1 + $0x156c] ss:$16 sps:$4 sm:$0xff]  }
 0x277   :  { %5349 = vmatpush1.bf16.msra.mxu0 %v15510_v38  ;;  %5882 = vmatpush1.bf16.msra.mxu1 %v15513_v54  ;;  %v15594_v38 = vld [vmem:[%s22237_s1 + $0x1560] ss:$16 sps:$4 sm:$0xff]   ;;  %v15597_v54 = vld [vmem:[%s22237_s1 + $0x1568] ss:$16 sps:$4 sm:$0xff]  }
 0x278   :  { %5350 = vmatprep.subr.bf16.mxu0 %v15518_v55  ;;  %5883 = vmatprep.subr.bf16.mxu1 %v15521_v56  ;;  %v15602_v55 = vld [vmem:[%s22237_s1 + $0x1584] ss:$16 sps:$4 sm:$0xff]   ;;  %v15605_v56 = vld [vmem:[%s22237_s1 + $0x158c] ss:$16 sps:$4 sm:$0xff]  }
 0x27b   :  { %5351 = vmatpush1.bf16.msra.mxu0 %v15516_v58  ;;  %5884 = vmatpush1.bf16.msra.mxu1 %v15519_v48  ;;  %v15608_v58 = vld [vmem:[%s22237_s1 + $0x15a4] ss:$16 sps:$4 sm:$0xff]   ;;  %v15611_v48 = vld [vmem:[%s22237_s1 + $0x15ac] ss:$16 sps:$4 sm:$0xff]  }
 0x27c   :  { %5352 = vmatprep.subr.bf16.mxu0 %v15524_v61  ;;  %5885 = vmatprep.subr.bf16.mxu1 %v15527_v62  ;;  %v15606_v61 = vld [vmem:[%s22237_s1 + $0x15a0] ss:$16 sps:$4 sm:$0xff]   ;;  %v15609_v62 = vld [vmem:[%s22237_s1 + $0x15a8] ss:$16 sps:$4 sm:$0xff]  }
 0x27f   :  { %5353 = vmatpush1.bf16.msra.mxu0 %v15522_v44  ;;  %5886 = vmatpush1.bf16.msra.mxu1 %v15525_v0  ;;  %v15614_v44 = vld [vmem:[%s22237_s1 + $0x15c4] ss:$16 sps:$4 sm:$0xff]   ;;  %v15617_v0 = vld [vmem:[%s22237_s1 + $0x15cc] ss:$16 sps:$4 sm:$0xff]  }
 0x280   :  { %5363 = vmatprep.subr.bf16.mxu0 %v15530_v1  ;;  %5896 = vmatprep.subr.bf16.mxu1 %v15533_v2  ;;  %v15612_v1 = vld [vmem:[%s22237_s1 + $0x15c0] ss:$16 sps:$4 sm:$0xff]   ;;  %v15615_v2 = vld [vmem:[%s22237_s1 + $0x15c8] ss:$16 sps:$4 sm:$0xff]  }
 0x282   :  { %5355 = vmatmul.mubr.bf16.vlgmr.msra.gmra.mrb[0].mxu0 %v987_v3  ;;  %5888 = vmatmul.mubr.bf16.vlgmr.msra.gmra.mrb[0].mxu1 %v987_v3  ;;  %v15623_v3 = vld [vmem:[%s22237_s1 + $0x15ec] ss:$16 sps:$4 sm:$0xff]  }
 0x283   :  { %5364 = vmatpush1.bf16.msra.mxu0 %v15528_v4  ;;  %5897 = vmatpush1.bf16.msra.mxu1 %v15531_v5  ;;  %v15618_v4 = vld [vmem:[%s22237_s1 + $0x15e0] ss:$16 sps:$4 sm:$0xff]   ;;  %v15621_v5 = vld [vmem:[%s22237_s1 + $0x15e8] ss:$16 sps:$4 sm:$0xff]  }
 0x284   :  { %5365 = vmatprep.subr.bf16.mxu0 %v15536_v6  ;;  %5898 = vmatprep.subr.bf16.mxu1 %v15539_v60  ;;  %v15627_v6 = vld [vmem:[%s22237_s1 + $0x1604] ss:$16 sps:$4 sm:$0xff]   ;;  %v15630_v60 = vld [vmem:[%s22237_s1 + $0x160c] ss:$16 sps:$4 sm:$0xff]  }
 0x285   :  { %5395 = vmatprep.mubr.bf16.mxu0 %v19093_v7  ;;  %5928 = vmatprep.mubr.bf16.mxu1 %v19093_v7 }
 0x287   :  { %5366 = vmatpush1.bf16.msra.mxu0 %v15534_v8  ;;  %5899 = vmatpush1.bf16.msra.mxu1 %v15537_v9  ;;  %v15625_v8 = vld [vmem:[%s22237_s1 + $0x1600] ss:$16 sps:$4 sm:$0xff]   ;;  %v15628_v9 = vld [vmem:[%s22237_s1 + $0x1608] ss:$16 sps:$4 sm:$0xff]  }
 0x288   :  { %5367 = vmatprep.subr.bf16.mxu0 %v15542_v10  ;;  %5900 = vmatprep.subr.bf16.mxu1 %v15545_v11  ;;  %v19285_v10 = vrot.slane %v19062_v63, %v17172_v49  ;;  %v15633_v11 = vld [vmem:[%s22237_s1 + $0x1624] ss:$16 sps:$4 sm:$0xff]   ;;  %v15634_v63 = vld [vmem:[%s22237_s1 + $0x1628] ss:$16 sps:$4 sm:$0xff]  }
 0x28b   :  { %5368 = vmatpush1.bf16.msra.mxu0 %v15540_v12  ;;  %5901 = vmatpush1.bf16.msra.mxu1 %v15543_v52  ;;  %v15636_v12 = vld [vmem:[%s22237_s1 + $0x162c] ss:$16 sps:$4 sm:$0xff]   ;;  %v15631_v52 = vld [vmem:[%s22237_s1 + $0x1620] ss:$16 sps:$4 sm:$0xff]  }
 0x28c   :  { %5369 = vmatprep.subr.bf16.mxu0 %v15548_v15  ;;  %5902 = vmatprep.subr.bf16.mxu1 %v15551_v16  ;;  %v990_v15 = vcombine.high %v19093_v7, %v19093_v7  ;;  %v15639_v16 = vld [vmem:[%s22237_s1 + $0x1644] ss:$16 sps:$4 sm:$0xff]   ;;  %v15637_v7 = vld [vmem:[%s22237_s1 + $0x1640] ss:$16 sps:$4 sm:$0xff]  }
 0x28f   :  { %5370 = vmatpush1.bf16.msra.mxu0 %v15546_v17  ;;  %5903 = vmatpush1.bf16.msra.mxu1 %v15549_v18  ;;  %v15642_v17 = vld [vmem:[%s22237_s1 + $0x164c] ss:$16 sps:$4 sm:$0xff]   ;;  %v15640_v18 = vld [vmem:[%s22237_s1 + $0x1648] ss:$16 sps:$4 sm:$0xff]  }
 0x290   :  { %5371 = vmatprep.subr.bf16.mxu0 %v15554_v19  ;;  %5904 = vmatprep.subr.bf16.mxu1 %v15557_v20  ;;  %v15645_v19 = vld [vmem:[%s22237_s1 + $0x1664] ss:$16 sps:$4 sm:$0xff]   ;;  %v15648_v20 = vld [vmem:[%s22237_s1 + $0x166c] ss:$16 sps:$4 sm:$0xff]  }
 0x293   :  { %5372 = vmatpush1.bf16.msra.mxu0 %v15552_v22  ;;  %5905 = vmatpush1.bf16.msra.mxu1 %v15555_v23  ;;  %v15643_v22 = vld [vmem:[%s22237_s1 + $0x1660] ss:$16 sps:$4 sm:$0xff]   ;;  %v15646_v23 = vld [vmem:[%s22237_s1 + $0x1668] ss:$16 sps:$4 sm:$0xff]  }
 0x294   :  { %5373 = vmatprep.subr.bf16.mxu0 %v15560_v24  ;;  %5906 = vmatprep.subr.bf16.mxu1 %v15563_v13  ;;  %v15651_v24 = vld [vmem:[%s22237_s1 + $0x1684] ss:$16 sps:$4 sm:$0xff]   ;;  %v15654_v13 = vld [vmem:[%s22237_s1 + $0x168c] ss:$16 sps:$4 sm:$0xff]  }
 0x297   :  { %5374 = vmatpush1.bf16.msra.mxu0 %v15558_v27  ;;  %5907 = vmatpush1.bf16.msra.mxu1 %v15561_v28  ;;  %v15649_v27 = vld [vmem:[%s22237_s1 + $0x1680] ss:$16 sps:$4 sm:$0xff]   ;;  %v15652_v28 = vld [vmem:[%s22237_s1 + $0x1688] ss:$16 sps:$4 sm:$0xff]  }
 0x298   :  { %5375 = vmatprep.subr.bf16.mxu0 %v15566_v29  ;;  %5908 = vmatprep.subr.bf16.mxu1 %v15569_v14  ;;  %v15657_v29 = vld [vmem:[%s22237_s1 + $0x16a4] ss:$16 sps:$4 sm:$0xff]   ;;  %v15660_v14 = vld [vmem:[%s22237_s1 + $0x16ac] ss:$16 sps:$4 sm:$0xff]  }
 0x29b   :  { %5376 = vmatpush1.bf16.msra.mxu0 %v15564_v30  ;;  %5909 = vmatpush1.bf16.msra.mxu1 %v15567_v31  ;;  %v15655_v30 = vld [vmem:[%s22237_s1 + $0x16a0] ss:$16 sps:$4 sm:$0xff]   ;;  %v15658_v31 = vld [vmem:[%s22237_s1 + $0x16a8] ss:$16 sps:$4 sm:$0xff]  }
 0x29c   :  { %5377 = vmatprep.subr.bf16.mxu0 %v15572_v25  ;;  %5910 = vmatprep.subr.bf16.mxu1 %v15575_v32  ;;  %v15663_v25 = vld [vmem:[%s22237_s1 + $0x16c4] ss:$16 sps:$4 sm:$0xff]   ;;  %v15666_v32 = vld [vmem:[%s22237_s1 + $0x16cc] ss:$16 sps:$4 sm:$0xff]  }
 0x29f   :  { %5378 = vmatpush1.bf16.msra.mxu0 %v15570_v33  ;;  %5911 = vmatpush1.bf16.msra.mxu1 %v15573_v26  ;;  %v15661_v33 = vld [vmem:[%s22237_s1 + $0x16c0] ss:$16 sps:$4 sm:$0xff]   ;;  %v15664_v26 = vld [vmem:[%s22237_s1 + $0x16c8] ss:$16 sps:$4 sm:$0xff]  }
 0x2a0   :  { %5379 = vmatprep.subr.bf16.mxu0 %v15578_v36  ;;  %5912 = vmatprep.subr.bf16.mxu1 %v15581_v37  ;;  %v15669_v36 = vld [vmem:[%s22237_s1 + $0x16e4] ss:$16 sps:$4 sm:$0xff]   ;;  %v15672_v37 = vld [vmem:[%s22237_s1 + $0x16ec] ss:$16 sps:$4 sm:$0xff]  }
 0x2a3   :  { %5380 = vmatpush1.bf16.msra.mxu0 %v15576_v21  ;;  %5913 = vmatpush1.bf16.msra.mxu1 %v15579_v39  ;;  %v15667_v21 = vld [vmem:[%s22237_s1 + $0x16e0] ss:$16 sps:$4 sm:$0xff]   ;;  %v15670_v39 = vld [vmem:[%s22237_s1 + $0x16e8] ss:$16 sps:$4 sm:$0xff]  }
 0x2a4   :  { %5381 = vmatprep.subr.bf16.mxu0 %v15584_v40  ;;  %5914 = vmatprep.subr.bf16.mxu1 %v15587_v41  ;;  %v15675_v40 = vld [vmem:[%s22237_s1 + $0x1704] ss:$16 sps:$4 sm:$0xff]   ;;  %v15678_v41 = vld [vmem:[%s22237_s1 + $0x170c] ss:$16 sps:$4 sm:$0xff]  }
 0x2a7   :  { %5382 = vmatpush1.bf16.msra.mxu0 %v15582_v34  ;;  %5915 = vmatpush1.bf16.msra.mxu1 %v15585_v43  ;;  %v15673_v34 = vld [vmem:[%s22237_s1 + $0x1700] ss:$16 sps:$4 sm:$0xff]   ;;  %v15676_v43 = vld [vmem:[%s22237_s1 + $0x1708] ss:$16 sps:$4 sm:$0xff]  }
 0x2a8   :  { %5383 = vmatprep.subr.bf16.mxu0 %v15590_v45  ;;  %5916 = vmatprep.subr.bf16.mxu1 %v15593_v46  ;;  %v15681_v45 = vld [vmem:[%s22237_s1 + $0x1724] ss:$16 sps:$4 sm:$0xff]   ;;  %v15684_v46 = vld [vmem:[%s22237_s1 + $0x172c] ss:$16 sps:$4 sm:$0xff]  }
 0x2ab   :  { %5384 = vmatpush1.bf16.msra.mxu0 %v15588_v35  ;;  %5917 = vmatpush1.bf16.msra.mxu1 %v15591_v50  ;;  %v15679_v35 = vld [vmem:[%s22237_s1 + $0x1720] ss:$16 sps:$4 sm:$0xff]   ;;  %v15682_v50 = vld [vmem:[%s22237_s1 + $0x1728] ss:$16 sps:$4 sm:$0xff]  }
 0x2ac   :  { %5385 = vmatprep.subr.bf16.mxu0 %v15596_v51  ;;  %5918 = vmatprep.subr.bf16.mxu1 %v15599_v53  ;;  %v15687_v51 = vld [vmem:[%s22237_s1 + $0x1744] ss:$16 sps:$4 sm:$0xff]   ;;  %v15690_v53 = vld [vmem:[%s22237_s1 + $0x174c] ss:$16 sps:$4 sm:$0xff]  }
 0x2af   :  { %5386 = vmatpush1.bf16.msra.mxu0 %v15594_v38  ;;  %5919 = vmatpush1.bf16.msra.mxu1 %v15597_v54  ;;  %v15685_v38 = vld [vmem:[%s22237_s1 + $0x1740] ss:$16 sps:$4 sm:$0xff]   ;;  %v15688_v54 = vld [vmem:[%s22237_s1 + $0x1748] ss:$16 sps:$4 sm:$0xff]  }
 0x2b0   :  { %5387 = vmatprep.subr.bf16.mxu0 %v15602_v55  ;;  %5920 = vmatprep.subr.bf16.mxu1 %v15605_v56  ;;  %v15693_v55 = vld [vmem:[%s22237_s1 + $0x1764] ss:$16 sps:$4 sm:$0xff]   ;;  %v15696_v56 = vld [vmem:[%s22237_s1 + $0x176c] ss:$16 sps:$4 sm:$0xff]  }
 0x2b3   :  { %5388 = vmatpush1.bf16.msra.mxu0 %v15600_v47  ;;  %5921 = vmatpush1.bf16.msra.mxu1 %v15603_v57  ;;  %v15691_v47 = vld [vmem:[%s22237_s1 + $0x1760] ss:$16 sps:$4 sm:$0xff]   ;;  %v15694_v57 = vld [vmem:[%s22237_s1 + $0x1768] ss:$16 sps:$4 sm:$0xff]  }
 0x2b4   :  { %5389 = vmatprep.subr.bf16.mxu0 %v15608_v58  ;;  %5922 = vmatprep.subr.bf16.mxu1 %v15611_v48  ;;  %v15699_v58 = vld [vmem:[%s22237_s1 + $0x1784] ss:$16 sps:$4 sm:$0xff]   ;;  %v15702_v48 = vld [vmem:[%s22237_s1 + $0x178c] ss:$16 sps:$4 sm:$0xff]  }
 0x2b7   :  { %5390 = vmatpush1.bf16.msra.mxu0 %v15606_v61  ;;  %5923 = vmatpush1.bf16.msra.mxu1 %v15609_v62  ;;  %v15697_v61 = vld [vmem:[%s22237_s1 + $0x1780] ss:$16 sps:$4 sm:$0xff]   ;;  %v15700_v62 = vld [vmem:[%s22237_s1 + $0x1788] ss:$16 sps:$4 sm:$0xff]  }
 0x2b8   :  { %5391 = vmatprep.subr.bf16.mxu0 %v15614_v44  ;;  %5924 = vmatprep.subr.bf16.mxu1 %v15617_v0  ;;  %v15705_v44 = vld [vmem:[%s22237_s1 + $0x17a4] ss:$16 sps:$4 sm:$0xff]   ;;  %v15708_v0 = vld [vmem:[%s22237_s1 + $0x17ac] ss:$16 sps:$4 sm:$0xff]  }
 0x2bb   :  { %5392 = vmatpush1.bf16.msra.mxu0 %v15612_v1  ;;  %5925 = vmatpush1.bf16.msra.mxu1 %v15615_v2  ;;  %v15703_v1 = vld [vmem:[%s22237_s1 + $0x17a0] ss:$16 sps:$4 sm:$0xff]   ;;  %v15706_v2 = vld [vmem:[%s22237_s1 + $0x17a8] ss:$16 sps:$4 sm:$0xff]  }
 0x2bc   :  { %5393 = vmatprep.subr.bf16.mxu0 %v15620_v59  ;;  %5926 = vmatprep.subr.bf16.mxu1 %v15623_v3  ;;  %v15711_v59 = vld [vmem:[%s22237_s1 + $0x17c4] ss:$16 sps:$4 sm:$0xff]   ;;  %v15714_v3 = vld [vmem:[%s22237_s1 + $0x17cc] ss:$16 sps:$4 sm:$0xff]  }
 0x2bf   :  { %5394 = vmatpush1.bf16.msra.mxu0 %v15618_v4  ;;  %5927 = vmatpush1.bf16.msra.mxu1 %v15621_v5  ;;  %v15709_v4 = vld [vmem:[%s22237_s1 + $0x17c0] ss:$16 sps:$4 sm:$0xff]   ;;  %v15712_v5 = vld [vmem:[%s22237_s1 + $0x17c8] ss:$16 sps:$4 sm:$0xff]  }
 0x2c0   :  { %5404 = vmatprep.subr.bf16.mxu0 %v15627_v6  ;;  %5937 = vmatprep.subr.bf16.mxu1 %v15630_v60  ;;  %v15717_v6 = vld [vmem:[%s22237_s1 + $0x17e4] ss:$16 sps:$4 sm:$0xff]   ;;  %v15720_v60 = vld [vmem:[%s22237_s1 + $0x17ec] ss:$16 sps:$4 sm:$0xff]  }
 0x2c2   :  { %5396 = vmatmul.mubr.bf16.vlgmr.msra.gmra.mrb[0].mxu0 %v19285_v10  ;;  %5929 = vmatmul.mubr.bf16.vlgmr.msra.gmra.mrb[0].mxu1 %v19285_v10 }
 0x2c3   :  { %5405 = vmatpush1.bf16.msra.mxu0 %v15625_v8  ;;  %5938 = vmatpush1.bf16.msra.mxu1 %v15628_v9  ;;  %v15715_v8 = vld [vmem:[%s22237_s1 + $0x17e0] ss:$16 sps:$4 sm:$0xff]   ;;  %v15718_v9 = vld [vmem:[%s22237_s1 + $0x17e8] ss:$16 sps:$4 sm:$0xff]  }
 0x2c4   :  { %5406 = vmatprep.subr.bf16.mxu0 %v15633_v11  ;;  %5939 = vmatprep.subr.bf16.mxu1 %v15636_v12  ;;  %v15723_v11 = vld [vmem:[%s22237_s1 + $0x1804] ss:$16 sps:$4 sm:$0xff]   ;;  %v15726_v12 = vld [vmem:[%s22237_s1 + $0x180c] ss:$16 sps:$4 sm:$0xff]  }
 0x2c5   :  { %5436 = vmatprep.mubr.bf16.mxu0 %v990_v15  ;;  %5969 = vmatprep.mubr.bf16.mxu1 %v990_v15  ;;  %v988_v15 = vcombine.high %v19285_v10, %v19285_v10  ;;  %v15730_v10 = vld [vmem:[%s22237_s1 + $0x1828] ss:$16 sps:$4 sm:$0xff]  }
 0x2c7   :  { %5407 = vmatpush1.bf16.msra.mxu0 %v15631_v52  ;;  %5940 = vmatpush1.bf16.msra.mxu1 %v15634_v63  ;;  %v15721_v52 = vld [vmem:[%s22237_s1 + $0x1800] ss:$16 sps:$4 sm:$0xff]   ;;  %v15724_v63 = vld [vmem:[%s22237_s1 + $0x1808] ss:$16 sps:$4 sm:$0xff]  }
 0x2c8   :  { %5408 = vmatprep.subr.bf16.mxu0 %v15639_v16  ;;  %5941 = vmatprep.subr.bf16.mxu1 %v15642_v17  ;;  %v15729_v16 = vld [vmem:[%s22237_s1 + $0x1824] ss:$16 sps:$4 sm:$0xff]   ;;  %v15732_v17 = vld [vmem:[%s22237_s1 + $0x182c] ss:$16 sps:$4 sm:$0xff]  }
 0x2cb   :  { %5409 = vmatpush1.bf16.msra.mxu0 %v15637_v7  ;;  %5942 = vmatpush1.bf16.msra.mxu1 %v15640_v18  ;;  %v15727_v7 = vld [vmem:[%s22237_s1 + $0x1820] ss:$16 sps:$4 sm:$0xff]   ;;  %v15735_v18 = vld [vmem:[%s22237_s1 + $0x1844] ss:$16 sps:$4 sm:$0xff]  }
 0x2cc   :  { %5410 = vmatprep.subr.bf16.mxu0 %v15645_v19  ;;  %5943 = vmatprep.subr.bf16.mxu1 %v15648_v20  ;;  %v15738_v19 = vld [vmem:[%s22237_s1 + $0x184c] ss:$16 sps:$4 sm:$0xff]   ;;  %v15733_v20 = vld [vmem:[%s22237_s1 + $0x1840] ss:$16 sps:$4 sm:$0xff]  }
 0x2cf   :  { %5411 = vmatpush1.bf16.msra.mxu0 %v15643_v22  ;;  %5944 = vmatpush1.bf16.msra.mxu1 %v15646_v23  ;;  %v15736_v22 = vld [vmem:[%s22237_s1 + $0x1848] ss:$16 sps:$4 sm:$0xff]   ;;  %v16990_v23 = vmov 0  }
 0x2d0   :  { %5412 = vmatprep.subr.bf16.mxu0 %v15651_v24  ;;  %5945 = vmatprep.subr.bf16.mxu1 %v15654_v13  ;;  %v15741_v24 = vld [vmem:[%s22237_s1 + $0x1864] ss:$16 sps:$4 sm:$0xff]   ;;  %v15744_v13 = vld [vmem:[%s22237_s1 + $0x186c] ss:$16 sps:$4 sm:$0xff]  }
 0x2d3   :  { %5413 = vmatpush1.bf16.msra.mxu0 %v15649_v27  ;;  %5946 = vmatpush1.bf16.msra.mxu1 %v15652_v28  ;;  %v15739_v27 = vld [vmem:[%s22237_s1 + $0x1860] ss:$16 sps:$4 sm:$0xff]   ;;  %v15742_v28 = vld [vmem:[%s22237_s1 + $0x1868] ss:$16 sps:$4 sm:$0xff]  }
 0x2d4   :  { %5414 = vmatprep.subr.bf16.mxu0 %v15657_v29  ;;  %5947 = vmatprep.subr.bf16.mxu1 %v15660_v14  ;;  %v12669_v29 = vld.sshfl [vmem:[%s22236_s0 + $0x18] sm:$0x1 pattern:$0x75316420]  ;;  %v15745_v14 = vld [vmem:[%s22239_s3 + $0x40] sm:$0xff]  }
 0x2d7   :  { %5415 = vmatpush1.bf16.msra.mxu0 %v15655_v30  ;;  %5948 = vmatpush1.bf16.msra.mxu1 %v15658_v31  ;;  %v15746_v30 = vld [vmem:[%s22239_s3 + $0xc0] sm:$0xff]  }
 0x2d8   :  { %5416 = vmatprep.subr.bf16.mxu0 %v15663_v25  ;;  %5949 = vmatprep.subr.bf16.mxu1 %v15666_v32  ;;  %v15747_v31 = vld [vmem:[%s22239_s3] sm:$0xff]   ;;  %v1004_v32 = vrot.slane %v12669_v29, %v17172_v49 }
 0x2d9   :  { %v15748_v25 = vld [vmem:[%s22239_s3 + $0x80] sm:$0xff]  }
 0x2db   :  { %5417 = vmatpush1.bf16.msra.mxu0 %v15661_v33  ;;  %5950 = vmatpush1.bf16.msra.mxu1 %v15664_v26  ;;  %v15749_v33 = vld [vmem:[%s22239_s3 + $0x48] sm:$0xff]  }
 0x2dc   :  { %5418 = vmatprep.subr.bf16.mxu0 %v15669_v36  ;;  %5951 = vmatprep.subr.bf16.mxu1 %v15672_v37  ;;  %v15750_v26 = vld [vmem:[%s22239_s3 + $0xc8] sm:$0xff]  }
 0x2dd   :  { %v15751_v36 = vld [vmem:[%s22239_s3 + $0x8] sm:$0xff]  }
 0x2de   :  { %v15752_v37 = vld [vmem:[%s22239_s3 + $0x88] sm:$0xff]  }
 0x2df   :  { %5419 = vmatpush1.bf16.msra.mxu0 %v15667_v21  ;;  %5952 = vmatpush1.bf16.msra.mxu1 %v15670_v39  ;;  %v15753_v21 = vld [vmem:[%s22239_s3 + $0x50] sm:$0xff]  }
 0x2e0   :  { %5420 = vmatprep.subr.bf16.mxu0 %v15675_v40  ;;  %5953 = vmatprep.subr.bf16.mxu1 %v15678_v41  ;;  %v15754_v39 = vld [vmem:[%s22239_s3 + $0xd0] sm:$0xff]  }
 0x2e1   :  { %v15755_v40 = vld [vmem:[%s22239_s3 + $0x10] sm:$0xff]  }
 0x2e2   :  { %v15756_v41 = vld [vmem:[%s22239_s3 + $0x90] sm:$0xff]  }
 0x2e3   :  { %5421 = vmatpush1.bf16.msra.mxu0 %v15673_v34  ;;  %5954 = vmatpush1.bf16.msra.mxu1 %v15676_v43  ;;  %v15757_v34 = vld [vmem:[%s22239_s3 + $0x58] sm:$0xff]  }
 0x2e4   :  { %5422 = vmatprep.subr.bf16.mxu0 %v15681_v45  ;;  %5955 = vmatprep.subr.bf16.mxu1 %v15684_v46  ;;  %v15758_v43 = vld [vmem:[%s22239_s3 + $0xd8] sm:$0xff]  }
 0x2e5   :  { %v15759_v45 = vld [vmem:[%s22239_s3 + $0x18] sm:$0xff]  }
 0x2e6   :  { %v15760_v46 = vld [vmem:[%s22239_s3 + $0x98] sm:$0xff]  }
 0x2e7   :  { %5423 = vmatpush1.bf16.msra.mxu0 %v15679_v35  ;;  %5956 = vmatpush1.bf16.msra.mxu1 %v15682_v50  ;;  %v15761_v35 = vld [vmem:[%s22239_s3 + $0x60] sm:$0xff]  }
 0x2e8   :  { %5424 = vmatprep.subr.bf16.mxu0 %v15687_v51  ;;  %5957 = vmatprep.subr.bf16.mxu1 %v15690_v53  ;;  %v15762_v50 = vld [vmem:[%s22239_s3 + $0xe0] sm:$0xff]  }
 0x2e9   :  { %v15763_v51 = vld [vmem:[%s22239_s3 + $0x20] sm:$0xff]  }
 0x2ea   :  { %v15764_v53 = vld [vmem:[%s22239_s3 + $0xa0] sm:$0xff]  }
 0x2eb   :  { %5425 = vmatpush1.bf16.msra.mxu0 %v15685_v38  ;;  %5958 = vmatpush1.bf16.msra.mxu1 %v15688_v54  ;;  %v15765_v38 = vld [vmem:[%s22239_s3 + $0x68] sm:$0xff]  }
 0x2ec   :  { %5426 = vmatprep.subr.bf16.mxu0 %v15693_v55  ;;  %5959 = vmatprep.subr.bf16.mxu1 %v15696_v56  ;;  %v15766_v54 = vld [vmem:[%s22239_s3 + $0xe8] sm:$0xff]  }
 0x2ed   :  { %v15767_v55 = vld [vmem:[%s22239_s3 + $0x28] sm:$0xff]  }
 0x2ee   :  { %v15768_v56 = vld [vmem:[%s22239_s3 + $0xa8] sm:$0xff]  }
 0x2ef   :  { %5427 = vmatpush1.bf16.msra.mxu0 %v15691_v47  ;;  %5960 = vmatpush1.bf16.msra.mxu1 %v15694_v57 }
 0x2f0   :  { %5428 = vmatprep.subr.bf16.mxu0 %v15699_v58  ;;  %5961 = vmatprep.subr.bf16.mxu1 %v15702_v48 }
 0x2f3   :  { %5429 = vmatpush1.bf16.msra.mxu0 %v15697_v61  ;;  %5962 = vmatpush1.bf16.msra.mxu1 %v15700_v62 }
 0x2f4   :  { %5430 = vmatprep.subr.bf16.mxu0 %v15705_v44  ;;  %5963 = vmatprep.subr.bf16.mxu1 %v15708_v0 }
 0x2f7   :  { %5431 = vmatpush1.bf16.msra.mxu0 %v15703_v1  ;;  %5964 = vmatpush1.bf16.msra.mxu1 %v15706_v2 }
 0x2f8   :  { %5432 = vmatprep.subr.bf16.mxu0 %v15711_v59  ;;  %5965 = vmatprep.subr.bf16.mxu1 %v15714_v3 }
 0x2fb   :  { %5433 = vmatpush1.bf16.msra.mxu0 %v15709_v4  ;;  %5966 = vmatpush1.bf16.msra.mxu1 %v15712_v5 }
 0x2fc   :  { %5434 = vmatprep.subr.bf16.mxu0 %v15717_v6  ;;  %5967 = vmatprep.subr.bf16.mxu1 %v15720_v60 }
 0x2ff   :  { %5435 = vmatpush1.bf16.msra.mxu0 %v15715_v8  ;;  %5968 = vmatpush1.bf16.msra.mxu1 %v15718_v9 }
 0x300   :  { %5445 = vmatprep.subr.bf16.mxu0 %v15723_v11  ;;  %5978 = vmatprep.subr.bf16.mxu1 %v15726_v12 }
 0x302   :  { %5437 = vmatmul.mubr.bf16.vlgmr.msra.gmra.mrb[0].mxu0 %v988_v15  ;;  %5970 = vmatmul.mubr.bf16.vlgmr.msra.gmra.mrb[0].mxu1 %v988_v15 }
 0x303   :  { %5446 = vmatpush1.bf16.msra.mxu0 %v15721_v52  ;;  %5979 = vmatpush1.bf16.msra.mxu1 %v15724_v63 }
 0x304   :  { %5447 = vmatprep.subr.bf16.mxu0 %v15729_v16  ;;  %5980 = vmatprep.subr.bf16.mxu1 %v15732_v17 }
 0x305   :  { %5477 = vmatprep.mubr.bf16.mxu0 %v16990_v23  ;;  %6010 = vmatprep.mubr.bf16.mxu1 %v16990_v23 }
 0x307   :  { %5448 = vmatpush1.bf16.msra.mxu0 %v15727_v7  ;;  %5981 = vmatpush1.bf16.msra.mxu1 %v15730_v10 }
 0x308   :  { %5449 = vmatprep.subr.bf16.mxu0 %v15735_v18  ;;  %5982 = vmatprep.subr.bf16.mxu1 %v15738_v19 }
 0x30b   :  { %5450 = vmatpush1.bf16.msra.mxu0 %v15733_v20  ;;  %5983 = vmatpush1.bf16.msra.mxu1 %v15736_v22 }
 0x30c   :  { %5451 = vmatprep.subr.bf16.mxu0 %v15741_v24  ;;  %5984 = vmatprep.subr.bf16.mxu1 %v15744_v13 }
 0x30f   :  { %5452 = vmatpush1.bf16.msra.mxu0 %v15739_v27  ;;  %5985 = vmatpush1.bf16.msra.mxu1 %v15742_v28 }
 0x310   :  { %14303 = vmatprep.subr.bf16.mxu0 %v15745_v14  ;;  %14325 = vmatprep.subr.bf16.mxu1 %v15746_v30 }
 0x312   :  { %13454 = vmatmul.mubr.msk.bf16.vlgmr.msra.gmra.mrb[0].mxu0 %vm4949_vm0, %v1004_v32  ;;  %13455 = vmatmul.mubr.msk.bf16.vlgmr.msra.gmra.mrb[0].mxu1 %vm4949_vm0, %v1004_v32 }
 0x313   :  { %14304 = vmatpush3.bf16.msra.mxu0 %v15747_v31  ;;  %14326 = vmatpush3.bf16.msra.mxu1 %v15748_v25 }
 0x314   :  { %14305 = vmatprep.subr.bf16.mxu0 %v15749_v33  ;;  %14327 = vmatprep.subr.bf16.mxu1 %v15750_v26 }
 0x317   :  { %14306 = vmatpush3.bf16.msra.mxu0 %v15751_v36  ;;  %14328 = vmatpush3.bf16.msra.mxu1 %v15752_v37 }
 0x318   :  { %14307 = vmatprep.subr.bf16.mxu0 %v15753_v21  ;;  %14329 = vmatprep.subr.bf16.mxu1 %v15754_v39 }
 0x31b   :  { %14308 = vmatpush3.bf16.msra.mxu0 %v15755_v40  ;;  %14330 = vmatpush3.bf16.msra.mxu1 %v15756_v41 }
 0x31c   :  { %14309 = vmatprep.subr.bf16.mxu0 %v15757_v34  ;;  %14331 = vmatprep.subr.bf16.mxu1 %v15758_v43 }
 0x31f   :  { %14310 = vmatpush3.bf16.msra.mxu0 %v15759_v45  ;;  %14332 = vmatpush3.bf16.msra.mxu1 %v15760_v46 }
 0x320   :  { %14311 = vmatprep.subr.bf16.mxu0 %v15761_v35  ;;  %14333 = vmatprep.subr.bf16.mxu1 %v15762_v50 }
 0x323   :  { %14312 = vmatpush3.bf16.msra.mxu0 %v15763_v51  ;;  %14334 = vmatpush3.bf16.msra.mxu1 %v15764_v53 }
 0x324   :  { %14313 = vmatprep.subr.bf16.mxu0 %v15765_v38  ;;  %14335 = vmatprep.subr.bf16.mxu1 %v15766_v54 }
 0x327   :  { %14314 = vmatpush3.bf16.msra.mxu0 %v15767_v55  ;;  %14336 = vmatpush3.bf16.msra.mxu1 %v15768_v56 }
 0x328   :  { %14 = vsyncpa [#allocation3], 0  ;;  %v15769_v47 = vld [vmem:[%s22239_s3 + $0x70] sm:$0xff]   ;;  %v15773_v61 = vld [vmem:[%s22239_s3 + $0x78] sm:$0xff]   ;;  %v19628_v59 = vsub.s32 0, %v17154_v42  ;;  %v19631_v3 = vsub.s32 2, %v17154_v42 }
 0x329   :  { %v15770_v57 = vld [vmem:[%s22239_s3 + $0xf0] sm:$0xff]   ;;  %14315 = vmatprep.subr.bf16.mxu0 %v15769_v47  ;;  %v15774_v62 = vld [vmem:[%s22239_s3 + $0xf8] sm:$0xff]   ;;  %v15779_v1 = vld [vmem:[%s22241_s5 + $0x4] ss:$100 sps:$4 sm:$0xff]   ;;  %v19637_v5 = vsub.s32 1, %v17154_v42  ;;  %v19640_v6 = vsub.s32 3, %v17154_v42 }
 0x32a   :  { %v15771_v58 = vld [vmem:[%s22239_s3 + $0x30] sm:$0xff]   ;;  %14337 = vmatprep.subr.bf16.mxu1 %v15770_v57  ;;  %v15775_v44 = vld [vmem:[%s22239_s3 + $0x38] sm:$0xff]   ;;  %v818_v4 = vld [vmem:[%s22238_s2] sm:$0xf] }
 0x32b   :  { %v15772_v48 = vld [vmem:[%s22239_s3 + $0xb0] sm:$0xff]   ;;  %14316 = vmatpush3.bf16.msra.mxu0 %v15771_v58  ;;  %v15776_v0 = vld [vmem:[%s22239_s3 + $0xb8] sm:$0xff]   ;;  %v823_v60 = vrot.slane %v818_v4, %v19628_v59  ;;  %v831_v8 = vrot.slane %v818_v4, %v19631_v3  ;;  %v827_v9 = vrot.slane %v818_v4, %v19637_v5  ;;  %v835_v11 = vrot.slane %v818_v4, %v19640_v6  ;;  %v15777_v14 = vld [vmem:[%s22241_s5] ss:$100 sps:$4 sm:$0xff]  }
 0x32c   :  { %14338 = vmatpush3.bf16.msra.mxu1 %v15772_v48  ;;  %14317 = vmatprep.subr.bf16.mxu0 %v15773_v61  ;;  %v15782_v2 = vld [vmem:[%s22241_s5 + $0xc] ss:$100 sps:$4 sm:$0xff]   ;;  %v15788_v33 = vld [vmem:[%s22241_s5 + $0xd4] ss:$100 sps:$4 sm:$0xff]   ;;  %v15794_v21 = vld [vmem:[%s22241_s5 + $0x19c] ss:$100 sps:$4 sm:$0xff]  }
 0x32d   :  { %14339 = vmatprep.subr.bf16.mxu1 %v15774_v62  ;;  %v15780_v30 = vld [vmem:[%s22241_s5 + $0x8] ss:$100 sps:$4 sm:$0xff]   ;;  %v15786_v36 = vld [vmem:[%s22241_s5 + $0xd0] ss:$100 sps:$4 sm:$0xff]   ;;  %v15792_v40 = vld [vmem:[%s22241_s5 + $0x198] ss:$100 sps:$4 sm:$0xff]  }
 0x32e   :  { %v15785_v32 = vld [vmem:[%s22241_s5 + $0xcc] ss:$100 sps:$4 sm:$0xff]   ;;  %v15791_v37 = vld [vmem:[%s22241_s5 + $0x194] ss:$100 sps:$4 sm:$0xff]   ;;  %v15797_v41 = vld [vmem:[%s22241_s5 + $0x25c] ss:$100 sps:$4 sm:$0xff]  }
 0x32f   :  { %14318 = vmatpush3.bf16.msra.mxu0 %v15775_v44  ;;  %v15783_v26 = vld [vmem:[%s22241_s5 + $0xc8] ss:$100 sps:$4 sm:$0xff]   ;;  %v15789_v39 = vld [vmem:[%s22241_s5 + $0x190] ss:$100 sps:$4 sm:$0xff]   ;;  %v15795_v43 = vld [vmem:[%s22241_s5 + $0x258] ss:$100 sps:$4 sm:$0xff]  }
 0x330   :  { %14340 = vmatpush3.bf16.msra.mxu1 %v15776_v0  ;;  %11368 = vmatprep.subr.bf16.mxu0 %v15779_v1  ;;  %v15800_v34 = vld [vmem:[%s22241_s5 + $0x264] ss:$100 sps:$4 sm:$0xff]   ;;  %v15806_v35 = vld [vmem:[%s22241_s5 + $0x32c] ss:$100 sps:$4 sm:$0xff]   ;;  %v15812_v38 = vld [vmem:[%s22241_s5 + $0x3f4] ss:$100 sps:$4 sm:$0xff]  }
 0x331   :  { %11450 = vmatprep.subr.bf16.mxu1 %v15782_v2  ;;  %v15798_v45 = vld [vmem:[%s22241_s5 + $0x260] ss:$100 sps:$4 sm:$0xff]   ;;  %v15804_v51 = vld [vmem:[%s22241_s5 + $0x328] ss:$100 sps:$4 sm:$0xff]   ;;  %v15810_v55 = vld [vmem:[%s22241_s5 + $0x3f0] ss:$100 sps:$4 sm:$0xff]  }
 0x332   :  { %v15803_v46 = vld [vmem:[%s22241_s5 + $0x324] ss:$100 sps:$4 sm:$0xff]   ;;  %v15809_v53 = vld [vmem:[%s22241_s5 + $0x3ec] ss:$100 sps:$4 sm:$0xff]   ;;  %v15815_v56 = vld [vmem:[%s22241_s5 + $0x4b4] ss:$100 sps:$4 sm:$0xff]  }
 0x333   :  { %v15801_v50 = vld [vmem:[%s22241_s5 + $0x320] ss:$100 sps:$4 sm:$0xff]   ;;  %v15807_v54 = vld [vmem:[%s22241_s5 + $0x3e8] ss:$100 sps:$4 sm:$0xff]   ;;  %v15813_v57 = vld [vmem:[%s22241_s5 + $0x4b0] ss:$100 sps:$4 sm:$0xff]  }
 0x334   :  { %v15818_v47 = vld [vmem:[%s22241_s5 + $0x4bc] ss:$100 sps:$4 sm:$0xff]   ;;  %v15824_v61 = vld [vmem:[%s22241_s5 + $0x584] ss:$100 sps:$4 sm:$0xff]   ;;  %v15830_v1 = vld [vmem:[%s22241_s5 + $0x64c] ss:$100 sps:$4 sm:$0xff]  }
 0x335   :  { %v15816_v58 = vld [vmem:[%s22241_s5 + $0x4b8] ss:$100 sps:$4 sm:$0xff]   ;;  %v15822_v44 = vld [vmem:[%s22241_s5 + $0x580] ss:$100 sps:$4 sm:$0xff]   ;;  %v15828_v4 = vld [vmem:[%s22241_s5 + $0x648] ss:$100 sps:$4 sm:$0xff]  }
 0x336   :  { %v15821_v48 = vld [vmem:[%s22241_s5 + $0x57c] ss:$100 sps:$4 sm:$0xff]   ;;  %v15827_v0 = vld [vmem:[%s22241_s5 + $0x644] ss:$100 sps:$4 sm:$0xff]  }
 0x337   :  { %v15819_v62 = vld [vmem:[%s22241_s5 + $0x578] ss:$100 sps:$4 sm:$0xff]   ;;  %v15825_v2 = vld [vmem:[%s22241_s5 + $0x640] ss:$100 sps:$4 sm:$0xff]  }
 0x3e5   :  { %v5479_v12 = vpop.f32.mrb[0].mxu0  ;;  %v6012_v52 = vpop.f32.mrb[0].mxu1 }
 0x3e6   :  { %v14391_v63 = vadd.f32 %v5479_v12, %v823_v60  ;;  %v14393_v15 = vadd.f32 %v6012_v52, %v831_v8  ;;  %v5481_v16 = vpop.f32.mrb[1].mxu0  ;;  %v6014_v17 = vpop.f32.mrb[1].mxu1  ;;  %v15833_v60 = vld [vmem:[%s22241_s5 + $0x70c] ss:$100 sps:$4 sm:$0xff]   ;;  %v15836_v8 = vld [vmem:[%s22241_s5 + $0x714] ss:$100 sps:$4 sm:$0xff]  }
 0x3e7   :  { %v14392_v7 = vadd.f32 %v5481_v16, %v827_v9  ;;  %v14394_v10 = vadd.f32 %v6014_v17, %v835_v11  ;;  %v5483_v18 = vpop.f32.mrb[2].mxu0  ;;  %v6016_v19 = vpop.f32.mrb[2].mxu1  ;;  %v15831_v9 = vld [vmem:[%s22241_s5 + $0x708] ss:$100 sps:$4 sm:$0xff]   ;;  %v15834_v11 = vld [vmem:[%s22241_s5 + $0x710] ss:$100 sps:$4 sm:$0xff]  }
 0x3e8   :  { %v6019_v20 = vmax.f32 %v14391_v63, 0.0  ;;  %v6021_v22 = vmax.f32 %v14393_v15, 0.0  ;;  %v5484_v23 = vpop.f32.mrb[3].mxu0  ;;  %v6017_v24 = vpop.f32.mrb[3].mxu1  ;;  %v15839_v12 = vld [vmem:[%s22241_s5 + $0x7d4] ss:$100 sps:$4 sm:$0xff]  }
 0x3e9   :  { %v6020_v13 = vmax.f32 %v14392_v7, 0.0  ;;  %v6022_v27 = vmax.f32 %v14394_v10, 0.0  ;;  %v15842_v52 = vld [vmem:[%s22241_s5 + $0x7dc] ss:$100 sps:$4 sm:$0xff]   ;;  %v15837_v63 = vld [vmem:[%s22241_s5 + $0x7d0] ss:$100 sps:$4 sm:$0xff]  }
 0x3ea   :  { %v19656_v31 = vpack.c.bf16 %v6019_v20, %v6019_v20  ;;  %v19658_v25 = vpack.c.bf16 %v6021_v22, %v6021_v22  ;;  %v15840_v15 = vld [vmem:[%s22241_s5 + $0x7d8] ss:$100 sps:$4 sm:$0xff]   ;;  %v15848_v17 = vld [vmem:[%s22241_s5 + $0x8a4] ss:$100 sps:$4 sm:$0xff]   ;;  %v15854_v19 = vld [vmem:[%s22241_s5 + $0x96c] ss:$100 sps:$4 sm:$0xff]  }
 0x3eb   :  { %v19646_v28 = vpack.c.bf16 %v6020_v13, %v6020_v13  ;;  %v19648_v29 = vpack.c.bf16 %v6022_v27, %v6022_v27  ;;  %v15845_v16 = vld [vmem:[%s22241_s5 + $0x89c] ss:$100 sps:$4 sm:$0xff]   ;;  %v15851_v18 = vld [vmem:[%s22241_s5 + $0x964] ss:$100 sps:$4 sm:$0xff]   ;;  %v15857_v23 = vld [vmem:[%s22241_s5 + $0xa2c] ss:$100 sps:$4 sm:$0xff]  }
 0x3ec   :  { %v15843_v7 = vld [vmem:[%s22241_s5 + $0x898] ss:$100 sps:$4 sm:$0xff]   ;;  %v15846_v10 = vld [vmem:[%s22241_s5 + $0x8a0] ss:$100 sps:$4 sm:$0xff]   ;;  %v15852_v22 = vld [vmem:[%s22241_s5 + $0x968] ss:$100 sps:$4 sm:$0xff]  }
 0x3ed   :  { %6322 = vmatprep.mubr.bf16.mxu0 %v19646_v28  ;;  %6362 = vmatprep.mubr.bf16.mxu1 %v19648_v29  ;;  %v15849_v20 = vld [vmem:[%s22241_s5 + $0x960] ss:$100 sps:$4 sm:$0xff]   ;;  %v15860_v24 = vld [vmem:[%s22241_s5 + $0xa34] ss:$100 sps:$4 sm:$0xff]   ;;  %v15855_v13 = vld [vmem:[%s22241_s5 + $0xa28] ss:$100 sps:$4 sm:$0xff]  }
 0x3ee   :  { %6323 = vmatmul.mubr.bf16.vlgmr.msra.gmra.mrb[4].mxu0 %v19656_v31  ;;  %6363 = vmatmul.mubr.bf16.vlgmr.msra.gmra.mrb[4].mxu1 %v19658_v25  ;;  %v15858_v27 = vld [vmem:[%s22241_s5 + $0xa30] ss:$100 sps:$4 sm:$0xff]  }
 0x3ef   :  { %11369 = vmatpush1.bf16.msra.mxu0 %v15777_v14  ;;  %11451 = vmatpush1.bf16.msra.mxu1 %v15780_v30  ;;  %v15863_v14 = vld [vmem:[%s22241_s5 + $0xaf4] ss:$100 sps:$4 sm:$0xff]   ;;  %v15866_v30 = vld [vmem:[%s22241_s5 + $0xafc] ss:$100 sps:$4 sm:$0xff]  }
 0x3f0   :  { %11400 = vmatprep.mubr.bf16.mxu0 %v19646_v28  ;;  %11482 = vmatprep.mubr.bf16.mxu1 %v19646_v28 }
 0x3f1   :  { %11370 = vmatprep.subr.bf16.mxu0 %v15785_v32  ;;  %11452 = vmatprep.subr.bf16.mxu1 %v15788_v33  ;;  %v15861_v32 = vld [vmem:[%s22241_s5 + $0xaf0] ss:$100 sps:$4 sm:$0xff]   ;;  %v15864_v33 = vld [vmem:[%s22241_s5 + $0xaf8] ss:$100 sps:$4 sm:$0xff]  }
 0x3f3   :  { %11371 = vmatpush1.bf16.msra.mxu0 %v15783_v26  ;;  %11453 = vmatpush1.bf16.msra.mxu1 %v15786_v36  ;;  %v15869_v26 = vld [vmem:[%s22241_s5 + $0xbbc] ss:$100 sps:$4 sm:$0xff]   ;;  %v15872_v36 = vld [vmem:[%s22241_s5 + $0xbc4] ss:$100 sps:$4 sm:$0xff]  }
 0x3f4   :  { %11372 = vmatprep.subr.bf16.mxu0 %v15791_v37  ;;  %11454 = vmatprep.subr.bf16.mxu1 %v15794_v21  ;;  %v15867_v37 = vld [vmem:[%s22241_s5 + $0xbb8] ss:$100 sps:$4 sm:$0xff]   ;;  %v15870_v21 = vld [vmem:[%s22241_s5 + $0xbc0] ss:$100 sps:$4 sm:$0xff]  }
 0x3f7   :  { %11373 = vmatpush1.bf16.msra.mxu0 %v15789_v39  ;;  %11455 = vmatpush1.bf16.msra.mxu1 %v15792_v40  ;;  %v15875_v39 = vld [vmem:[%s22241_s5 + $0xc84] ss:$100 sps:$4 sm:$0xff]   ;;  %v15878_v40 = vld [vmem:[%s22241_s5 + $0xc8c] ss:$100 sps:$4 sm:$0xff]  }
 0x3f8   :  { %11374 = vmatprep.subr.bf16.mxu0 %v15797_v41  ;;  %11456 = vmatprep.subr.bf16.mxu1 %v15800_v34  ;;  %v15873_v41 = vld [vmem:[%s22241_s5 + $0xc80] ss:$100 sps:$4 sm:$0xff]   ;;  %v15876_v34 = vld [vmem:[%s22241_s5 + $0xc88] ss:$100 sps:$4 sm:$0xff]  }
 0x3fb   :  { %11375 = vmatpush1.bf16.msra.mxu0 %v15795_v43  ;;  %11457 = vmatpush1.bf16.msra.mxu1 %v15798_v45  ;;  %v15881_v43 = vld [vmem:[%s22241_s5 + $0xd4c] ss:$100 sps:$4 sm:$0xff]   ;;  %v15884_v45 = vld [vmem:[%s22241_s5 + $0xd54] ss:$100 sps:$4 sm:$0xff]  }
 0x3fc   :  { %11376 = vmatprep.subr.bf16.mxu0 %v15803_v46  ;;  %11458 = vmatprep.subr.bf16.mxu1 %v15806_v35  ;;  %v15879_v46 = vld [vmem:[%s22241_s5 + $0xd48] ss:$100 sps:$4 sm:$0xff]   ;;  %v15882_v35 = vld [vmem:[%s22241_s5 + $0xd50] ss:$100 sps:$4 sm:$0xff]  }
 0x3ff   :  { %11377 = vmatpush1.bf16.msra.mxu0 %v15801_v50  ;;  %11459 = vmatpush1.bf16.msra.mxu1 %v15804_v51  ;;  %v15887_v50 = vld [vmem:[%s22241_s5 + $0xe14] ss:$100 sps:$4 sm:$0xff]   ;;  %v15890_v51 = vld [vmem:[%s22241_s5 + $0xe1c] ss:$100 sps:$4 sm:$0xff]  }
 0x400   :  { %11378 = vmatprep.subr.bf16.mxu0 %v15809_v53  ;;  %11460 = vmatprep.subr.bf16.mxu1 %v15812_v38  ;;  %v15885_v53 = vld [vmem:[%s22241_s5 + $0xe10] ss:$100 sps:$4 sm:$0xff]   ;;  %v15888_v38 = vld [vmem:[%s22241_s5 + $0xe18] ss:$100 sps:$4 sm:$0xff]  }
 0x403   :  { %11379 = vmatpush1.bf16.msra.mxu0 %v15807_v54  ;;  %11461 = vmatpush1.bf16.msra.mxu1 %v15810_v55  ;;  %v15893_v54 = vld [vmem:[%s22241_s5 + $0xedc] ss:$100 sps:$4 sm:$0xff]   ;;  %v15896_v55 = vld [vmem:[%s22241_s5 + $0xee4] ss:$100 sps:$4 sm:$0xff]  }
 0x404   :  { %11380 = vmatprep.subr.bf16.mxu0 %v15815_v56  ;;  %11462 = vmatprep.subr.bf16.mxu1 %v15818_v47  ;;  %v15891_v56 = vld [vmem:[%s22241_s5 + $0xed8] ss:$100 sps:$4 sm:$0xff]   ;;  %v15894_v47 = vld [vmem:[%s22241_s5 + $0xee0] ss:$100 sps:$4 sm:$0xff]  }
 0x407   :  { %11381 = vmatpush1.bf16.msra.mxu0 %v15813_v57  ;;  %11463 = vmatpush1.bf16.msra.mxu1 %v15816_v58  ;;  %v15899_v57 = vld [vmem:[%s22241_s5 + $0xfa4] ss:$100 sps:$4 sm:$0xff]   ;;  %v15902_v58 = vld [vmem:[%s22241_s5 + $0xfac] ss:$100 sps:$4 sm:$0xff]  }
 0x408   :  { %11382 = vmatprep.subr.bf16.mxu0 %v15821_v48  ;;  %11464 = vmatprep.subr.bf16.mxu1 %v15824_v61  ;;  %v15897_v48 = vld [vmem:[%s22241_s5 + $0xfa0] ss:$100 sps:$4 sm:$0xff]   ;;  %v15900_v61 = vld [vmem:[%s22241_s5 + $0xfa8] ss:$100 sps:$4 sm:$0xff]  }
 0x40b   :  { %11383 = vmatpush1.bf16.msra.mxu0 %v15819_v62  ;;  %11465 = vmatpush1.bf16.msra.mxu1 %v15822_v44  ;;  %v15905_v62 = vld [vmem:[%s22241_s5 + $0x106c] ss:$100 sps:$4 sm:$0xff]   ;;  %v15908_v44 = vld [vmem:[%s22241_s5 + $0x1074] ss:$100 sps:$4 sm:$0xff]  }
 0x40c   :  { %11384 = vmatprep.subr.bf16.mxu0 %v15827_v0  ;;  %11466 = vmatprep.subr.bf16.mxu1 %v15830_v1  ;;  %v15903_v0 = vld [vmem:[%s22241_s5 + $0x1068] ss:$100 sps:$4 sm:$0xff]   ;;  %v15906_v1 = vld [vmem:[%s22241_s5 + $0x1070] ss:$100 sps:$4 sm:$0xff]  }
 0x40f   :  { %11385 = vmatpush1.bf16.msra.mxu0 %v15825_v2  ;;  %11467 = vmatpush1.bf16.msra.mxu1 %v15828_v4  ;;  %v15911_v2 = vld [vmem:[%s22241_s5 + $0x1134] ss:$100 sps:$4 sm:$0xff]   ;;  %v15914_v4 = vld [vmem:[%s22241_s5 + $0x113c] ss:$100 sps:$4 sm:$0xff]  }
 0x410   :  { %11386 = vmatprep.subr.bf16.mxu0 %v15833_v60  ;;  %11468 = vmatprep.subr.bf16.mxu1 %v15836_v8  ;;  %v15909_v60 = vld [vmem:[%s22241_s5 + $0x1130] ss:$100 sps:$4 sm:$0xff]   ;;  %v15912_v8 = vld [vmem:[%s22241_s5 + $0x1138] ss:$100 sps:$4 sm:$0xff]  }
 0x413   :  { %11387 = vmatpush1.bf16.msra.mxu0 %v15831_v9  ;;  %11469 = vmatpush1.bf16.msra.mxu1 %v15834_v11  ;;  %v15917_v9 = vld [vmem:[%s22241_s5 + $0x11fc] ss:$100 sps:$4 sm:$0xff]   ;;  %v15920_v11 = vld [vmem:[%s22241_s5 + $0x1204] ss:$100 sps:$4 sm:$0xff]  }
 0x414   :  { %11388 = vmatprep.subr.bf16.mxu0 %v15839_v12  ;;  %11470 = vmatprep.subr.bf16.mxu1 %v15842_v52  ;;  %v15915_v12 = vld [vmem:[%s22241_s5 + $0x11f8] ss:$100 sps:$4 sm:$0xff]   ;;  %v15918_v52 = vld [vmem:[%s22241_s5 + $0x1200] ss:$100 sps:$4 sm:$0xff]  }
 0x417   :  { %11389 = vmatpush1.bf16.msra.mxu0 %v15837_v63  ;;  %11471 = vmatpush1.bf16.msra.mxu1 %v15840_v15  ;;  %v15923_v63 = vld [vmem:[%s22241_s5 + $0x12c4] ss:$100 sps:$4 sm:$0xff]   ;;  %v15926_v15 = vld [vmem:[%s22241_s5 + $0x12cc] ss:$100 sps:$4 sm:$0xff]  }
 0x418   :  { %11390 = vmatprep.subr.bf16.mxu0 %v15845_v16  ;;  %11472 = vmatprep.subr.bf16.mxu1 %v15848_v17  ;;  %v15921_v16 = vld [vmem:[%s22241_s5 + $0x12c0] ss:$100 sps:$4 sm:$0xff]   ;;  %v15924_v17 = vld [vmem:[%s22241_s5 + $0x12c8] ss:$100 sps:$4 sm:$0xff]  }
 0x41b   :  { %11391 = vmatpush1.bf16.msra.mxu0 %v15843_v7  ;;  %11473 = vmatpush1.bf16.msra.mxu1 %v15846_v10  ;;  %v15929_v7 = vld [vmem:[%s22241_s5 + $0x138c] ss:$100 sps:$4 sm:$0xff]   ;;  %v15932_v10 = vld [vmem:[%s22241_s5 + $0x1394] ss:$100 sps:$4 sm:$0xff]  }
 0x41c   :  { %11392 = vmatprep.subr.bf16.mxu0 %v15851_v18  ;;  %11474 = vmatprep.subr.bf16.mxu1 %v15854_v19  ;;  %v15927_v18 = vld [vmem:[%s22241_s5 + $0x1388] ss:$100 sps:$4 sm:$0xff]   ;;  %v15930_v19 = vld [vmem:[%s22241_s5 + $0x1390] ss:$100 sps:$4 sm:$0xff]  }
 0x41f   :  { %11393 = vmatpush1.bf16.msra.mxu0 %v15849_v20  ;;  %11475 = vmatpush1.bf16.msra.mxu1 %v15852_v22  ;;  %v15935_v20 = vld [vmem:[%s22241_s5 + $0x1454] ss:$100 sps:$4 sm:$0xff]   ;;  %v15938_v22 = vld [vmem:[%s22241_s5 + $0x145c] ss:$100 sps:$4 sm:$0xff]  }
 0x420   :  { %11394 = vmatprep.subr.bf16.mxu0 %v15857_v23  ;;  %11476 = vmatprep.subr.bf16.mxu1 %v15860_v24  ;;  %v15933_v23 = vld [vmem:[%s22241_s5 + $0x1450] ss:$100 sps:$4 sm:$0xff]   ;;  %v15936_v24 = vld [vmem:[%s22241_s5 + $0x1458] ss:$100 sps:$4 sm:$0xff]  }
 0x423   :  { %11395 = vmatpush1.bf16.msra.mxu0 %v15855_v13  ;;  %11477 = vmatpush1.bf16.msra.mxu1 %v15858_v27  ;;  %v15941_v13 = vld [vmem:[%s22241_s5 + $0x151c] ss:$100 sps:$4 sm:$0xff]   ;;  %v15944_v27 = vld [vmem:[%s22241_s5 + $0x1524] ss:$100 sps:$4 sm:$0xff]  }
 0x424   :  { %11396 = vmatprep.subr.bf16.mxu0 %v15863_v14  ;;  %11478 = vmatprep.subr.bf16.mxu1 %v15866_v30  ;;  %v15939_v14 = vld [vmem:[%s22241_s5 + $0x1518] ss:$100 sps:$4 sm:$0xff]   ;;  %v15942_v30 = vld [vmem:[%s22241_s5 + $0x1520] ss:$100 sps:$4 sm:$0xff]  }
 0x427   :  { %11397 = vmatpush1.bf16.msra.mxu0 %v15861_v32  ;;  %11479 = vmatpush1.bf16.msra.mxu1 %v15864_v33  ;;  %v15947_v32 = vld [vmem:[%s22241_s5 + $0x15e4] ss:$100 sps:$4 sm:$0xff]   ;;  %v15950_v33 = vld [vmem:[%s22241_s5 + $0x15ec] ss:$100 sps:$4 sm:$0xff]  }
 0x428   :  { %11398 = vmatprep.subr.bf16.mxu0 %v15869_v26  ;;  %11480 = vmatprep.subr.bf16.mxu1 %v15872_v36  ;;  %v15945_v26 = vld [vmem:[%s22241_s5 + $0x15e0] ss:$100 sps:$4 sm:$0xff]   ;;  %v15948_v36 = vld [vmem:[%s22241_s5 + $0x15e8] ss:$100 sps:$4 sm:$0xff]  }
 0x42b   :  { %11399 = vmatpush1.bf16.msra.mxu0 %v15867_v37  ;;  %11481 = vmatpush1.bf16.msra.mxu1 %v15870_v21  ;;  %v15953_v37 = vld [vmem:[%s22241_s5 + $0x16ac] ss:$100 sps:$4 sm:$0xff]   ;;  %v15956_v21 = vld [vmem:[%s22241_s5 + $0x16b4] ss:$100 sps:$4 sm:$0xff]  }
 0x42c   :  { %11409 = vmatprep.subr.bf16.mxu0 %v15875_v39  ;;  %11491 = vmatprep.subr.bf16.mxu1 %v15878_v40  ;;  %v15951_v39 = vld [vmem:[%s22241_s5 + $0x16a8] ss:$100 sps:$4 sm:$0xff]   ;;  %v15954_v40 = vld [vmem:[%s22241_s5 + $0x16b0] ss:$100 sps:$4 sm:$0xff]  }
 0x42e   :  { %11401 = vmatmul.mubr.bf16.vlgmr.msra.gmra.mrb[8].mxu0 %v19656_v31  ;;  %11483 = vmatmul.mubr.bf16.vlgmr.msra.gmra.mrb[8].mxu1 %v19656_v31 }
 0x42f   :  { %11410 = vmatpush1.bf16.msra.mxu0 %v15873_v41  ;;  %11441 = vmatprep.mubr.bf16.mxu0 %v19648_v29  ;;  %v15959_v41 = vld [vmem:[%s22241_s5 + $0x1774] ss:$100 sps:$4 sm:$0xff]  }
 0x430   :  { %11492 = vmatpush1.bf16.msra.mxu1 %v15876_v34  ;;  %11523 = vmatprep.mubr.bf16.mxu1 %v19648_v29  ;;  %v15962_v34 = vld [vmem:[%s22241_s5 + $0x177c] ss:$100 sps:$4 sm:$0xff]  }
 0x431   :  { %11411 = vmatprep.subr.bf16.mxu0 %v15881_v43  ;;  %11493 = vmatprep.subr.bf16.mxu1 %v15884_v45  ;;  %v15957_v43 = vld [vmem:[%s22241_s5 + $0x1770] ss:$100 sps:$4 sm:$0xff]   ;;  %v15960_v45 = vld [vmem:[%s22241_s5 + $0x1778] ss:$100 sps:$4 sm:$0xff]  }
 0x433   :  { %11412 = vmatpush1.bf16.msra.mxu0 %v15879_v46  ;;  %v15965_v46 = vld [vmem:[%s22241_s5 + $0x183c] ss:$100 sps:$4 sm:$0xff]  }
 0x434   :  { %11494 = vmatpush1.bf16.msra.mxu1 %v15882_v35  ;;  %11413 = vmatprep.subr.bf16.mxu0 %v15887_v50  ;;  %v15968_v35 = vld [vmem:[%s22241_s5 + $0x1844] ss:$100 sps:$4 sm:$0xff]   ;;  %v15963_v50 = vld [vmem:[%s22241_s5 + $0x1838] ss:$100 sps:$4 sm:$0xff]  }
 0x435   :  { %11495 = vmatprep.subr.bf16.mxu1 %v15890_v51  ;;  %v15966_v51 = vld [vmem:[%s22241_s5 + $0x1840] ss:$100 sps:$4 sm:$0xff]  }
 0x437   :  { %11414 = vmatpush1.bf16.msra.mxu0 %v15885_v53  ;;  %v15971_v53 = vld [vmem:[%s22241_s5 + $0x14] ss:$100 sps:$4 sm:$0xff]  }
 0x438   :  { %11496 = vmatpush1.bf16.msra.mxu1 %v15888_v38  ;;  %11415 = vmatprep.subr.bf16.mxu0 %v15893_v54  ;;  %v15974_v38 = vld [vmem:[%s22241_s5 + $0x1c] ss:$100 sps:$4 sm:$0xff]   ;;  %v15969_v54 = vld [vmem:[%s22241_s5 + $0x10] ss:$100 sps:$4 sm:$0xff]  }
 0x439   :  { %11497 = vmatprep.subr.bf16.mxu1 %v15896_v55  ;;  %v15972_v55 = vld [vmem:[%s22241_s5 + $0x18] ss:$100 sps:$4 sm:$0xff]  }
 0x43b   :  { %11416 = vmatpush1.bf16.msra.mxu0 %v15891_v56  ;;  %v15977_v56 = vld [vmem:[%s22241_s5 + $0xdc] ss:$100 sps:$4 sm:$0xff]  }
 0x43c   :  { %11498 = vmatpush1.bf16.msra.mxu1 %v15894_v47  ;;  %11417 = vmatprep.subr.bf16.mxu0 %v15899_v57  ;;  %v15980_v47 = vld [vmem:[%s22241_s5 + $0xe4] ss:$100 sps:$4 sm:$0xff]   ;;  %v15975_v57 = vld [vmem:[%s22241_s5 + $0xd8] ss:$100 sps:$4 sm:$0xff]  }
 0x43d   :  { %11499 = vmatprep.subr.bf16.mxu1 %v15902_v58  ;;  %v15978_v58 = vld [vmem:[%s22241_s5 + $0xe0] ss:$100 sps:$4 sm:$0xff]  }
 0x43f   :  { %11418 = vmatpush1.bf16.msra.mxu0 %v15897_v48  ;;  %v15983_v48 = vld [vmem:[%s22241_s5 + $0x1a4] ss:$100 sps:$4 sm:$0xff]  }
 0x440   :  { %11500 = vmatpush1.bf16.msra.mxu1 %v15900_v61  ;;  %11419 = vmatprep.subr.bf16.mxu0 %v15905_v62  ;;  %v15986_v61 = vld [vmem:[%s22241_s5 + $0x1ac] ss:$100 sps:$4 sm:$0xff]   ;;  %v15981_v62 = vld [vmem:[%s22241_s5 + $0x1a0] ss:$100 sps:$4 sm:$0xff]  }
 0x441   :  { %11501 = vmatprep.subr.bf16.mxu1 %v15908_v44  ;;  %v15984_v44 = vld [vmem:[%s22241_s5 + $0x1a8] ss:$100 sps:$4 sm:$0xff]  }
 0x443   :  { %11420 = vmatpush1.bf16.msra.mxu0 %v15903_v0  ;;  %v15989_v0 = vld [vmem:[%s22241_s5 + $0x26c] ss:$100 sps:$4 sm:$0xff]  }
 0x444   :  { %11502 = vmatpush1.bf16.msra.mxu1 %v15906_v1  ;;  %11421 = vmatprep.subr.bf16.mxu0 %v15911_v2  ;;  %v15992_v1 = vld [vmem:[%s22241_s5 + $0x274] ss:$100 sps:$4 sm:$0xff]   ;;  %v15987_v2 = vld [vmem:[%s22241_s5 + $0x268] ss:$100 sps:$4 sm:$0xff]  }
 0x445   :  { %11503 = vmatprep.subr.bf16.mxu1 %v15914_v4  ;;  %v15990_v4 = vld [vmem:[%s22241_s5 + $0x270] ss:$100 sps:$4 sm:$0xff]  }
 0x447   :  { %11422 = vmatpush1.bf16.msra.mxu0 %v15909_v60  ;;  %v15995_v60 = vld [vmem:[%s22241_s5 + $0x334] ss:$100 sps:$4 sm:$0xff]  }
 0x448   :  { %11504 = vmatpush1.bf16.msra.mxu1 %v15912_v8  ;;  %11423 = vmatprep.subr.bf16.mxu0 %v15917_v9  ;;  %v15998_v8 = vld [vmem:[%s22241_s5 + $0x33c] ss:$100 sps:$4 sm:$0xff]   ;;  %v15993_v9 = vld [vmem:[%s22241_s5 + $0x330] ss:$100 sps:$4 sm:$0xff]  }
 0x449   :  { %11505 = vmatprep.subr.bf16.mxu1 %v15920_v11  ;;  %v15996_v11 = vld [vmem:[%s22241_s5 + $0x338] ss:$100 sps:$4 sm:$0xff]  }
 0x44b   :  { %11424 = vmatpush1.bf16.msra.mxu0 %v15915_v12  ;;  %v16001_v12 = vld [vmem:[%s22241_s5 + $0x3fc] ss:$100 sps:$4 sm:$0xff]  }
 0x44c   :  { %11506 = vmatpush1.bf16.msra.mxu1 %v15918_v52  ;;  %11425 = vmatprep.subr.bf16.mxu0 %v15923_v63  ;;  %v16004_v52 = vld [vmem:[%s22241_s5 + $0x404] ss:$100 sps:$4 sm:$0xff]   ;;  %v15999_v63 = vld [vmem:[%s22241_s5 + $0x3f8] ss:$100 sps:$4 sm:$0xff]  }
 0x44d   :  { %11507 = vmatprep.subr.bf16.mxu1 %v15926_v15  ;;  %v16002_v15 = vld [vmem:[%s22241_s5 + $0x400] ss:$100 sps:$4 sm:$0xff]  }
 0x44f   :  { %11426 = vmatpush1.bf16.msra.mxu0 %v15921_v16  ;;  %v16007_v16 = vld [vmem:[%s22241_s5 + $0x4c4] ss:$100 sps:$4 sm:$0xff]  }
 0x450   :  { %11508 = vmatpush1.bf16.msra.mxu1 %v15924_v17  ;;  %11427 = vmatprep.subr.bf16.mxu0 %v15929_v7  ;;  %v16010_v17 = vld [vmem:[%s22241_s5 + $0x4cc] ss:$100 sps:$4 sm:$0xff]   ;;  %v16005_v7 = vld [vmem:[%s22241_s5 + $0x4c0] ss:$100 sps:$4 sm:$0xff]  }
 0x451   :  { %11509 = vmatprep.subr.bf16.mxu1 %v15932_v10  ;;  %v16008_v10 = vld [vmem:[%s22241_s5 + $0x4c8] ss:$100 sps:$4 sm:$0xff]  }
 0x453   :  { %11428 = vmatpush1.bf16.msra.mxu0 %v15927_v18  ;;  %v16013_v18 = vld [vmem:[%s22241_s5 + $0x58c] ss:$100 sps:$4 sm:$0xff]  }
 0x454   :  { %11510 = vmatpush1.bf16.msra.mxu1 %v15930_v19  ;;  %11429 = vmatprep.subr.bf16.mxu0 %v15935_v20  ;;  %v16016_v19 = vld [vmem:[%s22241_s5 + $0x594] ss:$100 sps:$4 sm:$0xff]   ;;  %v16011_v20 = vld [vmem:[%s22241_s5 + $0x588] ss:$100 sps:$4 sm:$0xff]  }
 0x455   :  { %11511 = vmatprep.subr.bf16.mxu1 %v15938_v22  ;;  %v16014_v22 = vld [vmem:[%s22241_s5 + $0x590] ss:$100 sps:$4 sm:$0xff]  }
 0x457   :  { %11430 = vmatpush1.bf16.msra.mxu0 %v15933_v23  ;;  %v16019_v23 = vld [vmem:[%s22241_s5 + $0x654] ss:$100 sps:$4 sm:$0xff]  }
 0x458   :  { %11512 = vmatpush1.bf16.msra.mxu1 %v15936_v24  ;;  %11431 = vmatprep.subr.bf16.mxu0 %v15941_v13  ;;  %v16022_v24 = vld [vmem:[%s22241_s5 + $0x65c] ss:$100 sps:$4 sm:$0xff]   ;;  %v16017_v13 = vld [vmem:[%s22241_s5 + $0x650] ss:$100 sps:$4 sm:$0xff]  }
 0x459   :  { %11513 = vmatprep.subr.bf16.mxu1 %v15944_v27  ;;  %v16020_v27 = vld [vmem:[%s22241_s5 + $0x658] ss:$100 sps:$4 sm:$0xff]  }
 0x45b   :  { %11432 = vmatpush1.bf16.msra.mxu0 %v15939_v14  ;;  %v16025_v14 = vld [vmem:[%s22241_s5 + $0x71c] ss:$100 sps:$4 sm:$0xff]  }
 0x45c   :  { %11514 = vmatpush1.bf16.msra.mxu1 %v15942_v30  ;;  %11433 = vmatprep.subr.bf16.mxu0 %v15947_v32  ;;  %v16028_v30 = vld [vmem:[%s22241_s5 + $0x724] ss:$100 sps:$4 sm:$0xff]   ;;  %v16023_v32 = vld [vmem:[%s22241_s5 + $0x718] ss:$100 sps:$4 sm:$0xff]  }
 0x45d   :  { %11515 = vmatprep.subr.bf16.mxu1 %v15950_v33  ;;  %v16026_v33 = vld [vmem:[%s22241_s5 + $0x720] ss:$100 sps:$4 sm:$0xff]  }
 0x45f   :  { %11434 = vmatpush1.bf16.msra.mxu0 %v15945_v26  ;;  %v16031_v26 = vld [vmem:[%s22241_s5 + $0x7e4] ss:$100 sps:$4 sm:$0xff]  }
 0x460   :  { %11516 = vmatpush1.bf16.msra.mxu1 %v15948_v36  ;;  %11435 = vmatprep.subr.bf16.mxu0 %v15953_v37  ;;  %v16034_v36 = vld [vmem:[%s22241_s5 + $0x7ec] ss:$100 sps:$4 sm:$0xff]   ;;  %v16029_v37 = vld [vmem:[%s22241_s5 + $0x7e0] ss:$100 sps:$4 sm:$0xff]  }
 0x461   :  { %11517 = vmatprep.subr.bf16.mxu1 %v15956_v21  ;;  %v16032_v21 = vld [vmem:[%s22241_s5 + $0x7e8] ss:$100 sps:$4 sm:$0xff]  }
 0x463   :  { %11436 = vmatpush1.bf16.msra.mxu0 %v15951_v39  ;;  %v16037_v39 = vld [vmem:[%s22241_s5 + $0x8ac] ss:$100 sps:$4 sm:$0xff]  }
 0x464   :  { %11518 = vmatpush1.bf16.msra.mxu1 %v15954_v40  ;;  %11437 = vmatprep.subr.bf16.mxu0 %v15959_v41  ;;  %v16040_v40 = vld [vmem:[%s22241_s5 + $0x8b4] ss:$100 sps:$4 sm:$0xff]   ;;  %v16035_v41 = vld [vmem:[%s22241_s5 + $0x8a8] ss:$100 sps:$4 sm:$0xff]  }
 0x465   :  { %11519 = vmatprep.subr.bf16.mxu1 %v15962_v34  ;;  %v16038_v34 = vld [vmem:[%s22241_s5 + $0x8b0] ss:$100 sps:$4 sm:$0xff]  }
 0x467   :  { %11438 = vmatpush1.bf16.msra.mxu0 %v15957_v43  ;;  %v16043_v43 = vld [vmem:[%s22241_s5 + $0x974] ss:$100 sps:$4 sm:$0xff]  }
 0x468   :  { %11520 = vmatpush1.bf16.msra.mxu1 %v15960_v45  ;;  %11439 = vmatprep.subr.bf16.mxu0 %v15965_v46  ;;  %v16046_v45 = vld [vmem:[%s22241_s5 + $0x97c] ss:$100 sps:$4 sm:$0xff]   ;;  %v16041_v46 = vld [vmem:[%s22241_s5 + $0x970] ss:$100 sps:$4 sm:$0xff]  }
 0x469   :  { %11521 = vmatprep.subr.bf16.mxu1 %v15968_v35  ;;  %v16044_v35 = vld [vmem:[%s22241_s5 + $0x978] ss:$100 sps:$4 sm:$0xff]  }
 0x46b   :  { %11440 = vmatpush1.bf16.msra.mxu0 %v15963_v50  ;;  %v16049_v50 = vld [vmem:[%s22241_s5 + $0xa3c] ss:$100 sps:$4 sm:$0xff]  }
 0x46c   :  { %11522 = vmatpush1.bf16.msra.mxu1 %v15966_v51  ;;  %11532 = vmatprep.subr.bf16.mxu0 %v15971_v53  ;;  %v16052_v51 = vld [vmem:[%s22241_s5 + $0xa44] ss:$100 sps:$4 sm:$0xff]   ;;  %v16047_v53 = vld [vmem:[%s22241_s5 + $0xa38] ss:$100 sps:$4 sm:$0xff]  }
 0x46d   :  { %11614 = vmatprep.subr.bf16.mxu1 %v15974_v38  ;;  %v16050_v38 = vld [vmem:[%s22241_s5 + $0xa40] ss:$100 sps:$4 sm:$0xff]  }
 0x46e   :  { %11442 = vmatmul.mubr.bf16.vlgmr.msra.gmra.mrb[8].mxu0 %v19658_v25 }
 0x46f   :  { %11524 = vmatmul.mubr.bf16.vlgmr.msra.gmra.mrb[8].mxu1 %v19658_v25  ;;  %11533 = vmatpush1.bf16.msra.mxu0 %v15969_v54  ;;  %v16055_v54 = vld [vmem:[%s22241_s5 + $0xb04] ss:$100 sps:$4 sm:$0xff]  }
 0x470   :  { %11564 = vmatprep.mubr.bf16.mxu0 %v19646_v28  ;;  %11615 = vmatpush1.bf16.msra.mxu1 %v15972_v55  ;;  %v16058_v55 = vld [vmem:[%s22241_s5 + $0xb0c] ss:$100 sps:$4 sm:$0xff]  }
 0x471   :  { %11646 = vmatprep.mubr.bf16.mxu1 %v19646_v28  ;;  %11534 = vmatprep.subr.bf16.mxu0 %v15977_v56  ;;  %v16053_v56 = vld [vmem:[%s22241_s5 + $0xb00] ss:$100 sps:$4 sm:$0xff]  }
 0x472   :  { %11616 = vmatprep.subr.bf16.mxu1 %v15980_v47  ;;  %v16056_v47 = vld [vmem:[%s22241_s5 + $0xb08] ss:$100 sps:$4 sm:$0xff]  }
 0x473   :  { %11535 = vmatpush1.bf16.msra.mxu0 %v15975_v57  ;;  %v16061_v57 = vld [vmem:[%s22241_s5 + $0xbcc] ss:$100 sps:$4 sm:$0xff]  }
 0x474   :  { %11617 = vmatpush1.bf16.msra.mxu1 %v15978_v58  ;;  %11536 = vmatprep.subr.bf16.mxu0 %v15983_v48  ;;  %v16064_v58 = vld [vmem:[%s22241_s5 + $0xbd4] ss:$100 sps:$4 sm:$0xff]   ;;  %v16059_v48 = vld [vmem:[%s22241_s5 + $0xbc8] ss:$100 sps:$4 sm:$0xff]  }
 0x475   :  { %11618 = vmatprep.subr.bf16.mxu1 %v15986_v61  ;;  %v16062_v61 = vld [vmem:[%s22241_s5 + $0xbd0] ss:$100 sps:$4 sm:$0xff]  }
 0x477   :  { %11537 = vmatpush1.bf16.msra.mxu0 %v15981_v62  ;;  %v16067_v62 = vld [vmem:[%s22241_s5 + $0xc94] ss:$100 sps:$4 sm:$0xff]  }
 0x478   :  { %11619 = vmatpush1.bf16.msra.mxu1 %v15984_v44  ;;  %11538 = vmatprep.subr.bf16.mxu0 %v15989_v0  ;;  %v16070_v44 = vld [vmem:[%s22241_s5 + $0xc9c] ss:$100 sps:$4 sm:$0xff]   ;;  %v16065_v0 = vld [vmem:[%s22241_s5 + $0xc90] ss:$100 sps:$4 sm:$0xff]  }
 0x479   :  { %11620 = vmatprep.subr.bf16.mxu1 %v15992_v1  ;;  %v16068_v1 = vld [vmem:[%s22241_s5 + $0xc98] ss:$100 sps:$4 sm:$0xff]  }
 0x47b   :  { %11539 = vmatpush1.bf16.msra.mxu0 %v15987_v2  ;;  %v16073_v2 = vld [vmem:[%s22241_s5 + $0xd5c] ss:$100 sps:$4 sm:$0xff]  }
 0x47c   :  { %11621 = vmatpush1.bf16.msra.mxu1 %v15990_v4  ;;  %11540 = vmatprep.subr.bf16.mxu0 %v15995_v60  ;;  %v16076_v4 = vld [vmem:[%s22241_s5 + $0xd64] ss:$100 sps:$4 sm:$0xff]   ;;  %v16071_v60 = vld [vmem:[%s22241_s5 + $0xd58] ss:$100 sps:$4 sm:$0xff]  }
 0x47d   :  { %11622 = vmatprep.subr.bf16.mxu1 %v15998_v8  ;;  %v16074_v8 = vld [vmem:[%s22241_s5 + $0xd60] ss:$100 sps:$4 sm:$0xff]  }
 0x47f   :  { %11541 = vmatpush1.bf16.msra.mxu0 %v15993_v9  ;;  %v16079_v9 = vld [vmem:[%s22241_s5 + $0xe24] ss:$100 sps:$4 sm:$0xff]  }
 0x480   :  { %11623 = vmatpush1.bf16.msra.mxu1 %v15996_v11  ;;  %11542 = vmatprep.subr.bf16.mxu0 %v16001_v12  ;;  %v16082_v11 = vld [vmem:[%s22241_s5 + $0xe2c] ss:$100 sps:$4 sm:$0xff]   ;;  %v16077_v12 = vld [vmem:[%s22241_s5 + $0xe20] ss:$100 sps:$4 sm:$0xff]  }
 0x481   :  { %11624 = vmatprep.subr.bf16.mxu1 %v16004_v52  ;;  %v16080_v52 = vld [vmem:[%s22241_s5 + $0xe28] ss:$100 sps:$4 sm:$0xff]  }
 0x483   :  { %11543 = vmatpush1.bf16.msra.mxu0 %v15999_v63  ;;  %v16085_v63 = vld [vmem:[%s22241_s5 + $0xeec] ss:$100 sps:$4 sm:$0xff]  }
 0x484   :  { %11625 = vmatpush1.bf16.msra.mxu1 %v16002_v15  ;;  %11544 = vmatprep.subr.bf16.mxu0 %v16007_v16  ;;  %v16088_v15 = vld [vmem:[%s22241_s5 + $0xef4] ss:$100 sps:$4 sm:$0xff]   ;;  %v16083_v16 = vld [vmem:[%s22241_s5 + $0xee8] ss:$100 sps:$4 sm:$0xff]  }
 0x485   :  { %11626 = vmatprep.subr.bf16.mxu1 %v16010_v17  ;;  %v16086_v17 = vld [vmem:[%s22241_s5 + $0xef0] ss:$100 sps:$4 sm:$0xff]  }
 0x487   :  { %11545 = vmatpush1.bf16.msra.mxu0 %v16005_v7  ;;  %v16091_v7 = vld [vmem:[%s22241_s5 + $0xfb4] ss:$100 sps:$4 sm:$0xff]  }
 0x488   :  { %11627 = vmatpush1.bf16.msra.mxu1 %v16008_v10  ;;  %11546 = vmatprep.subr.bf16.mxu0 %v16013_v18  ;;  %v16094_v10 = vld [vmem:[%s22241_s5 + $0xfbc] ss:$100 sps:$4 sm:$0xff]   ;;  %v16089_v18 = vld [vmem:[%s22241_s5 + $0xfb0] ss:$100 sps:$4 sm:$0xff]  }
 0x489   :  { %11628 = vmatprep.subr.bf16.mxu1 %v16016_v19  ;;  %v16092_v19 = vld [vmem:[%s22241_s5 + $0xfb8] ss:$100 sps:$4 sm:$0xff]  }
 0x48b   :  { %11547 = vmatpush1.bf16.msra.mxu0 %v16011_v20  ;;  %v16097_v20 = vld [vmem:[%s22241_s5 + $0x107c] ss:$100 sps:$4 sm:$0xff]  }
 0x48c   :  { %11629 = vmatpush1.bf16.msra.mxu1 %v16014_v22  ;;  %11548 = vmatprep.subr.bf16.mxu0 %v16019_v23  ;;  %v16100_v22 = vld [vmem:[%s22241_s5 + $0x1084] ss:$100 sps:$4 sm:$0xff]   ;;  %v16095_v23 = vld [vmem:[%s22241_s5 + $0x1078] ss:$100 sps:$4 sm:$0xff]  }
 0x48d   :  { %11630 = vmatprep.subr.bf16.mxu1 %v16022_v24  ;;  %v16098_v24 = vld [vmem:[%s22241_s5 + $0x1080] ss:$100 sps:$4 sm:$0xff]  }
 0x48f   :  { %11549 = vmatpush1.bf16.msra.mxu0 %v16017_v13  ;;  %v16103_v13 = vld [vmem:[%s22241_s5 + $0x1144] ss:$100 sps:$4 sm:$0xff]  }
 0x490   :  { %11631 = vmatpush1.bf16.msra.mxu1 %v16020_v27  ;;  %11550 = vmatprep.subr.bf16.mxu0 %v16025_v14 }
 0x491   :  { %11632 = vmatprep.subr.bf16.mxu1 %v16028_v30  ;;  %v16106_v30 = vld [vmem:[%s22241_s5 + $0x114c] ss:$100 sps:$4 sm:$0xff]  }
 0x493   :  { %11551 = vmatpush1.bf16.msra.mxu0 %v16023_v32  ;;  %v13456_v32 = vld [vmem:[%s22240_s4] ss:$0 sm:$0xff] }
 0x494   :  { %11633 = vmatpush1.bf16.msra.mxu1 %v16026_v33  ;;  %11552 = vmatprep.subr.bf16.mxu0 %v16031_v26 }
 0x495   :  { %11634 = vmatprep.subr.bf16.mxu1 %v16034_v36 }
 0x497   :  { %11553 = vmatpush1.bf16.msra.mxu0 %v16029_v37 }
 0x498   :  { %11635 = vmatpush1.bf16.msra.mxu1 %v16032_v21  ;;  %11554 = vmatprep.subr.bf16.mxu0 %v16037_v39 }
 0x499   :  { %11636 = vmatprep.subr.bf16.mxu1 %v16040_v40  ;;  %v16101_v40 = vld [vmem:[%s22241_s5 + $0x1140] ss:$100 sps:$4 sm:$0xff]  }
 0x49b   :  { %11555 = vmatpush1.bf16.msra.mxu0 %v16035_v41 }
 0x49c   :  { %11637 = vmatpush1.bf16.msra.mxu1 %v16038_v34  ;;  %11556 = vmatprep.subr.bf16.mxu0 %v16043_v43  ;;  %v16104_v43 = vld [vmem:[%s22241_s5 + $0x1148] ss:$100 sps:$4 sm:$0xff]  }
 0x49d   :  { %11638 = vmatprep.subr.bf16.mxu1 %v16046_v45  ;;  %v16109_v45 = vld [vmem:[%s22241_s5 + $0x120c] ss:$100 sps:$4 sm:$0xff]  }
 0x49f   :  { %11557 = vmatpush1.bf16.msra.mxu0 %v16041_v46 }
 0x4a0   :  { %11639 = vmatpush1.bf16.msra.mxu1 %v16044_v35  ;;  %11558 = vmatprep.subr.bf16.mxu0 %v16049_v50  ;;  %v16112_v35 = vld [vmem:[%s22241_s5 + $0x1214] ss:$100 sps:$4 sm:$0xff]   ;;  %v16107_v50 = vld [vmem:[%s22241_s5 + $0x1208] ss:$100 sps:$4 sm:$0xff]  }
 0x4a1   :  { %11640 = vmatprep.subr.bf16.mxu1 %v16052_v51 }
 0x4a3   :  { %11559 = vmatpush1.bf16.msra.mxu0 %v16047_v53  ;;  %v16110_v53 = vld [vmem:[%s22241_s5 + $0x1210] ss:$100 sps:$4 sm:$0xff]  }
 0x4a4   :  { %11641 = vmatpush1.bf16.msra.mxu1 %v16050_v38  ;;  %11560 = vmatprep.subr.bf16.mxu0 %v16055_v54  ;;  %v16115_v38 = vld [vmem:[%s22241_s5 + $0x12d4] ss:$100 sps:$4 sm:$0xff]   ;;  %v16118_v54 = vld [vmem:[%s22241_s5 + $0x12dc] ss:$100 sps:$4 sm:$0xff]  }
 0x4a5   :  { %11642 = vmatprep.subr.bf16.mxu1 %v16058_v55  ;;  %v16113_v55 = vld [vmem:[%s22241_s5 + $0x12d0] ss:$100 sps:$4 sm:$0xff]  }
 0x4a7   :  { %11561 = vmatpush1.bf16.msra.mxu0 %v16053_v56  ;;  %v16116_v56 = vld [vmem:[%s22241_s5 + $0x12d8] ss:$100 sps:$4 sm:$0xff]  }
 0x4a8   :  { %11643 = vmatpush1.bf16.msra.mxu1 %v16056_v47  ;;  %11562 = vmatprep.subr.bf16.mxu0 %v16061_v57  ;;  %v16121_v47 = vld [vmem:[%s22241_s5 + $0x139c] ss:$100 sps:$4 sm:$0xff]   ;;  %v16124_v57 = vld [vmem:[%s22241_s5 + $0x13a4] ss:$100 sps:$4 sm:$0xff]  }
 0x4a9   :  { %11644 = vmatprep.subr.bf16.mxu1 %v16064_v58  ;;  %v16119_v58 = vld [vmem:[%s22241_s5 + $0x1398] ss:$100 sps:$4 sm:$0xff]  }
 0x4ab   :  { %11563 = vmatpush1.bf16.msra.mxu0 %v16059_v48  ;;  %v16122_v48 = vld [vmem:[%s22241_s5 + $0x13a0] ss:$100 sps:$4 sm:$0xff]  }
 0x4ac   :  { %11645 = vmatpush1.bf16.msra.mxu1 %v16062_v61  ;;  %11573 = vmatprep.subr.bf16.mxu0 %v16067_v62  ;;  %v16127_v61 = vld [vmem:[%s22241_s5 + $0x1464] ss:$100 sps:$4 sm:$0xff]   ;;  %v16130_v62 = vld [vmem:[%s22241_s5 + $0x146c] ss:$100 sps:$4 sm:$0xff]  }
 0x4ad   :  { %11655 = vmatprep.subr.bf16.mxu1 %v16070_v44  ;;  %v16125_v44 = vld [vmem:[%s22241_s5 + $0x1460] ss:$100 sps:$4 sm:$0xff]  }
 0x4ae   :  { %11565 = vmatmul.mubr.bf16.vlgmr.msra.gmra.mrb[12].mxu0 %v19656_v31 }
 0x4af   :  { %11647 = vmatmul.mubr.bf16.vlgmr.msra.gmra.mrb[12].mxu1 %v19656_v31  ;;  %11574 = vmatpush1.bf16.msra.mxu0 %v16065_v0  ;;  %v16128_v0 = vld [vmem:[%s22241_s5 + $0x1468] ss:$100 sps:$4 sm:$0xff]  }
 0x4b0   :  { %11605 = vmatprep.mubr.bf16.mxu0 %v19648_v29  ;;  %11656 = vmatpush1.bf16.msra.mxu1 %v16068_v1  ;;  %v16133_v1 = vld [vmem:[%s22241_s5 + $0x152c] ss:$100 sps:$4 sm:$0xff]  }
 0x4b1   :  { %11687 = vmatprep.mubr.bf16.mxu1 %v19648_v29  ;;  %11575 = vmatprep.subr.bf16.mxu0 %v16073_v2  ;;  %v16136_v2 = vld [vmem:[%s22241_s5 + $0x1534] ss:$100 sps:$4 sm:$0xff]  }
 0x4b2   :  { %11657 = vmatprep.subr.bf16.mxu1 %v16076_v4  ;;  %v16131_v4 = vld [vmem:[%s22241_s5 + $0x1528] ss:$100 sps:$4 sm:$0xff]  }
 0x4b3   :  { %11576 = vmatpush1.bf16.msra.mxu0 %v16071_v60  ;;  %v16134_v60 = vld [vmem:[%s22241_s5 + $0x1530] ss:$100 sps:$4 sm:$0xff]  }
 0x4b4   :  { %11658 = vmatpush1.bf16.msra.mxu1 %v16074_v8  ;;  %11577 = vmatprep.subr.bf16.mxu0 %v16079_v9  ;;  %v16139_v8 = vld [vmem:[%s22241_s5 + $0x15f4] ss:$100 sps:$4 sm:$0xff]   ;;  %v16142_v9 = vld [vmem:[%s22241_s5 + $0x15fc] ss:$100 sps:$4 sm:$0xff]  }
 0x4b5   :  { %11659 = vmatprep.subr.bf16.mxu1 %v16082_v11  ;;  %v16137_v11 = vld [vmem:[%s22241_s5 + $0x15f0] ss:$100 sps:$4 sm:$0xff]  }
 0x4b7   :  { %11578 = vmatpush1.bf16.msra.mxu0 %v16077_v12  ;;  %v16140_v12 = vld [vmem:[%s22241_s5 + $0x15f8] ss:$100 sps:$4 sm:$0xff]  }
 0x4b8   :  { %11660 = vmatpush1.bf16.msra.mxu1 %v16080_v52  ;;  %11579 = vmatprep.subr.bf16.mxu0 %v16085_v63  ;;  %v16145_v52 = vld [vmem:[%s22241_s5 + $0x16bc] ss:$100 sps:$4 sm:$0xff]   ;;  %v16148_v63 = vld [vmem:[%s22241_s5 + $0x16c4] ss:$100 sps:$4 sm:$0xff]  }
 0x4b9   :  { %11661 = vmatprep.subr.bf16.mxu1 %v16088_v15  ;;  %v16143_v15 = vld [vmem:[%s22241_s5 + $0x16b8] ss:$100 sps:$4 sm:$0xff]  }
 0x4bb   :  { %11580 = vmatpush1.bf16.msra.mxu0 %v16083_v16  ;;  %v16146_v16 = vld [vmem:[%s22241_s5 + $0x16c0] ss:$100 sps:$4 sm:$0xff]  }
 0x4bc   :  { %11662 = vmatpush1.bf16.msra.mxu1 %v16086_v17  ;;  %11581 = vmatprep.subr.bf16.mxu0 %v16091_v7  ;;  %v16151_v17 = vld [vmem:[%s22241_s5 + $0x1784] ss:$100 sps:$4 sm:$0xff]   ;;  %v16154_v7 = vld [vmem:[%s22241_s5 + $0x178c] ss:$100 sps:$4 sm:$0xff]  }
 0x4bd   :  { %11663 = vmatprep.subr.bf16.mxu1 %v16094_v10  ;;  %v16149_v10 = vld [vmem:[%s22241_s5 + $0x1780] ss:$100 sps:$4 sm:$0xff]  }
 0x4bf   :  { %11582 = vmatpush1.bf16.msra.mxu0 %v16089_v18  ;;  %v16152_v18 = vld [vmem:[%s22241_s5 + $0x1788] ss:$100 sps:$4 sm:$0xff]  }
 0x4c0   :  { %11664 = vmatpush1.bf16.msra.mxu1 %v16092_v19  ;;  %11583 = vmatprep.subr.bf16.mxu0 %v16097_v20  ;;  %v16157_v19 = vld [vmem:[%s22241_s5 + $0x184c] ss:$100 sps:$4 sm:$0xff]   ;;  %v16160_v20 = vld [vmem:[%s22241_s5 + $0x1854] ss:$100 sps:$4 sm:$0xff]  }
 0x4c1   :  { %v14319_v27 = vpop.f32.mrb[4].mxu0  ;;  %v14341_v14 = vpop.f32.mrb[4].mxu1  ;;  %11665 = vmatprep.subr.bf16.mxu1 %v16100_v22  ;;  %v16155_v22 = vld [vmem:[%s22241_s5 + $0x1848] ss:$100 sps:$4 sm:$0xff]  }
 0x4c2   :  { %v14320_v33 = vpop.f32.mrb[5].mxu0  ;;  %v14342_v26 = vpop.f32.mrb[5].mxu1 }
 0x4c3   :  { %v14321_v36 = vadd.f32 %v14320_v33, %v14319_v27  ;;  %v14343_v37 = vadd.f32 %v14342_v26, %v14341_v14  ;;  %11584 = vmatpush1.bf16.msra.mxu0 %v16095_v23  ;;  %v14322_v21 = vpop.f32.mrb[6].mxu0  ;;  %v14344_v39 = vpop.f32.mrb[6].mxu1  ;;  %v16158_v23 = vld [vmem:[%s22241_s5 + $0x1850] ss:$100 sps:$4 sm:$0xff]   ;;  %v16161_v27 = vld [vmem:[%s22241_s5 + $0x20] ss:$100 sps:$4 sm:$0xff]  }
 0x4c4   :  { %11666 = vmatpush1.bf16.msra.mxu1 %v16098_v24  ;;  %v14323_v41 = vpop.f32.mrb[7].mxu0  ;;  %v14345_v34 = vpop.f32.mrb[7].mxu1  ;;  %11585 = vmatprep.subr.bf16.mxu0 %v16103_v13  ;;  %v16163_v24 = vld [vmem:[%s22241_s5 + $0x24] ss:$100 sps:$4 sm:$0xff]   ;;  %v16166_v13 = vld [vmem:[%s22241_s5 + $0x2c] ss:$100 sps:$4 sm:$0xff]  }
 0x4c5   :  { %v6325_v46 = vadd.f32 %v14321_v36, %v13456_v32  ;;  %11667 = vmatprep.subr.bf16.mxu1 %v16106_v30  ;;  %v16164_v14 = vld [vmem:[%s22241_s5 + $0x28] ss:$100 sps:$4 sm:$0xff]   ;;  %v16172_v32 = vld [vmem:[%s22241_s5 + $0xf4] ss:$100 sps:$4 sm:$0xff]  }
 0x4c6   :  { %v16169_v30 = vld [vmem:[%s22241_s5 + $0xec] ss:$100 sps:$4 sm:$0xff]   ;;  %v16175_v36 = vld [vmem:[%s22241_s5 + $0x1b4] ss:$100 sps:$4 sm:$0xff]   ;;  %v16184_v41 = vld [vmem:[%s22241_s5 + $0x284] ss:$100 sps:$4 sm:$0xff]  }
 0x4c7   :  { %11586 = vmatpush1.bf16.msra.mxu0 %v16101_v40  ;;  %v6365_v51 = vadd.f32 %v14343_v37, %v6325_v46  ;;  %v16167_v33 = vld [vmem:[%s22241_s5 + $0xe8] ss:$100 sps:$4 sm:$0xff]   ;;  %v16170_v26 = vld [vmem:[%s22241_s5 + $0xf0] ss:$100 sps:$4 sm:$0xff]   ;;  %v16178_v37 = vld [vmem:[%s22241_s5 + $0x1bc] ss:$100 sps:$4 sm:$0xff]  }
 0x4c8   :  { %11668 = vmatpush1.bf16.msra.mxu1 %v16104_v43  ;;  %11587 = vmatprep.subr.bf16.mxu0 %v16109_v45  ;;  %v16173_v21 = vld [vmem:[%s22241_s5 + $0x1b0] ss:$100 sps:$4 sm:$0xff]   ;;  %v16176_v39 = vld [vmem:[%s22241_s5 + $0x1b8] ss:$100 sps:$4 sm:$0xff]   ;;  %v16182_v43 = vld [vmem:[%s22241_s5 + $0x280] ss:$100 sps:$4 sm:$0xff]  }
 0x4c9   :  { %11669 = vmatprep.subr.bf16.mxu1 %v16112_v35  ;;  %6370 = vst [vmem:[#allocation2] sm:$0x3] %v6365_v51  ;;  %v16181_v40 = vld [vmem:[%s22241_s5 + $0x27c] ss:$100 sps:$4 sm:$0xff]   ;;  %v16187_v45 = vld [vmem:[%s22241_s5 + $0x344] ss:$100 sps:$4 sm:$0xff]  }
 0x4ca   :  { %v16179_v34 = vld [vmem:[%s22241_s5 + $0x278] ss:$100 sps:$4 sm:$0xff]   ;;  %v16190_v46 = vld [vmem:[%s22241_s5 + $0x34c] ss:$100 sps:$4 sm:$0xff]   ;;  %v16185_v35 = vld [vmem:[%s22241_s5 + $0x340] ss:$100 sps:$4 sm:$0xff]  }
 0x4cb   :  { %11588 = vmatpush1.bf16.msra.mxu0 %v16107_v50  ;;  %v16188_v50 = vld [vmem:[%s22241_s5 + $0x348] ss:$100 sps:$4 sm:$0xff]  }
 0x4cc   :  { %11670 = vmatpush1.bf16.msra.mxu1 %v16110_v53  ;;  %11589 = vmatprep.subr.bf16.mxu0 %v16115_v38  ;;  %v16193_v51 = vld [vmem:[%s22241_s5 + $0x40c] ss:$100 sps:$4 sm:$0xff]   ;;  %v16196_v53 = vld [vmem:[%s22241_s5 + $0x414] ss:$100 sps:$4 sm:$0xff]  }
 0x4cd   :  { %11671 = vmatprep.subr.bf16.mxu1 %v16118_v54  ;;  %v16191_v38 = vld [vmem:[%s22241_s5 + $0x408] ss:$100 sps:$4 sm:$0xff]   ;;  %v16194_v54 = vld [vmem:[%s22241_s5 + $0x410] ss:$100 sps:$4 sm:$0xff]  }
 0x4cf   :  { %11590 = vmatpush1.bf16.msra.mxu0 %v16113_v55  ;;  %v16199_v55 = vld [vmem:[%s22241_s5 + $0x4d4] ss:$100 sps:$4 sm:$0xff]  }
 0x4d0   :  { %11672 = vmatpush1.bf16.msra.mxu1 %v16116_v56  ;;  %11591 = vmatprep.subr.bf16.mxu0 %v16121_v47  ;;  %v16202_v56 = vld [vmem:[%s22241_s5 + $0x4dc] ss:$100 sps:$4 sm:$0xff]   ;;  %v16197_v47 = vld [vmem:[%s22241_s5 + $0x4d0] ss:$100 sps:$4 sm:$0xff]  }
 0x4d1   :  { %11673 = vmatprep.subr.bf16.mxu1 %v16124_v57  ;;  %v16200_v57 = vld [vmem:[%s22241_s5 + $0x4d8] ss:$100 sps:$4 sm:$0xff]  }
 0x4d3   :  { %11592 = vmatpush1.bf16.msra.mxu0 %v16119_v58  ;;  %v16205_v58 = vld [vmem:[%s22241_s5 + $0x59c] ss:$100 sps:$4 sm:$0xff]  }
 0x4d4   :  { %11674 = vmatpush1.bf16.msra.mxu1 %v16122_v48  ;;  %11593 = vmatprep.subr.bf16.mxu0 %v16127_v61  ;;  %v16208_v48 = vld [vmem:[%s22241_s5 + $0x5a4] ss:$100 sps:$4 sm:$0xff]   ;;  %v16203_v61 = vld [vmem:[%s22241_s5 + $0x598] ss:$100 sps:$4 sm:$0xff]  }
 0x4d5   :  { %11675 = vmatprep.subr.bf16.mxu1 %v16130_v62  ;;  %v16206_v62 = vld [vmem:[%s22241_s5 + $0x5a0] ss:$100 sps:$4 sm:$0xff]  }
 0x4d7   :  { %11594 = vmatpush1.bf16.msra.mxu0 %v16125_v44  ;;  %v16211_v44 = vld [vmem:[%s22241_s5 + $0x664] ss:$100 sps:$4 sm:$0xff]  }
 0x4d8   :  { %11676 = vmatpush1.bf16.msra.mxu1 %v16128_v0  ;;  %11595 = vmatprep.subr.bf16.mxu0 %v16133_v1  ;;  %v16214_v0 = vld [vmem:[%s22241_s5 + $0x66c] ss:$100 sps:$4 sm:$0xff]   ;;  %v16209_v1 = vld [vmem:[%s22241_s5 + $0x660] ss:$100 sps:$4 sm:$0xff]  }
 0x4d9   :  { %11677 = vmatprep.subr.bf16.mxu1 %v16136_v2  ;;  %v16212_v2 = vld [vmem:[%s22241_s5 + $0x668] ss:$100 sps:$4 sm:$0xff]  }
 0x4db   :  { %11596 = vmatpush1.bf16.msra.mxu0 %v16131_v4  ;;  %v16217_v4 = vld [vmem:[%s22241_s5 + $0x72c] ss:$100 sps:$4 sm:$0xff]  }
 0x4dc   :  { %11678 = vmatpush1.bf16.msra.mxu1 %v16134_v60  ;;  %11597 = vmatprep.subr.bf16.mxu0 %v16139_v8  ;;  %v16220_v60 = vld [vmem:[%s22241_s5 + $0x734] ss:$100 sps:$4 sm:$0xff]   ;;  %v16215_v8 = vld [vmem:[%s22241_s5 + $0x728] ss:$100 sps:$4 sm:$0xff]  }
 0x4dd   :  { %11679 = vmatprep.subr.bf16.mxu1 %v16142_v9  ;;  %v16218_v9 = vld [vmem:[%s22241_s5 + $0x730] ss:$100 sps:$4 sm:$0xff]  }
 0x4df   :  { %11598 = vmatpush1.bf16.msra.mxu0 %v16137_v11  ;;  %v16223_v11 = vld [vmem:[%s22241_s5 + $0x7f4] ss:$100 sps:$4 sm:$0xff]  }
 0x4e0   :  { %11680 = vmatpush1.bf16.msra.mxu1 %v16140_v12  ;;  %11599 = vmatprep.subr.bf16.mxu0 %v16145_v52  ;;  %v16226_v12 = vld [vmem:[%s22241_s5 + $0x7fc] ss:$100 sps:$4 sm:$0xff]   ;;  %v16221_v52 = vld [vmem:[%s22241_s5 + $0x7f0] ss:$100 sps:$4 sm:$0xff]  }
 0x4e1   :  { %11681 = vmatprep.subr.bf16.mxu1 %v16148_v63  ;;  %v16224_v63 = vld [vmem:[%s22241_s5 + $0x7f8] ss:$100 sps:$4 sm:$0xff]  }
 0x4e3   :  { %11600 = vmatpush1.bf16.msra.mxu0 %v16143_v15  ;;  %v16229_v15 = vld [vmem:[%s22241_s5 + $0x8bc] ss:$100 sps:$4 sm:$0xff]  }
 0x4e4   :  { %11682 = vmatpush1.bf16.msra.mxu1 %v16146_v16  ;;  %11601 = vmatprep.subr.bf16.mxu0 %v16151_v17  ;;  %v16232_v16 = vld [vmem:[%s22241_s5 + $0x8c4] ss:$100 sps:$4 sm:$0xff]   ;;  %v16227_v17 = vld [vmem:[%s22241_s5 + $0x8b8] ss:$100 sps:$4 sm:$0xff]  }
 0x4e5   :  { %11683 = vmatprep.subr.bf16.mxu1 %v16154_v7  ;;  %v16230_v7 = vld [vmem:[%s22241_s5 + $0x8c0] ss:$100 sps:$4 sm:$0xff]  }
 0x4e7   :  { %11602 = vmatpush1.bf16.msra.mxu0 %v16149_v10  ;;  %v16235_v10 = vld [vmem:[%s22241_s5 + $0x984] ss:$100 sps:$4 sm:$0xff]  }
 0x4e8   :  { %11684 = vmatpush1.bf16.msra.mxu1 %v16152_v18  ;;  %11603 = vmatprep.subr.bf16.mxu0 %v16157_v19  ;;  %v16238_v18 = vld [vmem:[%s22241_s5 + $0x98c] ss:$100 sps:$4 sm:$0xff]   ;;  %v16233_v19 = vld [vmem:[%s22241_s5 + $0x980] ss:$100 sps:$4 sm:$0xff]  }
 0x4e9   :  { %11685 = vmatprep.subr.bf16.mxu1 %v16160_v20  ;;  %v16236_v20 = vld [vmem:[%s22241_s5 + $0x988] ss:$100 sps:$4 sm:$0xff]  }
 0x4eb   :  { %11604 = vmatpush1.bf16.msra.mxu0 %v16155_v22  ;;  %v16241_v22 = vld [vmem:[%s22241_s5 + $0xa4c] ss:$100 sps:$4 sm:$0xff]  }
 0x4ec   :  { %11686 = vmatpush1.bf16.msra.mxu1 %v16158_v23  ;;  %11696 = vmatprep.subr.bf16.mxu0 %v16163_v24  ;;  %v16244_v23 = vld [vmem:[%s22241_s5 + $0xa54] ss:$100 sps:$4 sm:$0xff]   ;;  %v16239_v24 = vld [vmem:[%s22241_s5 + $0xa48] ss:$100 sps:$4 sm:$0xff]  }
 0x4ed   :  { %11778 = vmatprep.subr.bf16.mxu1 %v16166_v13  ;;  %v16242_v13 = vld [vmem:[%s22241_s5 + $0xa50] ss:$100 sps:$4 sm:$0xff]  }
 0x4ee   :  { %11606 = vmatmul.mubr.bf16.vlgmr.msra.gmra.mrb[12].mxu0 %v19658_v25 }
 0x4ef   :  { %11688 = vmatmul.mubr.bf16.vlgmr.msra.gmra.mrb[12].mxu1 %v19658_v25  ;;  %11697 = vmatpush1.bf16.msra.mxu0 %v16161_v27  ;;  %v16247_v27 = vld [vmem:[%s22241_s5 + $0xb14] ss:$100 sps:$4 sm:$0xff]  }
 0x4f0   :  { %11728 = vmatprep.mubr.bf16.mxu0 %v19646_v28  ;;  %11779 = vmatpush1.bf16.msra.mxu1 %v16164_v14  ;;  %v16250_v14 = vld [vmem:[%s22241_s5 + $0xb1c] ss:$100 sps:$4 sm:$0xff]  }
 0x4f1   :  { %11810 = vmatprep.mubr.bf16.mxu1 %v19646_v28  ;;  %11698 = vmatprep.subr.bf16.mxu0 %v16169_v30  ;;  %v16245_v30 = vld [vmem:[%s22241_s5 + $0xb10] ss:$100 sps:$4 sm:$0xff]  }
 0x4f2   :  { %11780 = vmatprep.subr.bf16.mxu1 %v16172_v32  ;;  %v16248_v32 = vld [vmem:[%s22241_s5 + $0xb18] ss:$100 sps:$4 sm:$0xff]  }
 0x4f3   :  { %11699 = vmatpush1.bf16.msra.mxu0 %v16167_v33  ;;  %v16253_v33 = vld [vmem:[%s22241_s5 + $0xbdc] ss:$100 sps:$4 sm:$0xff]  }
 0x4f4   :  { %11781 = vmatpush1.bf16.msra.mxu1 %v16170_v26  ;;  %11700 = vmatprep.subr.bf16.mxu0 %v16175_v36  ;;  %v16256_v26 = vld [vmem:[%s22241_s5 + $0xbe4] ss:$100 sps:$4 sm:$0xff]   ;;  %v16251_v36 = vld [vmem:[%s22241_s5 + $0xbd8] ss:$100 sps:$4 sm:$0xff]  }
 0x4f5   :  { %11782 = vmatprep.subr.bf16.mxu1 %v16178_v37  ;;  %v16254_v37 = vld [vmem:[%s22241_s5 + $0xbe0] ss:$100 sps:$4 sm:$0xff]  }
 0x4f7   :  { %11701 = vmatpush1.bf16.msra.mxu0 %v16173_v21  ;;  %v16259_v21 = vld [vmem:[%s22241_s5 + $0xca4] ss:$100 sps:$4 sm:$0xff]  }
 0x4f8   :  { %11783 = vmatpush1.bf16.msra.mxu1 %v16176_v39  ;;  %11702 = vmatprep.subr.bf16.mxu0 %v16181_v40  ;;  %v16262_v39 = vld [vmem:[%s22241_s5 + $0xcac] ss:$100 sps:$4 sm:$0xff]   ;;  %v16257_v40 = vld [vmem:[%s22241_s5 + $0xca0] ss:$100 sps:$4 sm:$0xff]  }
 0x4f9   :  { %11784 = vmatprep.subr.bf16.mxu1 %v16184_v41  ;;  %v16260_v41 = vld [vmem:[%s22241_s5 + $0xca8] ss:$100 sps:$4 sm:$0xff]  }
 0x4fb   :  { %11703 = vmatpush1.bf16.msra.mxu0 %v16179_v34  ;;  %v16265_v34 = vld [vmem:[%s22241_s5 + $0xd6c] ss:$100 sps:$4 sm:$0xff]  }
 0x4fc   :  { %11785 = vmatpush1.bf16.msra.mxu1 %v16182_v43  ;;  %11704 = vmatprep.subr.bf16.mxu0 %v16187_v45  ;;  %v16268_v43 = vld [vmem:[%s22241_s5 + $0xd74] ss:$100 sps:$4 sm:$0xff]   ;;  %v16263_v45 = vld [vmem:[%s22241_s5 + $0xd68] ss:$100 sps:$4 sm:$0xff]  }
 0x4fd   :  { %11786 = vmatprep.subr.bf16.mxu1 %v16190_v46  ;;  %v16266_v46 = vld [vmem:[%s22241_s5 + $0xd70] ss:$100 sps:$4 sm:$0xff]  }
 0x4ff   :  { %11705 = vmatpush1.bf16.msra.mxu0 %v16185_v35  ;;  %v16271_v35 = vld [vmem:[%s22241_s5 + $0xe34] ss:$100 sps:$4 sm:$0xff]  }
 0x500   :  { %11787 = vmatpush1.bf16.msra.mxu1 %v16188_v50  ;;  %11706 = vmatprep.subr.bf16.mxu0 %v16193_v51  ;;  %v16274_v50 = vld [vmem:[%s22241_s5 + $0xe3c] ss:$100 sps:$4 sm:$0xff]   ;;  %v16269_v51 = vld [vmem:[%s22241_s5 + $0xe30] ss:$100 sps:$4 sm:$0xff]  }
 0x501   :  { %11788 = vmatprep.subr.bf16.mxu1 %v16196_v53  ;;  %v16272_v53 = vld [vmem:[%s22241_s5 + $0xe38] ss:$100 sps:$4 sm:$0xff]  }
 0x503   :  { %11707 = vmatpush1.bf16.msra.mxu0 %v16191_v38  ;;  %v16277_v38 = vld [vmem:[%s22241_s5 + $0xefc] ss:$100 sps:$4 sm:$0xff]  }
 0x504   :  { %11789 = vmatpush1.bf16.msra.mxu1 %v16194_v54  ;;  %11708 = vmatprep.subr.bf16.mxu0 %v16199_v55  ;;  %v16280_v54 = vld [vmem:[%s22241_s5 + $0xf04] ss:$100 sps:$4 sm:$0xff]   ;;  %v16275_v55 = vld [vmem:[%s22241_s5 + $0xef8] ss:$100 sps:$4 sm:$0xff]  }
 0x505   :  { %11790 = vmatprep.subr.bf16.mxu1 %v16202_v56  ;;  %v16278_v56 = vld [vmem:[%s22241_s5 + $0xf00] ss:$100 sps:$4 sm:$0xff]  }
 0x507   :  { %11709 = vmatpush1.bf16.msra.mxu0 %v16197_v47  ;;  %v16283_v47 = vld [vmem:[%s22241_s5 + $0xfc4] ss:$100 sps:$4 sm:$0xff]  }
 0x508   :  { %11791 = vmatpush1.bf16.msra.mxu1 %v16200_v57  ;;  %11710 = vmatprep.subr.bf16.mxu0 %v16205_v58  ;;  %v16286_v57 = vld [vmem:[%s22241_s5 + $0xfcc] ss:$100 sps:$4 sm:$0xff]   ;;  %v16281_v58 = vld [vmem:[%s22241_s5 + $0xfc0] ss:$100 sps:$4 sm:$0xff]  }
 0x509   :  { %11792 = vmatprep.subr.bf16.mxu1 %v16208_v48  ;;  %v20697_v48 = vld [vmem:[%s22242_s6] sm:$0xff] }
 0x50b   :  { %11711 = vmatpush1.bf16.msra.mxu0 %v16203_v61  ;;  %v16284_v61 = vld [vmem:[%s22241_s5 + $0xfc8] ss:$100 sps:$4 sm:$0xff]  }
 0x50c   :  { %11793 = vmatpush1.bf16.msra.mxu1 %v16206_v62  ;;  %11712 = vmatprep.subr.bf16.mxu0 %v16211_v44  ;;  %v16289_v62 = vld [vmem:[%s22241_s5 + $0x108c] ss:$100 sps:$4 sm:$0xff]   ;;  %v16292_v44 = vld [vmem:[%s22241_s5 + $0x1094] ss:$100 sps:$4 sm:$0xff]  }
 0x50d   :  { %11794 = vmatprep.subr.bf16.mxu1 %v16214_v0  ;;  %v7214_v0 = vrot.slane %v20697_v48, %v19628_v59 }
 0x50f   :  { %11713 = vmatpush1.bf16.msra.mxu0 %v16209_v1  ;;  %v7222_v1 = vrot.slane %v20697_v48, %v19631_v3 }
 0x510   :  { %11795 = vmatpush1.bf16.msra.mxu1 %v16212_v2  ;;  %11714 = vmatprep.subr.bf16.mxu0 %v16217_v4  ;;  %v7218_v2 = vrot.slane %v20697_v48, %v19637_v5  ;;  %v16287_v4 = vld [vmem:[%s22241_s5 + $0x1088] ss:$100 sps:$4 sm:$0xff]  }
 0x511   :  { %11796 = vmatprep.subr.bf16.mxu1 %v16220_v60  ;;  %v7226_v60 = vrot.slane %v20697_v48, %v19640_v6 }
 0x513   :  { %11715 = vmatpush1.bf16.msra.mxu0 %v16215_v8  ;;  %v16290_v8 = vld [vmem:[%s22241_s5 + $0x1090] ss:$100 sps:$4 sm:$0xff]  }
 0x514   :  { %11797 = vmatpush1.bf16.msra.mxu1 %v16218_v9  ;;  %11716 = vmatprep.subr.bf16.mxu0 %v16223_v11  ;;  %v16295_v9 = vld [vmem:[%s22241_s5 + $0x1154] ss:$100 sps:$4 sm:$0xff]  }
 0x515   :  { %11798 = vmatprep.subr.bf16.mxu1 %v16226_v12  ;;  %v16298_v12 = vld [vmem:[%s22241_s5 + $0x115c] ss:$100 sps:$4 sm:$0xff]  }
 0x517   :  { %11717 = vmatpush1.bf16.msra.mxu0 %v16221_v52 }
 0x518   :  { %11799 = vmatpush1.bf16.msra.mxu1 %v16224_v63  ;;  %11718 = vmatprep.subr.bf16.mxu0 %v16229_v15 }
 0x519   :  { %11800 = vmatprep.subr.bf16.mxu1 %v16232_v16 }
 0x51b   :  { %11719 = vmatpush1.bf16.msra.mxu0 %v16227_v17 }
 0x51c   :  { %11801 = vmatpush1.bf16.msra.mxu1 %v16230_v7  ;;  %11720 = vmatprep.subr.bf16.mxu0 %v16235_v10 }
 0x51d   :  { %11802 = vmatprep.subr.bf16.mxu1 %v16238_v18  ;;  %v16293_v18 = vld [vmem:[%s22241_s5 + $0x1150] ss:$100 sps:$4 sm:$0xff]  }
 0x51f   :  { %11721 = vmatpush1.bf16.msra.mxu0 %v16233_v19 }
 0x520   :  { %11803 = vmatpush1.bf16.msra.mxu1 %v16236_v20  ;;  %11722 = vmatprep.subr.bf16.mxu0 %v16241_v22 }
 0x521   :  { %11804 = vmatprep.subr.bf16.mxu1 %v16244_v23  ;;  %v16296_v23 = vld [vmem:[%s22241_s5 + $0x1158] ss:$100 sps:$4 sm:$0xff]  }
 0x523   :  { %11723 = vmatpush1.bf16.msra.mxu0 %v16239_v24  ;;  %v16301_v24 = vld [vmem:[%s22241_s5 + $0x121c] ss:$100 sps:$4 sm:$0xff]  }
 0x524   :  { %11805 = vmatpush1.bf16.msra.mxu1 %v16242_v13  ;;  %11724 = vmatprep.subr.bf16.mxu0 %v16247_v27 }
 0x525   :  { %11806 = vmatprep.subr.bf16.mxu1 %v16250_v14  ;;  %v16304_v14 = vld [vmem:[%s22241_s5 + $0x1224] ss:$100 sps:$4 sm:$0xff]  }
 0x527   :  { %11725 = vmatpush1.bf16.msra.mxu0 %v16245_v30 }
 0x528   :  { %11807 = vmatpush1.bf16.msra.mxu1 %v16248_v32  ;;  %11726 = vmatprep.subr.bf16.mxu0 %v16253_v33  ;;  %v16299_v33 = vld [vmem:[%s22241_s5 + $0x1218] ss:$100 sps:$4 sm:$0xff]  }
 0x529   :  { %11808 = vmatprep.subr.bf16.mxu1 %v16256_v26 }
 0x52b   :  { %11727 = vmatpush1.bf16.msra.mxu0 %v16251_v36  ;;  %v16302_v36 = vld [vmem:[%s22241_s5 + $0x1220] ss:$100 sps:$4 sm:$0xff]  }
 0x52c   :  { %11809 = vmatpush1.bf16.msra.mxu1 %v16254_v37  ;;  %11737 = vmatprep.subr.bf16.mxu0 %v16259_v21  ;;  %v16307_v37 = vld [vmem:[%s22241_s5 + $0x12e4] ss:$100 sps:$4 sm:$0xff]   ;;  %v16310_v21 = vld [vmem:[%s22241_s5 + $0x12ec] ss:$100 sps:$4 sm:$0xff]  }
 0x52d   :  { %11819 = vmatprep.subr.bf16.mxu1 %v16262_v39 }
 0x52e   :  { %11729 = vmatmul.mubr.bf16.vlgmr.msra.gmra.mrb[16].mxu0 %v19656_v31 }
 0x52f   :  { %11811 = vmatmul.mubr.bf16.vlgmr.msra.gmra.mrb[16].mxu1 %v19656_v31  ;;  %11738 = vmatpush1.bf16.msra.mxu0 %v16257_v40  ;;  %v16305_v40 = vld [vmem:[%s22241_s5 + $0x12e0] ss:$100 sps:$4 sm:$0xff]  }
 0x530   :  { %11769 = vmatprep.mubr.bf16.mxu0 %v19648_v29  ;;  %11820 = vmatpush1.bf16.msra.mxu1 %v16260_v41  ;;  %v16308_v41 = vld [vmem:[%s22241_s5 + $0x12e8] ss:$100 sps:$4 sm:$0xff]  }
 0x531   :  { %11851 = vmatprep.mubr.bf16.mxu1 %v19648_v29  ;;  %11739 = vmatprep.subr.bf16.mxu0 %v16265_v34  ;;  %v16313_v34 = vld [vmem:[%s22241_s5 + $0x13ac] ss:$100 sps:$4 sm:$0xff]  }
 0x532   :  { %11821 = vmatprep.subr.bf16.mxu1 %v16268_v43  ;;  %v16316_v43 = vld [vmem:[%s22241_s5 + $0x13b4] ss:$100 sps:$4 sm:$0xff]  }
 0x533   :  { %11740 = vmatpush1.bf16.msra.mxu0 %v16263_v45  ;;  %v16311_v45 = vld [vmem:[%s22241_s5 + $0x13a8] ss:$100 sps:$4 sm:$0xff]  }
 0x534   :  { %11822 = vmatpush1.bf16.msra.mxu1 %v16266_v46  ;;  %11741 = vmatprep.subr.bf16.mxu0 %v16271_v35  ;;  %v16314_v46 = vld [vmem:[%s22241_s5 + $0x13b0] ss:$100 sps:$4 sm:$0xff]  }
 0x535   :  { %11823 = vmatprep.subr.bf16.mxu1 %v16274_v50  ;;  %v16319_v35 = vld [vmem:[%s22241_s5 + $0x1474] ss:$100 sps:$4 sm:$0xff]   ;;  %v16322_v50 = vld [vmem:[%s22241_s5 + $0x147c] ss:$100 sps:$4 sm:$0xff]  }
 0x537   :  { %11742 = vmatpush1.bf16.msra.mxu0 %v16269_v51  ;;  %v16317_v51 = vld [vmem:[%s22241_s5 + $0x1470] ss:$100 sps:$4 sm:$0xff]  }
 0x538   :  { %11824 = vmatpush1.bf16.msra.mxu1 %v16272_v53  ;;  %11743 = vmatprep.subr.bf16.mxu0 %v16277_v38  ;;  %v16320_v53 = vld [vmem:[%s22241_s5 + $0x1478] ss:$100 sps:$4 sm:$0xff]  }
 0x539   :  { %11825 = vmatprep.subr.bf16.mxu1 %v16280_v54  ;;  %v16325_v38 = vld [vmem:[%s22241_s5 + $0x153c] ss:$100 sps:$4 sm:$0xff]   ;;  %v16328_v54 = vld [vmem:[%s22241_s5 + $0x1544] ss:$100 sps:$4 sm:$0xff]  }
 0x53b   :  { %11744 = vmatpush1.bf16.msra.mxu0 %v16275_v55  ;;  %v16323_v55 = vld [vmem:[%s22241_s5 + $0x1538] ss:$100 sps:$4 sm:$0xff]  }
 0x53c   :  { %11826 = vmatpush1.bf16.msra.mxu1 %v16278_v56  ;;  %11745 = vmatprep.subr.bf16.mxu0 %v16283_v47  ;;  %v16326_v56 = vld [vmem:[%s22241_s5 + $0x1540] ss:$100 sps:$4 sm:$0xff]  }
 0x53d   :  { %11827 = vmatprep.subr.bf16.mxu1 %v16286_v57  ;;  %v16331_v47 = vld [vmem:[%s22241_s5 + $0x1604] ss:$100 sps:$4 sm:$0xff]   ;;  %v16334_v57 = vld [vmem:[%s22241_s5 + $0x160c] ss:$100 sps:$4 sm:$0xff]  }
 0x53f   :  { %11746 = vmatpush1.bf16.msra.mxu0 %v16281_v58  ;;  %v16329_v58 = vld [vmem:[%s22241_s5 + $0x1600] ss:$100 sps:$4 sm:$0xff]  }
 0x540   :  { %11828 = vmatpush1.bf16.msra.mxu1 %v16284_v61  ;;  %11747 = vmatprep.subr.bf16.mxu0 %v16289_v62  ;;  %v16332_v61 = vld [vmem:[%s22241_s5 + $0x1608] ss:$100 sps:$4 sm:$0xff]  }
 0x541   :  { %v11443_v11 = vpop.f32.mrb[8].mxu0  ;;  %11829 = vmatprep.subr.bf16.mxu1 %v16292_v44  ;;  %v16337_v62 = vld [vmem:[%s22241_s5 + $0x16cc] ss:$100 sps:$4 sm:$0xff]   ;;  %v16340_v44 = vld [vmem:[%s22241_s5 + $0x16d4] ss:$100 sps:$4 sm:$0xff]  }
 0x542   :  { %v14395_v52 = vadd.f32 %v11443_v11, %v7214_v0  ;;  %v11525_v63 = vpop.f32.mrb[8].mxu1  ;;  %v11445_v15 = vpop.f32.mrb[9].mxu0  ;;  %v16335_v0 = vld [vmem:[%s22241_s5 + $0x16c8] ss:$100 sps:$4 sm:$0xff]  }
 0x543   :  { %v14397_v16 = vadd.f32 %v11525_v63, %v7222_v1  ;;  %v14396_v17 = vadd.f32 %v11445_v15, %v7218_v2  ;;  %v11527_v7 = vpop.f32.mrb[9].mxu1  ;;  %v11447_v10 = vpop.f32.mrb[10].mxu0  ;;  %11748 = vmatpush1.bf16.msra.mxu0 %v16287_v4  ;;  %v16338_v1 = vld [vmem:[%s22241_s5 + $0x16d0] ss:$100 sps:$4 sm:$0xff]   ;;  %v16346_v4 = vld [vmem:[%s22241_s5 + $0x179c] ss:$100 sps:$4 sm:$0xff]  }
 0x544   :  { %v14398_v19 = vadd.f32 %v11527_v7, %v7226_v60  ;;  %v11529_v20 = vpop.f32.mrb[10].mxu1  ;;  %11830 = vmatpush1.bf16.msra.mxu1 %v16290_v8  ;;  %v11448_v22 = vpop.f32.mrb[11].mxu0  ;;  %11749 = vmatprep.subr.bf16.mxu0 %v16295_v9  ;;  %v16343_v2 = vld [vmem:[%s22241_s5 + $0x1794] ss:$100 sps:$4 sm:$0xff]   ;;  %v16349_v9 = vld [vmem:[%s22241_s5 + $0x185c] ss:$100 sps:$4 sm:$0xff]  }
 0x545   :  { %v14290_v13 = vpack.c.bf16 %v14396_v17, %v14395_v52  ;;  %v11530_v27 = vpop.f32.mrb[11].mxu1  ;;  %11831 = vmatprep.subr.bf16.mxu1 %v16298_v12  ;;  %v16341_v60 = vld [vmem:[%s22241_s5 + $0x1790] ss:$100 sps:$4 sm:$0xff]   ;;  %v16344_v8 = vld [vmem:[%s22241_s5 + $0x1798] ss:$100 sps:$4 sm:$0xff]  }
 0x546   :  { %v14291_v30 = vpack.c.bf16 %v14398_v19, %v14397_v16  ;;  %v16352_v11 = vld [vmem:[%s22241_s5 + $0x1864] ss:$100 sps:$4 sm:$0xff]   ;;  %v16347_v12 = vld [vmem:[%s22241_s5 + $0x1858] ss:$100 sps:$4 sm:$0xff]   ;;  %v16353_v16 = vld [vmem:[%s22241_s5 + $0x30] ss:$100 sps:$4 sm:$0xff]  }
 0x547   :  { %v20741_v32 = vrot.slane %v14290_v13, %v17172_v49  ;;  %11750 = vmatpush1.bf16.msra.mxu0 %v16293_v18  ;;  %v16350_v52 = vld [vmem:[%s22241_s5 + $0x1860] ss:$100 sps:$4 sm:$0xff]   ;;  %v16355_v63 = vld [vmem:[%s22241_s5 + $0x34] ss:$100 sps:$4 sm:$0xff]   ;;  %v16370_v22 = vld [vmem:[%s22241_s5 + $0x1cc] ss:$100 sps:$4 sm:$0xff]  }
 0x548   :  { %v20747_v26 = vrot.slane %v14291_v30, %v17172_v49  ;;  %11832 = vmatpush1.bf16.msra.mxu1 %v16296_v23  ;;  %11751 = vmatprep.subr.bf16.mxu0 %v16301_v24  ;;  %v16358_v15 = vld [vmem:[%s22241_s5 + $0x3c] ss:$100 sps:$4 sm:$0xff]   ;;  %v16364_v10 = vld [vmem:[%s22241_s5 + $0x104] ss:$100 sps:$4 sm:$0xff]   ;;  %v16373_v13 = vld [vmem:[%s22241_s5 + $0x28c] ss:$100 sps:$4 sm:$0xff]  }
 0x549   :  { %11833 = vmatprep.subr.bf16.mxu1 %v16304_v14  ;;  %v16356_v17 = vld [vmem:[%s22241_s5 + $0x38] ss:$100 sps:$4 sm:$0xff]   ;;  %v16362_v19 = vld [vmem:[%s22241_s5 + $0x100] ss:$100 sps:$4 sm:$0xff]   ;;  %v16368_v24 = vld [vmem:[%s22241_s5 + $0x1c8] ss:$100 sps:$4 sm:$0xff]  }
 0x54a   :  { %v12514_v39 = vcombine.low %v20741_v32, %v20747_v26  ;;  %v16361_v7 = vld [vmem:[%s22241_s5 + $0xfc] ss:$100 sps:$4 sm:$0xff]   ;;  %v16367_v20 = vld [vmem:[%s22241_s5 + $0x1c4] ss:$100 sps:$4 sm:$0xff]   ;;  %v16376_v27 = vld [vmem:[%s22241_s5 + $0x294] ss:$100 sps:$4 sm:$0xff]  }
 0x54b   :  { %11752 = vmatpush1.bf16.msra.mxu0 %v16299_v33  ;;  %v16359_v18 = vld [vmem:[%s22241_s5 + $0xf8] ss:$100 sps:$4 sm:$0xff]   ;;  %v16365_v23 = vld [vmem:[%s22241_s5 + $0x1c0] ss:$100 sps:$4 sm:$0xff]   ;;  %v16371_v14 = vld [vmem:[%s22241_s5 + $0x288] ss:$100 sps:$4 sm:$0xff]  }
 0x54c   :  { %11834 = vmatpush1.bf16.msra.mxu1 %v16302_v36  ;;  %11753 = vmatprep.subr.bf16.mxu0 %v16307_v37  ;;  %v16374_v30 = vld [vmem:[%s22241_s5 + $0x290] ss:$100 sps:$4 sm:$0xff]   ;;  %v16382_v36 = vld [vmem:[%s22241_s5 + $0x35c] ss:$100 sps:$4 sm:$0xff]  }
 0x54d   :  { %11835 = vmatprep.subr.bf16.mxu1 %v16310_v21  ;;  %v16379_v33 = vld [vmem:[%s22241_s5 + $0x354] ss:$100 sps:$4 sm:$0xff]   ;;  %v16506_v26 = vld [vmem:[%s22241_s5 + $0x13c0] ss:$100 sps:$4 sm:$0xff]  }
 0x54e   :  { %v16377_v37 = vld [vmem:[%s22241_s5 + $0x350] ss:$100 sps:$4 sm:$0xff]   ;;  %v16380_v21 = vld [vmem:[%s22241_s5 + $0x358] ss:$100 sps:$4 sm:$0xff]  }
 0x54f   :  { %11754 = vmatpush1.bf16.msra.mxu0 %v16305_v40  ;;  %v16385_v40 = vld [vmem:[%s22241_s5 + $0x41c] ss:$100 sps:$4 sm:$0xff]  }
 0x550   :  { %11836 = vmatpush1.bf16.msra.mxu1 %v16308_v41  ;;  %11755 = vmatprep.subr.bf16.mxu0 %v16313_v34  ;;  %v16388_v41 = vld [vmem:[%s22241_s5 + $0x424] ss:$100 sps:$4 sm:$0xff]   ;;  %v16383_v34 = vld [vmem:[%s22241_s5 + $0x418] ss:$100 sps:$4 sm:$0xff]  }
 0x551   :  { %11837 = vmatprep.subr.bf16.mxu1 %v16316_v43  ;;  %v16386_v43 = vld [vmem:[%s22241_s5 + $0x420] ss:$100 sps:$4 sm:$0xff]   ;;  %v16503_v32 = vld [vmem:[%s22241_s5 + $0x13b8] ss:$100 sps:$4 sm:$0xff]  }
 0x553   :  { %11756 = vmatpush1.bf16.msra.mxu0 %v16311_v45  ;;  %v16391_v45 = vld [vmem:[%s22241_s5 + $0x4e4] ss:$100 sps:$4 sm:$0xff]  }
 0x554   :  { %11838 = vmatpush1.bf16.msra.mxu1 %v16314_v46  ;;  %11757 = vmatprep.subr.bf16.mxu0 %v16319_v35  ;;  %v16394_v46 = vld [vmem:[%s22241_s5 + $0x4ec] ss:$100 sps:$4 sm:$0xff]   ;;  %v16389_v35 = vld [vmem:[%s22241_s5 + $0x4e0] ss:$100 sps:$4 sm:$0xff]  }
 0x555   :  { %11839 = vmatprep.subr.bf16.mxu1 %v16322_v50  ;;  %v16392_v50 = vld [vmem:[%s22241_s5 + $0x4e8] ss:$100 sps:$4 sm:$0xff]  }
 0x557   :  { %11758 = vmatpush1.bf16.msra.mxu0 %v16317_v51  ;;  %v16397_v51 = vld [vmem:[%s22241_s5 + $0x5ac] ss:$100 sps:$4 sm:$0xff]  }
 0x558   :  { %11840 = vmatpush1.bf16.msra.mxu1 %v16320_v53  ;;  %11759 = vmatprep.subr.bf16.mxu0 %v16325_v38  ;;  %v16400_v53 = vld [vmem:[%s22241_s5 + $0x5b4] ss:$100 sps:$4 sm:$0xff]   ;;  %v16395_v38 = vld [vmem:[%s22241_s5 + $0x5a8] ss:$100 sps:$4 sm:$0xff]  }
 0x559   :  { %11841 = vmatprep.subr.bf16.mxu1 %v16328_v54  ;;  %v16398_v54 = vld [vmem:[%s22241_s5 + $0x5b0] ss:$100 sps:$4 sm:$0xff]  }
 0x55b   :  { %11760 = vmatpush1.bf16.msra.mxu0 %v16323_v55  ;;  %v16403_v55 = vld [vmem:[%s22241_s5 + $0x674] ss:$100 sps:$4 sm:$0xff]  }
 0x55c   :  { %11842 = vmatpush1.bf16.msra.mxu1 %v16326_v56  ;;  %11761 = vmatprep.subr.bf16.mxu0 %v16331_v47  ;;  %v16406_v56 = vld [vmem:[%s22241_s5 + $0x67c] ss:$100 sps:$4 sm:$0xff]   ;;  %v16401_v47 = vld [vmem:[%s22241_s5 + $0x670] ss:$100 sps:$4 sm:$0xff]  }
 0x55d   :  { %11843 = vmatprep.subr.bf16.mxu1 %v16334_v57  ;;  %v16404_v57 = vld [vmem:[%s22241_s5 + $0x678] ss:$100 sps:$4 sm:$0xff]  }
 0x55f   :  { %11762 = vmatpush1.bf16.msra.mxu0 %v16329_v58  ;;  %v16409_v58 = vld [vmem:[%s22241_s5 + $0x73c] ss:$100 sps:$4 sm:$0xff]  }
 0x560   :  { %11844 = vmatpush1.bf16.msra.mxu1 %v16332_v61  ;;  %11763 = vmatprep.subr.bf16.mxu0 %v16337_v62  ;;  %v16412_v61 = vld [vmem:[%s22241_s5 + $0x744] ss:$100 sps:$4 sm:$0xff]   ;;  %v16407_v62 = vld [vmem:[%s22241_s5 + $0x738] ss:$100 sps:$4 sm:$0xff]  }
 0x561   :  { %11845 = vmatprep.subr.bf16.mxu1 %v16340_v44  ;;  %v16410_v44 = vld [vmem:[%s22241_s5 + $0x740] ss:$100 sps:$4 sm:$0xff]  }
 0x563   :  { %11764 = vmatpush1.bf16.msra.mxu0 %v16335_v0  ;;  %v16415_v0 = vld [vmem:[%s22241_s5 + $0x804] ss:$100 sps:$4 sm:$0xff]  }
 0x564   :  { %11846 = vmatpush1.bf16.msra.mxu1 %v16338_v1  ;;  %11765 = vmatprep.subr.bf16.mxu0 %v16343_v2  ;;  %v16418_v1 = vld [vmem:[%s22241_s5 + $0x80c] ss:$100 sps:$4 sm:$0xff]   ;;  %v16413_v2 = vld [vmem:[%s22241_s5 + $0x800] ss:$100 sps:$4 sm:$0xff]  }
 0x565   :  { %11847 = vmatprep.subr.bf16.mxu1 %v16346_v4  ;;  %v16416_v4 = vld [vmem:[%s22241_s5 + $0x808] ss:$100 sps:$4 sm:$0xff]  }
 0x567   :  { %11766 = vmatpush1.bf16.msra.mxu0 %v16341_v60  ;;  %v16421_v60 = vld [vmem:[%s22241_s5 + $0x8cc] ss:$100 sps:$4 sm:$0xff]  }
 0x568   :  { %11848 = vmatpush1.bf16.msra.mxu1 %v16344_v8  ;;  %11767 = vmatprep.subr.bf16.mxu0 %v16349_v9  ;;  %v16424_v8 = vld [vmem:[%s22241_s5 + $0x8d4] ss:$100 sps:$4 sm:$0xff]   ;;  %v16419_v9 = vld [vmem:[%s22241_s5 + $0x8c8] ss:$100 sps:$4 sm:$0xff]  }
 0x569   :  { %11849 = vmatprep.subr.bf16.mxu1 %v16352_v11  ;;  %v16422_v11 = vld [vmem:[%s22241_s5 + $0x8d0] ss:$100 sps:$4 sm:$0xff]  }
 0x56b   :  { %11768 = vmatpush1.bf16.msra.mxu0 %v16347_v12  ;;  %v16427_v12 = vld [vmem:[%s22241_s5 + $0x994] ss:$100 sps:$4 sm:$0xff]  }
 0x56c   :  { %11850 = vmatpush1.bf16.msra.mxu1 %v16350_v52  ;;  %11860 = vmatprep.subr.bf16.mxu0 %v16355_v63  ;;  %v16430_v52 = vld [vmem:[%s22241_s5 + $0x99c] ss:$100 sps:$4 sm:$0xff]   ;;  %v16425_v63 = vld [vmem:[%s22241_s5 + $0x990] ss:$100 sps:$4 sm:$0xff]  }
 0x56d   :  { %11942 = vmatprep.subr.bf16.mxu1 %v16358_v15  ;;  %v16428_v15 = vld [vmem:[%s22241_s5 + $0x998] ss:$100 sps:$4 sm:$0xff]  }
 0x56e   :  { %11770 = vmatmul.mubr.bf16.vlgmr.msra.gmra.mrb[16].mxu0 %v19658_v25 }
 0x56f   :  { %11852 = vmatmul.mubr.bf16.vlgmr.msra.gmra.mrb[16].mxu1 %v19658_v25  ;;  %11861 = vmatpush1.bf16.msra.mxu0 %v16353_v16  ;;  %v16433_v16 = vld [vmem:[%s22241_s5 + $0xa5c] ss:$100 sps:$4 sm:$0xff]  }
 0x570   :  { %11892 = vmatprep.mubr.bf16.mxu0 %v19646_v28  ;;  %11943 = vmatpush1.bf16.msra.mxu1 %v16356_v17  ;;  %v16436_v17 = vld [vmem:[%s22241_s5 + $0xa64] ss:$100 sps:$4 sm:$0xff]  }
 0x571   :  { %11974 = vmatprep.mubr.bf16.mxu1 %v19646_v28  ;;  %11862 = vmatprep.subr.bf16.mxu0 %v16361_v7  ;;  %v16431_v7 = vld [vmem:[%s22241_s5 + $0xa58] ss:$100 sps:$4 sm:$0xff]  }
 0x572   :  { %11944 = vmatprep.subr.bf16.mxu1 %v16364_v10  ;;  %v16434_v10 = vld [vmem:[%s22241_s5 + $0xa60] ss:$100 sps:$4 sm:$0xff]  }
 0x573   :  { %11863 = vmatpush1.bf16.msra.mxu0 %v16359_v18  ;;  %v16439_v18 = vld [vmem:[%s22241_s5 + $0xb24] ss:$100 sps:$4 sm:$0xff]  }
 0x574   :  { %11945 = vmatpush1.bf16.msra.mxu1 %v16362_v19  ;;  %11864 = vmatprep.subr.bf16.mxu0 %v16367_v20  ;;  %v16442_v19 = vld [vmem:[%s22241_s5 + $0xb2c] ss:$100 sps:$4 sm:$0xff]   ;;  %v16437_v20 = vld [vmem:[%s22241_s5 + $0xb20] ss:$100 sps:$4 sm:$0xff]  }
 0x575   :  { %11946 = vmatprep.subr.bf16.mxu1 %v16370_v22  ;;  %v16440_v22 = vld [vmem:[%s22241_s5 + $0xb28] ss:$100 sps:$4 sm:$0xff]  }
 0x577   :  { %11865 = vmatpush1.bf16.msra.mxu0 %v16365_v23  ;;  %v16445_v23 = vld [vmem:[%s22241_s5 + $0xbec] ss:$100 sps:$4 sm:$0xff]  }
 0x578   :  { %11947 = vmatpush1.bf16.msra.mxu1 %v16368_v24  ;;  %11866 = vmatprep.subr.bf16.mxu0 %v16373_v13  ;;  %v16448_v24 = vld [vmem:[%s22241_s5 + $0xbf4] ss:$100 sps:$4 sm:$0xff]   ;;  %v16443_v13 = vld [vmem:[%s22241_s5 + $0xbe8] ss:$100 sps:$4 sm:$0xff]  }
 0x579   :  { %11948 = vmatprep.subr.bf16.mxu1 %v16376_v27  ;;  %v16446_v27 = vld [vmem:[%s22241_s5 + $0xbf0] ss:$100 sps:$4 sm:$0xff]  }
 0x57b   :  { %11867 = vmatpush1.bf16.msra.mxu0 %v16371_v14  ;;  %v16451_v14 = vld [vmem:[%s22241_s5 + $0xcb4] ss:$100 sps:$4 sm:$0xff]  }
 0x57c   :  { %11949 = vmatpush1.bf16.msra.mxu1 %v16374_v30  ;;  %11868 = vmatprep.subr.bf16.mxu0 %v16379_v33  ;;  %v16454_v30 = vld [vmem:[%s22241_s5 + $0xcbc] ss:$100 sps:$4 sm:$0xff]   ;;  %v16449_v33 = vld [vmem:[%s22241_s5 + $0xcb0] ss:$100 sps:$4 sm:$0xff]  }
 0x57d   :  { %11950 = vmatprep.subr.bf16.mxu1 %v16382_v36  ;;  %v16452_v36 = vld [vmem:[%s22241_s5 + $0xcb8] ss:$100 sps:$4 sm:$0xff]  }
 0x57f   :  { %11869 = vmatpush1.bf16.msra.mxu0 %v16377_v37  ;;  %v16457_v37 = vld [vmem:[%s22241_s5 + $0xd7c] ss:$100 sps:$4 sm:$0xff]  }
 0x580   :  { %11951 = vmatpush1.bf16.msra.mxu1 %v16380_v21  ;;  %11870 = vmatprep.subr.bf16.mxu0 %v16385_v40  ;;  %v16460_v21 = vld [vmem:[%s22241_s5 + $0xd84] ss:$100 sps:$4 sm:$0xff]   ;;  %v16455_v40 = vld [vmem:[%s22241_s5 + $0xd78] ss:$100 sps:$4 sm:$0xff]  }
 0x581   :  { %11952 = vmatprep.subr.bf16.mxu1 %v16388_v41  ;;  %v16458_v41 = vld [vmem:[%s22241_s5 + $0xd80] ss:$100 sps:$4 sm:$0xff]  }
 0x583   :  { %11871 = vmatpush1.bf16.msra.mxu0 %v16383_v34  ;;  %v16463_v34 = vld [vmem:[%s22241_s5 + $0xe44] ss:$100 sps:$4 sm:$0xff]  }
 0x584   :  { %11953 = vmatpush1.bf16.msra.mxu1 %v16386_v43  ;;  %11872 = vmatprep.subr.bf16.mxu0 %v16391_v45  ;;  %v16466_v43 = vld [vmem:[%s22241_s5 + $0xe4c] ss:$100 sps:$4 sm:$0xff]   ;;  %v16461_v45 = vld [vmem:[%s22241_s5 + $0xe40] ss:$100 sps:$4 sm:$0xff]  }
 0x585   :  { %11954 = vmatprep.subr.bf16.mxu1 %v16394_v46  ;;  %v16464_v46 = vld [vmem:[%s22241_s5 + $0xe48] ss:$100 sps:$4 sm:$0xff]  }
 0x587   :  { %11873 = vmatpush1.bf16.msra.mxu0 %v16389_v35  ;;  %v16469_v35 = vld [vmem:[%s22241_s5 + $0xf0c] ss:$100 sps:$4 sm:$0xff]  }
 0x588   :  { %11955 = vmatpush1.bf16.msra.mxu1 %v16392_v50  ;;  %11874 = vmatprep.subr.bf16.mxu0 %v16397_v51  ;;  %v16472_v50 = vld [vmem:[%s22241_s5 + $0xf14] ss:$100 sps:$4 sm:$0xff]   ;;  %v16467_v51 = vld [vmem:[%s22241_s5 + $0xf08] ss:$100 sps:$4 sm:$0xff]  }
 0x589   :  { %11956 = vmatprep.subr.bf16.mxu1 %v16400_v53  ;;  %v16470_v53 = vld [vmem:[%s22241_s5 + $0xf10] ss:$100 sps:$4 sm:$0xff]  }
 0x58b   :  { %11875 = vmatpush1.bf16.msra.mxu0 %v16395_v38  ;;  %v16475_v38 = vld [vmem:[%s22241_s5 + $0xfd4] ss:$100 sps:$4 sm:$0xff]  }
 0x58c   :  { %11957 = vmatpush1.bf16.msra.mxu1 %v16398_v54  ;;  %11876 = vmatprep.subr.bf16.mxu0 %v16403_v55  ;;  %v16478_v54 = vld [vmem:[%s22241_s5 + $0xfdc] ss:$100 sps:$4 sm:$0xff]   ;;  %v21105_v55 = vsub.s32 4, %v17154_v42 }
 0x58d   :  { %11958 = vmatprep.subr.bf16.mxu1 %v16406_v56  ;;  %v16473_v56 = vld [vmem:[%s22241_s5 + $0xfd0] ss:$100 sps:$4 sm:$0xff]  }
 0x58f   :  { %11877 = vmatpush1.bf16.msra.mxu0 %v16401_v47  ;;  %v21111_v47 = vsub.s32 6, %v17154_v42 }
 0x590   :  { %11959 = vmatpush1.bf16.msra.mxu1 %v16404_v57  ;;  %11878 = vmatprep.subr.bf16.mxu0 %v16409_v58  ;;  %v21114_v57 = vsub.s32 5, %v17154_v42  ;;  %v16476_v58 = vld [vmem:[%s22241_s5 + $0xfd8] ss:$100 sps:$4 sm:$0xff]  }
 0x591   :  { %11960 = vmatprep.subr.bf16.mxu1 %v16412_v61  ;;  %v21120_v61 = vsub.s32 7, %v17154_v42 }
 0x592   :  { %v7234_v42 = vrot.slane %v20697_v48, %v21114_v57 }
 0x593   :  { %11879 = vmatpush1.bf16.msra.mxu0 %v16407_v62  ;;  %v16481_v62 = vld [vmem:[%s22241_s5 + $0x109c] ss:$100 sps:$4 sm:$0xff]  }
 0x594   :  { %11961 = vmatpush1.bf16.msra.mxu1 %v16410_v44  ;;  %11880 = vmatprep.subr.bf16.mxu0 %v16415_v0  ;;  %v16484_v44 = vld [vmem:[%s22241_s5 + $0x10a4] ss:$100 sps:$4 sm:$0xff]   ;;  %v7230_v0 = vrot.slane %v20697_v48, %v21105_v55 }
 0x595   :  { %11962 = vmatprep.subr.bf16.mxu1 %v16418_v1  ;;  %v7238_v1 = vrot.slane %v20697_v48, %v21111_v47 }
 0x597   :  { %11881 = vmatpush1.bf16.msra.mxu0 %v16413_v2  ;;  %v16479_v2 = vld [vmem:[%s22241_s5 + $0x1098] ss:$100 sps:$4 sm:$0xff]  }
 0x598   :  { %11963 = vmatpush1.bf16.msra.mxu1 %v16416_v4  ;;  %11882 = vmatprep.subr.bf16.mxu0 %v16421_v60  ;;  %v7242_v4 = vrot.slane %v20697_v48, %v21120_v61  ;;  %v16482_v60 = vld [vmem:[%s22241_s5 + $0x10a0] ss:$100 sps:$4 sm:$0xff]  }
 0x599   :  { %11964 = vmatprep.subr.bf16.mxu1 %v16424_v8  ;;  %v16487_v8 = vld [vmem:[%s22241_s5 + $0x1164] ss:$100 sps:$4 sm:$0xff]  }
 0x59b   :  { %11883 = vmatpush1.bf16.msra.mxu0 %v16419_v9 }
 0x59c   :  { %11965 = vmatpush1.bf16.msra.mxu1 %v16422_v11  ;;  %11884 = vmatprep.subr.bf16.mxu0 %v16427_v12  ;;  %v16490_v11 = vld [vmem:[%s22241_s5 + $0x116c] ss:$100 sps:$4 sm:$0xff]  }
 0x59d   :  { %11966 = vmatprep.subr.bf16.mxu1 %v16430_v52 }
 0x59f   :  { %11885 = vmatpush1.bf16.msra.mxu0 %v16425_v63 }
 0x5a0   :  { %11967 = vmatpush1.bf16.msra.mxu1 %v16428_v15  ;;  %11886 = vmatprep.subr.bf16.mxu0 %v16433_v16 }
 0x5a1   :  { %11968 = vmatprep.subr.bf16.mxu1 %v16436_v17 }
 0x5a3   :  { %11887 = vmatpush1.bf16.msra.mxu0 %v16431_v7  ;;  %v16485_v7 = vld [vmem:[%s22241_s5 + $0x1160] ss:$100 sps:$4 sm:$0xff]  }
 0x5a4   :  { %11969 = vmatpush1.bf16.msra.mxu1 %v16434_v10  ;;  %11888 = vmatprep.subr.bf16.mxu0 %v16439_v18 }
 0x5a5   :  { %11970 = vmatprep.subr.bf16.mxu1 %v16442_v19 }
 0x5a7   :  { %11889 = vmatpush1.bf16.msra.mxu0 %v16437_v20  ;;  %v16488_v20 = vld [vmem:[%s22241_s5 + $0x1168] ss:$100 sps:$4 sm:$0xff]  }
 0x5a8   :  { %11971 = vmatpush1.bf16.msra.mxu1 %v16440_v22  ;;  %11890 = vmatprep.subr.bf16.mxu0 %v16445_v23  ;;  %v16493_v22 = vld [vmem:[%s22241_s5 + $0x122c] ss:$100 sps:$4 sm:$0xff]  }
 0x5a9   :  { %11972 = vmatprep.subr.bf16.mxu1 %v16448_v24 }
 0x5ab   :  { %11891 = vmatpush1.bf16.msra.mxu0 %v16443_v13  ;;  %v16496_v13 = vld [vmem:[%s22241_s5 + $0x1234] ss:$100 sps:$4 sm:$0xff]  }
 0x5ac   :  { %11973 = vmatpush1.bf16.msra.mxu1 %v16446_v27  ;;  %11901 = vmatprep.subr.bf16.mxu0 %v16451_v14 }
 0x5ad   :  { %11983 = vmatprep.subr.bf16.mxu1 %v16454_v30  ;;  %v16491_v30 = vld [vmem:[%s22241_s5 + $0x1228] ss:$100 sps:$4 sm:$0xff]  }
 0x5ae   :  { %11893 = vmatmul.mubr.bf16.vlgmr.msra.gmra.mrb[20].mxu0 %v19656_v31 }
 0x5af   :  { %11975 = vmatmul.mubr.bf16.vlgmr.msra.gmra.mrb[20].mxu1 %v19656_v31  ;;  %11902 = vmatpush1.bf16.msra.mxu0 %v16449_v33 }
 0x5b0   :  { %11933 = vmatprep.mubr.bf16.mxu0 %v19648_v29  ;;  %11984 = vmatpush1.bf16.msra.mxu1 %v16452_v36  ;;  %v16494_v36 = vld [vmem:[%s22241_s5 + $0x1230] ss:$100 sps:$4 sm:$0xff]  }
 0x5b1   :  { %12015 = vmatprep.mubr.bf16.mxu1 %v19648_v29  ;;  %11903 = vmatprep.subr.bf16.mxu0 %v16457_v37  ;;  %v16499_v37 = vld [vmem:[%s22241_s5 + $0x12f4] ss:$100 sps:$4 sm:$0xff]  }
 0x5b2   :  { %11985 = vmatprep.subr.bf16.mxu1 %v16460_v21  ;;  %v16502_v21 = vld [vmem:[%s22241_s5 + $0x12fc] ss:$100 sps:$4 sm:$0xff]  }
 0x5b3   :  { %11904 = vmatpush1.bf16.msra.mxu0 %v16455_v40 }
 0x5b4   :  { %11986 = vmatpush1.bf16.msra.mxu1 %v16458_v41  ;;  %11905 = vmatprep.subr.bf16.mxu0 %v16463_v34  ;;  %v16497_v41 = vld [vmem:[%s22241_s5 + $0x12f0] ss:$100 sps:$4 sm:$0xff]   ;;  %v12522_v34 = vrot.slane %v12514_v39, %v17172_v49  ;;  %v16511_v39 = vld [vmem:[%s22241_s5 + $0x1484] ss:$100 sps:$4 sm:$0xff]  }
 0x5b5   :  { %11987 = vmatprep.subr.bf16.mxu1 %v16466_v43 }
 0x5b7   :  { %11906 = vmatpush1.bf16.msra.mxu0 %v16461_v45  ;;  %v16500_v45 = vld [vmem:[%s22241_s5 + $0x12f8] ss:$100 sps:$4 sm:$0xff]  }
 0x5b8   :  { %11988 = vmatpush1.bf16.msra.mxu1 %v16464_v46  ;;  %11907 = vmatprep.subr.bf16.mxu0 %v16469_v35  ;;  %v16505_v46 = vld [vmem:[%s22241_s5 + $0x13bc] ss:$100 sps:$4 sm:$0xff]   ;;  %v16508_v35 = vld [vmem:[%s22241_s5 + $0x13c4] ss:$100 sps:$4 sm:$0xff]  }
 0x5b9   :  { %11989 = vmatprep.subr.bf16.mxu1 %v16472_v50 }
 0x5bb   :  { %11908 = vmatpush1.bf16.msra.mxu0 %v16467_v51  ;;  %v16514_v51 = vld [vmem:[%s22241_s5 + $0x148c] ss:$100 sps:$4 sm:$0xff]  }
 0x5bc   :  { %11990 = vmatpush1.bf16.msra.mxu1 %v16470_v53  ;;  %11909 = vmatprep.subr.bf16.mxu0 %v16475_v38  ;;  %v16509_v53 = vld [vmem:[%s22241_s5 + $0x1480] ss:$100 sps:$4 sm:$0xff]   ;;  %v16512_v38 = vld [vmem:[%s22241_s5 + $0x1488] ss:$100 sps:$4 sm:$0xff]  }
 0x5bd   :  { %11991 = vmatprep.subr.bf16.mxu1 %v16478_v54  ;;  %v16517_v54 = vld [vmem:[%s22241_s5 + $0x154c] ss:$100 sps:$4 sm:$0xff]  }
 0x5bf   :  { %11910 = vmatpush1.bf16.msra.mxu0 %v16473_v56  ;;  %v16520_v56 = vld [vmem:[%s22241_s5 + $0x1554] ss:$100 sps:$4 sm:$0xff]  }
 0x5c0   :  { %11992 = vmatpush1.bf16.msra.mxu1 %v16476_v58  ;;  %11911 = vmatprep.subr.bf16.mxu0 %v16481_v62  ;;  %v16515_v58 = vld [vmem:[%s22241_s5 + $0x1548] ss:$100 sps:$4 sm:$0xff]   ;;  %v16518_v62 = vld [vmem:[%s22241_s5 + $0x1550] ss:$100 sps:$4 sm:$0xff]  }
 0x5c1   :  { %v11607_v9 = vpop.f32.mrb[12].mxu0  ;;  %11993 = vmatprep.subr.bf16.mxu1 %v16484_v44  ;;  %v16523_v44 = vld [vmem:[%s22241_s5 + $0x1614] ss:$100 sps:$4 sm:$0xff]  }
 0x5c2   :  { %v14399_v12 = vadd.f32 %v11607_v9, %v7230_v0  ;;  %v11689_v52 = vpop.f32.mrb[12].mxu1  ;;  %v11609_v63 = vpop.f32.mrb[13].mxu0  ;;  %v16526_v0 = vld [vmem:[%s22241_s5 + $0x161c] ss:$100 sps:$4 sm:$0xff]   ;;  %v16535_v9 = vld [vmem:[%s22241_s5 + $0x17a4] ss:$100 sps:$4 sm:$0xff]  }
 0x5c3   :  { %v14401_v15 = vadd.f32 %v11689_v52, %v7238_v1  ;;  %v14400_v48 = vadd.f32 %v11609_v63, %v7234_v42  ;;  %v11691_v16 = vpop.f32.mrb[13].mxu1  ;;  %v11611_v17 = vpop.f32.mrb[14].mxu0  ;;  %11912 = vmatpush1.bf16.msra.mxu0 %v16479_v2  ;;  %v16521_v1 = vld [vmem:[%s22241_s5 + $0x1610] ss:$100 sps:$4 sm:$0xff]   ;;  %v16524_v42 = vld [vmem:[%s22241_s5 + $0x1618] ss:$100 sps:$4 sm:$0xff]  }
 0x5c4   :  { %v14402_v10 = vadd.f32 %v11691_v16, %v7242_v4  ;;  %v11693_v18 = vpop.f32.mrb[14].mxu1  ;;  %11994 = vmatpush1.bf16.msra.mxu1 %v16482_v60  ;;  %v11612_v19 = vpop.f32.mrb[15].mxu0  ;;  %11913 = vmatprep.subr.bf16.mxu0 %v16487_v8  ;;  %v16529_v2 = vld [vmem:[%s22241_s5 + $0x16dc] ss:$100 sps:$4 sm:$0xff]   ;;  %v16532_v4 = vld [vmem:[%s22241_s5 + $0x16e4] ss:$100 sps:$4 sm:$0xff]  }
 0x5c5   :  { %v14292_v23 = vpack.c.bf16 %v14400_v48, %v14399_v12  ;;  %v11694_v24 = vpop.f32.mrb[15].mxu1  ;;  %11995 = vmatprep.subr.bf16.mxu1 %v16490_v11  ;;  %v16527_v60 = vld [vmem:[%s22241_s5 + $0x16d8] ss:$100 sps:$4 sm:$0xff]   ;;  %v16530_v8 = vld [vmem:[%s22241_s5 + $0x16e0] ss:$100 sps:$4 sm:$0xff]  }
 0x5c6   :  { %v14293_v27 = vpack.c.bf16 %v14402_v10, %v14401_v15  ;;  %v16538_v11 = vld [vmem:[%s22241_s5 + $0x17ac] ss:$100 sps:$4 sm:$0xff]   ;;  %v16533_v12 = vld [vmem:[%s22241_s5 + $0x17a0] ss:$100 sps:$4 sm:$0xff]   ;;  %v16544_v15 = vld [vmem:[%s22241_s5 + $0x1874] ss:$100 sps:$4 sm:$0xff]  }
 0x5c7   :  { %v12506_v14 = vrot.slane %v14292_v23, %v17172_v49  ;;  %11914 = vmatpush1.bf16.msra.mxu0 %v16485_v7  ;;  %v16536_v52 = vld [vmem:[%s22241_s5 + $0x17a8] ss:$100 sps:$4 sm:$0xff]   ;;  %v16542_v16 = vld [vmem:[%s22241_s5 + $0x1870] ss:$100 sps:$4 sm:$0xff]   ;;  %v16545_v10 = vld [vmem:[%s22241_s5 + $0x40] ss:$100 sps:$4 sm:$0xff]  }
 0x5c8   :  { %v12513_v33 = vrot.slane %v14293_v27, %v17172_v49  ;;  %11996 = vmatpush1.bf16.msra.mxu1 %v16488_v20  ;;  %11915 = vmatprep.subr.bf16.mxu0 %v16493_v22  ;;  %v16541_v63 = vld [vmem:[%s22241_s5 + $0x186c] ss:$100 sps:$4 sm:$0xff]   ;;  %v16547_v17 = vld [vmem:[%s22241_s5 + $0x44] ss:$100 sps:$4 sm:$0xff]   ;;  %v16556_v20 = vld [vmem:[%s22241_s5 + $0x114] ss:$100 sps:$4 sm:$0xff]  }
 0x5c9   :  { %11997 = vmatprep.subr.bf16.mxu1 %v16496_v13  ;;  %v16539_v48 = vld [vmem:[%s22241_s5 + $0x1868] ss:$100 sps:$4 sm:$0xff]   ;;  %v16554_v23 = vld [vmem:[%s22241_s5 + $0x110] ss:$100 sps:$4 sm:$0xff]   ;;  %v16562_v13 = vld [vmem:[%s22241_s5 + $0x1dc] ss:$100 sps:$4 sm:$0xff]  }
 0x5ca   :  { %v12515_v40 = vcombine.low %v12506_v14, %v12513_v33  ;;  %v16550_v7 = vld [vmem:[%s22241_s5 + $0x4c] ss:$100 sps:$4 sm:$0xff]   ;;  %v16559_v24 = vld [vmem:[%s22241_s5 + $0x1d4] ss:$100 sps:$4 sm:$0xff]   ;;  %v16568_v33 = vld [vmem:[%s22241_s5 + $0x2a4] ss:$100 sps:$4 sm:$0xff]  }
 0x5cb   :  { %11916 = vmatpush1.bf16.msra.mxu0 %v16491_v30  ;;  %v16548_v18 = vld [vmem:[%s22241_s5 + $0x48] ss:$100 sps:$4 sm:$0xff]   ;;  %v16557_v27 = vld [vmem:[%s22241_s5 + $0x1d0] ss:$100 sps:$4 sm:$0xff]   ;;  %v16560_v14 = vld [vmem:[%s22241_s5 + $0x1d8] ss:$100 sps:$4 sm:$0xff]  }
 0x5cc   :  { %v12529_v43 = vrot.slane %v12515_v40, %v17172_v49  ;;  %11998 = vmatpush1.bf16.msra.mxu1 %v16494_v36  ;;  %11917 = vmatprep.subr.bf16.mxu0 %v16499_v37  ;;  %v16553_v19 = vld [vmem:[%s22241_s5 + $0x10c] ss:$100 sps:$4 sm:$0xff]   ;;  %v16565_v30 = vld [vmem:[%s22241_s5 + $0x29c] ss:$100 sps:$4 sm:$0xff]  }
 0x5cd   :  { %11999 = vmatprep.subr.bf16.mxu1 %v16502_v21  ;;  %v16551_v22 = vld [vmem:[%s22241_s5 + $0x108] ss:$100 sps:$4 sm:$0xff]   ;;  %v16563_v36 = vld [vmem:[%s22241_s5 + $0x298] ss:$100 sps:$4 sm:$0xff]   ;;  %v16566_v37 = vld [vmem:[%s22241_s5 + $0x2a0] ss:$100 sps:$4 sm:$0xff]  }
 0x5ce   :  { %v12530_v50 = vcombine.low %v12522_v34, %v12529_v43  ;;  %v16571_v21 = vld [vmem:[%s22241_s5 + $0x364] ss:$100 sps:$4 sm:$0xff]   ;;  %v16574_v40 = vld [vmem:[%s22241_s5 + $0x36c] ss:$100 sps:$4 sm:$0xff]  }
 0x5cf   :  { %11918 = vmatpush1.bf16.msra.mxu0 %v16497_v41  ;;  %v16569_v41 = vld [vmem:[%s22241_s5 + $0x360] ss:$100 sps:$4 sm:$0xff]   ;;  %v16572_v34 = vld [vmem:[%s22241_s5 + $0x368] ss:$100 sps:$4 sm:$0xff]  }
 0x5d0   :  { %12647 = vst [vmem:[%s22244_s8] sm:$0xff] %v12530_v50  ;;  %12000 = vmatpush1.bf16.msra.mxu1 %v16500_v45  ;;  %11919 = vmatprep.subr.bf16.mxu0 %v16505_v46  ;;  %v16577_v43 = vld [vmem:[%s22241_s5 + $0x42c] ss:$100 sps:$4 sm:$0xff]   ;;  %v16580_v45 = vld [vmem:[%s22241_s5 + $0x434] ss:$100 sps:$4 sm:$0xff]  }
 0x5d1   :  { %12001 = vmatprep.subr.bf16.mxu1 %v16508_v35  ;;  %v16575_v46 = vld [vmem:[%s22241_s5 + $0x428] ss:$100 sps:$4 sm:$0xff]   ;;  %v16578_v35 = vld [vmem:[%s22241_s5 + $0x430] ss:$100 sps:$4 sm:$0xff]  }
 0x5d2   :  { %v16583_v50 = vld [vmem:[%s22241_s5 + $0x4f4] ss:$100 sps:$4 sm:$0xff]  }
 0x5d3   :  { %11920 = vmatpush1.bf16.msra.mxu0 %v16503_v32  ;;  %v16586_v32 = vld [vmem:[%s22241_s5 + $0x4fc] ss:$100 sps:$4 sm:$0xff]  }
 0x5d4   :  { %12002 = vmatpush1.bf16.msra.mxu1 %v16506_v26  ;;  %11921 = vmatprep.subr.bf16.mxu0 %v16511_v39  ;;  %v16581_v26 = vld [vmem:[%s22241_s5 + $0x4f0] ss:$100 sps:$4 sm:$0xff]   ;;  %v16584_v39 = vld [vmem:[%s22241_s5 + $0x4f8] ss:$100 sps:$4 sm:$0xff]  }
 0x5d5   :  { %12003 = vmatprep.subr.bf16.mxu1 %v16514_v51  ;;  %v16589_v51 = vld [vmem:[%s22241_s5 + $0x5bc] ss:$100 sps:$4 sm:$0xff]  }
 0x5d7   :  { %11922 = vmatpush1.bf16.msra.mxu0 %v16509_v53  ;;  %v16592_v53 = vld [vmem:[%s22241_s5 + $0x5c4] ss:$100 sps:$4 sm:$0xff]  }
 0x5d8   :  { %12004 = vmatpush1.bf16.msra.mxu1 %v16512_v38  ;;  %11923 = vmatprep.subr.bf16.mxu0 %v16517_v54  ;;  %v16587_v38 = vld [vmem:[%s22241_s5 + $0x5b8] ss:$100 sps:$4 sm:$0xff]   ;;  %v16590_v54 = vld [vmem:[%s22241_s5 + $0x5c0] ss:$100 sps:$4 sm:$0xff]  }
 0x5d9   :  { %12005 = vmatprep.subr.bf16.mxu1 %v16520_v56  ;;  %v16595_v56 = vld [vmem:[%s22241_s5 + $0x684] ss:$100 sps:$4 sm:$0xff]  }
 0x5db   :  { %11924 = vmatpush1.bf16.msra.mxu0 %v16515_v58  ;;  %v16598_v58 = vld [vmem:[%s22241_s5 + $0x68c] ss:$100 sps:$4 sm:$0xff]  }
 0x5dc   :  { %12006 = vmatpush1.bf16.msra.mxu1 %v16518_v62  ;;  %11925 = vmatprep.subr.bf16.mxu0 %v16523_v44  ;;  %v16593_v62 = vld [vmem:[%s22241_s5 + $0x680] ss:$100 sps:$4 sm:$0xff]   ;;  %v16596_v44 = vld [vmem:[%s22241_s5 + $0x688] ss:$100 sps:$4 sm:$0xff]  }
 0x5dd   :  { %12007 = vmatprep.subr.bf16.mxu1 %v16526_v0  ;;  %v16601_v0 = vld [vmem:[%s22241_s5 + $0x74c] ss:$100 sps:$4 sm:$0xff]  }
 0x5df   :  { %11926 = vmatpush1.bf16.msra.mxu0 %v16521_v1  ;;  %v16604_v1 = vld [vmem:[%s22241_s5 + $0x754] ss:$100 sps:$4 sm:$0xff]  }
 0x5e0   :  { %12008 = vmatpush1.bf16.msra.mxu1 %v16524_v42  ;;  %11927 = vmatprep.subr.bf16.mxu0 %v16529_v2  ;;  %v16599_v42 = vld [vmem:[%s22241_s5 + $0x748] ss:$100 sps:$4 sm:$0xff]   ;;  %v16602_v2 = vld [vmem:[%s22241_s5 + $0x750] ss:$100 sps:$4 sm:$0xff]  }
 0x5e1   :  { %12009 = vmatprep.subr.bf16.mxu1 %v16532_v4  ;;  %v16607_v4 = vld [vmem:[%s22241_s5 + $0x814] ss:$100 sps:$4 sm:$0xff]  }
 0x5e3   :  { %11928 = vmatpush1.bf16.msra.mxu0 %v16527_v60  ;;  %v16610_v60 = vld [vmem:[%s22241_s5 + $0x81c] ss:$100 sps:$4 sm:$0xff]  }
 0x5e4   :  { %12010 = vmatpush1.bf16.msra.mxu1 %v16530_v8  ;;  %11929 = vmatprep.subr.bf16.mxu0 %v16535_v9  ;;  %v16605_v8 = vld [vmem:[%s22241_s5 + $0x810] ss:$100 sps:$4 sm:$0xff]   ;;  %v16608_v9 = vld [vmem:[%s22241_s5 + $0x818] ss:$100 sps:$4 sm:$0xff]  }
 0x5e5   :  { %12011 = vmatprep.subr.bf16.mxu1 %v16538_v11  ;;  %v16613_v11 = vld [vmem:[%s22241_s5 + $0x8dc] ss:$100 sps:$4 sm:$0xff]  }
 0x5e7   :  { %11930 = vmatpush1.bf16.msra.mxu0 %v16533_v12  ;;  %v16616_v12 = vld [vmem:[%s22241_s5 + $0x8e4] ss:$100 sps:$4 sm:$0xff]  }
 0x5e8   :  { %12012 = vmatpush1.bf16.msra.mxu1 %v16536_v52  ;;  %11931 = vmatprep.subr.bf16.mxu0 %v16541_v63  ;;  %v16611_v52 = vld [vmem:[%s22241_s5 + $0x8d8] ss:$100 sps:$4 sm:$0xff]   ;;  %v16614_v63 = vld [vmem:[%s22241_s5 + $0x8e0] ss:$100 sps:$4 sm:$0xff]  }
 0x5e9   :  { %12013 = vmatprep.subr.bf16.mxu1 %v16544_v15  ;;  %v16619_v15 = vld [vmem:[%s22241_s5 + $0x9a4] ss:$100 sps:$4 sm:$0xff]  }
 0x5eb   :  { %11932 = vmatpush1.bf16.msra.mxu0 %v16539_v48  ;;  %v16622_v48 = vld [vmem:[%s22241_s5 + $0x9ac] ss:$100 sps:$4 sm:$0xff]  }
 0x5ec   :  { %12014 = vmatpush1.bf16.msra.mxu1 %v16542_v16  ;;  %12024 = vmatprep.subr.bf16.mxu0 %v16547_v17  ;;  %v16617_v16 = vld [vmem:[%s22241_s5 + $0x9a0] ss:$100 sps:$4 sm:$0xff]   ;;  %v16620_v17 = vld [vmem:[%s22241_s5 + $0x9a8] ss:$100 sps:$4 sm:$0xff]  }
 0x5ed   :  { %12106 = vmatprep.subr.bf16.mxu1 %v16550_v7  ;;  %v16625_v7 = vld [vmem:[%s22241_s5 + $0xa6c] ss:$100 sps:$4 sm:$0xff]  }
 0x5ee   :  { %11934 = vmatmul.mubr.bf16.vlgmr.msra.gmra.mrb[20].mxu0 %v19658_v25 }
 0x5ef   :  { %12016 = vmatmul.mubr.bf16.vlgmr.msra.gmra.mrb[20].mxu1 %v19658_v25  ;;  %12025 = vmatpush1.bf16.msra.mxu0 %v16545_v10  ;;  %v16628_v10 = vld [vmem:[%s22241_s5 + $0xa74] ss:$100 sps:$4 sm:$0xff]  }
 0x5f0   :  { %12056 = vmatprep.mubr.bf16.mxu0 %v19646_v28  ;;  %12107 = vmatpush1.bf16.msra.mxu1 %v16548_v18  ;;  %v16623_v18 = vld [vmem:[%s22241_s5 + $0xa68] ss:$100 sps:$4 sm:$0xff]  }
 0x5f1   :  { %12138 = vmatprep.mubr.bf16.mxu1 %v19646_v28  ;;  %12026 = vmatprep.subr.bf16.mxu0 %v16553_v19  ;;  %v16626_v19 = vld [vmem:[%s22241_s5 + $0xa70] ss:$100 sps:$4 sm:$0xff]  }
 0x5f2   :  { %12108 = vmatprep.subr.bf16.mxu1 %v16556_v20  ;;  %v16631_v20 = vld [vmem:[%s22241_s5 + $0xb34] ss:$100 sps:$4 sm:$0xff]  }
 0x5f3   :  { %12027 = vmatpush1.bf16.msra.mxu0 %v16551_v22  ;;  %v16634_v22 = vld [vmem:[%s22241_s5 + $0xb3c] ss:$100 sps:$4 sm:$0xff]  }
 0x5f4   :  { %12109 = vmatpush1.bf16.msra.mxu1 %v16554_v23  ;;  %12028 = vmatprep.subr.bf16.mxu0 %v16559_v24  ;;  %v16629_v23 = vld [vmem:[%s22241_s5 + $0xb30] ss:$100 sps:$4 sm:$0xff]   ;;  %v16632_v24 = vld [vmem:[%s22241_s5 + $0xb38] ss:$100 sps:$4 sm:$0xff]  }
 0x5f5   :  { %12110 = vmatprep.subr.bf16.mxu1 %v16562_v13  ;;  %v16637_v13 = vld [vmem:[%s22241_s5 + $0xbfc] ss:$100 sps:$4 sm:$0xff]  }
 0x5f7   :  { %12029 = vmatpush1.bf16.msra.mxu0 %v16557_v27  ;;  %v16640_v27 = vld [vmem:[%s22241_s5 + $0xc04] ss:$100 sps:$4 sm:$0xff]  }
 0x5f8   :  { %12111 = vmatpush1.bf16.msra.mxu1 %v16560_v14  ;;  %12030 = vmatprep.subr.bf16.mxu0 %v16565_v30  ;;  %v16635_v14 = vld [vmem:[%s22241_s5 + $0xbf8] ss:$100 sps:$4 sm:$0xff]   ;;  %v16638_v30 = vld [vmem:[%s22241_s5 + $0xc00] ss:$100 sps:$4 sm:$0xff]  }
 0x5f9   :  { %12112 = vmatprep.subr.bf16.mxu1 %v16568_v33  ;;  %v16643_v33 = vld [vmem:[%s22241_s5 + $0xcc4] ss:$100 sps:$4 sm:$0xff]  }
 0x5fb   :  { %12031 = vmatpush1.bf16.msra.mxu0 %v16563_v36  ;;  %v16646_v36 = vld [vmem:[%s22241_s5 + $0xccc] ss:$100 sps:$4 sm:$0xff]  }
 0x5fc   :  { %12113 = vmatpush1.bf16.msra.mxu1 %v16566_v37  ;;  %12032 = vmatprep.subr.bf16.mxu0 %v16571_v21  ;;  %v16641_v37 = vld [vmem:[%s22241_s5 + $0xcc0] ss:$100 sps:$4 sm:$0xff]   ;;  %v16644_v21 = vld [vmem:[%s22241_s5 + $0xcc8] ss:$100 sps:$4 sm:$0xff]  }
 0x5fd   :  { %12114 = vmatprep.subr.bf16.mxu1 %v16574_v40  ;;  %v16649_v40 = vld [vmem:[%s22241_s5 + $0xd8c] ss:$100 sps:$4 sm:$0xff]  }
 0x5ff   :  { %12033 = vmatpush1.bf16.msra.mxu0 %v16569_v41  ;;  %v16652_v41 = vld [vmem:[%s22241_s5 + $0xd94] ss:$100 sps:$4 sm:$0xff]  }
 0x600   :  { %12115 = vmatpush1.bf16.msra.mxu1 %v16572_v34  ;;  %12034 = vmatprep.subr.bf16.mxu0 %v16577_v43  ;;  %v16647_v34 = vld [vmem:[%s22241_s5 + $0xd88] ss:$100 sps:$4 sm:$0xff]   ;;  %v16650_v43 = vld [vmem:[%s22241_s5 + $0xd90] ss:$100 sps:$4 sm:$0xff]  }
 0x601   :  { %12116 = vmatprep.subr.bf16.mxu1 %v16580_v45  ;;  %v16655_v45 = vld [vmem:[%s22241_s5 + $0xe54] ss:$100 sps:$4 sm:$0xff]  }
 0x603   :  { %12035 = vmatpush1.bf16.msra.mxu0 %v16575_v46  ;;  %v16658_v46 = vld [vmem:[%s22241_s5 + $0xe5c] ss:$100 sps:$4 sm:$0xff]  }
 0x604   :  { %12117 = vmatpush1.bf16.msra.mxu1 %v16578_v35  ;;  %12036 = vmatprep.subr.bf16.mxu0 %v16583_v50  ;;  %v16653_v35 = vld [vmem:[%s22241_s5 + $0xe50] ss:$100 sps:$4 sm:$0xff]   ;;  %v16656_v50 = vld [vmem:[%s22241_s5 + $0xe58] ss:$100 sps:$4 sm:$0xff]  }
 0x605   :  { %12118 = vmatprep.subr.bf16.mxu1 %v16586_v32  ;;  %v16661_v32 = vld [vmem:[%s22241_s5 + $0xf1c] ss:$100 sps:$4 sm:$0xff]  }
 0x607   :  { %12037 = vmatpush1.bf16.msra.mxu0 %v16581_v26  ;;  %v16664_v26 = vld [vmem:[%s22241_s5 + $0xf24] ss:$100 sps:$4 sm:$0xff]  }
 0x608   :  { %12119 = vmatpush1.bf16.msra.mxu1 %v16584_v39  ;;  %12038 = vmatprep.subr.bf16.mxu0 %v16589_v51  ;;  %v16659_v39 = vld [vmem:[%s22241_s5 + $0xf18] ss:$100 sps:$4 sm:$0xff]   ;;  %v16662_v51 = vld [vmem:[%s22241_s5 + $0xf20] ss:$100 sps:$4 sm:$0xff]  }
 0x609   :  { %12120 = vmatprep.subr.bf16.mxu1 %v16592_v53  ;;  %v16667_v53 = vld [vmem:[%s22241_s5 + $0xfe4] ss:$100 sps:$4 sm:$0xff]  }
 0x60b   :  { %12039 = vmatpush1.bf16.msra.mxu0 %v16587_v38  ;;  %v16670_v38 = vld [vmem:[%s22241_s5 + $0xfec] ss:$100 sps:$4 sm:$0xff]  }
 0x60c   :  { %12121 = vmatpush1.bf16.msra.mxu1 %v16590_v54  ;;  %12040 = vmatprep.subr.bf16.mxu0 %v16595_v56  ;;  %v16665_v54 = vld [vmem:[%s22241_s5 + $0xfe0] ss:$100 sps:$4 sm:$0xff]   ;;  %v21532_v56 = vld [vmem:[%s22242_s6 + $0x8] sm:$0xff] }
 0x60d   :  { %12122 = vmatprep.subr.bf16.mxu1 %v16598_v58  ;;  %v16668_v58 = vld [vmem:[%s22241_s5 + $0xfe8] ss:$100 sps:$4 sm:$0xff]  }
 0x60f   :  { %12041 = vmatpush1.bf16.msra.mxu0 %v16593_v62  ;;  %v16673_v62 = vld [vmem:[%s22241_s5 + $0x10ac] ss:$100 sps:$4 sm:$0xff]  }
 0x610   :  { %12123 = vmatpush1.bf16.msra.mxu1 %v16596_v44  ;;  %12042 = vmatprep.subr.bf16.mxu0 %v16601_v0  ;;  %v16676_v44 = vld [vmem:[%s22241_s5 + $0x10b4] ss:$100 sps:$4 sm:$0xff]   ;;  %v7246_v0 = vrot.slane %v21532_v56, %v19628_v59 }
 0x611   :  { %12124 = vmatprep.subr.bf16.mxu1 %v16604_v1  ;;  %v7254_v1 = vrot.slane %v21532_v56, %v19631_v3 }
 0x613   :  { %12043 = vmatpush1.bf16.msra.mxu0 %v16599_v42  ;;  %v7250_v42 = vrot.slane %v21532_v56, %v19637_v5 }
 0x614   :  { %12125 = vmatpush1.bf16.msra.mxu1 %v16602_v2  ;;  %12044 = vmatprep.subr.bf16.mxu0 %v16607_v4  ;;  %v16671_v2 = vld [vmem:[%s22241_s5 + $0x10a8] ss:$100 sps:$4 sm:$0xff]   ;;  %v7258_v4 = vrot.slane %v21532_v56, %v19640_v6 }
 0x615   :  { %12126 = vmatprep.subr.bf16.mxu1 %v16610_v60  ;;  %v16674_v60 = vld [vmem:[%s22241_s5 + $0x10b0] ss:$100 sps:$4 sm:$0xff]  }
 0x617   :  { %12045 = vmatpush1.bf16.msra.mxu0 %v16605_v8  ;;  %v16679_v8 = vld [vmem:[%s22241_s5 + $0x1174] ss:$100 sps:$4 sm:$0xff]  }
 0x618   :  { %12127 = vmatpush1.bf16.msra.mxu1 %v16608_v9  ;;  %12046 = vmatprep.subr.bf16.mxu0 %v16613_v11  ;;  %v16682_v11 = vld [vmem:[%s22241_s5 + $0x117c] ss:$100 sps:$4 sm:$0xff]  }
 0x619   :  { %12128 = vmatprep.subr.bf16.mxu1 %v16616_v12 }
 0x61b   :  { %12047 = vmatpush1.bf16.msra.mxu0 %v16611_v52 }
 0x61c   :  { %12129 = vmatpush1.bf16.msra.mxu1 %v16614_v63  ;;  %12048 = vmatprep.subr.bf16.mxu0 %v16619_v15 }
 0x61d   :  { %12130 = vmatprep.subr.bf16.mxu1 %v16622_v48 }
 0x61f   :  { %12049 = vmatpush1.bf16.msra.mxu0 %v16617_v16 }
 0x620   :  { %12131 = vmatpush1.bf16.msra.mxu1 %v16620_v17  ;;  %12050 = vmatprep.subr.bf16.mxu0 %v16625_v7  ;;  %v16677_v7 = vld [vmem:[%s22241_s5 + $0x1170] ss:$100 sps:$4 sm:$0xff]  }
 0x621   :  { %12132 = vmatprep.subr.bf16.mxu1 %v16628_v10 }
 0x623   :  { %12051 = vmatpush1.bf16.msra.mxu0 %v16623_v18 }
 0x624   :  { %12133 = vmatpush1.bf16.msra.mxu1 %v16626_v19  ;;  %12052 = vmatprep.subr.bf16.mxu0 %v16631_v20  ;;  %v16680_v20 = vld [vmem:[%s22241_s5 + $0x1178] ss:$100 sps:$4 sm:$0xff]  }
 0x625   :  { %12134 = vmatprep.subr.bf16.mxu1 %v16634_v22  ;;  %v16685_v22 = vld [vmem:[%s22241_s5 + $0x123c] ss:$100 sps:$4 sm:$0xff]  }
 0x627   :  { %12053 = vmatpush1.bf16.msra.mxu0 %v16629_v23 }
 0x628   :  { %12135 = vmatpush1.bf16.msra.mxu1 %v16632_v24  ;;  %12054 = vmatprep.subr.bf16.mxu0 %v16637_v13  ;;  %v16688_v13 = vld [vmem:[%s22241_s5 + $0x1244] ss:$100 sps:$4 sm:$0xff]  }
 0x629   :  { %12136 = vmatprep.subr.bf16.mxu1 %v16640_v27 }
 0x62b   :  { %12055 = vmatpush1.bf16.msra.mxu0 %v16635_v14 }
 0x62c   :  { %12137 = vmatpush1.bf16.msra.mxu1 %v16638_v30  ;;  %12065 = vmatprep.subr.bf16.mxu0 %v16643_v33  ;;  %v16683_v30 = vld [vmem:[%s22241_s5 + $0x1238] ss:$100 sps:$4 sm:$0xff]  }
 0x62d   :  { %12147 = vmatprep.subr.bf16.mxu1 %v16646_v36  ;;  %v16686_v36 = vld [vmem:[%s22241_s5 + $0x1240] ss:$100 sps:$4 sm:$0xff]  }
 0x62e   :  { %12057 = vmatmul.mubr.bf16.vlgmr.msra.gmra.mrb[24].mxu0 %v19656_v31 }
 0x62f   :  { %12139 = vmatmul.mubr.bf16.vlgmr.msra.gmra.mrb[24].mxu1 %v19656_v31  ;;  %12066 = vmatpush1.bf16.msra.mxu0 %v16641_v37  ;;  %v16691_v37 = vld [vmem:[%s22241_s5 + $0x1304] ss:$100 sps:$4 sm:$0xff]  }
 0x630   :  { %12097 = vmatprep.mubr.bf16.mxu0 %v19648_v29  ;;  %12148 = vmatpush1.bf16.msra.mxu1 %v16644_v21  ;;  %v16694_v21 = vld [vmem:[%s22241_s5 + $0x130c] ss:$100 sps:$4 sm:$0xff]  }
 0x631   :  { %12179 = vmatprep.mubr.bf16.mxu1 %v19648_v29  ;;  %12067 = vmatprep.subr.bf16.mxu0 %v16649_v40 }
 0x632   :  { %12149 = vmatprep.subr.bf16.mxu1 %v16652_v41  ;;  %v16689_v41 = vld [vmem:[%s22241_s5 + $0x1300] ss:$100 sps:$4 sm:$0xff]  }
 0x633   :  { %12068 = vmatpush1.bf16.msra.mxu0 %v16647_v34  ;;  %v16692_v34 = vld [vmem:[%s22241_s5 + $0x1308] ss:$100 sps:$4 sm:$0xff]  }
 0x634   :  { %12150 = vmatpush1.bf16.msra.mxu1 %v16650_v43  ;;  %12069 = vmatprep.subr.bf16.mxu0 %v16655_v45  ;;  %v16697_v43 = vld [vmem:[%s22241_s5 + $0x13cc] ss:$100 sps:$4 sm:$0xff]   ;;  %v16700_v45 = vld [vmem:[%s22241_s5 + $0x13d4] ss:$100 sps:$4 sm:$0xff]  }
 0x635   :  { %12151 = vmatprep.subr.bf16.mxu1 %v16658_v46  ;;  %v16695_v46 = vld [vmem:[%s22241_s5 + $0x13c8] ss:$100 sps:$4 sm:$0xff]  }
 0x637   :  { %12070 = vmatpush1.bf16.msra.mxu0 %v16653_v35  ;;  %v16698_v35 = vld [vmem:[%s22241_s5 + $0x13d0] ss:$100 sps:$4 sm:$0xff]  }
 0x638   :  { %12152 = vmatpush1.bf16.msra.mxu1 %v16656_v50  ;;  %12071 = vmatprep.subr.bf16.mxu0 %v16661_v32  ;;  %v16703_v50 = vld [vmem:[%s22241_s5 + $0x1494] ss:$100 sps:$4 sm:$0xff]   ;;  %v16706_v32 = vld [vmem:[%s22241_s5 + $0x149c] ss:$100 sps:$4 sm:$0xff]  }
 0x639   :  { %12153 = vmatprep.subr.bf16.mxu1 %v16664_v26  ;;  %v16701_v26 = vld [vmem:[%s22241_s5 + $0x1490] ss:$100 sps:$4 sm:$0xff]  }
 0x63b   :  { %12072 = vmatpush1.bf16.msra.mxu0 %v16659_v39  ;;  %v16704_v39 = vld [vmem:[%s22241_s5 + $0x1498] ss:$100 sps:$4 sm:$0xff]  }
 0x63c   :  { %12154 = vmatpush1.bf16.msra.mxu1 %v16662_v51  ;;  %12073 = vmatprep.subr.bf16.mxu0 %v16667_v53  ;;  %v16709_v51 = vld [vmem:[%s22241_s5 + $0x155c] ss:$100 sps:$4 sm:$0xff]   ;;  %v16712_v53 = vld [vmem:[%s22241_s5 + $0x1564] ss:$100 sps:$4 sm:$0xff]  }
 0x63d   :  { %12155 = vmatprep.subr.bf16.mxu1 %v16670_v38  ;;  %v16707_v38 = vld [vmem:[%s22241_s5 + $0x1558] ss:$100 sps:$4 sm:$0xff]  }
 0x63f   :  { %12074 = vmatpush1.bf16.msra.mxu0 %v16665_v54  ;;  %v16710_v54 = vld [vmem:[%s22241_s5 + $0x1560] ss:$100 sps:$4 sm:$0xff]  }
 0x640   :  { %12156 = vmatpush1.bf16.msra.mxu1 %v16668_v58  ;;  %12075 = vmatprep.subr.bf16.mxu0 %v16673_v62  ;;  %v16715_v58 = vld [vmem:[%s22241_s5 + $0x1624] ss:$100 sps:$4 sm:$0xff]   ;;  %v16718_v62 = vld [vmem:[%s22241_s5 + $0x162c] ss:$100 sps:$4 sm:$0xff]  }
 0x641   :  { %v11771_v9 = vpop.f32.mrb[16].mxu0  ;;  %12157 = vmatprep.subr.bf16.mxu1 %v16676_v44  ;;  %v16713_v44 = vld [vmem:[%s22241_s5 + $0x1620] ss:$100 sps:$4 sm:$0xff]  }
 0x642   :  { %v14403_v12 = vadd.f32 %v11771_v9, %v7246_v0  ;;  %v11853_v52 = vpop.f32.mrb[16].mxu1  ;;  %v11773_v63 = vpop.f32.mrb[17].mxu0  ;;  %v16716_v0 = vld [vmem:[%s22241_s5 + $0x1628] ss:$100 sps:$4 sm:$0xff]   ;;  %v16725_v9 = vld [vmem:[%s22241_s5 + $0x17b0] ss:$100 sps:$4 sm:$0xff]  }
 0x643   :  { %v14405_v15 = vadd.f32 %v11853_v52, %v7254_v1  ;;  %v14404_v48 = vadd.f32 %v11773_v63, %v7250_v42  ;;  %v11855_v16 = vpop.f32.mrb[17].mxu1  ;;  %v11775_v17 = vpop.f32.mrb[18].mxu0  ;;  %12076 = vmatpush1.bf16.msra.mxu0 %v16671_v2  ;;  %v16721_v1 = vld [vmem:[%s22241_s5 + $0x16ec] ss:$100 sps:$4 sm:$0xff]   ;;  %v16724_v42 = vld [vmem:[%s22241_s5 + $0x16f4] ss:$100 sps:$4 sm:$0xff]  }
 0x644   :  { %v14406_v10 = vadd.f32 %v11855_v16, %v7258_v4  ;;  %v11857_v18 = vpop.f32.mrb[18].mxu1  ;;  %12158 = vmatpush1.bf16.msra.mxu1 %v16674_v60  ;;  %v11776_v19 = vpop.f32.mrb[19].mxu0  ;;  %12077 = vmatprep.subr.bf16.mxu0 %v16679_v8  ;;  %v16719_v2 = vld [vmem:[%s22241_s5 + $0x16e8] ss:$100 sps:$4 sm:$0xff]   ;;  %v16722_v4 = vld [vmem:[%s22241_s5 + $0x16f0] ss:$100 sps:$4 sm:$0xff]  }
 0x645   :  { %v14294_v23 = vpack.c.bf16 %v14404_v48, %v14403_v12  ;;  %v11858_v24 = vpop.f32.mrb[19].mxu1  ;;  %12159 = vmatprep.subr.bf16.mxu1 %v16682_v11  ;;  %v16727_v60 = vld [vmem:[%s22241_s5 + $0x17b4] ss:$100 sps:$4 sm:$0xff]   ;;  %v16730_v8 = vld [vmem:[%s22241_s5 + $0x17bc] ss:$100 sps:$4 sm:$0xff]  }
 0x646   :  { %v14295_v27 = vpack.c.bf16 %v14406_v10, %v14405_v15  ;;  %v16728_v11 = vld [vmem:[%s22241_s5 + $0x17b8] ss:$100 sps:$4 sm:$0xff]   ;;  %v16736_v52 = vld [vmem:[%s22241_s5 + $0x1884] ss:$100 sps:$4 sm:$0xff]   ;;  %v16737_v17 = vld [vmem:[%s22241_s5 + $0x50] ss:$100 sps:$4 sm:$0xff]  }
 0x647   :  { %v21576_v14 = vrot.slane %v14294_v23, %v17172_v49  ;;  %12078 = vmatpush1.bf16.msra.mxu0 %v16677_v7  ;;  %v16733_v12 = vld [vmem:[%s22241_s5 + $0x187c] ss:$100 sps:$4 sm:$0xff]   ;;  %v16739_v48 = vld [vmem:[%s22241_s5 + $0x54] ss:$100 sps:$4 sm:$0xff]   ;;  %v16748_v18 = vld [vmem:[%s22241_s5 + $0x124] ss:$100 sps:$4 sm:$0xff]  }
 0x648   :  { %v21582_v33 = vrot.slane %v14295_v27, %v17172_v49  ;;  %12160 = vmatpush1.bf16.msra.mxu1 %v16680_v20  ;;  %12079 = vmatprep.subr.bf16.mxu0 %v16685_v22  ;;  %v16731_v63 = vld [vmem:[%s22241_s5 + $0x1878] ss:$100 sps:$4 sm:$0xff]   ;;  %v16734_v15 = vld [vmem:[%s22241_s5 + $0x1880] ss:$100 sps:$4 sm:$0xff]   ;;  %v16754_v23 = vld [vmem:[%s22241_s5 + $0x1ec] ss:$100 sps:$4 sm:$0xff]  }
 0x649   :  { %12161 = vmatprep.subr.bf16.mxu1 %v16688_v13  ;;  %v16742_v16 = vld [vmem:[%s22241_s5 + $0x5c] ss:$100 sps:$4 sm:$0xff]   ;;  %v16751_v22 = vld [vmem:[%s22241_s5 + $0x1e4] ss:$100 sps:$4 sm:$0xff]   ;;  %v16757_v27 = vld [vmem:[%s22241_s5 + $0x2ac] ss:$100 sps:$4 sm:$0xff]  }
 0x64a   :  { %v12563_v40 = vcombine.low %v21576_v14, %v21582_v33  ;;  %v16740_v7 = vld [vmem:[%s22241_s5 + $0x58] ss:$100 sps:$4 sm:$0xff]   ;;  %v16746_v20 = vld [vmem:[%s22241_s5 + $0x120] ss:$100 sps:$4 sm:$0xff]   ;;  %v16752_v13 = vld [vmem:[%s22241_s5 + $0x1e8] ss:$100 sps:$4 sm:$0xff]  }
 0x64b   :  { %12080 = vmatpush1.bf16.msra.mxu0 %v16683_v30  ;;  %v16745_v10 = vld [vmem:[%s22241_s5 + $0x11c] ss:$100 sps:$4 sm:$0xff]   ;;  %v16760_v30 = vld [vmem:[%s22241_s5 + $0x2b4] ss:$100 sps:$4 sm:$0xff]  }
 0x64c   :  { %12162 = vmatpush1.bf16.msra.mxu1 %v16686_v36  ;;  %12081 = vmatprep.subr.bf16.mxu0 %v16691_v37  ;;  %v16743_v19 = vld [vmem:[%s22241_s5 + $0x118] ss:$100 sps:$4 sm:$0xff]   ;;  %v16749_v24 = vld [vmem:[%s22241_s5 + $0x1e0] ss:$100 sps:$4 sm:$0xff]   ;;  %v16755_v36 = vld [vmem:[%s22241_s5 + $0x2a8] ss:$100 sps:$4 sm:$0xff]  }
 0x64d   :  { %12163 = vmatprep.subr.bf16.mxu1 %v16694_v21  ;;  %v16758_v37 = vld [vmem:[%s22241_s5 + $0x2b0] ss:$100 sps:$4 sm:$0xff]   ;;  %v16887_v14 = vld [vmem:[%s22241_s5 + $0x13d8] ss:$100 sps:$4 sm:$0xff]   ;;  %v16890_v33 = vld [vmem:[%s22241_s5 + $0x13e0] ss:$100 sps:$4 sm:$0xff]  }
 0x64e   :  { %v16763_v21 = vld [vmem:[%s22241_s5 + $0x374] ss:$100 sps:$4 sm:$0xff]  }
 0x64f   :  { %12082 = vmatpush1.bf16.msra.mxu0 %v16689_v41  ;;  %v16766_v41 = vld [vmem:[%s22241_s5 + $0x37c] ss:$100 sps:$4 sm:$0xff]  }
 0x650   :  { %12164 = vmatpush1.bf16.msra.mxu1 %v16692_v34  ;;  %12083 = vmatprep.subr.bf16.mxu0 %v16697_v43  ;;  %v16761_v34 = vld [vmem:[%s22241_s5 + $0x370] ss:$100 sps:$4 sm:$0xff]   ;;  %v16764_v43 = vld [vmem:[%s22241_s5 + $0x378] ss:$100 sps:$4 sm:$0xff]  }
 0x651   :  { %12165 = vmatprep.subr.bf16.mxu1 %v16700_v45  ;;  %v16769_v45 = vld [vmem:[%s22241_s5 + $0x43c] ss:$100 sps:$4 sm:$0xff]  }
 0x653   :  { %12084 = vmatpush1.bf16.msra.mxu0 %v16695_v46  ;;  %v16772_v46 = vld [vmem:[%s22241_s5 + $0x444] ss:$100 sps:$4 sm:$0xff]  }
 0x654   :  { %12166 = vmatpush1.bf16.msra.mxu1 %v16698_v35  ;;  %12085 = vmatprep.subr.bf16.mxu0 %v16703_v50  ;;  %v16767_v35 = vld [vmem:[%s22241_s5 + $0x438] ss:$100 sps:$4 sm:$0xff]   ;;  %v16770_v50 = vld [vmem:[%s22241_s5 + $0x440] ss:$100 sps:$4 sm:$0xff]  }
 0x655   :  { %12167 = vmatprep.subr.bf16.mxu1 %v16706_v32  ;;  %v16775_v32 = vld [vmem:[%s22241_s5 + $0x504] ss:$100 sps:$4 sm:$0xff]  }
 0x657   :  { %12086 = vmatpush1.bf16.msra.mxu0 %v16701_v26  ;;  %v16778_v26 = vld [vmem:[%s22241_s5 + $0x50c] ss:$100 sps:$4 sm:$0xff]  }
 0x658   :  { %12168 = vmatpush1.bf16.msra.mxu1 %v16704_v39  ;;  %12087 = vmatprep.subr.bf16.mxu0 %v16709_v51  ;;  %v16773_v39 = vld [vmem:[%s22241_s5 + $0x500] ss:$100 sps:$4 sm:$0xff]   ;;  %v16776_v51 = vld [vmem:[%s22241_s5 + $0x508] ss:$100 sps:$4 sm:$0xff]  }
 0x659   :  { %12169 = vmatprep.subr.bf16.mxu1 %v16712_v53  ;;  %v16781_v53 = vld [vmem:[%s22241_s5 + $0x5cc] ss:$100 sps:$4 sm:$0xff]  }
 0x65b   :  { %12088 = vmatpush1.bf16.msra.mxu0 %v16707_v38  ;;  %v16784_v38 = vld [vmem:[%s22241_s5 + $0x5d4] ss:$100 sps:$4 sm:$0xff]  }
 0x65c   :  { %12170 = vmatpush1.bf16.msra.mxu1 %v16710_v54  ;;  %12089 = vmatprep.subr.bf16.mxu0 %v16715_v58  ;;  %v16779_v54 = vld [vmem:[%s22241_s5 + $0x5c8] ss:$100 sps:$4 sm:$0xff]   ;;  %v16782_v58 = vld [vmem:[%s22241_s5 + $0x5d0] ss:$100 sps:$4 sm:$0xff]  }
 0x65d   :  { %12171 = vmatprep.subr.bf16.mxu1 %v16718_v62  ;;  %v16787_v62 = vld [vmem:[%s22241_s5 + $0x694] ss:$100 sps:$4 sm:$0xff]  }
 0x65f   :  { %12090 = vmatpush1.bf16.msra.mxu0 %v16713_v44  ;;  %v16790_v44 = vld [vmem:[%s22241_s5 + $0x69c] ss:$100 sps:$4 sm:$0xff]  }
 0x660   :  { %12172 = vmatpush1.bf16.msra.mxu1 %v16716_v0  ;;  %12091 = vmatprep.subr.bf16.mxu0 %v16721_v1  ;;  %v16785_v0 = vld [vmem:[%s22241_s5 + $0x690] ss:$100 sps:$4 sm:$0xff]   ;;  %v16788_v1 = vld [vmem:[%s22241_s5 + $0x698] ss:$100 sps:$4 sm:$0xff]  }
 0x661   :  { %12173 = vmatprep.subr.bf16.mxu1 %v16724_v42  ;;  %v16793_v42 = vld [vmem:[%s22241_s5 + $0x75c] ss:$100 sps:$4 sm:$0xff]  }
 0x663   :  { %12092 = vmatpush1.bf16.msra.mxu0 %v16719_v2  ;;  %v16796_v2 = vld [vmem:[%s22241_s5 + $0x764] ss:$100 sps:$4 sm:$0xff]  }
 0x664   :  { %12174 = vmatpush1.bf16.msra.mxu1 %v16722_v4  ;;  %12093 = vmatprep.subr.bf16.mxu0 %v16727_v60  ;;  %v16791_v4 = vld [vmem:[%s22241_s5 + $0x758] ss:$100 sps:$4 sm:$0xff]   ;;  %v16794_v60 = vld [vmem:[%s22241_s5 + $0x760] ss:$100 sps:$4 sm:$0xff]  }
 0x665   :  { %12175 = vmatprep.subr.bf16.mxu1 %v16730_v8  ;;  %v16799_v8 = vld [vmem:[%s22241_s5 + $0x824] ss:$100 sps:$4 sm:$0xff]  }
 0x667   :  { %12094 = vmatpush1.bf16.msra.mxu0 %v16725_v9  ;;  %v16802_v9 = vld [vmem:[%s22241_s5 + $0x82c] ss:$100 sps:$4 sm:$0xff]  }
 0x668   :  { %12176 = vmatpush1.bf16.msra.mxu1 %v16728_v11  ;;  %12095 = vmatprep.subr.bf16.mxu0 %v16733_v12  ;;  %v16797_v11 = vld [vmem:[%s22241_s5 + $0x820] ss:$100 sps:$4 sm:$0xff]   ;;  %v16800_v12 = vld [vmem:[%s22241_s5 + $0x828] ss:$100 sps:$4 sm:$0xff]  }
 0x669   :  { %12177 = vmatprep.subr.bf16.mxu1 %v16736_v52  ;;  %v16805_v52 = vld [vmem:[%s22241_s5 + $0x8ec] ss:$100 sps:$4 sm:$0xff]  }
 0x66b   :  { %12096 = vmatpush1.bf16.msra.mxu0 %v16731_v63  ;;  %v16808_v63 = vld [vmem:[%s22241_s5 + $0x8f4] ss:$100 sps:$4 sm:$0xff]  }
 0x66c   :  { %12178 = vmatpush1.bf16.msra.mxu1 %v16734_v15  ;;  %12188 = vmatprep.subr.bf16.mxu0 %v16739_v48  ;;  %v16803_v15 = vld [vmem:[%s22241_s5 + $0x8e8] ss:$100 sps:$4 sm:$0xff]   ;;  %v16806_v48 = vld [vmem:[%s22241_s5 + $0x8f0] ss:$100 sps:$4 sm:$0xff]  }
 0x66d   :  { %12270 = vmatprep.subr.bf16.mxu1 %v16742_v16  ;;  %v16811_v16 = vld [vmem:[%s22241_s5 + $0x9b4] ss:$100 sps:$4 sm:$0xff]  }
 0x66e   :  { %12098 = vmatmul.mubr.bf16.vlgmr.msra.gmra.mrb[24].mxu0 %v19658_v25 }
 0x66f   :  { %12180 = vmatmul.mubr.bf16.vlgmr.msra.gmra.mrb[24].mxu1 %v19658_v25  ;;  %12189 = vmatpush1.bf16.msra.mxu0 %v16737_v17  ;;  %v16814_v17 = vld [vmem:[%s22241_s5 + $0x9bc] ss:$100 sps:$4 sm:$0xff]  }
 0x670   :  { %12220 = vmatprep.mubr.bf16.mxu0 %v19646_v28  ;;  %12271 = vmatpush1.bf16.msra.mxu1 %v16740_v7  ;;  %v16809_v7 = vld [vmem:[%s22241_s5 + $0x9b0] ss:$100 sps:$4 sm:$0xff]  }
 0x671   :  { %12302 = vmatprep.mubr.bf16.mxu1 %v19646_v28  ;;  %12190 = vmatprep.subr.bf16.mxu0 %v16745_v10  ;;  %v16812_v10 = vld [vmem:[%s22241_s5 + $0x9b8] ss:$100 sps:$4 sm:$0xff]  }
 0x672   :  { %12272 = vmatprep.subr.bf16.mxu1 %v16748_v18  ;;  %v16817_v18 = vld [vmem:[%s22241_s5 + $0xa7c] ss:$100 sps:$4 sm:$0xff]  }
 0x673   :  { %12191 = vmatpush1.bf16.msra.mxu0 %v16743_v19  ;;  %v16820_v19 = vld [vmem:[%s22241_s5 + $0xa84] ss:$100 sps:$4 sm:$0xff]  }
 0x674   :  { %12273 = vmatpush1.bf16.msra.mxu1 %v16746_v20  ;;  %12192 = vmatprep.subr.bf16.mxu0 %v16751_v22  ;;  %v16815_v20 = vld [vmem:[%s22241_s5 + $0xa78] ss:$100 sps:$4 sm:$0xff]   ;;  %v16818_v22 = vld [vmem:[%s22241_s5 + $0xa80] ss:$100 sps:$4 sm:$0xff]  }
 0x675   :  { %12274 = vmatprep.subr.bf16.mxu1 %v16754_v23  ;;  %v16823_v23 = vld [vmem:[%s22241_s5 + $0xb44] ss:$100 sps:$4 sm:$0xff]  }
 0x677   :  { %12193 = vmatpush1.bf16.msra.mxu0 %v16749_v24  ;;  %v16826_v24 = vld [vmem:[%s22241_s5 + $0xb4c] ss:$100 sps:$4 sm:$0xff]  }
 0x678   :  { %12275 = vmatpush1.bf16.msra.mxu1 %v16752_v13  ;;  %12194 = vmatprep.subr.bf16.mxu0 %v16757_v27  ;;  %v16821_v13 = vld [vmem:[%s22241_s5 + $0xb40] ss:$100 sps:$4 sm:$0xff]   ;;  %v16824_v27 = vld [vmem:[%s22241_s5 + $0xb48] ss:$100 sps:$4 sm:$0xff]  }
 0x679   :  { %12276 = vmatprep.subr.bf16.mxu1 %v16760_v30  ;;  %v16829_v30 = vld [vmem:[%s22241_s5 + $0xc0c] ss:$100 sps:$4 sm:$0xff]  }
 0x67b   :  { %12195 = vmatpush1.bf16.msra.mxu0 %v16755_v36  ;;  %v16832_v36 = vld [vmem:[%s22241_s5 + $0xc14] ss:$100 sps:$4 sm:$0xff]  }
 0x67c   :  { %12277 = vmatpush1.bf16.msra.mxu1 %v16758_v37  ;;  %12196 = vmatprep.subr.bf16.mxu0 %v16763_v21  ;;  %v16827_v37 = vld [vmem:[%s22241_s5 + $0xc08] ss:$100 sps:$4 sm:$0xff]   ;;  %v16830_v21 = vld [vmem:[%s22241_s5 + $0xc10] ss:$100 sps:$4 sm:$0xff]  }
 0x67d   :  { %12278 = vmatprep.subr.bf16.mxu1 %v16766_v41  ;;  %v16835_v41 = vld [vmem:[%s22241_s5 + $0xcd4] ss:$100 sps:$4 sm:$0xff]  }
 0x67f   :  { %12197 = vmatpush1.bf16.msra.mxu0 %v16761_v34  ;;  %v16838_v34 = vld [vmem:[%s22241_s5 + $0xcdc] ss:$100 sps:$4 sm:$0xff]  }
 0x680   :  { %12279 = vmatpush1.bf16.msra.mxu1 %v16764_v43  ;;  %12198 = vmatprep.subr.bf16.mxu0 %v16769_v45  ;;  %v16833_v43 = vld [vmem:[%s22241_s5 + $0xcd0] ss:$100 sps:$4 sm:$0xff]   ;;  %v16836_v45 = vld [vmem:[%s22241_s5 + $0xcd8] ss:$100 sps:$4 sm:$0xff]  }
 0x681   :  { %12280 = vmatprep.subr.bf16.mxu1 %v16772_v46  ;;  %v16841_v46 = vld [vmem:[%s22241_s5 + $0xd9c] ss:$100 sps:$4 sm:$0xff]  }
 0x683   :  { %12199 = vmatpush1.bf16.msra.mxu0 %v16767_v35  ;;  %v16844_v35 = vld [vmem:[%s22241_s5 + $0xda4] ss:$100 sps:$4 sm:$0xff]  }
 0x684   :  { %12281 = vmatpush1.bf16.msra.mxu1 %v16770_v50  ;;  %12200 = vmatprep.subr.bf16.mxu0 %v16775_v32  ;;  %v16839_v50 = vld [vmem:[%s22241_s5 + $0xd98] ss:$100 sps:$4 sm:$0xff]   ;;  %v16842_v32 = vld [vmem:[%s22241_s5 + $0xda0] ss:$100 sps:$4 sm:$0xff]  }
 0x685   :  { %12282 = vmatprep.subr.bf16.mxu1 %v16778_v26  ;;  %v16847_v26 = vld [vmem:[%s22241_s5 + $0xe64] ss:$100 sps:$4 sm:$0xff]  }
 0x687   :  { %12201 = vmatpush1.bf16.msra.mxu0 %v16773_v39  ;;  %v16850_v39 = vld [vmem:[%s22241_s5 + $0xe6c] ss:$100 sps:$4 sm:$0xff]  }
 0x688   :  { %12283 = vmatpush1.bf16.msra.mxu1 %v16776_v51  ;;  %12202 = vmatprep.subr.bf16.mxu0 %v16781_v53  ;;  %v16845_v51 = vld [vmem:[%s22241_s5 + $0xe60] ss:$100 sps:$4 sm:$0xff]   ;;  %v16848_v53 = vld [vmem:[%s22241_s5 + $0xe68] ss:$100 sps:$4 sm:$0xff]  }
 0x689   :  { %12284 = vmatprep.subr.bf16.mxu1 %v16784_v38  ;;  %v16853_v38 = vld [vmem:[%s22241_s5 + $0xf2c] ss:$100 sps:$4 sm:$0xff]  }
 0x68b   :  { %12203 = vmatpush1.bf16.msra.mxu0 %v16779_v54  ;;  %v16856_v54 = vld [vmem:[%s22241_s5 + $0xf34] ss:$100 sps:$4 sm:$0xff]  }
 0x68c   :  { %12285 = vmatpush1.bf16.msra.mxu1 %v16782_v58  ;;  %12204 = vmatprep.subr.bf16.mxu0 %v16787_v62  ;;  %v16851_v58 = vld [vmem:[%s22241_s5 + $0xf28] ss:$100 sps:$4 sm:$0xff]   ;;  %v16854_v62 = vld [vmem:[%s22241_s5 + $0xf30] ss:$100 sps:$4 sm:$0xff]  }
 0x68d   :  { %12286 = vmatprep.subr.bf16.mxu1 %v16790_v44  ;;  %v16859_v44 = vld [vmem:[%s22241_s5 + $0xff4] ss:$100 sps:$4 sm:$0xff]  }
 0x68f   :  { %12205 = vmatpush1.bf16.msra.mxu0 %v16785_v0  ;;  %v16862_v0 = vld [vmem:[%s22241_s5 + $0xffc] ss:$100 sps:$4 sm:$0xff]  }
 0x690   :  { %12287 = vmatpush1.bf16.msra.mxu1 %v16788_v1  ;;  %12206 = vmatprep.subr.bf16.mxu0 %v16793_v42  ;;  %v16857_v1 = vld [vmem:[%s22241_s5 + $0xff0] ss:$100 sps:$4 sm:$0xff]   ;;  %v16860_v42 = vld [vmem:[%s22241_s5 + $0xff8] ss:$100 sps:$4 sm:$0xff]  }
 0x691   :  { %12288 = vmatprep.subr.bf16.mxu1 %v16796_v2  ;;  %v16865_v2 = vld [vmem:[%s22241_s5 + $0x10bc] ss:$100 sps:$4 sm:$0xff]  }
 0x693   :  { %12207 = vmatpush1.bf16.msra.mxu0 %v16791_v4  ;;  %v16868_v4 = vld [vmem:[%s22241_s5 + $0x10c4] ss:$100 sps:$4 sm:$0xff]  }
 0x694   :  { %12289 = vmatpush1.bf16.msra.mxu1 %v16794_v60  ;;  %12208 = vmatprep.subr.bf16.mxu0 %v16799_v8  ;;  %v7262_v60 = vrot.slane %v21532_v56, %v21105_v55  ;;  %v7270_v8 = vrot.slane %v21532_v56, %v21111_v47 }
 0x695   :  { %12290 = vmatprep.subr.bf16.mxu1 %v16802_v9  ;;  %v7266_v9 = vrot.slane %v21532_v56, %v21114_v57 }
 0x697   :  { %12209 = vmatpush1.bf16.msra.mxu0 %v16797_v11  ;;  %v16863_v11 = vld [vmem:[%s22241_s5 + $0x10b8] ss:$100 sps:$4 sm:$0xff]  }
 0x698   :  { %12291 = vmatpush1.bf16.msra.mxu1 %v16800_v12  ;;  %12210 = vmatprep.subr.bf16.mxu0 %v16805_v52  ;;  %v7274_v12 = vrot.slane %v21532_v56, %v21120_v61  ;;  %v16866_v52 = vld [vmem:[%s22241_s5 + $0x10c0] ss:$100 sps:$4 sm:$0xff]  }
 0x699   :  { %12292 = vmatprep.subr.bf16.mxu1 %v16808_v63  ;;  %v16871_v63 = vld [vmem:[%s22241_s5 + $0x1184] ss:$100 sps:$4 sm:$0xff]  }
 0x69b   :  { %12211 = vmatpush1.bf16.msra.mxu0 %v16803_v15 }
 0x69c   :  { %12293 = vmatpush1.bf16.msra.mxu1 %v16806_v48  ;;  %12212 = vmatprep.subr.bf16.mxu0 %v16811_v16  ;;  %v16874_v48 = vld [vmem:[%s22241_s5 + $0x118c] ss:$100 sps:$4 sm:$0xff]  }
 0x69d   :  { %12294 = vmatprep.subr.bf16.mxu1 %v16814_v17 }
 0x69f   :  { %12213 = vmatpush1.bf16.msra.mxu0 %v16809_v7 }
 0x6a0   :  { %12295 = vmatpush1.bf16.msra.mxu1 %v16812_v10  ;;  %12214 = vmatprep.subr.bf16.mxu0 %v16817_v18 }
 0x6a1   :  { %12296 = vmatprep.subr.bf16.mxu1 %v16820_v19 }
 0x6a3   :  { %12215 = vmatpush1.bf16.msra.mxu0 %v16815_v20  ;;  %v16869_v20 = vld [vmem:[%s22241_s5 + $0x1180] ss:$100 sps:$4 sm:$0xff]  }
 0x6a4   :  { %12297 = vmatpush1.bf16.msra.mxu1 %v16818_v22  ;;  %12216 = vmatprep.subr.bf16.mxu0 %v16823_v23 }
 0x6a5   :  { %12298 = vmatprep.subr.bf16.mxu1 %v16826_v24 }
 0x6a7   :  { %12217 = vmatpush1.bf16.msra.mxu0 %v16821_v13  ;;  %v16872_v13 = vld [vmem:[%s22241_s5 + $0x1188] ss:$100 sps:$4 sm:$0xff]  }
 0x6a8   :  { %12299 = vmatpush1.bf16.msra.mxu1 %v16824_v27  ;;  %12218 = vmatprep.subr.bf16.mxu0 %v16829_v30  ;;  %v16877_v27 = vld [vmem:[%s22241_s5 + $0x124c] ss:$100 sps:$4 sm:$0xff]  }
 0x6a9   :  { %12300 = vmatprep.subr.bf16.mxu1 %v16832_v36 }
 0x6ab   :  { %12219 = vmatpush1.bf16.msra.mxu0 %v16827_v37  ;;  %v16880_v37 = vld [vmem:[%s22241_s5 + $0x1254] ss:$100 sps:$4 sm:$0xff]  }
 0x6ac   :  { %12301 = vmatpush1.bf16.msra.mxu1 %v16830_v21  ;;  %12229 = vmatprep.subr.bf16.mxu0 %v16835_v41 }
 0x6ad   :  { %12311 = vmatprep.subr.bf16.mxu1 %v16838_v34  ;;  %v16875_v34 = vld [vmem:[%s22241_s5 + $0x1248] ss:$100 sps:$4 sm:$0xff]  }
 0x6ae   :  { %12221 = vmatmul.mubr.bf16.vlgmr.msra.gmra.mrb[28].mxu0 %v19656_v31 }
 0x6af   :  { %12303 = vmatmul.mubr.bf16.vlgmr.msra.gmra.mrb[28].mxu1 %v19656_v31  ;;  %12230 = vmatpush1.bf16.msra.mxu0 %v16833_v43 }
 0x6b0   :  { %12261 = vmatprep.mubr.bf16.mxu0 %v19648_v29  ;;  %12312 = vmatpush1.bf16.msra.mxu1 %v16836_v45  ;;  %v16878_v45 = vld [vmem:[%s22241_s5 + $0x1250] ss:$100 sps:$4 sm:$0xff]  }
 0x6b1   :  { %12343 = vmatprep.mubr.bf16.mxu1 %v19648_v29  ;;  %12231 = vmatprep.subr.bf16.mxu0 %v16841_v46  ;;  %v16883_v46 = vld [vmem:[%s22241_s5 + $0x1314] ss:$100 sps:$4 sm:$0xff]  }
 0x6b2   :  { %12313 = vmatprep.subr.bf16.mxu1 %v16844_v35  ;;  %v16886_v35 = vld [vmem:[%s22241_s5 + $0x131c] ss:$100 sps:$4 sm:$0xff]  }
 0x6b3   :  { %12232 = vmatpush1.bf16.msra.mxu0 %v16839_v50 }
 0x6b4   :  { %12314 = vmatpush1.bf16.msra.mxu1 %v16842_v32  ;;  %12233 = vmatprep.subr.bf16.mxu0 %v16847_v26  ;;  %v16881_v32 = vld [vmem:[%s22241_s5 + $0x1310] ss:$100 sps:$4 sm:$0xff]   ;;  %v12571_v26 = vrot.slane %v12563_v40, %v17172_v49  ;;  %v16895_v40 = vld [vmem:[%s22241_s5 + $0x14a4] ss:$100 sps:$4 sm:$0xff]  }
 0x6b5   :  { %12315 = vmatprep.subr.bf16.mxu1 %v16850_v39 }
 0x6b7   :  { %12234 = vmatpush1.bf16.msra.mxu0 %v16845_v51  ;;  %v16884_v51 = vld [vmem:[%s22241_s5 + $0x1318] ss:$100 sps:$4 sm:$0xff]  }
 0x6b8   :  { %12316 = vmatpush1.bf16.msra.mxu1 %v16848_v53  ;;  %12235 = vmatprep.subr.bf16.mxu0 %v16853_v38  ;;  %v16889_v53 = vld [vmem:[%s22241_s5 + $0x13dc] ss:$100 sps:$4 sm:$0xff]   ;;  %v16892_v38 = vld [vmem:[%s22241_s5 + $0x13e4] ss:$100 sps:$4 sm:$0xff]  }
 0x6b9   :  { %12317 = vmatprep.subr.bf16.mxu1 %v16856_v54 }
 0x6bb   :  { %12236 = vmatpush1.bf16.msra.mxu0 %v16851_v58  ;;  %v16898_v58 = vld [vmem:[%s22241_s5 + $0x14ac] ss:$100 sps:$4 sm:$0xff]  }
 0x6bc   :  { %12318 = vmatpush1.bf16.msra.mxu1 %v16854_v62  ;;  %12237 = vmatprep.subr.bf16.mxu0 %v16859_v44  ;;  %v16893_v62 = vld [vmem:[%s22241_s5 + $0x14a0] ss:$100 sps:$4 sm:$0xff]   ;;  %v16896_v44 = vld [vmem:[%s22241_s5 + $0x14a8] ss:$100 sps:$4 sm:$0xff]  }
 0x6bd   :  { %12319 = vmatprep.subr.bf16.mxu1 %v16862_v0  ;;  %v16901_v0 = vld [vmem:[%s22241_s5 + $0x156c] ss:$100 sps:$4 sm:$0xff]  }
 0x6bf   :  { %12238 = vmatpush1.bf16.msra.mxu0 %v16857_v1  ;;  %v16904_v1 = vld [vmem:[%s22241_s5 + $0x1574] ss:$100 sps:$4 sm:$0xff]  }
 0x6c0   :  { %12320 = vmatpush1.bf16.msra.mxu1 %v16860_v42  ;;  %12239 = vmatprep.subr.bf16.mxu0 %v16865_v2  ;;  %v16899_v42 = vld [vmem:[%s22241_s5 + $0x1568] ss:$100 sps:$4 sm:$0xff]   ;;  %v16902_v2 = vld [vmem:[%s22241_s5 + $0x1570] ss:$100 sps:$4 sm:$0xff]  }
 0x6c1   :  { %v11935_v15 = vpop.f32.mrb[20].mxu0  ;;  %12321 = vmatprep.subr.bf16.mxu1 %v16868_v4  ;;  %v16907_v4 = vld [vmem:[%s22241_s5 + $0x1634] ss:$100 sps:$4 sm:$0xff]  }
 0x6c2   :  { %v14407_v16 = vadd.f32 %v11935_v15, %v7262_v60  ;;  %v12017_v17 = vpop.f32.mrb[20].mxu1  ;;  %v11937_v7 = vpop.f32.mrb[21].mxu0  ;;  %v16910_v60 = vld [vmem:[%s22241_s5 + $0x163c] ss:$100 sps:$4 sm:$0xff]   ;;  %v16919_v15 = vld [vmem:[%s22241_s5 + $0x17c4] ss:$100 sps:$4 sm:$0xff]  }
 0x6c3   :  { %v14409_v10 = vadd.f32 %v12017_v17, %v7270_v8  ;;  %v14408_v56 = vadd.f32 %v11937_v7, %v7266_v9  ;;  %v12019_v18 = vpop.f32.mrb[21].mxu1  ;;  %v11939_v19 = vpop.f32.mrb[22].mxu0  ;;  %12240 = vmatpush1.bf16.msra.mxu0 %v16863_v11  ;;  %v16905_v8 = vld [vmem:[%s22241_s5 + $0x1630] ss:$100 sps:$4 sm:$0xff]   ;;  %v16908_v9 = vld [vmem:[%s22241_s5 + $0x1638] ss:$100 sps:$4 sm:$0xff]  }
 0x6c4   :  { %v14410_v22 = vadd.f32 %v12019_v18, %v7274_v12  ;;  %v12021_v23 = vpop.f32.mrb[22].mxu1  ;;  %12322 = vmatpush1.bf16.msra.mxu1 %v16866_v52  ;;  %v11940_v24 = vpop.f32.mrb[23].mxu0  ;;  %12241 = vmatprep.subr.bf16.mxu0 %v16871_v63  ;;  %v16913_v11 = vld [vmem:[%s22241_s5 + $0x16fc] ss:$100 sps:$4 sm:$0xff]   ;;  %v16916_v12 = vld [vmem:[%s22241_s5 + $0x1704] ss:$100 sps:$4 sm:$0xff]  }
 0x6c5   :  { %v14296_v30 = vpack.c.bf16 %v14408_v56, %v14407_v16  ;;  %v12022_v36 = vpop.f32.mrb[23].mxu1  ;;  %12323 = vmatprep.subr.bf16.mxu1 %v16874_v48  ;;  %v16911_v52 = vld [vmem:[%s22241_s5 + $0x16f8] ss:$100 sps:$4 sm:$0xff]   ;;  %v16914_v63 = vld [vmem:[%s22241_s5 + $0x1700] ss:$100 sps:$4 sm:$0xff]  }
 0x6c6   :  { %v14297_v21 = vpack.c.bf16 %v14410_v22, %v14409_v10  ;;  %v16922_v48 = vld [vmem:[%s22241_s5 + $0x17cc] ss:$100 sps:$4 sm:$0xff]   ;;  %v16917_v16 = vld [vmem:[%s22241_s5 + $0x17c0] ss:$100 sps:$4 sm:$0xff]   ;;  %v16928_v10 = vld [vmem:[%s22241_s5 + $0x1894] ss:$100 sps:$4 sm:$0xff]  }
 0x6c7   :  { %v12555_v41 = vrot.slane %v14296_v30, %v17172_v49  ;;  %12242 = vmatpush1.bf16.msra.mxu0 %v16869_v20  ;;  %v16920_v17 = vld [vmem:[%s22241_s5 + $0x17c8] ss:$100 sps:$4 sm:$0xff]   ;;  %v16926_v18 = vld [vmem:[%s22241_s5 + $0x1890] ss:$100 sps:$4 sm:$0xff]   ;;  %v16929_v19 = vld [vmem:[%s22241_s5 + $0x6a0] ss:$100 sps:$4 sm:$0xff]  }
 0x6c8   :  { %v12562_v43 = vrot.slane %v14297_v21, %v17172_v49  ;;  %12324 = vmatpush1.bf16.msra.mxu1 %v16872_v13  ;;  %12243 = vmatprep.subr.bf16.mxu0 %v16877_v27  ;;  %v16925_v7 = vld [vmem:[%s22241_s5 + $0x188c] ss:$100 sps:$4 sm:$0xff]   ;;  %v16930_v20 = vld [vmem:[%s22241_s5 + $0x1320] ss:$100 sps:$4 sm:$0xff]  }
 0x6c9   :  { %12325 = vmatprep.subr.bf16.mxu1 %v16880_v37  ;;  %v16923_v56 = vld [vmem:[%s22241_s5 + $0x1888] ss:$100 sps:$4 sm:$0xff]   ;;  %v16931_v22 = vld [vmem:[%s22241_s5 + $0x60] ss:$100 sps:$4 sm:$0xff]   ;;  %v16937_v36 = vld [vmem:[%s22241_s5 + $0x830] ss:$100 sps:$4 sm:$0xff]  }
 0x6ca   :  { %v12564_v50 = vcombine.low %v12555_v41, %v12562_v43  ;;  %v16932_v23 = vld [vmem:[%s22241_s5 + $0xce0] ss:$100 sps:$4 sm:$0xff]   ;;  %v16933_v24 = vld [vmem:[%s22241_s5 + $0x768] ss:$100 sps:$4 sm:$0xff]   ;;  %v16938_v37 = vld [vmem:[%s22241_s5 + $0x14b0] ss:$100 sps:$4 sm:$0xff]  }
 0x6cb   :  { %12244 = vmatpush1.bf16.msra.mxu0 %v16875_v34  ;;  %v16934_v13 = vld [vmem:[%s22241_s5 + $0x13e8] ss:$100 sps:$4 sm:$0xff]   ;;  %v16940_v21 = vld [vmem:[%s22241_s5 + $0xe70] ss:$100 sps:$4 sm:$0xff]   ;;  %v16942_v41 = vld [vmem:[%s22241_s5 + $0x1578] ss:$100 sps:$4 sm:$0xff]  }
 0x6cc   :  { %v12578_v39 = vrot.slane %v12564_v50, %v17172_v49  ;;  %12326 = vmatpush1.bf16.msra.mxu1 %v16878_v45  ;;  %12245 = vmatprep.subr.bf16.mxu0 %v16883_v46  ;;  %v16935_v27 = vld [vmem:[%s22241_s5 + $0x128] ss:$100 sps:$4 sm:$0xff]   ;;  %v16943_v34 = vld [vmem:[%s22241_s5 + $0x2b8] ss:$100 sps:$4 sm:$0xff]   ;;  %v16945_v45 = vld [vmem:[%s22241_s5 + $0x9c0] ss:$100 sps:$4 sm:$0xff]  }
 0x6cd   :  { %12327 = vmatprep.subr.bf16.mxu1 %v16886_v35  ;;  %v16936_v30 = vld [vmem:[%s22241_s5 + $0xda8] ss:$100 sps:$4 sm:$0xff]   ;;  %v16944_v43 = vld [vmem:[%s22241_s5 + $0xf38] ss:$100 sps:$4 sm:$0xff]   ;;  %v16946_v46 = vld [vmem:[%s22241_s5 + $0x1640] ss:$100 sps:$4 sm:$0xff]  }
 0x6ce   :  { %v12579_v54 = vcombine.low %v12571_v26, %v12578_v39  ;;  %v16947_v35 = vld [vmem:[%s22241_s5 + $0x380] ss:$100 sps:$4 sm:$0xff]   ;;  %v16950_v26 = vld [vmem:[%s22241_s5 + $0x1708] ss:$100 sps:$4 sm:$0xff]  }
 0x6cf   :  { %12246 = vmatpush1.bf16.msra.mxu0 %v16881_v32  ;;  %v16948_v50 = vld [vmem:[%s22241_s5 + $0x1000] ss:$100 sps:$4 sm:$0xff]   ;;  %v16949_v32 = vld [vmem:[%s22241_s5 + $0xa88] ss:$100 sps:$4 sm:$0xff]  }
 0x6d0   :  { %12648 = vst [vmem:[%s22244_s8 + $0x8] sm:$0xff] %v12579_v54  ;;  %12328 = vmatpush1.bf16.msra.mxu1 %v16884_v51  ;;  %12247 = vmatprep.subr.bf16.mxu0 %v16889_v53  ;;  %v16951_v39 = vld [vmem:[%s22241_s5 + $0x448] ss:$100 sps:$4 sm:$0xff]   ;;  %v16953_v53 = vld [vmem:[%s22241_s5 + $0xb50] ss:$100 sps:$4 sm:$0xff]  }
 0x6d1   :  { %12329 = vmatprep.subr.bf16.mxu1 %v16892_v38  ;;  %v16952_v51 = vld [vmem:[%s22241_s5 + $0x10c8] ss:$100 sps:$4 sm:$0xff]   ;;  %v16954_v38 = vld [vmem:[%s22241_s5 + $0x17d0] ss:$100 sps:$4 sm:$0xff]  }
 0x6d2   :  { %v16955_v54 = vld [vmem:[%s22241_s5 + $0x510] ss:$100 sps:$4 sm:$0xff]  }
 0x6d3   :  { %12248 = vmatpush1.bf16.msra.mxu0 %v16887_v14  ;;  %v16956_v14 = vld [vmem:[%s22241_s5 + $0x1190] ss:$100 sps:$4 sm:$0xff]  }
 0x6d4   :  { %12330 = vmatpush1.bf16.msra.mxu1 %v16890_v33  ;;  %12249 = vmatprep.subr.bf16.mxu0 %v16895_v40  ;;  %v16957_v33 = vld [vmem:[%s22241_s5 + $0xc18] ss:$100 sps:$4 sm:$0xff]  }
 0x6d5   :  { %12331 = vmatprep.subr.bf16.mxu1 %v16898_v58  ;;  %v16958_v40 = vld [vmem:[%s22241_s5 + $0x1898] ss:$100 sps:$4 sm:$0xff]  }
 0x6d6   :  { %v16959_v58 = vld [vmem:[%s22241_s5 + $0x5d8] ss:$100 sps:$4 sm:$0xff]  }
 0x6d7   :  { %12250 = vmatpush1.bf16.msra.mxu0 %v16893_v62  ;;  %v16960_v62 = vld [vmem:[%s22241_s5 + $0x1258] ss:$100 sps:$4 sm:$0xff]  }
 0x6d8   :  { %12332 = vmatpush1.bf16.msra.mxu1 %v16896_v44  ;;  %12251 = vmatprep.subr.bf16.mxu0 %v16901_v0  ;;  %v7205_v44 = vld [vmem:[%s22242_s6 + $0x10] sm:$0xff] }
 0x6d9   :  { %12333 = vmatprep.subr.bf16.mxu1 %v16904_v1  ;;  %v7278_v0 = vrot.slane %v7205_v44, %v19628_v59  ;;  %v7286_v1 = vrot.slane %v7205_v44, %v19631_v3 }
 0x6db   :  { %12252 = vmatpush1.bf16.msra.mxu0 %v16899_v42  ;;  %v7282_v42 = vrot.slane %v7205_v44, %v19637_v5 }
 0x6dc   :  { %12334 = vmatpush1.bf16.msra.mxu1 %v16902_v2  ;;  %12253 = vmatprep.subr.bf16.mxu0 %v16907_v4  ;;  %v7290_v2 = vrot.slane %v7205_v44, %v19640_v6 }
 0x6dd   :  { %12335 = vmatprep.subr.bf16.mxu1 %v16910_v60 }
 0x6df   :  { %12254 = vmatpush1.bf16.msra.mxu0 %v16905_v8 }
 0x6e0   :  { %12336 = vmatpush1.bf16.msra.mxu1 %v16908_v9  ;;  %12255 = vmatprep.subr.bf16.mxu0 %v16913_v11 }
 0x6e1   :  { %12337 = vmatprep.subr.bf16.mxu1 %v16916_v12 }
 0x6e3   :  { %12256 = vmatpush1.bf16.msra.mxu0 %v16911_v52 }
 0x6e4   :  { %12338 = vmatpush1.bf16.msra.mxu1 %v16914_v63  ;;  %12257 = vmatprep.subr.bf16.mxu0 %v16919_v15 }
 0x6e5   :  { %12339 = vmatprep.subr.bf16.mxu1 %v16922_v48 }
 0x6e7   :  { %12258 = vmatpush1.bf16.msra.mxu0 %v16917_v16 }
 0x6e8   :  { %12340 = vmatpush1.bf16.msra.mxu1 %v16920_v17  ;;  %12259 = vmatprep.subr.bf16.mxu0 %v16925_v7 }
 0x6e9   :  { %12341 = vmatprep.subr.bf16.mxu1 %v16928_v10 }
 0x6eb   :  { %12260 = vmatpush1.bf16.msra.mxu0 %v16923_v56 }
 0x6ec   :  { %12342 = vmatpush1.bf16.msra.mxu1 %v16926_v18  ;;  %14347 = vmatprep.subr.bf16.mxu0 %v16929_v19 }
 0x6ed   :  { %14369 = vmatprep.subr.bf16.mxu1 %v16930_v20 }
 0x6ee   :  { %12262 = vmatmul.mubr.bf16.vlgmr.msra.gmra.mrb[28].mxu0 %v19658_v25 }
 0x6ef   :  { %12344 = vmatmul.mubr.bf16.vlgmr.msra.gmra.mrb[28].mxu1 %v19658_v25  ;;  %14348 = vmatpush3.bf16.msra.mxu0 %v16931_v22 }
 0x6f0   :  { %12384 = vmatprep.mubr.bf16.mxu0 %v19646_v28  ;;  %14370 = vmatpush3.bf16.msra.mxu1 %v16932_v23  ;;  %v16939_v28 = vld [vmem:[%s22241_s5 + $0x1f0] ss:$100 sps:$4 sm:$0xff]  }
 0x6f1   :  { %12424 = vmatprep.mubr.bf16.mxu1 %v19648_v29  ;;  %14349 = vmatprep.subr.bf16.mxu0 %v16933_v24  ;;  %v16941_v29 = vld [vmem:[%s22241_s5 + $0x8f8] ss:$100 sps:$4 sm:$0xff]   ;;  %s16991_s5 = smov [#allocation2]  }
 0x6f2   :  { %14371 = vmatprep.subr.bf16.mxu1 %v16934_v13  ;;  %s12657_s23 = sshll.u32 %s16991_s5, 4  ;;  %s12658_s23 = int_to_ptr.vmem [resolvable:$true] %s12657_s23 }
 0x6f3   :  { %14350 = vmatpush3.bf16.msra.mxu0 %v16935_v27  ;;  %s16965_s24 = scalar_lea.vmem %s12658_s23, 32  ;;  %p16970_p1 = scmp.lt.s32.totalorder %s12658_s23, %s12658_s23 }
 0x6f4   :  { %14372 = vmatpush3.bf16.msra.mxu1 %v16936_v30  ;;  %14351 = vmatprep.subr.bf16.mxu0 %v16937_v36  ;;  %p16966_p0 = scmp.ne.s32.totalorder %s12658_s23, %s16965_s24  ;;  %p16971_p2 = scmp.lt.s32.totalorder %s16965_s24, %s16965_s24 }
 0x6f5   :  { %14373 = vmatprep.subr.bf16.mxu1 %v16938_v37 }
 0x6f6   :  { %p16972_p3 = por %p16971_p2, %p16970_p1 }
 0x6f7   :  { %14352 = vmatpush3.bf16.msra.mxu0 %v16939_v28 }
 0x6f8   :  { %14374 = vmatpush3.bf16.msra.mxu1 %v16940_v21  ;;  %14353 = vmatprep.subr.bf16.mxu0 %v16941_v29  ;;  %p16973_p4 = pnand %p16972_p3, %p16966_p0 }
 0x6f9   :  { %14375 = vmatprep.subr.bf16.mxu1 %v16942_v41 }
 0x6fb   :  { %14354 = vmatpush3.bf16.msra.mxu0 %v16943_v34 }
 0x6fc   :  { %14376 = vmatpush3.bf16.msra.mxu1 %v16944_v43  ;;  %14355 = vmatprep.subr.bf16.mxu0 %v16945_v45 }
 0x6fd   :  { %14377 = vmatprep.subr.bf16.mxu1 %v16946_v46 }
 0x6ff   :  { %14356 = vmatpush3.bf16.msra.mxu0 %v16947_v35 }
 0x700   :  { %14378 = vmatpush3.bf16.msra.mxu1 %v16948_v50  ;;  %14357 = vmatprep.subr.bf16.mxu0 %v16949_v32 }
 0x701   :  { %14379 = vmatprep.subr.bf16.mxu1 %v16950_v26 }
 0x703   :  { %14358 = vmatpush3.bf16.msra.mxu0 %v16951_v39 }
 0x704   :  { %14380 = vmatpush3.bf16.msra.mxu1 %v16952_v51  ;;  %14359 = vmatprep.subr.bf16.mxu0 %v16953_v53 }
 0x705   :  { %14381 = vmatprep.subr.bf16.mxu1 %v16954_v38 }
 0x707   :  { %14360 = vmatpush3.bf16.msra.mxu0 %v16955_v54 }
 0x708   :  { %14382 = vmatpush3.bf16.msra.mxu1 %v16956_v14  ;;  %14361 = vmatprep.subr.bf16.mxu0 %v16957_v33 }
 0x709   :  { %14383 = vmatprep.subr.bf16.mxu1 %v16958_v40 }
 0x70b   :  { %14362 = vmatpush3.bf16.msra.mxu0 %v16959_v58 }
 0x70c   :  { %14384 = vmatpush3.bf16.msra.mxu1 %v16960_v62 }
 0x70e   :  { %12385 = vmatmul.mubr.bf16.vlgmr.msra.gmra.mrb[32].mxu0 %v19656_v31 }
 0x70f   :  { %12425 = vmatmul.mubr.bf16.vlgmr.msra.gmra.mrb[32].mxu1 %v19658_v25 }
 0x741   :  { %v12099_v4 = vpop.f32.mrb[24].mxu0 }
 0x742   :  { %v14411_v60 = vadd.f32 %v12099_v4, %v7278_v0  ;;  %v12181_v8 = vpop.f32.mrb[24].mxu1  ;;  %v12101_v9 = vpop.f32.mrb[25].mxu0 }
 0x743   :  { %v14413_v11 = vadd.f32 %v12181_v8, %v7286_v1  ;;  %v14412_v31 = vadd.f32 %v12101_v9, %v7282_v42  ;;  %v12183_v12 = vpop.f32.mrb[25].mxu1  ;;  %v12103_v25 = vpop.f32.mrb[26].mxu0 }
 0x744   :  { %v14414_v52 = vadd.f32 %v12183_v12, %v7290_v2  ;;  %v12185_v63 = vpop.f32.mrb[26].mxu1  ;;  %v12104_v15 = vpop.f32.mrb[27].mxu0 }
 0x745   :  { %v14298_v48 = vpack.c.bf16 %v14412_v31, %v14411_v60  ;;  %v12186_v16 = vpop.f32.mrb[27].mxu1 }
 0x746   :  { %v14299_v59 = vpack.c.bf16 %v14414_v52, %v14413_v11 }
 0x747   :  { %v12590_v3 = vrot.slane %v14298_v48, %v17172_v49 }
 0x748   :  { %v12597_v5 = vrot.slane %v14299_v59, %v17172_v49 }
 0x74a   :  { %v12612_v17 = vcombine.low %v12590_v3, %v12597_v5 }
 0x74b   :  { %16976 = shalt.err (!%p16973_p4)
}
 0x74c   :  { %s16977_s27 = scalar_lea.hbm %s22243_s7, 32 }
 0x74d   :  { %p16978_p5 = scmp.ne.s32.totalorder %s22243_s7, %s16977_s27  ;;  %p16981_p6 = scmp.lt.u32.totalorder %s16977_s27, %s22243_s7 }
 0x74f   :  { %p16983_p7 = pnand %p16981_p6, %p16978_p5 }
 0x751   :  { %16986 = shalt.err (!%p16983_p7)
}
 0x752   :  { %12660 = dma.vmem_to_hbm [thread:$0]  %s12658_s23, 32, %s22243_s7, [#allocation3]   ;;  %v7294_v6 = vrot.slane %v7205_v44, %v21105_v55  ;;  %v7302_v7 = vrot.slane %v7205_v44, %v21111_v47  ;;  %v7298_v10 = vrot.slane %v7205_v44, %v21114_v57  ;;  %v7306_v56 = vrot.slane %v7205_v44, %v21120_v61  ;;  %v13489_v46 = vld [vmem:[%s22242_s6 + $0x18] ss:$0 sm:$0xff] }
 0x753   :  { %v12620_v61 = vrot.slane %v12612_v17, %v17172_v49 }
 0x7c1   :  { %v12263_v18 = vpop.f32.mrb[28].mxu0 }
 0x7c2   :  { %v14415_v19 = vadd.f32 %v12263_v18, %v7294_v6  ;;  %v12345_v20 = vpop.f32.mrb[28].mxu1  ;;  %v12265_v22 = vpop.f32.mrb[29].mxu0 }
 0x7c3   :  { %v14417_v23 = vadd.f32 %v12345_v20, %v7302_v7  ;;  %v14416_v24 = vadd.f32 %v12265_v22, %v7298_v10  ;;  %v12347_v13 = vpop.f32.mrb[29].mxu1  ;;  %v12267_v27 = vpop.f32.mrb[30].mxu0 }
 0x7c4   :  { %v14418_v30 = vadd.f32 %v12347_v13, %v7306_v56  ;;  %v12349_v36 = vpop.f32.mrb[30].mxu1  ;;  %v12268_v37 = vpop.f32.mrb[31].mxu0 }
 0x7c5   :  { %v14300_v28 = vpack.c.bf16 %v14416_v24, %v14415_v19  ;;  %v12350_v21 = vpop.f32.mrb[31].mxu1 }
 0x7c6   :  { %v14301_v55 = vpack.c.bf16 %v14418_v30, %v14417_v23 }
 0x7c7   :  { %v12604_v47 = vrot.slane %v14300_v28, %v17172_v49 }
 0x7c8   :  { %v12611_v57 = vrot.slane %v14301_v55, %v17172_v49 }
 0x7ca   :  { %v12613_v29 = vcombine.low %v12604_v47, %v12611_v57 }
 0x7cc   :  { %v12627_v41 = vrot.slane %v12613_v29, %v17172_v49 }
 0x7ce   :  { %v12628_v34 = vcombine.low %v12620_v61, %v12627_v41 }
 0x7d0   :  { %12649 = vst [vmem:[%s22244_s8 + $0x10] sm:$0xff] %v12628_v34 }
 0x7e1   :  { %v14363_v43 = vpop.f32.mrb[32].mxu0 }
 0x7e2   :  { %v14385_v45 = vpop.f32.mrb[32].mxu1  ;;  %v14364_v35 = vpop.f32.mrb[33].mxu0 }
 0x7e3   :  { %v14365_v50 = vadd.f32 %v14364_v35, %v14363_v43  ;;  %v14386_v32 = vpop.f32.mrb[33].mxu1  ;;  %v14366_v26 = vpop.f32.mrb[34].mxu0 }
 0x7e4   :  { %v14387_v39 = vadd.f32 %v14386_v32, %v14385_v45  ;;  %v14388_v51 = vpop.f32.mrb[34].mxu1  ;;  %v14367_v53 = vpop.f32.mrb[35].mxu0 }
 0x7e5   :  { %v12387_v38 = vadd.f32 %v14365_v50, %v13489_v46  ;;  %v14389_v54 = vpop.f32.mrb[35].mxu1 }
 0x7e7   :  { %v12427_v14 = vadd.f32 %v14387_v39, %v12387_v38 }
 0x7e9   :  { %v12456_v33 = vpack.c.bf16 %v12427_v14, %v12427_v14 }
 0x7eb   :  { %v12635_v40 = vrot.slane %v12456_v33, %v17172_v49 }
 0x7ed   :  { %14302 = vst.sshfl [vmem:[%s22244_s8 + $0x18] sm:$0x1 pattern:$0x73625140] %v12635_v40 }
 0x7ee   :  { %16987 = dma.done.wait [#allocation3], 32  }
 0x7ef   :  { %16988 = vsyncadd [#allocation3], 4294967264 }
 0x7f0   :  { %12668 = vsyncpa [#allocation3], 1 }

// kernel: dqn_forward.12
= control target key start
LH: loop header
LB: loop body
LE: loop exit
PB: predicated region body
PF: predicated region fallthrough
CT: control target
= control target key end

     0   :  { %vm795_vm0 = vcmask 523264   ;;  %s2842_s1 = inlined_call_operand.vmem [shape: bf16[576,128], index: 1, kind: input, shape index: {}]   ;;  %s2843_s0 = inlined_call_operand.vmem [shape: bf16[242,576], index: 0, kind: input, shape index: {}]   ;;  %s2844_s2 = inlined_call_operand.vmem [shape: f32[1,128], index: 2, kind: input, shape index: {}]   ;;  %s2845_s3 = inlined_call_operand.vmem [shape: bf16[242,128], index: 3, kind: output, shape index: {}]  }
   0x1   :  { %v2099_v0 = vld [vmem:[%s2842_s1 + $0x40] sm:$0xff]   ;;  %v2101_v2 = vld [vmem:[%s2842_s1 + $0x48] sm:$0xff]   ;;  %v2103_v4 = vld [vmem:[%s2842_s1 + $0x50] sm:$0xff]  }
   0x2   :  { %v2100_v1 = vld [vmem:[%s2842_s1] sm:$0xff]   ;;  %1799 = vmatprep.subr.bf16.mxu0 %v2099_v0  ;;  %2083 = vmatprep.subr.bf16.mxu1 %v2099_v0  ;;  %v2102_v3 = vld [vmem:[%s2842_s1 + $0x8] sm:$0xff]   ;;  %v2104_v5 = vld [vmem:[%s2842_s1 + $0x10] sm:$0xff]  }
   0x3   :  { %1800 = vmatpush3.bf16.msra.mxu0 %v2100_v1  ;;  %2091 = vmatpush3.bf16.msra.mxu1 %v2100_v1  ;;  %v2105_v6 = vld [vmem:[%s2842_s1 + $0x58] sm:$0xff]   ;;  %v2107_v8 = vld [vmem:[%s2842_s1 + $0x60] sm:$0xff]   ;;  %v2109_v10 = vld [vmem:[%s2842_s1 + $0x68] sm:$0xff]  }
   0x4   :  { %1801 = vmatprep.subr.bf16.mxu0 %v2101_v2  ;;  %2084 = vmatprep.subr.bf16.mxu1 %v2101_v2  ;;  %v2106_v7 = vld [vmem:[%s2842_s1 + $0x18] sm:$0xff]   ;;  %v2108_v9 = vld [vmem:[%s2842_s1 + $0x20] sm:$0xff]   ;;  %v2110_v13 = vld [vmem:[%s2842_s1 + $0x28] sm:$0xff]  }
   0x5   :  { %v2117_v11 = vld [vmem:[%s2843_s0 + $0x4] ss:$20 sps:$4 sm:$0xff]   ;;  %v2111_v14 = vld [vmem:[%s2842_s1 + $0x70] sm:$0xff]   ;;  %v2124_v23 = vld [vmem:[%s2842_s1 + $0xc8] sm:$0xff]  }
   0x6   :  { %v2120_v12 = vld [vmem:[%s2843_s0 + $0x1e4] ss:$20 sps:$4 sm:$0xff]   ;;  %876 = vmatprep.mubr.bf16.mxu0 %v2117_v11  ;;  %v2112_v15 = vld [vmem:[%s2842_s1 + $0x30] sm:$0xff]   ;;  %v2126_v24 = vld [vmem:[%s2843_s0 + $0x2c] ss:$20 sps:$4 sm:$0xff]  }
   0x7   :  { %1802 = vmatpush3.bf16.msra.mxu0 %v2102_v3  ;;  %2092 = vmatpush3.bf16.msra.mxu1 %v2102_v3  ;;  %v2113_v16 = vld [vmem:[%s2842_s1 + $0x78] sm:$0xff]   ;;  %v2121_v18 = vld [vmem:[%s2842_s1 + $0xc0] sm:$0xff]   ;;  %v2125_v26 = vld [vmem:[%s2842_s1 + $0x88] sm:$0xff]  }
   0x8   :  { %1803 = vmatprep.subr.bf16.mxu0 %v2103_v4  ;;  %2085 = vmatprep.subr.bf16.mxu1 %v2103_v4  ;;  %v2114_v17 = vld [vmem:[%s2842_s1 + $0x38] sm:$0xff]   ;;  %v2123_v19 = vld [vmem:[%s2842_s1 + $0x100] sm:$0xff]   ;;  %v2132_v28 = vld [vmem:[%s2842_s1 + $0xd0] sm:$0xff]  }
   0x9   :  { %972 = vmatprep.mubr.bf16.mxu1 %v2120_v12  ;;  %v2115_v20 = vld [vmem:[%s2843_s0] ss:$20 sps:$4 sm:$0xff]   ;;  %v2130_v27 = vld [vmem:[%s2843_s0 + $0x28] ss:$20 sps:$4 sm:$0xff]   ;;  %v2140_v36 = vld [vmem:[%s2843_s0 + $0x50] ss:$20 sps:$4 sm:$0xff]  }
   0xa   :  { %v2118_v21 = vld [vmem:[%s2843_s0 + $0x1e0] ss:$20 sps:$4 sm:$0xff]   ;;  %v2131_v29 = vld [vmem:[%s2843_s0 + $0x208] ss:$20 sps:$4 sm:$0xff]   ;;  %v2141_v38 = vld [vmem:[%s2843_s0 + $0x230] ss:$20 sps:$4 sm:$0xff]  }
   0xb   :  { %1804 = vmatpush3.bf16.msra.mxu0 %v2104_v5  ;;  %2093 = vmatpush3.bf16.msra.mxu1 %v2104_v5  ;;  %v2122_v22 = vld [vmem:[%s2842_s1 + $0x80] sm:$0xff]   ;;  %v2133_v30 = vld [vmem:[%s2842_s1 + $0x90] sm:$0xff]   ;;  %v2134_v31 = vld [vmem:[%s2842_s1 + $0xd8] sm:$0xff]  }
   0xc   :  { %1805 = vmatprep.subr.bf16.mxu0 %v2105_v6  ;;  %2086 = vmatprep.subr.bf16.mxu1 %v2105_v6  ;;  %v2128_v25 = vld [vmem:[%s2843_s0 + $0x20c] ss:$20 sps:$4 sm:$0xff]   ;;  %v2136_v32 = vld [vmem:[%s2843_s0 + $0x54] ss:$20 sps:$4 sm:$0xff]   ;;  %v2135_v35 = vld [vmem:[%s2842_s1 + $0x98] sm:$0xff]  }
   0xd   :  { %v2138_v33 = vld [vmem:[%s2843_s0 + $0x234] ss:$20 sps:$4 sm:$0xff]   ;;  %v2142_v37 = vld [vmem:[%s2842_s1 + $0xe0] sm:$0xff]   ;;  %v105_v39 = vld [vmem:[%s2843_s0 + $0x258] sm:$0x11] }
   0xe   :  { %v2153_v34 = vld [vmem:[%s2842_s1 + $0x108] sm:$0xff]   ;;  %v2143_v40 = vld [vmem:[%s2842_s1 + $0xa0] sm:$0xff]   ;;  %v2146_v41 = vld [vmem:[%s2843_s0 + $0x7c] ss:$20 sps:$4 sm:$0xff]   ;;  %v1592_v43 = vcombine.high %v105_v39, %v105_v39  ;;  %v1591_v48 = vcombine.low %v105_v39, %v105_v39 }
   0xf   :  { %1806 = vmatpush3.bf16.msra.mxu0 %v2106_v7  ;;  %2094 = vmatpush3.bf16.msra.mxu1 %v2106_v7  ;;  %v2144_v42 = vld [vmem:[%s2842_s1 + $0xe8] sm:$0xff]   ;;  %v2151_v45 = vld [vmem:[%s2842_s1 + $0xf0] sm:$0xff]   ;;  %v2154_v50 = vld [vmem:[%s2842_s1 + $0xf8] sm:$0xff]  }
  0x10   :  { %1807 = vmatprep.subr.bf16.mxu0 %v2107_v8  ;;  %2087 = vmatprep.subr.bf16.mxu1 %v2107_v8  ;;  %v2145_v44 = vld [vmem:[%s2842_s1 + $0xa8] sm:$0xff]   ;;  %v2174_v46 = vld [vmem:[%s2842_s1 + $0x110] sm:$0xff]   ;;  %v2156_v51 = vld [vmem:[%s2843_s0 + $0xa4] ss:$20 sps:$4 sm:$0xff]  }
  0x11   :  { %v2149_v47 = vld [vmem:[%s2843_s0 + $0x78] ss:$20 sps:$4 sm:$0xff]   ;;  %v2152_v49 = vld [vmem:[%s2842_s1 + $0xb0] sm:$0xff]   ;;  %v2158_v54 = vld [vmem:[%s2843_s0 + $0x8] ss:$20 sps:$4 sm:$0xff]  }
  0x12   :  { %v2160_v52 = vld [vmem:[%s2843_s0 + $0xc] ss:$20 sps:$4 sm:$0xff]   ;;  %v2155_v53 = vld [vmem:[%s2842_s1 + $0xb8] sm:$0xff]   ;;  %v2164_v58 = vld [vmem:[%s2843_s0 + $0x34] ss:$20 sps:$4 sm:$0xff]  }
  0x13   :  { %1808 = vmatpush3.bf16.msra.mxu0 %v2108_v9  ;;  %2095 = vmatpush3.bf16.msra.mxu1 %v2108_v9  ;;  %v2193_v55 = vld [vmem:[%s2842_s1 + $0x118] sm:$0xff]   ;;  %v2161_v56 = vld [vmem:[%s2843_s0 + $0xa0] ss:$20 sps:$4 sm:$0xff]   ;;  %v2167_v60 = vld [vmem:[%s2843_s0 + $0x30] ss:$20 sps:$4 sm:$0xff]  }
  0x14   :  { %1809 = vmatprep.subr.bf16.mxu0 %v2109_v10  ;;  %2088 = vmatprep.subr.bf16.mxu1 %v2109_v10  ;;  %v2162_v57 = vld [vmem:[%s2843_s0 + $0xcc] ss:$20 sps:$4 sm:$0xff]   ;;  %v2166_v59 = vld [vmem:[%s2843_s0 + $0xc8] ss:$20 sps:$4 sm:$0xff]   ;;  %v2172_v63 = vld [vmem:[%s2843_s0 + $0xf0] ss:$20 sps:$4 sm:$0xff]  }
  0x15   :  { %v2168_v61 = vld [vmem:[%s2843_s0 + $0xf4] ss:$20 sps:$4 sm:$0xff]   ;;  %v2170_v62 = vld [vmem:[%s2843_s0 + $0x5c] ss:$20 sps:$4 sm:$0xff]   ;;  %v2173_v0 = vld [vmem:[%s2843_s0 + $0x58] ss:$20 sps:$4 sm:$0xff]  }
  0x16   :  { %v2175_v1 = vld [vmem:[%s2843_s0 + $0x11c] ss:$20 sps:$4 sm:$0xff]   ;;  %v2177_v2 = vld [vmem:[%s2843_s0 + $0x84] ss:$20 sps:$4 sm:$0xff]   ;;  %v2180_v4 = vld [vmem:[%s2843_s0 + $0x80] ss:$20 sps:$4 sm:$0xff]  }
  0x17   :  { %1810 = vmatpush3.bf16.msra.mxu0 %v2110_v13  ;;  %2096 = vmatpush3.bf16.msra.mxu1 %v2110_v13  ;;  %v2179_v3 = vld [vmem:[%s2843_s0 + $0x118] ss:$20 sps:$4 sm:$0xff]   ;;  %v2185_v7 = vld [vmem:[%s2843_s0 + $0x140] ss:$20 sps:$4 sm:$0xff]   ;;  %v2186_v8 = vld [vmem:[%s2843_s0 + $0xa8] ss:$20 sps:$4 sm:$0xff]  }
  0x18   :  { %1811 = vmatprep.subr.bf16.mxu0 %v2111_v14  ;;  %2089 = vmatprep.subr.bf16.mxu1 %v2111_v14  ;;  %v2181_v5 = vld [vmem:[%s2843_s0 + $0x144] ss:$20 sps:$4 sm:$0xff]   ;;  %v2183_v6 = vld [vmem:[%s2843_s0 + $0xac] ss:$20 sps:$4 sm:$0xff]   ;;  %v2189_v10 = vld [vmem:[%s2843_s0 + $0xd4] ss:$20 sps:$4 sm:$0xff]  }
  0x19   :  { %v2187_v9 = vld [vmem:[%s2843_s0 + $0x16c] ss:$20 sps:$4 sm:$0xff]   ;;  %v2191_v11 = vld [vmem:[%s2843_s0 + $0x168] ss:$20 sps:$4 sm:$0xff]   ;;  %v2192_v12 = vld [vmem:[%s2843_s0 + $0xd0] ss:$20 sps:$4 sm:$0xff]  }
  0x1a   :  { %v2194_v13 = vld [vmem:[%s2843_s0 + $0x194] ss:$20 sps:$4 sm:$0xff]   ;;  %v2196_v14 = vld [vmem:[%s2843_s0 + $0xfc] ss:$20 sps:$4 sm:$0xff]  }
  0x1b   :  { %1812 = vmatpush3.bf16.msra.mxu0 %v2112_v15  ;;  %2097 = vmatpush3.bf16.msra.mxu1 %v2112_v15  ;;  %v2198_v15 = vld [vmem:[%s2843_s0 + $0x190] ss:$20 sps:$4 sm:$0xff]   ;;  %v2229_v39 = vld [vmem:[%s2843_s0 + $0x1e8] ss:$20 sps:$4 sm:$0xff]  }
  0x1c   :  { %1813 = vmatprep.subr.bf16.mxu0 %v2113_v16  ;;  %2090 = vmatprep.subr.bf16.mxu1 %v2113_v16  ;;  %v2199_v16 = vld [vmem:[%s2843_s0 + $0xf8] ss:$20 sps:$4 sm:$0xff]  }
  0x1f   :  { %1814 = vmatpush3.bf16.msra.mxu0 %v2114_v17  ;;  %2098 = vmatpush3.bf16.msra.mxu1 %v2114_v17  ;;  %v2200_v17 = vld [vmem:[%s2843_s0 + $0x1bc] ss:$20 sps:$4 sm:$0xff]  }
  0x20   :  { %1911 = vmatprep.subr.bf16.mxu1 %v2121_v18  ;;  %2043 = vmatprep.subr.bf16.mxu0 %v2123_v19  ;;  %v2202_v18 = vld [vmem:[%s2843_s0 + $0x124] ss:$20 sps:$4 sm:$0xff]  }
  0x22   :  { %877 = vmatmul.mubr.bf16.vlgmr.msra.gmra.mrb[0].mxu0 %v2115_v20  ;;  %973 = vmatmul.mubr.bf16.vlgmr.msra.gmra.mrb[0].mxu1 %v2118_v21  ;;  %v2205_v20 = vld [vmem:[%s2843_s0 + $0x120] ss:$20 sps:$4 sm:$0xff]  }
  0x23   :  { %1912 = vmatpush3.bf16.msra.mxu1 %v2122_v22  ;;  %2044 = vmatpush3.bf16.msra.mxu0 %v2123_v19  ;;  %v2204_v19 = vld [vmem:[%s2843_s0 + $0x1b8] ss:$20 sps:$4 sm:$0xff]   ;;  %v2208_v22 = vld [vmem:[%s2843_s0 + $0x10] ss:$20 sps:$4 sm:$0xff]  }
  0x24   :  { %1913 = vmatprep.subr.bf16.mxu1 %v2124_v23  ;;  %884 = vmatprep.mubr.bf16.mxu0 %v2126_v24  ;;  %v2206_v21 = vld [vmem:[%s2843_s0 + $0x14c] ss:$20 sps:$4 sm:$0xff]   ;;  %v2209_v23 = vld [vmem:[%s2843_s0 + $0x148] ss:$20 sps:$4 sm:$0xff]  }
  0x25   :  { %980 = vmatprep.mubr.bf16.mxu1 %v2128_v25  ;;  %2045 = vmatprep.subr.bf16.mxu0 %v2153_v34  ;;  %v2210_v24 = vld [vmem:[%s2843_s0 + $0x38] ss:$20 sps:$4 sm:$0xff]   ;;  %v2211_v25 = vld [vmem:[%s2843_s0 + $0x174] ss:$20 sps:$4 sm:$0xff]  }
  0x27   :  { %1914 = vmatpush3.bf16.msra.mxu1 %v2125_v26  ;;  %2046 = vmatpush3.bf16.msra.mxu0 %v2153_v34  ;;  %v2213_v26 = vld [vmem:[%s2843_s0 + $0x60] ss:$20 sps:$4 sm:$0xff]  }
  0x28   :  { %1915 = vmatprep.subr.bf16.mxu1 %v2132_v28  ;;  %2047 = vmatprep.subr.bf16.mxu0 %v2174_v46  ;;  %v2215_v28 = vld [vmem:[%s2843_s0 + $0x88] ss:$20 sps:$4 sm:$0xff]   ;;  %v2223_v34 = vld [vmem:[%s2843_s0 + $0x100] ss:$20 sps:$4 sm:$0xff]  }
  0x2a   :  { %885 = vmatmul.mubr.bf16.gmra.mrb[4].mxu0 %v2130_v27  ;;  %981 = vmatmul.mubr.bf16.gmra.mrb[4].mxu1 %v2131_v29  ;;  %v2214_v27 = vld [vmem:[%s2843_s0 + $0x170] ss:$20 sps:$4 sm:$0xff]  }
  0x2b   :  { %1916 = vmatpush3.bf16.msra.mxu1 %v2133_v30  ;;  %892 = vmatprep.mubr.bf16.mxu0 %v2136_v32  ;;  %v2216_v29 = vld [vmem:[%s2843_s0 + $0x19c] ss:$20 sps:$4 sm:$0xff]   ;;  %v2220_v32 = vld [vmem:[%s2843_s0 + $0xd8] ss:$20 sps:$4 sm:$0xff]  }
  0x2c   :  { %1917 = vmatprep.subr.bf16.mxu1 %v2134_v31  ;;  %988 = vmatprep.mubr.bf16.mxu1 %v2138_v33  ;;  %v2218_v30 = vld [vmem:[%s2843_s0 + $0xb0] ss:$20 sps:$4 sm:$0xff]   ;;  %v2219_v31 = vld [vmem:[%s2843_s0 + $0x198] ss:$20 sps:$4 sm:$0xff]  }
  0x2d   :  { %2048 = vmatpush3.bf16.msra.mxu0 %v2174_v46  ;;  %v2221_v33 = vld [vmem:[%s2843_s0 + $0x1c4] ss:$20 sps:$4 sm:$0xff]  }
  0x2e   :  { %2049 = vmatprep.subr.bf16.mxu0 %v2193_v55  ;;  %v2238_v46 = vld [vmem:[%s2843_s0 + $0x1f0] ss:$20 sps:$4 sm:$0xff]  }
  0x2f   :  { %1918 = vmatpush3.bf16.msra.mxu1 %v2135_v35  ;;  %v2224_v35 = vld [vmem:[%s2843_s0 + $0x1c0] ss:$20 sps:$4 sm:$0xff]  }
  0x30   :  { %1919 = vmatprep.subr.bf16.mxu1 %v2142_v37  ;;  %v2226_v37 = vld [vmem:[%s2843_s0 + $0x1ec] ss:$20 sps:$4 sm:$0xff]  }
  0x31   :  { %2050 = vmatpush3.bf16.msra.mxu0 %v2193_v55 }
  0x32   :  { %893 = vmatmul.mubr.bf16.gmra.mrb[8].mxu0 %v2140_v36  ;;  %989 = vmatmul.mubr.bf16.gmra.mrb[8].mxu1 %v2141_v38  ;;  %v2225_v36 = vld [vmem:[%s2843_s0 + $0x128] ss:$20 sps:$4 sm:$0xff]   ;;  %v2228_v38 = vld [vmem:[%s2843_s0 + $0x150] ss:$20 sps:$4 sm:$0xff]  }
  0x33   :  { %1920 = vmatpush3.bf16.msra.mxu1 %v2143_v40  ;;  %900 = vmatprep.mubr.bf16.mxu0 %v2146_v41  ;;  %v2230_v40 = vld [vmem:[%s2843_s0 + $0x178] ss:$20 sps:$4 sm:$0xff]   ;;  %v2231_v41 = vld [vmem:[%s2843_s0 + $0x214] ss:$20 sps:$4 sm:$0xff]  }
  0x34   :  { %1921 = vmatprep.subr.bf16.mxu1 %v2144_v42  ;;  %996 = vmatprep.mubr.bf16.mxu1 %v1592_v43  ;;  %v2233_v42 = vld [vmem:[%s2843_s0 + $0x1a0] ss:$20 sps:$4 sm:$0xff]   ;;  %v2234_v43 = vld [vmem:[%s2843_s0 + $0x210] ss:$20 sps:$4 sm:$0xff]  }
  0x37   :  { %1922 = vmatpush3.bf16.msra.mxu1 %v2145_v44  ;;  %v2235_v44 = vld [vmem:[%s2843_s0 + $0x1c8] ss:$20 sps:$4 sm:$0xff]  }
  0x38   :  { %1923 = vmatprep.subr.bf16.mxu1 %v2151_v45  ;;  %v2236_v45 = vld [vmem:[%s2843_s0 + $0x23c] ss:$20 sps:$4 sm:$0xff]  }
  0x3a   :  { %901 = vmatmul.mubr.bf16.gmra.mrb[12].mxu0 %v2149_v47  ;;  %997 = vmatmul.mubr.bf16.gmra.mrb[12].mxu1 %v1591_v48  ;;  %v106_v47 = vld [vmem:[%s2843_s0 + $0x260] sm:$0x11]  ;;  %v2239_v48 = vld [vmem:[%s2843_s0 + $0x238] ss:$20 sps:$4 sm:$0xff]  }
  0x3b   :  { %1924 = vmatpush3.bf16.msra.mxu1 %v2152_v49  ;;  %908 = vmatprep.mubr.bf16.mxu0 %v2156_v51  ;;  %v2240_v49 = vld [vmem:[%s2843_s0 + $0x218] ss:$20 sps:$4 sm:$0xff]   ;;  %v2242_v51 = vld [vmem:[%s2843_s0 + $0x240] ss:$20 sps:$4 sm:$0xff]  }
  0x3c   :  { %1925 = vmatprep.subr.bf16.mxu1 %v2154_v50  ;;  %1036 = vmatprep.mubr.bf16.mxu1 %v2160_v52  ;;  %v1594_v50 = vcombine.high %v106_v47, %v106_v47  ;;  %v1593_v52 = vcombine.low %v106_v47, %v106_v47 }
  0x3f   :  { %1926 = vmatpush3.bf16.msra.mxu1 %v2155_v53  ;;  %v2244_v53 = vld [vmem:[%s2843_s0 + $0x268] ss:$0 sps:$4 sm:$0x11]  }
  0x42   :  { %909 = vmatmul.mubr.bf16.gmra.mrb[16].mxu0 %v2161_v56  ;;  %1037 = vmatmul.mubr.bf16.vlgmr.msra.gmra.mrb[16].mxu1 %v2158_v54 }
  0x43   :  { %916 = vmatprep.mubr.bf16.mxu0 %v2162_v57  ;;  %1044 = vmatprep.mubr.bf16.mxu1 %v2164_v58 }
  0x4a   :  { %917 = vmatmul.mubr.bf16.gmra.mrb[20].mxu0 %v2166_v59  ;;  %1045 = vmatmul.mubr.bf16.gmra.mrb[20].mxu1 %v2167_v60 }
  0x4b   :  { %924 = vmatprep.mubr.bf16.mxu0 %v2168_v61  ;;  %1052 = vmatprep.mubr.bf16.mxu1 %v2170_v62 }
  0x52   :  { %925 = vmatmul.mubr.bf16.gmra.mrb[24].mxu0 %v2172_v63  ;;  %1053 = vmatmul.mubr.bf16.gmra.mrb[24].mxu1 %v2173_v0 }
  0x53   :  { %932 = vmatprep.mubr.bf16.mxu0 %v2175_v1  ;;  %1060 = vmatprep.mubr.bf16.mxu1 %v2177_v2 }
  0x5a   :  { %933 = vmatmul.mubr.bf16.gmra.mrb[28].mxu0 %v2179_v3  ;;  %1061 = vmatmul.mubr.bf16.gmra.mrb[28].mxu1 %v2180_v4 }
  0x5b   :  { %940 = vmatprep.mubr.bf16.mxu0 %v2181_v5  ;;  %1068 = vmatprep.mubr.bf16.mxu1 %v2183_v6 }
  0x62   :  { %941 = vmatmul.mubr.bf16.gmra.mrb[32].mxu0 %v2185_v7  ;;  %1069 = vmatmul.mubr.bf16.gmra.mrb[32].mxu1 %v2186_v8 }
  0x63   :  { %948 = vmatprep.mubr.bf16.mxu0 %v2187_v9  ;;  %1076 = vmatprep.mubr.bf16.mxu1 %v2189_v10 }
  0x6a   :  { %949 = vmatmul.mubr.bf16.gmra.mrb[36].mxu0 %v2191_v11  ;;  %1077 = vmatmul.mubr.bf16.gmra.mrb[36].mxu1 %v2192_v12 }
  0x6b   :  { %956 = vmatprep.mubr.bf16.mxu0 %v2194_v13  ;;  %1084 = vmatprep.mubr.bf16.mxu1 %v2196_v14 }
  0x72   :  { %957 = vmatmul.mubr.bf16.gmra.mrb[40].mxu0 %v2198_v15  ;;  %1085 = vmatmul.mubr.bf16.gmra.mrb[40].mxu1 %v2199_v16 }
  0x73   :  { %964 = vmatprep.mubr.bf16.mxu0 %v2200_v17  ;;  %1092 = vmatprep.mubr.bf16.mxu1 %v2202_v18 }
  0x7a   :  { %965 = vmatmul.mubr.bf16.gmra.mrb[44].mxu0 %v2204_v19  ;;  %1093 = vmatmul.mubr.bf16.gmra.mrb[44].mxu1 %v2205_v20 }
  0x7b   :  { %1100 = vmatprep.mubr.bf16.mxu1 %v2206_v21  ;;  %2051 = vmatprep.mubr.msk.bf16.mxu0 %vm795_vm0, %v2208_v22 }
  0x82   :  { %1101 = vmatmul.mubr.bf16.gmra.mrb[48].mxu1 %v2209_v23  ;;  %2052 = vmatmul.mubr.msk.bf16.vlgmr.msra.gmra.mrb[48].mxu0 %vm795_vm0, %v2210_v24 }
  0x83   :  { %1108 = vmatprep.mubr.bf16.mxu1 %v2211_v25  ;;  %2055 = vmatprep.mubr.msk.bf16.mxu0 %vm795_vm0, %v2213_v26 }
  0x8a   :  { %1109 = vmatmul.mubr.bf16.gmra.mrb[52].mxu1 %v2214_v27  ;;  %2056 = vmatmul.mubr.msk.bf16.gmra.mrb[52].mxu0 %vm795_vm0, %v2215_v28 }
  0x8b   :  { %1116 = vmatprep.mubr.bf16.mxu1 %v2216_v29  ;;  %2059 = vmatprep.mubr.msk.bf16.mxu0 %vm795_vm0, %v2218_v30 }
  0x92   :  { %1117 = vmatmul.mubr.bf16.gmra.mrb[56].mxu1 %v2219_v31  ;;  %2060 = vmatmul.mubr.msk.bf16.gmra.mrb[56].mxu0 %vm795_vm0, %v2220_v32 }
  0x93   :  { %1124 = vmatprep.mubr.bf16.mxu1 %v2221_v33  ;;  %2063 = vmatprep.mubr.msk.bf16.mxu0 %vm795_vm0, %v2223_v34 }
  0x9a   :  { %1125 = vmatmul.mubr.bf16.gmra.mrb[60].mxu1 %v2224_v35  ;;  %2064 = vmatmul.mubr.msk.bf16.gmra.mrb[60].mxu0 %vm795_vm0, %v2225_v36 }
  0x9b   :  { %1132 = vmatprep.mubr.bf16.mxu1 %v2226_v37  ;;  %2067 = vmatprep.mubr.msk.bf16.mxu0 %vm795_vm0, %v2228_v38  ;;  %v2640_v37 = vld [vmem:[%s2844_s2] ss:$0 sm:$0xff] }
  0xa2   :  { %1133 = vmatmul.mubr.bf16.gmra.mrb[64].mxu1 %v2229_v39  ;;  %2068 = vmatmul.mubr.msk.bf16.gmra.mrb[64].mxu0 %vm795_vm0, %v2230_v40 }
  0xa3   :  { %1140 = vmatprep.mubr.bf16.mxu1 %v2231_v41  ;;  %2071 = vmatprep.mubr.msk.bf16.mxu0 %vm795_vm0, %v2233_v42 }
  0xaa   :  { %1141 = vmatmul.mubr.bf16.gmra.mrb[68].mxu1 %v2234_v43  ;;  %2072 = vmatmul.mubr.msk.bf16.gmra.mrb[68].mxu0 %vm795_vm0, %v2235_v44 }
  0xab   :  { %1148 = vmatprep.mubr.bf16.mxu1 %v2236_v45  ;;  %2075 = vmatprep.mubr.msk.bf16.mxu0 %vm795_vm0, %v2238_v46 }
  0xb2   :  { %1149 = vmatmul.mubr.bf16.gmra.mrb[72].mxu1 %v2239_v48  ;;  %2076 = vmatmul.mubr.msk.bf16.gmra.mrb[72].mxu0 %vm795_vm0, %v2240_v49 }
  0xb3   :  { %1156 = vmatprep.mubr.bf16.mxu1 %v1594_v50  ;;  %2079 = vmatprep.mubr.msk.bf16.mxu0 %vm795_vm0, %v2242_v51 }
  0xba   :  { %1157 = vmatmul.mubr.bf16.gmra.mrb[76].mxu1 %v1593_v52  ;;  %2080 = vmatmul.mubr.msk.bf16.gmra.mrb[76].mxu0 %vm795_vm0, %v2244_v53 }
  0xf5   :  { %v1815_v54 = vpop.f32.mrb[0].mxu0  ;;  %v1887_v55 = vpop.f32.mrb[0].mxu1 }
  0xf6   :  { %v1816_v56 = vpop.f32.mrb[1].mxu0  ;;  %v1888_v57 = vpop.f32.mrb[1].mxu1 }
  0xf7   :  { %v1817_v58 = vadd.f32 %v1816_v56, %v1815_v54  ;;  %v2623_v59 = vadd.f32 %v1888_v57, %v1887_v55  ;;  %v1818_v60 = vpop.f32.mrb[2].mxu0  ;;  %v1890_v61 = vpop.f32.mrb[2].mxu1 }
  0xf8   :  { %v1819_v62 = vpop.f32.mrb[3].mxu0  ;;  %v1891_v63 = vpop.f32.mrb[3].mxu1 }
  0xf9   :  { %v1820_v0 = vadd.f32 %v1819_v62, %v1818_v60  ;;  %v2625_v1 = vadd.f32 %v1891_v63, %v1890_v61  ;;  %v879_v42 = vadd.f32 %v1817_v58, %v2640_v37 }
  0xfb   :  { %v882_v49 = vadd.f32 %v1820_v0, %v2640_v37 }
  0xfd   :  { %v1821_v2 = vpop.f32.mrb[4].mxu0  ;;  %v1893_v3 = vpop.f32.mrb[4].mxu1 }
  0xfe   :  { %v1822_v4 = vpop.f32.mrb[5].mxu0  ;;  %v1894_v5 = vpop.f32.mrb[5].mxu1 }
  0xff   :  { %v1823_v6 = vadd.f32 %v1822_v4, %v1821_v2  ;;  %v2627_v7 = vadd.f32 %v1894_v5, %v1893_v3  ;;  %v1824_v8 = vpop.f32.mrb[6].mxu0  ;;  %v1896_v9 = vpop.f32.mrb[6].mxu1 }
 0x100   :  { %v1825_v10 = vpop.f32.mrb[7].mxu0  ;;  %v1897_v11 = vpop.f32.mrb[7].mxu1 }
 0x101   :  { %v1826_v12 = vadd.f32 %v1825_v10, %v1824_v8  ;;  %v2629_v13 = vadd.f32 %v1897_v11, %v1896_v9  ;;  %v887_v58 = vadd.f32 %v1823_v6, %v2640_v37 }
 0x103   :  { %v890_v3 = vadd.f32 %v1826_v12, %v2640_v37 }
 0x105   :  { %v1827_v14 = vpop.f32.mrb[8].mxu0  ;;  %v1899_v15 = vpop.f32.mrb[8].mxu1 }
 0x106   :  { %v1828_v16 = vpop.f32.mrb[9].mxu0  ;;  %v1900_v17 = vpop.f32.mrb[9].mxu1 }
 0x107   :  { %v1829_v18 = vadd.f32 %v1828_v16, %v1827_v14  ;;  %v2631_v19 = vadd.f32 %v1900_v17, %v1899_v15  ;;  %v1830_v20 = vpop.f32.mrb[10].mxu0  ;;  %v1902_v21 = vpop.f32.mrb[10].mxu1 }
 0x108   :  { %v1831_v22 = vpop.f32.mrb[11].mxu0  ;;  %v1903_v23 = vpop.f32.mrb[11].mxu1 }
 0x109   :  { %v1832_v24 = vadd.f32 %v1831_v22, %v1830_v20  ;;  %v2633_v25 = vadd.f32 %v1903_v23, %v1902_v21  ;;  %v895_v15 = vadd.f32 %v1829_v18, %v2640_v37 }
 0x10b   :  { %v898_v23 = vadd.f32 %v1832_v24, %v2640_v37 }
 0x10d   :  { %v1833_v26 = vpop.f32.mrb[12].mxu0  ;;  %v1905_v27 = vpop.f32.mrb[12].mxu1 }
 0x10e   :  { %v1834_v28 = vpop.f32.mrb[13].mxu0  ;;  %v1906_v29 = vpop.f32.mrb[13].mxu1 }
 0x10f   :  { %v1835_v30 = vadd.f32 %v1834_v28, %v1833_v26  ;;  %v2635_v31 = vadd.f32 %v1906_v29, %v1905_v27  ;;  %v1836_v32 = vpop.f32.mrb[14].mxu0  ;;  %v1908_v33 = vpop.f32.mrb[14].mxu1 }
 0x110   :  { %v1837_v34 = vpop.f32.mrb[15].mxu0  ;;  %v1909_v35 = vpop.f32.mrb[15].mxu1 }
 0x111   :  { %v1838_v36 = vadd.f32 %v1837_v34, %v1836_v32  ;;  %v903_v35 = vadd.f32 %v1835_v30, %v2640_v37 }
 0x115   :  { %v1839_v38 = vpop.f32.mrb[16].mxu0  ;;  %v1927_v39 = vpop.f32.mrb[16].mxu1 }
 0x116   :  { %v1840_v40 = vpop.f32.mrb[17].mxu0  ;;  %v1928_v41 = vpop.f32.mrb[17].mxu1 }
 0x117   :  { %v2643_v43 = vadd.f32 %v1840_v40, %v1839_v38  ;;  %v1929_v44 = vadd.f32 %v1928_v41, %v1927_v39  ;;  %v1842_v45 = vpop.f32.mrb[18].mxu0  ;;  %v1930_v46 = vpop.f32.mrb[18].mxu1 }
 0x118   :  { %v1843_v47 = vpop.f32.mrb[19].mxu0  ;;  %v1931_v48 = vpop.f32.mrb[19].mxu1 }
 0x119   :  { %v2646_v50 = vadd.f32 %v1843_v47, %v1842_v45  ;;  %v1932_v51 = vadd.f32 %v1931_v48, %v1930_v46  ;;  %v2648_v52 = vadd.f32 %v1929_v44, %v879_v42  ;;  %v906_v44 = vadd.f32 %v1838_v36, %v2640_v37 }
 0x11b   :  { %v2650_v53 = vadd.f32 %v1932_v51, %v882_v49 }
 0x11d   :  { %v1845_v54 = vpop.f32.mrb[20].mxu0  ;;  %v1933_v55 = vpop.f32.mrb[20].mxu1 }
 0x11e   :  { %v1846_v56 = vpop.f32.mrb[21].mxu0  ;;  %v1934_v57 = vpop.f32.mrb[21].mxu1 }
 0x11f   :  { %v2653_v60 = vadd.f32 %v1846_v56, %v1845_v54  ;;  %v1935_v61 = vadd.f32 %v1934_v57, %v1933_v55  ;;  %v1848_v62 = vpop.f32.mrb[22].mxu0  ;;  %v1936_v63 = vpop.f32.mrb[22].mxu1  ;;  %v911_v55 = vadd.f32 %v2643_v43, %v2640_v37 }
 0x120   :  { %v1849_v2 = vpop.f32.mrb[23].mxu0  ;;  %v1937_v0 = vpop.f32.mrb[23].mxu1 }
 0x121   :  { %v2656_v4 = vadd.f32 %v1849_v2, %v1848_v62  ;;  %v1938_v5 = vadd.f32 %v1937_v0, %v1936_v63  ;;  %v2658_v8 = vadd.f32 %v1935_v61, %v887_v58  ;;  %v914_v63 = vadd.f32 %v2646_v50, %v2640_v37 }
 0x123   :  { %v2660_v9 = vadd.f32 %v1938_v5, %v890_v3 }
 0x125   :  { %v1851_v10 = vpop.f32.mrb[24].mxu0  ;;  %v1939_v11 = vpop.f32.mrb[24].mxu1 }
 0x126   :  { %v1852_v14 = vpop.f32.mrb[25].mxu0  ;;  %v1940_v6 = vpop.f32.mrb[25].mxu1 }
 0x127   :  { %v2663_v16 = vadd.f32 %v1852_v14, %v1851_v10  ;;  %v1941_v17 = vadd.f32 %v1940_v6, %v1939_v11  ;;  %v1854_v20 = vpop.f32.mrb[26].mxu0  ;;  %v1942_v21 = vpop.f32.mrb[26].mxu1  ;;  %v919_v6 = vadd.f32 %v2653_v60, %v2640_v37 }
 0x128   :  { %v1855_v22 = vpop.f32.mrb[27].mxu0  ;;  %v1943_v12 = vpop.f32.mrb[27].mxu1 }
 0x129   :  { %v2666_v26 = vadd.f32 %v1855_v22, %v1854_v20  ;;  %v1944_v27 = vadd.f32 %v1943_v12, %v1942_v21  ;;  %v2668_v28 = vadd.f32 %v1941_v17, %v895_v15  ;;  %v922_v12 = vadd.f32 %v2656_v4, %v2640_v37 }
 0x12b   :  { %v2670_v29 = vadd.f32 %v1944_v27, %v898_v23 }
 0x12d   :  { %v1857_v32 = vpop.f32.mrb[28].mxu0  ;;  %v1945_v33 = vpop.f32.mrb[28].mxu1 }
 0x12e   :  { %v1858_v34 = vpop.f32.mrb[29].mxu0  ;;  %v1946_v18 = vpop.f32.mrb[29].mxu1 }
 0x12f   :  { %v2673_v38 = vadd.f32 %v1858_v34, %v1857_v32  ;;  %v1947_v39 = vadd.f32 %v1946_v18, %v1945_v33  ;;  %v1860_v40 = vpop.f32.mrb[30].mxu0  ;;  %v1948_v41 = vpop.f32.mrb[30].mxu1 }
 0x130   :  { %v1861_v42 = vpop.f32.mrb[31].mxu0  ;;  %v1949_v24 = vpop.f32.mrb[31].mxu1 }
 0x131   :  { %v2676_v45 = vadd.f32 %v1861_v42, %v1860_v40  ;;  %v1950_v46 = vadd.f32 %v1949_v24, %v1948_v41  ;;  %v2678_v47 = vadd.f32 %v1947_v39, %v903_v35  ;;  %v927_v39 = vadd.f32 %v2663_v16, %v2640_v37 }
 0x133   :  { %v2680_v48 = vadd.f32 %v1950_v46, %v906_v44  ;;  %v930_v46 = vadd.f32 %v2666_v26, %v2640_v37 }
 0x135   :  { %v1863_v49 = vpop.f32.mrb[32].mxu0  ;;  %v1951_v51 = vpop.f32.mrb[32].mxu1 }
 0x136   :  { %v1864_v54 = vpop.f32.mrb[33].mxu0  ;;  %v1952_v30 = vpop.f32.mrb[33].mxu1 }
 0x137   :  { %v2684_v56 = vadd.f32 %v1864_v54, %v1863_v49  ;;  %v1953_v57 = vadd.f32 %v1952_v30, %v1951_v51  ;;  %v1866_v58 = vpop.f32.mrb[34].mxu0  ;;  %v1954_v61 = vpop.f32.mrb[34].mxu1 }
 0x138   :  { %v1867_v36 = vpop.f32.mrb[35].mxu0  ;;  %v1955_v62 = vpop.f32.mrb[35].mxu1 }
 0x139   :  { %v2688_v2 = vadd.f32 %v1867_v36, %v1866_v58  ;;  %v1956_v0 = vadd.f32 %v1955_v62, %v1954_v61  ;;  %v2690_v3 = vadd.f32 %v1953_v57, %v911_v55  ;;  %v935_v61 = vadd.f32 %v2673_v38, %v2640_v37 }
 0x13b   :  { %v2692_v5 = vadd.f32 %v1956_v0, %v914_v63 }
 0x13d   :  { %v1869_v10 = vpop.f32.mrb[36].mxu0  ;;  %v1957_v11 = vpop.f32.mrb[36].mxu1 }
 0x13e   :  { %v1870_v43 = vpop.f32.mrb[37].mxu0  ;;  %v1958_v14 = vpop.f32.mrb[37].mxu1 }
 0x13f   :  { %v2696_v15 = vadd.f32 %v1870_v43, %v1869_v10  ;;  %v1959_v17 = vadd.f32 %v1958_v14, %v1957_v11  ;;  %v1872_v20 = vpop.f32.mrb[38].mxu0  ;;  %v1960_v21 = vpop.f32.mrb[38].mxu1  ;;  %v938_v11 = vadd.f32 %v2676_v45, %v2640_v37 }
 0x140   :  { %v1873_v50 = vpop.f32.mrb[39].mxu0  ;;  %v1961_v22 = vpop.f32.mrb[39].mxu1 }
 0x141   :  { %v2700_v23 = vadd.f32 %v1873_v50, %v1872_v20  ;;  %v1962_v27 = vadd.f32 %v1961_v22, %v1960_v21  ;;  %v2702_v32 = vadd.f32 %v1959_v17, %v919_v6 }
 0x143   :  { %v2704_v33 = vadd.f32 %v1962_v27, %v922_v12  ;;  %v943_v12 = vadd.f32 %v2684_v56, %v2640_v37 }
 0x145   :  { %v1875_v34 = vpop.f32.mrb[40].mxu0  ;;  %v1963_v18 = vpop.f32.mrb[40].mxu1 }
 0x146   :  { %v1876_v60 = vpop.f32.mrb[41].mxu0  ;;  %v1964_v35 = vpop.f32.mrb[41].mxu1 }
 0x147   :  { %v2708_v40 = vadd.f32 %v1876_v60, %v1875_v34  ;;  %v1965_v41 = vadd.f32 %v1964_v35, %v1963_v18  ;;  %v1878_v42 = vpop.f32.mrb[42].mxu0  ;;  %v1966_v24 = vpop.f32.mrb[42].mxu1 }
 0x148   :  { %v1879_v4 = vpop.f32.mrb[43].mxu0  ;;  %v1967_v44 = vpop.f32.mrb[43].mxu1 }
 0x149   :  { %v2712_v49 = vadd.f32 %v1879_v4, %v1878_v42  ;;  %v1968_v51 = vadd.f32 %v1967_v44, %v1966_v24  ;;  %v2714_v54 = vadd.f32 %v1965_v41, %v927_v39  ;;  %v946_v41 = vadd.f32 %v2688_v2, %v2640_v37 }
 0x14b   :  { %v2716_v30 = vadd.f32 %v1968_v51, %v930_v46 }
 0x14d   :  { %v1881_v55 = vpop.f32.mrb[44].mxu0  ;;  %v1969_v57 = vpop.f32.mrb[44].mxu1 }
 0x14e   :  { %v1882_v16 = vpop.f32.mrb[45].mxu0  ;;  %v1970_v58 = vpop.f32.mrb[45].mxu1 }
 0x14f   :  { %v2720_v36 = vadd.f32 %v1882_v16, %v1881_v55  ;;  %v1971_v62 = vadd.f32 %v1970_v58, %v1969_v57  ;;  %v1884_v63 = vpop.f32.mrb[46].mxu0  ;;  %v1972_v0 = vpop.f32.mrb[46].mxu1  ;;  %v951_v58 = vadd.f32 %v2696_v15, %v2640_v37 }
 0x150   :  { %v1885_v26 = vpop.f32.mrb[47].mxu0  ;;  %v1973_v10 = vpop.f32.mrb[47].mxu1 }
 0x151   :  { %v2724_v43 = vadd.f32 %v1885_v26, %v1884_v63  ;;  %v1974_v14 = vadd.f32 %v1973_v10, %v1972_v0  ;;  %v2726_v6 = vadd.f32 %v1971_v62, %v935_v61 }
 0x153   :  { %v2728_v17 = vadd.f32 %v1974_v14, %v938_v11 }
 0x155   :  { %v1975_v20 = vpop.f32.mrb[48].mxu1  ;;  %v2053_v21 = vpop.f32.mrb[48].mxu0 }
 0x156   :  { %v1207_v38 = vadd.f32 %v2053_v21, %v2658_v8  ;;  %v1976_v50 = vpop.f32.mrb[49].mxu1  ;;  %v1198_v22 = vpop.f32.mrb[49].mxu0 }
 0x157   :  { %v1977_v27 = vadd.f32 %v1976_v50, %v1975_v20  ;;  %v1199_v34 = vadd.f32 %v1198_v22, %v2648_v52  ;;  %v1978_v45 = vpop.f32.mrb[50].mxu1  ;;  %v2054_v18 = vpop.f32.mrb[50].mxu0 }
 0x158   :  { %v1210_v60 = vadd.f32 %v2054_v18, %v2660_v9  ;;  %v1979_v35 = vpop.f32.mrb[51].mxu1  ;;  %v1201_v39 = vpop.f32.mrb[51].mxu0  ;;  %v1326_v4 = vmax.f32 %v1207_v38, 0.0  ;;  %v959_v18 = vadd.f32 %v2708_v40, %v2640_v37 }
 0x159   :  { %v1980_v42 = vadd.f32 %v1979_v35, %v1978_v45  ;;  %v1202_v8 = vadd.f32 %v1201_v39, %v2650_v53  ;;  %v2738_v24 = vadd.f32 %v1977_v27, %v943_v12  ;;  %v1324_v56 = vmax.f32 %v1199_v34, 0.0 }
 0x15a   :  { %v1327_v44 = vmax.f32 %v1210_v60, 0.0 }
 0x15b   :  { %v1325_v46 = vmax.f32 %v1202_v8, 0.0  ;;  %v2740_v51 = vadd.f32 %v1980_v42, %v946_v41 }
 0x15c   :  { %v1718_v52 = vpack.c.bf16 %v1327_v44, %v1326_v4 }
 0x15d   :  { %v1713_v55 = vpack.c.bf16 %v1325_v46, %v1324_v56  ;;  %v1981_v57 = vpop.f32.mrb[52].mxu1  ;;  %v2057_v9 = vpop.f32.mrb[52].mxu0 }
 0x15e   :  { %1785 = vst [vmem:[%s2845_s3 + $0x8] sm:$0xff] %v1718_v52   ;;  %v1223_v2 = vadd.f32 %v2057_v9, %v2678_v47  ;;  %v1982_v16 = vpop.f32.mrb[53].mxu1  ;;  %v1214_v53 = vpop.f32.mrb[53].mxu0  ;;  %v954_v47 = vadd.f32 %v2700_v23, %v2640_v37 }
 0x15f   :  { %1714 = vst [vmem:[%s2845_s3] sm:$0xff] %v1713_v55   ;;  %v1983_v61 = vadd.f32 %v1982_v16, %v1981_v57  ;;  %v1215_v62 = vadd.f32 %v1214_v53, %v2668_v28  ;;  %v1984_v63 = vpop.f32.mrb[54].mxu1  ;;  %v2058_v0 = vpop.f32.mrb[54].mxu0 }
 0x160   :  { %v1226_v26 = vadd.f32 %v2058_v0, %v2680_v48  ;;  %v1985_v10 = vpop.f32.mrb[55].mxu1  ;;  %v1217_v11 = vpop.f32.mrb[55].mxu0  ;;  %v1330_v21 = vmax.f32 %v1223_v2, 0.0 }
 0x161   :  { %v1986_v14 = vadd.f32 %v1985_v10, %v1984_v63  ;;  %v1218_v20 = vadd.f32 %v1217_v11, %v2670_v29  ;;  %v2756_v15 = vadd.f32 %v1983_v61, %v951_v58  ;;  %v1328_v50 = vmax.f32 %v1215_v62, 0.0 }
 0x162   :  { %v1331_v38 = vmax.f32 %v1226_v26, 0.0  ;;  %v967_v58 = vadd.f32 %v2720_v36, %v2640_v37 }
 0x163   :  { %v1329_v22 = vmax.f32 %v1218_v20, 0.0  ;;  %v2758_v12 = vadd.f32 %v1986_v14, %v954_v47 }
 0x164   :  { %v1728_v28 = vpack.c.bf16 %v1331_v38, %v1330_v21 }
 0x165   :  { %v1723_v27 = vpack.c.bf16 %v1329_v22, %v1328_v50  ;;  %v1987_v34 = vpop.f32.mrb[56].mxu1  ;;  %v2061_v48 = vpop.f32.mrb[56].mxu0 }
 0x166   :  { %1787 = vst [vmem:[%s2845_s3 + $0x18] sm:$0xff] %v1728_v28   ;;  %v1239_v23 = vadd.f32 %v2061_v48, %v2702_v32  ;;  %v1988_v45 = vpop.f32.mrb[57].mxu1  ;;  %v1230_v29 = vpop.f32.mrb[57].mxu0  ;;  %v962_v32 = vadd.f32 %v2712_v49, %v2640_v37 }
 0x167   :  { %1786 = vst [vmem:[%s2845_s3 + $0x10] sm:$0xff] %v1723_v27   ;;  %v1989_v60 = vadd.f32 %v1988_v45, %v1987_v34  ;;  %v1231_v35 = vadd.f32 %v1230_v29, %v2690_v3  ;;  %v1990_v39 = vpop.f32.mrb[58].mxu1  ;;  %v2062_v41 = vpop.f32.mrb[58].mxu0 }
 0x168   :  { %v1242_v42 = vadd.f32 %v2062_v41, %v2704_v33  ;;  %v1991_v8 = vpop.f32.mrb[59].mxu1  ;;  %v1233_v4 = vpop.f32.mrb[59].mxu0  ;;  %v1334_v46 = vmax.f32 %v1239_v23, 0.0 }
 0x169   :  { %v1992_v44 = vadd.f32 %v1991_v8, %v1990_v39  ;;  %v1234_v56 = vadd.f32 %v1233_v4, %v2692_v5  ;;  %v2774_v40 = vadd.f32 %v1989_v60, %v959_v18  ;;  %v1332_v55 = vmax.f32 %v1231_v35, 0.0 }
 0x16a   :  { %v1335_v52 = vmax.f32 %v1242_v42, 0.0 }
 0x16b   :  { %v1333_v57 = vmax.f32 %v1234_v56, 0.0  ;;  %v2776_v9 = vadd.f32 %v1992_v44, %v962_v32 }
 0x16c   :  { %v1738_v3 = vpack.c.bf16 %v1335_v52, %v1334_v46 }
 0x16d   :  { %v1733_v2 = vpack.c.bf16 %v1333_v57, %v1332_v55  ;;  %v1993_v16 = vpop.f32.mrb[60].mxu1  ;;  %v2065_v33 = vpop.f32.mrb[60].mxu0 }
 0x16e   :  { %1789 = vst [vmem:[%s2845_s3 + $0x28] sm:$0xff] %v1738_v3   ;;  %v1255_v49 = vadd.f32 %v2065_v33, %v2726_v6  ;;  %v1994_v53 = vpop.f32.mrb[61].mxu1  ;;  %v1246_v5 = vpop.f32.mrb[61].mxu0  ;;  %v970_v6 = vadd.f32 %v2724_v43, %v2640_v37 }
 0x16f   :  { %1788 = vst [vmem:[%s2845_s3 + $0x20] sm:$0xff] %v1733_v2   ;;  %v1995_v61 = vadd.f32 %v1994_v53, %v1993_v16  ;;  %v1247_v62 = vadd.f32 %v1246_v5, %v2714_v54  ;;  %v1996_v63 = vpop.f32.mrb[62].mxu1  ;;  %v2066_v0 = vpop.f32.mrb[62].mxu0 }
 0x170   :  { %v1258_v26 = vadd.f32 %v2066_v0, %v2728_v17  ;;  %v1997_v10 = vpop.f32.mrb[63].mxu1  ;;  %v1249_v11 = vpop.f32.mrb[63].mxu0  ;;  %v1338_v20 = vmax.f32 %v1255_v49, 0.0 }
 0x171   :  { %v1998_v47 = vadd.f32 %v1997_v10, %v1996_v63  ;;  %v1250_v14 = vadd.f32 %v1249_v11, %v2716_v30  ;;  %v1127_v36 = vadd.f32 %v1995_v61, %v967_v58  ;;  %v1336_v38 = vmax.f32 %v1247_v62, 0.0 }
 0x172   :  { %v1339_v21 = vmax.f32 %v1258_v26, 0.0  ;;  %v975_v30 = vadd.f32 %v2623_v59, %v2640_v37  ;;  %v986_v58 = vadd.f32 %v2629_v13, %v2640_v37 }
 0x173   :  { %v1337_v50 = vmax.f32 %v1250_v14, 0.0  ;;  %v1130_v22 = vadd.f32 %v1998_v47, %v970_v6 }
 0x174   :  { %v1748_v28 = vpack.c.bf16 %v1339_v21, %v1338_v20 }
 0x175   :  { %v1743_v54 = vpack.c.bf16 %v1337_v50, %v1336_v38  ;;  %v1999_v27 = vpop.f32.mrb[64].mxu1  ;;  %v2069_v34 = vpop.f32.mrb[64].mxu0 }
 0x176   :  { %1791 = vst [vmem:[%s2845_s3 + $0x38] sm:$0xff] %v1748_v28   ;;  %v1271_v17 = vadd.f32 %v2069_v34, %v2756_v15  ;;  %v2000_v43 = vpop.f32.mrb[65].mxu1  ;;  %v1262_v48 = vpop.f32.mrb[65].mxu0  ;;  %v978_v15 = vadd.f32 %v2625_v1, %v2640_v37  ;;  %v994_v34 = vadd.f32 %v2633_v25, %v2640_v37  ;;  %v999_v25 = vadd.f32 %v2635_v31, %v2640_v37 }
 0x177   :  { %1790 = vst [vmem:[%s2845_s3 + $0x30] sm:$0xff] %v1743_v54   ;;  %v2001_v23 = vadd.f32 %v2000_v43, %v1999_v27  ;;  %v1263_v45 = vadd.f32 %v1262_v48, %v2738_v24  ;;  %v2002_v29 = vpop.f32.mrb[66].mxu1  ;;  %v2070_v18 = vpop.f32.mrb[66].mxu0 }
 0x178   :  { %v1274_v60 = vadd.f32 %v2070_v18, %v2758_v12  ;;  %v2003_v35 = vpop.f32.mrb[67].mxu1  ;;  %v1265_v39 = vpop.f32.mrb[67].mxu0  ;;  %v1342_v8 = vmax.f32 %v1271_v17, 0.0 }
 0x179   :  { %v2004_v41 = vadd.f32 %v2003_v35, %v2002_v29  ;;  %v1266_v42 = vadd.f32 %v1265_v39, %v2740_v51  ;;  %v1135_v59 = vadd.f32 %v2001_v23, %v975_v30  ;;  %v1340_v32 = vmax.f32 %v1263_v45, 0.0 }
 0x17a   :  { %v1343_v4 = vmax.f32 %v1274_v60, 0.0  ;;  %v983_v51 = vadd.f32 %v2627_v7, %v2640_v37 }
 0x17b   :  { %v1341_v44 = vmax.f32 %v1266_v42, 0.0  ;;  %v1138_v56 = vadd.f32 %v2004_v41, %v978_v15 }
 0x17c   :  { %v1758_v46 = vpack.c.bf16 %v1343_v4, %v1342_v8 }
 0x17d   :  { %v1753_v24 = vpack.c.bf16 %v1341_v44, %v1340_v32  ;;  %v2005_v52 = vpop.f32.mrb[68].mxu1  ;;  %v2073_v55 = vpop.f32.mrb[68].mxu0 }
 0x17e   :  { %1793 = vst [vmem:[%s2845_s3 + $0x48] sm:$0xff] %v1758_v46   ;;  %v1287_v12 = vadd.f32 %v2073_v55, %v1127_v36  ;;  %v2006_v57 = vpop.f32.mrb[69].mxu1  ;;  %v1278_v1 = vpop.f32.mrb[69].mxu0 }
 0x17f   :  { %1792 = vst [vmem:[%s2845_s3 + $0x40] sm:$0xff] %v1753_v24   ;;  %v2007_v3 = vadd.f32 %v2006_v57, %v2005_v52  ;;  %v1279_v2 = vadd.f32 %v1278_v1, %v2774_v40  ;;  %v2008_v16 = vpop.f32.mrb[70].mxu1  ;;  %v2074_v33 = vpop.f32.mrb[70].mxu0 }
 0x180   :  { %v1290_v49 = vadd.f32 %v2074_v33, %v1130_v22  ;;  %v2009_v53 = vpop.f32.mrb[71].mxu1  ;;  %v1281_v5 = vpop.f32.mrb[71].mxu0  ;;  %v1346_v7 = vmax.f32 %v1287_v12, 0.0 }
 0x181   :  { %v2010_v61 = vadd.f32 %v2009_v53, %v2008_v16  ;;  %v1282_v62 = vadd.f32 %v1281_v5, %v2776_v9  ;;  %v1143_v63 = vadd.f32 %v2007_v3, %v983_v51  ;;  %v1344_v26 = vmax.f32 %v1279_v2, 0.0 }
 0x182   :  { %v1347_v0 = vmax.f32 %v1290_v49, 0.0  ;;  %v991_v9 = vadd.f32 %v2631_v19, %v2640_v37 }
 0x183   :  { %v1345_v10 = vmax.f32 %v1282_v62, 0.0  ;;  %v1146_v11 = vadd.f32 %v2010_v61, %v986_v58 }
 0x184   :  { %v1768_v6 = vpack.c.bf16 %v1347_v0, %v1346_v7 }
 0x185   :  { %v1763_v47 = vpack.c.bf16 %v1345_v10, %v1344_v26  ;;  %v2011_v40 = vpop.f32.mrb[72].mxu1  ;;  %v2077_v14 = vpop.f32.mrb[72].mxu0 }
 0x186   :  { %1795 = vst [vmem:[%s2845_s3 + $0x58] sm:$0xff] %v1768_v6   ;;  %v1303_v36 = vadd.f32 %v2077_v14, %v1143_v63  ;;  %v2012_v20 = vpop.f32.mrb[73].mxu1  ;;  %v1294_v13 = vpop.f32.mrb[73].mxu0 }
 0x187   :  { %1794 = vst [vmem:[%s2845_s3 + $0x50] sm:$0xff] %v1763_v47   ;;  %v2013_v21 = vadd.f32 %v2012_v20, %v2011_v40  ;;  %v1295_v38 = vadd.f32 %v1294_v13, %v1135_v59  ;;  %v2014_v50 = vpop.f32.mrb[74].mxu1  ;;  %v2078_v22 = vpop.f32.mrb[74].mxu0 }
 0x188   :  { %v1306_v28 = vadd.f32 %v2078_v22, %v1146_v11  ;;  %v2015_v54 = vpop.f32.mrb[75].mxu1  ;;  %v1297_v27 = vpop.f32.mrb[75].mxu0  ;;  %v1350_v30 = vmax.f32 %v1303_v36, 0.0 }
 0x189   :  { %v2016_v17 = vadd.f32 %v2015_v54, %v2014_v50  ;;  %v1298_v43 = vadd.f32 %v1297_v27, %v1138_v56  ;;  %v1151_v48 = vadd.f32 %v2013_v21, %v991_v9  ;;  %v1348_v19 = vmax.f32 %v1295_v38, 0.0 }
 0x18a   :  { %v1351_v23 = vmax.f32 %v1306_v28, 0.0 }
 0x18b   :  { %v1349_v45 = vmax.f32 %v1298_v43, 0.0  ;;  %v1154_v29 = vadd.f32 %v2016_v17, %v994_v34 }
 0x18c   :  { %v1778_v18 = vpack.c.bf16 %v1351_v23, %v1350_v30 }
 0x18d   :  { %v1773_v60 = vpack.c.bf16 %v1349_v45, %v1348_v19  ;;  %v2017_v35 = vpop.f32.mrb[76].mxu1  ;;  %v2081_v39 = vpop.f32.mrb[76].mxu0 }
 0x18e   :  { %1797 = vst [vmem:[%s2845_s3 + $0x68] sm:$0xff] %v1778_v18   ;;  %v2018_v15 = vpop.f32.mrb[77].mxu1  ;;  %v1310_v41 = vpop.f32.mrb[77].mxu0 }
 0x18f   :  { %1796 = vst [vmem:[%s2845_s3 + $0x60] sm:$0xff] %v1773_v60   ;;  %v2019_v42 = vadd.f32 %v2018_v15, %v2017_v35  ;;  %v1311_v59 = vadd.f32 %v1310_v41, %v1151_v48  ;;  %v2020_v8 = vpop.f32.mrb[78].mxu1  ;;  %v2082_v4 = vpop.f32.mrb[78].mxu0 }
 0x190   :  { %v2021_v32 = vpop.f32.mrb[79].mxu1  ;;  %v1313_v44 = vpop.f32.mrb[79].mxu0 }
 0x191   :  { %v1159_v56 = vadd.f32 %v2019_v42, %v999_v25  ;;  %v1314_v46 = vadd.f32 %v1313_v44, %v1154_v29  ;;  %v1352_v52 = vmax.f32 %v1311_v59, 0.0 }
 0x193   :  { %v1319_v24 = vadd.f32 %v2081_v39, %v1159_v56  ;;  %v1353_v55 = vmax.f32 %v1314_v46, 0.0 }
 0x195   :  { %v1354_v12 = vmax.f32 %v1319_v24, 0.0  ;;  %v1783_v57 = vpack.c.bf16 %v1353_v55, %v1352_v52 }
 0x197   :  { %v1709_v1 = vpack.c.bf16 %v1354_v12, %v1354_v12  ;;  %1798 = vst [vmem:[%s2845_s3 + $0x70] sm:$0xff] %v1783_v57  }
 0x199   :  { %1510 = vst [vmem:[%s2845_s3 + $0x78] sm:$0x1] %v1709_v1 }

// kernel: dqn_forward.13
= control target key start
LH: loop header
LB: loop body
LE: loop exit
PB: predicated region body
PF: predicated region fallthrough
CT: control target
= control target key end

     0   :  { %v1467_v0 = vmov 0   ;;  %vm577_vm0 = vcmask 261120   ;;  %s2007_s1 = inlined_call_operand.vmem [shape: bf16[288,128], index: 1, kind: input, shape index: {}]   ;;  %s2008_s0 = inlined_call_operand.vmem [shape: bf16[338,288], index: 0, kind: input, shape index: {}]   ;;  %s2009_s2 = inlined_call_operand.vmem [shape: f32[1,128], index: 2, kind: input, shape index: {}]   ;;  %s2010_s3 = inlined_call_operand.vmem [shape: f32[338,128], index: 3, kind: output, shape index: {}]  }
   0x1   :  { %644 = vmatprep.subr.bf16.mxu0 %v1467_v0  ;;  %1329 = vmatprep.subr.bf16.mxu1 %v1467_v0  ;;  %v1362_v1 = vld [vmem:[%s2007_s1] sm:$0xff]   ;;  %v1363_v2 = vld [vmem:[%s2007_s1 + $0x8] sm:$0xff]   ;;  %v1364_v3 = vld [vmem:[%s2007_s1 + $0x10] sm:$0xff]  }
   0x2   :  { %645 = vmatpush1.bf16.msra.mxu0 %v1362_v1  ;;  %1345 = vmatpush1.bf16.msra.mxu1 %v1362_v1  ;;  %v1365_v4 = vld [vmem:[%s2007_s1 + $0x18] sm:$0xff]   ;;  %v1366_v5 = vld [vmem:[%s2007_s1 + $0x20] sm:$0xff]   ;;  %v1367_v7 = vld [vmem:[%s2007_s1 + $0x28] sm:$0xff]  }
   0x3   :  { %646 = vmatprep.subr.bf16.mxu0 %v1467_v0  ;;  %1330 = vmatprep.subr.bf16.mxu1 %v1467_v0  ;;  %v1380_v6 = vld [vmem:[%s2008_s0 + $0x4] ss:$12 sps:$4 sm:$0xff]   ;;  %v1383_v8 = vld [vmem:[%s2008_s0 + $0x19c] ss:$12 sps:$4 sm:$0xff]   ;;  %v1378_v20 = vld [vmem:[%s2008_s0] ss:$12 sps:$4 sm:$0xff]  }
   0x4   :  { %676 = vmatprep.mubr.bf16.mxu0 %v1380_v6  ;;  %812 = vmatprep.mubr.bf16.mxu1 %v1383_v8  ;;  %v1368_v9 = vld [vmem:[%s2007_s1 + $0x30] sm:$0xff]   ;;  %v1369_v10 = vld [vmem:[%s2007_s1 + $0x38] sm:$0xff]   ;;  %v1370_v11 = vld [vmem:[%s2007_s1 + $0x40] sm:$0xff]  }
   0x5   :  { %v1371_v12 = vld [vmem:[%s2007_s1 + $0x48] sm:$0xff]   ;;  %v1372_v13 = vld [vmem:[%s2007_s1 + $0x50] sm:$0xff]   ;;  %v1373_v14 = vld [vmem:[%s2007_s1 + $0x58] sm:$0xff]  }
   0x6   :  { %647 = vmatpush1.bf16.msra.mxu0 %v1363_v2  ;;  %1346 = vmatpush1.bf16.msra.mxu1 %v1363_v2  ;;  %v1374_v15 = vld [vmem:[%s2007_s1 + $0x60] sm:$0xff]   ;;  %v1375_v16 = vld [vmem:[%s2007_s1 + $0x68] sm:$0xff]   ;;  %v1376_v17 = vld [vmem:[%s2007_s1 + $0x70] sm:$0xff]  }
   0x7   :  { %648 = vmatprep.subr.bf16.mxu0 %v1467_v0  ;;  %1331 = vmatprep.subr.bf16.mxu1 %v1467_v0  ;;  %v1377_v18 = vld [vmem:[%s2007_s1 + $0x78] sm:$0xff]   ;;  %v1390_v19 = vld [vmem:[%s2007_s1 + $0x80] sm:$0xff]   ;;  %v1403_v24 = vld [vmem:[%s2007_s1 + $0x88] sm:$0xff]  }
   0x8   :  { %v1381_v21 = vld [vmem:[%s2008_s0 + $0x198] ss:$12 sps:$4 sm:$0xff]   ;;  %v1384_v22 = vld [vmem:[%s2008_s0 + $0x1c] ss:$12 sps:$4 sm:$0xff]   ;;  %v1386_v23 = vld [vmem:[%s2008_s0 + $0x1b4] ss:$12 sps:$4 sm:$0xff]  }
   0x9   :  { %v1388_v25 = vld [vmem:[%s2008_s0 + $0x18] ss:$12 sps:$4 sm:$0xff]   ;;  %v1389_v26 = vld [vmem:[%s2008_s0 + $0x1b0] ss:$12 sps:$4 sm:$0xff]   ;;  %v1391_v27 = vld [vmem:[%s2008_s0 + $0x34] ss:$12 sps:$4 sm:$0xff]  }
   0xa   :  { %649 = vmatpush1.bf16.msra.mxu0 %v1364_v3  ;;  %1347 = vmatpush1.bf16.msra.mxu1 %v1364_v3  ;;  %v1393_v28 = vld [vmem:[%s2008_s0 + $0x1cc] ss:$12 sps:$4 sm:$0xff]   ;;  %v1395_v29 = vld [vmem:[%s2008_s0 + $0x30] ss:$12 sps:$4 sm:$0xff]   ;;  %v1396_v30 = vld [vmem:[%s2008_s0 + $0x1c8] ss:$12 sps:$4 sm:$0xff]  }
   0xb   :  { %650 = vmatprep.subr.bf16.mxu0 %v1467_v0  ;;  %1332 = vmatprep.subr.bf16.mxu1 %v1467_v0  ;;  %v1397_v31 = vld [vmem:[%s2008_s0 + $0x4c] ss:$12 sps:$4 sm:$0xff]   ;;  %v1399_v32 = vld [vmem:[%s2008_s0 + $0x1e4] ss:$12 sps:$4 sm:$0xff]   ;;  %v1401_v34 = vld [vmem:[%s2008_s0 + $0x48] ss:$12 sps:$4 sm:$0xff]  }
   0xc   :  { %v99_v33 = vld [vmem:[%s2008_s0 + $0x1f8] sm:$0x11]  ;;  %v1402_v35 = vld [vmem:[%s2008_s0 + $0x1e0] ss:$12 sps:$4 sm:$0xff]   ;;  %v1404_v36 = vld [vmem:[%s2008_s0 + $0x64] ss:$12 sps:$4 sm:$0xff]  }
   0xd   :  { %v1215_v37 = vcombine.high %v99_v33, %v99_v33  ;;  %v1407_v38 = vld [vmem:[%s2008_s0 + $0x60] ss:$12 sps:$4 sm:$0xff]   ;;  %v1214_v39 = vcombine.low %v99_v33, %v99_v33  ;;  %v1409_v40 = vld [vmem:[%s2008_s0 + $0x7c] ss:$12 sps:$4 sm:$0xff]   ;;  %v1412_v42 = vld [vmem:[%s2008_s0 + $0x78] ss:$12 sps:$4 sm:$0xff]  }
   0xe   :  { %651 = vmatpush1.bf16.msra.mxu0 %v1365_v4  ;;  %1348 = vmatpush1.bf16.msra.mxu1 %v1365_v4  ;;  %v1411_v41 = vld [vmem:[%s2008_s0 + $0x8] ss:$12 sps:$4 sm:$0xff]   ;;  %v1413_v43 = vld [vmem:[%s2008_s0 + $0x20] ss:$12 sps:$4 sm:$0xff]   ;;  %v1416_v45 = vld [vmem:[%s2008_s0 + $0x38] ss:$12 sps:$4 sm:$0xff]  }
   0xf   :  { %652 = vmatprep.subr.bf16.mxu0 %v1467_v0  ;;  %1333 = vmatprep.subr.bf16.mxu1 %v1467_v0  ;;  %v1414_v44 = vld [vmem:[%s2008_s0 + $0x94] ss:$12 sps:$4 sm:$0xff]   ;;  %v1417_v46 = vld [vmem:[%s2008_s0 + $0x90] ss:$12 sps:$4 sm:$0xff]   ;;  %v1419_v48 = vld [vmem:[%s2008_s0 + $0xac] ss:$12 sps:$4 sm:$0xff]  }
  0x10   :  { %v1418_v47 = vld [vmem:[%s2008_s0 + $0x50] ss:$12 sps:$4 sm:$0xff]   ;;  %v1421_v49 = vld [vmem:[%s2008_s0 + $0x68] ss:$12 sps:$4 sm:$0xff]   ;;  %v1423_v51 = vld [vmem:[%s2008_s0 + $0x80] ss:$12 sps:$4 sm:$0xff]  }
  0x11   :  { %v1422_v50 = vld [vmem:[%s2008_s0 + $0xa8] ss:$12 sps:$4 sm:$0xff]   ;;  %v1424_v52 = vld [vmem:[%s2008_s0 + $0xc4] ss:$12 sps:$4 sm:$0xff]   ;;  %v1427_v54 = vld [vmem:[%s2008_s0 + $0xc0] ss:$12 sps:$4 sm:$0xff]  }
  0x12   :  { %653 = vmatpush1.bf16.msra.mxu0 %v1366_v5  ;;  %1349 = vmatpush1.bf16.msra.mxu1 %v1366_v5  ;;  %v1426_v53 = vld [vmem:[%s2008_s0 + $0x98] ss:$12 sps:$4 sm:$0xff]   ;;  %v1428_v55 = vld [vmem:[%s2008_s0 + $0xb0] ss:$12 sps:$4 sm:$0xff]   ;;  %v1431_v57 = vld [vmem:[%s2008_s0 + $0xc8] ss:$12 sps:$4 sm:$0xff]  }
  0x13   :  { %654 = vmatprep.subr.bf16.mxu0 %v1467_v0  ;;  %1334 = vmatprep.subr.bf16.mxu1 %v1467_v0  ;;  %v1429_v56 = vld [vmem:[%s2008_s0 + $0xdc] ss:$12 sps:$4 sm:$0xff]   ;;  %v1432_v58 = vld [vmem:[%s2008_s0 + $0xd8] ss:$12 sps:$4 sm:$0xff]   ;;  %v1433_v59 = vld [vmem:[%s2008_s0 + $0xe0] ss:$12 sps:$4 sm:$0xff]  }
  0x14   :  { %v1434_v60 = vld [vmem:[%s2008_s0 + $0xf4] ss:$12 sps:$4 sm:$0xff]   ;;  %v1436_v61 = vld [vmem:[%s2008_s0 + $0xf8] ss:$12 sps:$4 sm:$0xff]   ;;  %v1437_v62 = vld [vmem:[%s2008_s0 + $0xf0] ss:$12 sps:$4 sm:$0xff]  }
  0x15   :  { %v1438_v63 = vld [vmem:[%s2008_s0 + $0x110] ss:$12 sps:$4 sm:$0xff]   ;;  %v1441_v1 = vld [vmem:[%s2008_s0 + $0x128] ss:$12 sps:$4 sm:$0xff]   ;;  %v1443_v3 = vld [vmem:[%s2008_s0 + $0x140] ss:$12 sps:$4 sm:$0xff]  }
  0x16   :  { %655 = vmatpush1.bf16.msra.mxu0 %v1367_v7  ;;  %1350 = vmatpush1.bf16.msra.mxu1 %v1367_v7  ;;  %v1442_v2 = vld [vmem:[%s2008_s0 + $0x108] ss:$12 sps:$4 sm:$0xff]   ;;  %v1444_v4 = vld [vmem:[%s2008_s0 + $0x124] ss:$12 sps:$4 sm:$0xff]   ;;  %v1447_v6 = vld [vmem:[%s2008_s0 + $0x120] ss:$12 sps:$4 sm:$0xff]  }
  0x17   :  { %656 = vmatprep.subr.bf16.mxu0 %v1467_v0  ;;  %1335 = vmatprep.subr.bf16.mxu1 %v1467_v0  ;;  %v1446_v5 = vld [vmem:[%s2008_s0 + $0x158] ss:$12 sps:$4 sm:$0xff]   ;;  %v1448_v7 = vld [vmem:[%s2008_s0 + $0x170] ss:$12 sps:$4 sm:$0xff]  }
  0x18   :  { %v1449_v8 = vld [vmem:[%s2008_s0 + $0x13c] ss:$12 sps:$4 sm:$0xff]  }
  0x1a   :  { %657 = vmatpush1.bf16.msra.mxu0 %v1368_v9  ;;  %1351 = vmatpush1.bf16.msra.mxu1 %v1368_v9  ;;  %v1451_v9 = vld [vmem:[%s2008_s0 + $0x188] ss:$12 sps:$4 sm:$0xff]  }
  0x1b   :  { %658 = vmatprep.subr.bf16.mxu0 %v1467_v0  ;;  %1336 = vmatprep.subr.bf16.mxu1 %v1467_v0 }
  0x1e   :  { %659 = vmatpush1.bf16.msra.mxu0 %v1369_v10  ;;  %1352 = vmatpush1.bf16.msra.mxu1 %v1369_v10  ;;  %v1452_v10 = vld [vmem:[%s2008_s0 + $0x138] ss:$12 sps:$4 sm:$0xff]  }
  0x1f   :  { %660 = vmatprep.subr.bf16.mxu0 %v1467_v0  ;;  %1337 = vmatprep.subr.bf16.mxu1 %v1467_v0 }
  0x22   :  { %661 = vmatpush1.bf16.msra.mxu0 %v1370_v11  ;;  %1353 = vmatpush1.bf16.msra.mxu1 %v1370_v11  ;;  %v1453_v11 = vld [vmem:[%s2008_s0 + $0x1a0] ss:$12 sps:$4 sm:$0xff]  }
  0x23   :  { %662 = vmatprep.subr.bf16.mxu0 %v1467_v0  ;;  %1338 = vmatprep.subr.bf16.mxu1 %v1467_v0 }
  0x26   :  { %663 = vmatpush1.bf16.msra.mxu0 %v1371_v12  ;;  %1354 = vmatpush1.bf16.msra.mxu1 %v1371_v12  ;;  %v1454_v12 = vld [vmem:[%s2008_s0 + $0x154] ss:$12 sps:$4 sm:$0xff]  }
  0x27   :  { %664 = vmatprep.subr.bf16.mxu0 %v1467_v0  ;;  %1339 = vmatprep.subr.bf16.mxu1 %v1467_v0 }
  0x2a   :  { %665 = vmatpush1.bf16.msra.mxu0 %v1372_v13  ;;  %1355 = vmatpush1.bf16.msra.mxu1 %v1372_v13  ;;  %v1456_v13 = vld [vmem:[%s2008_s0 + $0x1b8] ss:$12 sps:$4 sm:$0xff]  }
  0x2b   :  { %666 = vmatprep.subr.bf16.mxu0 %v1467_v0  ;;  %1340 = vmatprep.subr.bf16.mxu1 %v1467_v0 }
  0x2e   :  { %667 = vmatpush1.bf16.msra.mxu0 %v1373_v14  ;;  %1356 = vmatpush1.bf16.msra.mxu1 %v1373_v14  ;;  %v1457_v14 = vld [vmem:[%s2008_s0 + $0x150] ss:$12 sps:$4 sm:$0xff]  }
  0x2f   :  { %668 = vmatprep.subr.bf16.mxu0 %v1467_v0  ;;  %1341 = vmatprep.subr.bf16.mxu1 %v1467_v0 }
  0x32   :  { %669 = vmatpush1.bf16.msra.mxu0 %v1374_v15  ;;  %1357 = vmatpush1.bf16.msra.mxu1 %v1374_v15  ;;  %v1458_v15 = vld [vmem:[%s2008_s0 + $0x1d0] ss:$12 sps:$4 sm:$0xff]  }
  0x33   :  { %670 = vmatprep.subr.bf16.mxu0 %v1467_v0  ;;  %1342 = vmatprep.subr.bf16.mxu1 %v1467_v0 }
  0x36   :  { %671 = vmatpush1.bf16.msra.mxu0 %v1375_v16  ;;  %1358 = vmatpush1.bf16.msra.mxu1 %v1375_v16  ;;  %v1459_v16 = vld [vmem:[%s2008_s0 + $0x16c] ss:$12 sps:$4 sm:$0xff]  }
  0x37   :  { %672 = vmatprep.subr.bf16.mxu0 %v1467_v0  ;;  %1343 = vmatprep.subr.bf16.mxu1 %v1467_v0 }
  0x3a   :  { %673 = vmatpush1.bf16.msra.mxu0 %v1376_v17  ;;  %1359 = vmatpush1.bf16.msra.mxu1 %v1376_v17  ;;  %v1461_v17 = vld [vmem:[%s2008_s0 + $0x1e8] ss:$12 sps:$4 sm:$0xff]  }
  0x3b   :  { %674 = vmatprep.subr.bf16.mxu0 %v1467_v0  ;;  %1344 = vmatprep.subr.bf16.mxu1 %v1467_v0  ;;  %v1439_v0 = vld [vmem:[%s2008_s0 + $0x10c] ss:$12 sps:$4 sm:$0xff]  }
  0x3e   :  { %675 = vmatpush1.bf16.msra.mxu0 %v1377_v18  ;;  %1360 = vmatpush1.bf16.msra.mxu1 %v1377_v18  ;;  %v1462_v18 = vld [vmem:[%s2008_s0 + $0x168] ss:$12 sps:$4 sm:$0xff]  }
  0x3f   :  { %1281 = vmatprep.subr.bf16.mxu1 %v1390_v19 }
  0x41   :  { %677 = vmatmul.mubr.bf16.vlgmr.msra.gmra.mrb[0].mxu0 %v1378_v20  ;;  %813 = vmatmul.mubr.bf16.vlgmr.msra.gmra.mrb[0].mxu1 %v1381_v21  ;;  %v1464_v20 = vld [vmem:[%s2008_s0 + $0x184] ss:$12 sps:$4 sm:$0xff]   ;;  %v1466_v21 = vld [vmem:[%s2008_s0 + $0x180] ss:$12 sps:$4 sm:$0xff]  }
  0x42   :  { %684 = vmatprep.mubr.bf16.mxu0 %v1384_v22  ;;  %820 = vmatprep.mubr.bf16.mxu1 %v1386_v23 }
  0x43   :  { %1282 = vmatpush3.bf16.msra.mxu1 %v1390_v19  ;;  %v1463_v19 = vld [vmem:[%s2008_s0 + $0x200] ss:$0 sps:$4 sm:$0x11]  }
  0x44   :  { %1283 = vmatprep.subr.bf16.mxu1 %v1403_v24 }
  0x47   :  { %1284 = vmatpush3.bf16.msra.mxu1 %v1403_v24 }
  0x49   :  { %685 = vmatmul.mubr.bf16.gmra.mrb[4].mxu0 %v1388_v25  ;;  %821 = vmatmul.mubr.bf16.gmra.mrb[4].mxu1 %v1389_v26 }
  0x4a   :  { %692 = vmatprep.mubr.bf16.mxu0 %v1391_v27  ;;  %828 = vmatprep.mubr.bf16.mxu1 %v1393_v28 }
  0x51   :  { %693 = vmatmul.mubr.bf16.gmra.mrb[8].mxu0 %v1395_v29  ;;  %829 = vmatmul.mubr.bf16.gmra.mrb[8].mxu1 %v1396_v30 }
  0x52   :  { %700 = vmatprep.mubr.bf16.mxu0 %v1397_v31  ;;  %836 = vmatprep.mubr.bf16.mxu1 %v1399_v32 }
  0x59   :  { %701 = vmatmul.mubr.bf16.gmra.mrb[12].mxu0 %v1401_v34  ;;  %837 = vmatmul.mubr.bf16.gmra.mrb[12].mxu1 %v1402_v35 }
  0x5a   :  { %708 = vmatprep.mubr.bf16.mxu0 %v1404_v36  ;;  %844 = vmatprep.mubr.bf16.mxu1 %v1215_v37 }
  0x61   :  { %709 = vmatmul.mubr.bf16.gmra.mrb[16].mxu0 %v1407_v38  ;;  %845 = vmatmul.mubr.bf16.gmra.mrb[16].mxu1 %v1214_v39 }
  0x62   :  { %716 = vmatprep.mubr.bf16.mxu0 %v1409_v40  ;;  %1285 = vmatprep.mubr.msk.bf16.mxu1 %vm577_vm0, %v1411_v41 }
  0x69   :  { %717 = vmatmul.mubr.bf16.gmra.mrb[20].mxu0 %v1412_v42  ;;  %1286 = vmatmul.mubr.msk.bf16.vlgmr.msra.gmra.mrb[20].mxu1 %vm577_vm0, %v1413_v43 }
  0x6a   :  { %724 = vmatprep.mubr.bf16.mxu0 %v1414_v44  ;;  %1289 = vmatprep.mubr.msk.bf16.mxu1 %vm577_vm0, %v1416_v45 }
  0x71   :  { %725 = vmatmul.mubr.bf16.gmra.mrb[24].mxu0 %v1417_v46  ;;  %1290 = vmatmul.mubr.msk.bf16.gmra.mrb[24].mxu1 %vm577_vm0, %v1418_v47 }
  0x72   :  { %732 = vmatprep.mubr.bf16.mxu0 %v1419_v48  ;;  %1293 = vmatprep.mubr.msk.bf16.mxu1 %vm577_vm0, %v1421_v49 }
  0x79   :  { %733 = vmatmul.mubr.bf16.gmra.mrb[28].mxu0 %v1422_v50  ;;  %1294 = vmatmul.mubr.msk.bf16.gmra.mrb[28].mxu1 %vm577_vm0, %v1423_v51 }
  0x7a   :  { %740 = vmatprep.mubr.bf16.mxu0 %v1424_v52  ;;  %1297 = vmatprep.mubr.msk.bf16.mxu1 %vm577_vm0, %v1426_v53 }
  0x81   :  { %741 = vmatmul.mubr.bf16.gmra.mrb[32].mxu0 %v1427_v54  ;;  %1298 = vmatmul.mubr.msk.bf16.gmra.mrb[32].mxu1 %vm577_vm0, %v1428_v55 }
  0x82   :  { %748 = vmatprep.mubr.bf16.mxu0 %v1429_v56  ;;  %1301 = vmatprep.mubr.msk.bf16.mxu1 %vm577_vm0, %v1431_v57 }
  0x89   :  { %749 = vmatmul.mubr.bf16.gmra.mrb[36].mxu0 %v1432_v58  ;;  %1302 = vmatmul.mubr.msk.bf16.gmra.mrb[36].mxu1 %vm577_vm0, %v1433_v59 }
  0x8a   :  { %756 = vmatprep.mubr.bf16.mxu0 %v1434_v60  ;;  %1305 = vmatprep.mubr.msk.bf16.mxu1 %vm577_vm0, %v1436_v61 }
  0x91   :  { %757 = vmatmul.mubr.bf16.gmra.mrb[40].mxu0 %v1437_v62  ;;  %1306 = vmatmul.mubr.msk.bf16.gmra.mrb[40].mxu1 %vm577_vm0, %v1438_v63  ;;  %v1812_v62 = vld [vmem:[%s2009_s2] ss:$0 sm:$0xff] }
  0x92   :  { %764 = vmatprep.mubr.bf16.mxu0 %v1439_v0  ;;  %1309 = vmatprep.mubr.msk.bf16.mxu1 %vm577_vm0, %v1441_v1 }
  0x99   :  { %765 = vmatmul.mubr.bf16.gmra.mrb[44].mxu0 %v1442_v2  ;;  %1310 = vmatmul.mubr.msk.bf16.gmra.mrb[44].mxu1 %vm577_vm0, %v1443_v3 }
  0x9a   :  { %772 = vmatprep.mubr.bf16.mxu0 %v1444_v4  ;;  %1313 = vmatprep.mubr.msk.bf16.mxu1 %vm577_vm0, %v1446_v5 }
  0xa1   :  { %773 = vmatmul.mubr.bf16.gmra.mrb[48].mxu0 %v1447_v6  ;;  %1314 = vmatmul.mubr.msk.bf16.gmra.mrb[48].mxu1 %vm577_vm0, %v1448_v7 }
  0xa2   :  { %780 = vmatprep.mubr.bf16.mxu0 %v1449_v8  ;;  %1317 = vmatprep.mubr.msk.bf16.mxu1 %vm577_vm0, %v1451_v9 }
  0xa9   :  { %781 = vmatmul.mubr.bf16.gmra.mrb[52].mxu0 %v1452_v10  ;;  %1318 = vmatmul.mubr.msk.bf16.gmra.mrb[52].mxu1 %vm577_vm0, %v1453_v11 }
  0xaa   :  { %788 = vmatprep.mubr.bf16.mxu0 %v1454_v12  ;;  %1321 = vmatprep.mubr.msk.bf16.mxu1 %vm577_vm0, %v1456_v13 }
  0xb1   :  { %789 = vmatmul.mubr.bf16.gmra.mrb[56].mxu0 %v1457_v14  ;;  %1322 = vmatmul.mubr.msk.bf16.gmra.mrb[56].mxu1 %vm577_vm0, %v1458_v15 }
  0xb2   :  { %796 = vmatprep.mubr.bf16.mxu0 %v1459_v16  ;;  %1325 = vmatprep.mubr.msk.bf16.mxu1 %vm577_vm0, %v1461_v17 }
  0xb9   :  { %797 = vmatmul.mubr.bf16.gmra.mrb[60].mxu0 %v1462_v18  ;;  %1326 = vmatmul.mubr.msk.bf16.gmra.mrb[60].mxu1 %vm577_vm0, %v1463_v19 }
  0xba   :  { %804 = vmatprep.mubr.bf16.mxu0 %v1464_v20 }
  0xc1   :  { %805 = vmatmul.mubr.bf16.gmra.mrb[64].mxu0 %v1466_v21 }
 0x114   :  { %v678_v22 = vpop.f32.mrb[0].mxu0  ;;  %v1791_v23 = vpop.f32.mrb[0].mxu1 }
 0x115   :  { %v680_v24 = vpop.f32.mrb[1].mxu0  ;;  %v816_v25 = vpop.f32.mrb[1].mxu1  ;;  %v679_v0 = vadd.f32 %v1812_v62, %v678_v22 }
 0x116   :  { %v681_v26 = vpop.f32.mrb[2].mxu0  ;;  %v1793_v27 = vpop.f32.mrb[2].mxu1 }
 0x117   :  { %v683_v28 = vpop.f32.mrb[3].mxu0  ;;  %v819_v29 = vpop.f32.mrb[3].mxu1  ;;  %v682_v7 = vadd.f32 %v1812_v62, %v681_v26 }
 0x11c   :  { %v686_v30 = vpop.f32.mrb[4].mxu0  ;;  %v1795_v31 = vpop.f32.mrb[4].mxu1 }
 0x11d   :  { %v688_v32 = vpop.f32.mrb[5].mxu0  ;;  %v824_v33 = vpop.f32.mrb[5].mxu1  ;;  %v687_v63 = vadd.f32 %v1812_v62, %v686_v30 }
 0x11e   :  { %v689_v34 = vpop.f32.mrb[6].mxu0  ;;  %v1797_v35 = vpop.f32.mrb[6].mxu1 }
 0x11f   :  { %v691_v36 = vpop.f32.mrb[7].mxu0  ;;  %v827_v37 = vpop.f32.mrb[7].mxu1  ;;  %v690_v3 = vadd.f32 %v1812_v62, %v689_v34 }
 0x124   :  { %v694_v38 = vpop.f32.mrb[8].mxu0  ;;  %v1799_v39 = vpop.f32.mrb[8].mxu1 }
 0x125   :  { %v696_v40 = vpop.f32.mrb[9].mxu0  ;;  %v832_v41 = vpop.f32.mrb[9].mxu1  ;;  %v695_v20 = vadd.f32 %v1812_v62, %v694_v38 }
 0x126   :  { %v697_v42 = vpop.f32.mrb[10].mxu0  ;;  %v1801_v43 = vpop.f32.mrb[10].mxu1 }
 0x127   :  { %v699_v44 = vpop.f32.mrb[11].mxu0  ;;  %v835_v45 = vpop.f32.mrb[11].mxu1  ;;  %v698_v29 = vadd.f32 %v1812_v62, %v697_v42 }
 0x12c   :  { %v702_v46 = vpop.f32.mrb[12].mxu0  ;;  %v1803_v47 = vpop.f32.mrb[12].mxu1 }
 0x12d   :  { %v704_v48 = vpop.f32.mrb[13].mxu0  ;;  %v840_v49 = vpop.f32.mrb[13].mxu1  ;;  %v703_v19 = vadd.f32 %v1812_v62, %v702_v46 }
 0x12e   :  { %v705_v50 = vpop.f32.mrb[14].mxu0  ;;  %v1805_v51 = vpop.f32.mrb[14].mxu1 }
 0x12f   :  { %v707_v52 = vpop.f32.mrb[15].mxu0  ;;  %v843_v53 = vpop.f32.mrb[15].mxu1  ;;  %v706_v24 = vadd.f32 %v1812_v62, %v705_v50 }
 0x134   :  { %v710_v54 = vpop.f32.mrb[16].mxu0  ;;  %v1807_v55 = vpop.f32.mrb[16].mxu1 }
 0x135   :  { %v712_v56 = vpop.f32.mrb[17].mxu0  ;;  %v848_v57 = vpop.f32.mrb[17].mxu1  ;;  %v711_v46 = vadd.f32 %v1812_v62, %v710_v54 }
 0x136   :  { %v713_v58 = vpop.f32.mrb[18].mxu0  ;;  %v849_v59 = vpop.f32.mrb[18].mxu1 }
 0x137   :  { %v715_v60 = vpop.f32.mrb[19].mxu0  ;;  %v850_v61 = vpop.f32.mrb[19].mxu1  ;;  %v714_v57 = vadd.f32 %v1812_v62, %v713_v58 }
 0x13c   :  { %v718_v1 = vpop.f32.mrb[20].mxu0  ;;  %v1287_v2 = vpop.f32.mrb[20].mxu1 }
 0x13d   :  { %v895_v4 = vadd.f32 %v1287_v2, %v687_v63  ;;  %v720_v5 = vpop.f32.mrb[21].mxu0  ;;  %v886_v6 = vpop.f32.mrb[21].mxu1  ;;  %v719_v42 = vadd.f32 %v1812_v62, %v718_v1 }
 0x13e   :  { %v887_v8 = vadd.f32 %v886_v6, %v679_v0  ;;  %v721_v9 = vpop.f32.mrb[22].mxu0  ;;  %v1288_v10 = vpop.f32.mrb[22].mxu1 }
 0x13f   :  { %v1062_v11 = vmax.f32 %v895_v4, 0.0  ;;  %v898_v12 = vadd.f32 %v1288_v10, %v690_v3  ;;  %v723_v13 = vpop.f32.mrb[23].mxu0  ;;  %v889_v14 = vpop.f32.mrb[23].mxu1  ;;  %v722_v50 = vadd.f32 %v1812_v62, %v721_v9 }
 0x140   :  { %v1060_v15 = vmax.f32 %v887_v8, 0.0  ;;  %v890_v16 = vadd.f32 %v889_v14, %v682_v7 }
 0x141   :  { %1105 = vst [vmem:[%s2010_s3 + $0x10] sm:$0xff] %v1062_v11  ;;  %v1063_v17 = vmax.f32 %v898_v12, 0.0 }
 0x142   :  { %1103 = vst [vmem:[%s2010_s3] sm:$0xff] %v1060_v15  ;;  %v1061_v18 = vmax.f32 %v890_v16, 0.0 }
 0x143   :  { %1106 = vst [vmem:[%s2010_s3 + $0x18] sm:$0xff] %v1063_v17 }
 0x144   :  { %1104 = vst [vmem:[%s2010_s3 + $0x8] sm:$0xff] %v1061_v18  ;;  %v726_v21 = vpop.f32.mrb[24].mxu0  ;;  %v1291_v22 = vpop.f32.mrb[24].mxu1 }
 0x145   :  { %v911_v25 = vadd.f32 %v1291_v22, %v703_v19  ;;  %v728_v26 = vpop.f32.mrb[25].mxu0  ;;  %v902_v28 = vpop.f32.mrb[25].mxu1  ;;  %v727_v6 = vadd.f32 %v1812_v62, %v726_v21 }
 0x146   :  { %v903_v30 = vadd.f32 %v902_v28, %v695_v20  ;;  %v729_v32 = vpop.f32.mrb[26].mxu0  ;;  %v1292_v33 = vpop.f32.mrb[26].mxu1 }
 0x147   :  { %v1066_v34 = vmax.f32 %v911_v25, 0.0  ;;  %v914_v36 = vadd.f32 %v1292_v33, %v706_v24  ;;  %v731_v37 = vpop.f32.mrb[27].mxu0  ;;  %v905_v38 = vpop.f32.mrb[27].mxu1  ;;  %v730_v13 = vadd.f32 %v1812_v62, %v729_v32 }
 0x148   :  { %v1064_v40 = vmax.f32 %v903_v30, 0.0  ;;  %v906_v41 = vadd.f32 %v905_v38, %v698_v29 }
 0x149   :  { %1109 = vst [vmem:[%s2010_s3 + $0x30] sm:$0xff] %v1066_v34  ;;  %v1067_v44 = vmax.f32 %v914_v36, 0.0 }
 0x14a   :  { %1107 = vst [vmem:[%s2010_s3 + $0x20] sm:$0xff] %v1064_v40  ;;  %v1065_v45 = vmax.f32 %v906_v41, 0.0 }
 0x14b   :  { %1110 = vst [vmem:[%s2010_s3 + $0x38] sm:$0xff] %v1067_v44 }
 0x14c   :  { %1108 = vst [vmem:[%s2010_s3 + $0x28] sm:$0xff] %v1065_v45  ;;  %v734_v48 = vpop.f32.mrb[28].mxu0  ;;  %v1295_v49 = vpop.f32.mrb[28].mxu1 }
 0x14d   :  { %v927_v52 = vadd.f32 %v1295_v49, %v719_v42  ;;  %v736_v53 = vpop.f32.mrb[29].mxu0  ;;  %v918_v56 = vpop.f32.mrb[29].mxu1  ;;  %v735_v58 = vadd.f32 %v1812_v62, %v734_v48 }
 0x14e   :  { %v919_v59 = vadd.f32 %v918_v56, %v711_v46  ;;  %v737_v60 = vpop.f32.mrb[30].mxu0  ;;  %v1296_v61 = vpop.f32.mrb[30].mxu1 }
 0x14f   :  { %v1070_v63 = vmax.f32 %v927_v52, 0.0  ;;  %v930_v0 = vadd.f32 %v1296_v61, %v722_v50  ;;  %v739_v1 = vpop.f32.mrb[31].mxu0  ;;  %v921_v54 = vpop.f32.mrb[31].mxu1  ;;  %v738_v9 = vadd.f32 %v1812_v62, %v737_v60 }
 0x150   :  { %v1068_v2 = vmax.f32 %v919_v59, 0.0  ;;  %v922_v3 = vadd.f32 %v921_v54, %v714_v57 }
 0x151   :  { %1113 = vst [vmem:[%s2010_s3 + $0x50] sm:$0xff] %v1070_v63  ;;  %v1071_v4 = vmax.f32 %v930_v0, 0.0 }
 0x152   :  { %1111 = vst [vmem:[%s2010_s3 + $0x40] sm:$0xff] %v1068_v2  ;;  %v1069_v5 = vmax.f32 %v922_v3, 0.0 }
 0x153   :  { %1114 = vst [vmem:[%s2010_s3 + $0x58] sm:$0xff] %v1071_v4 }
 0x154   :  { %1112 = vst [vmem:[%s2010_s3 + $0x48] sm:$0xff] %v1069_v5  ;;  %v742_v7 = vpop.f32.mrb[32].mxu0  ;;  %v1299_v8 = vpop.f32.mrb[32].mxu1 }
 0x155   :  { %v943_v10 = vadd.f32 %v1299_v8, %v735_v58  ;;  %v744_v11 = vpop.f32.mrb[33].mxu0  ;;  %v934_v12 = vpop.f32.mrb[33].mxu1  ;;  %v743_v26 = vadd.f32 %v1812_v62, %v742_v7 }
 0x156   :  { %v935_v14 = vadd.f32 %v934_v12, %v727_v6  ;;  %v745_v15 = vpop.f32.mrb[34].mxu0  ;;  %v1300_v16 = vpop.f32.mrb[34].mxu1 }
 0x157   :  { %v1074_v17 = vmax.f32 %v943_v10, 0.0  ;;  %v946_v18 = vadd.f32 %v1300_v16, %v738_v9  ;;  %v747_v19 = vpop.f32.mrb[35].mxu0  ;;  %v937_v20 = vpop.f32.mrb[35].mxu1  ;;  %v746_v34 = vadd.f32 %v1812_v62, %v745_v15 }
 0x158   :  { %v1072_v21 = vmax.f32 %v935_v14, 0.0  ;;  %v938_v22 = vadd.f32 %v937_v20, %v730_v13 }
 0x159   :  { %1117 = vst [vmem:[%s2010_s3 + $0x70] sm:$0xff] %v1074_v17  ;;  %v1075_v24 = vmax.f32 %v946_v18, 0.0 }
 0x15a   :  { %1115 = vst [vmem:[%s2010_s3 + $0x60] sm:$0xff] %v1072_v21  ;;  %v1073_v25 = vmax.f32 %v938_v22, 0.0 }
 0x15b   :  { %1118 = vst [vmem:[%s2010_s3 + $0x78] sm:$0xff] %v1075_v24 }
 0x15c   :  { %1116 = vst [vmem:[%s2010_s3 + $0x68] sm:$0xff] %v1073_v25  ;;  %v750_v28 = vpop.f32.mrb[36].mxu0  ;;  %v1303_v29 = vpop.f32.mrb[36].mxu1 }
 0x15d   :  { %v751_v30 = vadd.f32 %v1812_v62, %v750_v28  ;;  %v752_v32 = vpop.f32.mrb[37].mxu0  ;;  %v950_v33 = vpop.f32.mrb[37].mxu1 }
 0x15e   :  { %v951_v36 = vadd.f32 %v950_v33, %v743_v26  ;;  %v753_v37 = vpop.f32.mrb[38].mxu0  ;;  %v1304_v38 = vpop.f32.mrb[38].mxu1 }
 0x15f   :  { %v959_v40 = vadd.f32 %v1303_v29, %v751_v30  ;;  %v754_v41 = vadd.f32 %v1812_v62, %v753_v37  ;;  %v755_v44 = vpop.f32.mrb[39].mxu0  ;;  %v953_v45 = vpop.f32.mrb[39].mxu1 }
 0x160   :  { %v1076_v42 = vmax.f32 %v951_v36, 0.0  ;;  %v954_v46 = vadd.f32 %v953_v45, %v746_v34  ;;  %v815_v36 = vadd.f32 %v1812_v62, %v1791_v23 }
 0x161   :  { %v1078_v48 = vmax.f32 %v959_v40, 0.0  ;;  %v962_v49 = vadd.f32 %v1304_v38, %v754_v41  ;;  %v818_v41 = vadd.f32 %v1812_v62, %v1793_v27 }
 0x162   :  { %1119 = vst [vmem:[%s2010_s3 + $0x80] sm:$0xff] %v1076_v42  ;;  %v1077_v50 = vmax.f32 %v954_v46, 0.0 }
 0x163   :  { %1121 = vst [vmem:[%s2010_s3 + $0x90] sm:$0xff] %v1078_v48  ;;  %v1079_v52 = vmax.f32 %v962_v49, 0.0 }
 0x164   :  { %1120 = vst [vmem:[%s2010_s3 + $0x88] sm:$0xff] %v1077_v50  ;;  %v758_v53 = vpop.f32.mrb[40].mxu0  ;;  %v1307_v56 = vpop.f32.mrb[40].mxu1 }
 0x165   :  { %1122 = vst [vmem:[%s2010_s3 + $0x98] sm:$0xff] %v1079_v52  ;;  %v759_v57 = vadd.f32 %v1812_v62, %v758_v53  ;;  %v760_v59 = vpop.f32.mrb[41].mxu0  ;;  %v966_v60 = vpop.f32.mrb[41].mxu1 }
 0x166   :  { %v761_v61 = vpop.f32.mrb[42].mxu0  ;;  %v1308_v63 = vpop.f32.mrb[42].mxu1 }
 0x167   :  { %v762_v0 = vadd.f32 %v1812_v62, %v761_v61  ;;  %v967_v1 = vadd.f32 %v966_v60, %v759_v57  ;;  %v763_v54 = vpop.f32.mrb[43].mxu0  ;;  %v969_v2 = vpop.f32.mrb[43].mxu1  ;;  %v831_v61 = vadd.f32 %v1812_v62, %v1799_v39 }
 0x169   :  { %v1080_v3 = vmax.f32 %v967_v1, 0.0  ;;  %v970_v4 = vadd.f32 %v969_v2, %v762_v0  ;;  %v823_v0 = vadd.f32 %v1812_v62, %v1795_v31  ;;  %v834_v2 = vadd.f32 %v1812_v62, %v1801_v43 }
 0x16b   :  { %1123 = vst [vmem:[%s2010_s3 + $0xa0] sm:$0xff] %v1080_v3  ;;  %v1081_v5 = vmax.f32 %v970_v4, 0.0 }
 0x16c   :  { %v766_v58 = vpop.f32.mrb[44].mxu0  ;;  %v1311_v6 = vpop.f32.mrb[44].mxu1 }
 0x16d   :  { %1124 = vst [vmem:[%s2010_s3 + $0xa8] sm:$0xff] %v1081_v5  ;;  %v767_v7 = vadd.f32 %v1812_v62, %v766_v58  ;;  %v768_v8 = vpop.f32.mrb[45].mxu0  ;;  %v982_v9 = vpop.f32.mrb[45].mxu1  ;;  %v826_v58 = vadd.f32 %v1812_v62, %v1797_v35 }
 0x16e   :  { %v769_v10 = vpop.f32.mrb[46].mxu0  ;;  %v1312_v11 = vpop.f32.mrb[46].mxu1 }
 0x16f   :  { %v975_v12 = vadd.f32 %v1307_v56, %v767_v7  ;;  %v770_v13 = vadd.f32 %v1812_v62, %v769_v10  ;;  %v771_v14 = vpop.f32.mrb[47].mxu0  ;;  %v985_v15 = vpop.f32.mrb[47].mxu1 }
 0x171   :  { %v1082_v16 = vmax.f32 %v975_v12, 0.0  ;;  %v978_v17 = vadd.f32 %v1308_v63, %v770_v13 }
 0x173   :  { %1125 = vst [vmem:[%s2010_s3 + $0xb0] sm:$0xff] %v1082_v16  ;;  %v1083_v18 = vmax.f32 %v978_v17, 0.0 }
 0x174   :  { %v774_v19 = vpop.f32.mrb[48].mxu0  ;;  %v1907_v20 = vpop.f32.mrb[48].mxu1 }
 0x175   :  { %1126 = vst [vmem:[%s2010_s3 + $0xb8] sm:$0xff] %v1083_v18  ;;  %v775_v21 = vadd.f32 %v1812_v62, %v774_v19  ;;  %v776_v22 = vpop.f32.mrb[49].mxu0  ;;  %v998_v24 = vpop.f32.mrb[49].mxu1  ;;  %v847_v18 = vadd.f32 %v1812_v62, %v1807_v55 }
 0x176   :  { %v777_v25 = vpop.f32.mrb[50].mxu0  ;;  %v1913_v26 = vpop.f32.mrb[50].mxu1 }
 0x177   :  { %v983_v28 = vadd.f32 %v982_v9, %v775_v21  ;;  %v778_v29 = vadd.f32 %v1812_v62, %v777_v25  ;;  %v779_v30 = vpop.f32.mrb[51].mxu0  ;;  %v1001_v32 = vpop.f32.mrb[51].mxu1  ;;  %v839_v21 = vadd.f32 %v1812_v62, %v1803_v47 }
 0x178   :  { %v842_v30 = vadd.f32 %v1812_v62, %v1805_v51 }
 0x179   :  { %v1084_v33 = vmax.f32 %v983_v28, 0.0  ;;  %v986_v34 = vadd.f32 %v985_v15, %v778_v29 }
 0x17b   :  { %1127 = vst [vmem:[%s2010_s3 + $0xc0] sm:$0xff] %v1084_v33  ;;  %v1085_v37 = vmax.f32 %v986_v34, 0.0 }
 0x17c   :  { %v782_v38 = vpop.f32.mrb[52].mxu0  ;;  %v1319_v40 = vpop.f32.mrb[52].mxu1 }
 0x17d   :  { %1128 = vst [vmem:[%s2010_s3 + $0xc8] sm:$0xff] %v1085_v37  ;;  %v783_v44 = vadd.f32 %v1812_v62, %v782_v38  ;;  %v1023_v45 = vadd.f32 %v1319_v40, %v815_v36  ;;  %v784_v42 = vpop.f32.mrb[53].mxu0  ;;  %v1927_v46 = vpop.f32.mrb[53].mxu1 }
 0x17e   :  { %v785_v23 = vpop.f32.mrb[54].mxu0  ;;  %v1320_v48 = vpop.f32.mrb[54].mxu1 }
 0x17f   :  { %v991_v49 = vadd.f32 %v1311_v6, %v783_v44  ;;  %v1094_v50 = vmax.f32 %v1023_v45, 0.0  ;;  %v786_v52 = vadd.f32 %v1812_v62, %v785_v23  ;;  %v1026_v53 = vadd.f32 %v1320_v48, %v818_v41  ;;  %v787_v56 = vpop.f32.mrb[55].mxu0  ;;  %v1930_v57 = vpop.f32.mrb[55].mxu1 }
 0x181   :  { %v1086_v27 = vmax.f32 %v991_v49, 0.0  ;;  %1137 = vst [vmem:[%s2010_s3 + $0x110] sm:$0xff] %v1094_v50  ;;  %v994_v59 = vadd.f32 %v1312_v11, %v786_v52  ;;  %v1095_v60 = vmax.f32 %v1026_v53, 0.0 }
 0x183   :  { %1129 = vst [vmem:[%s2010_s3 + $0xd0] sm:$0xff] %v1086_v27  ;;  %v1087_v63 = vmax.f32 %v994_v59, 0.0  ;;  %1138 = vst [vmem:[%s2010_s3 + $0x118] sm:$0xff] %v1095_v60 }
 0x184   :  { %v790_v1 = vpop.f32.mrb[56].mxu0  ;;  %v1323_v54 = vpop.f32.mrb[56].mxu1 }
 0x185   :  { %1130 = vst [vmem:[%s2010_s3 + $0xd8] sm:$0xff] %v1087_v63  ;;  %v791_v39 = vadd.f32 %v1812_v62, %v790_v1  ;;  %v1039_v3 = vadd.f32 %v1323_v54, %v831_v61  ;;  %v792_v4 = vpop.f32.mrb[57].mxu0  ;;  %v1030_v5 = vpop.f32.mrb[57].mxu1 }
 0x186   :  { %v1031_v6 = vadd.f32 %v1030_v5, %v823_v0  ;;  %v793_v7 = vpop.f32.mrb[58].mxu0  ;;  %v1324_v31 = vpop.f32.mrb[58].mxu1 }
 0x187   :  { %v999_v8 = vadd.f32 %v998_v24, %v791_v39  ;;  %v1098_v9 = vmax.f32 %v1039_v3, 0.0  ;;  %v794_v10 = vadd.f32 %v1812_v62, %v793_v7  ;;  %v1042_v43 = vadd.f32 %v1324_v31, %v834_v2  ;;  %v795_v11 = vpop.f32.mrb[59].mxu0  ;;  %v1033_v12 = vpop.f32.mrb[59].mxu1 }
 0x188   :  { %v1096_v13 = vmax.f32 %v1031_v6, 0.0  ;;  %v1034_v14 = vadd.f32 %v1033_v12, %v826_v58 }
 0x189   :  { %v1088_v15 = vmax.f32 %v999_v8, 0.0  ;;  %1141 = vst [vmem:[%s2010_s3 + $0x130] sm:$0xff] %v1098_v9  ;;  %v1002_v16 = vadd.f32 %v1001_v32, %v794_v10  ;;  %v1099_v17 = vmax.f32 %v1042_v43, 0.0 }
 0x18a   :  { %1139 = vst [vmem:[%s2010_s3 + $0x120] sm:$0xff] %v1096_v13  ;;  %v1097_v35 = vmax.f32 %v1034_v14, 0.0 }
 0x18b   :  { %1131 = vst [vmem:[%s2010_s3 + $0xe0] sm:$0xff] %v1088_v15  ;;  %v1089_v19 = vmax.f32 %v1002_v16, 0.0  ;;  %1142 = vst [vmem:[%s2010_s3 + $0x138] sm:$0xff] %v1099_v17 }
 0x18c   :  { %1140 = vst [vmem:[%s2010_s3 + $0x128] sm:$0xff] %v1097_v35  ;;  %v798_v22 = vpop.f32.mrb[60].mxu0  ;;  %v1327_v24 = vpop.f32.mrb[60].mxu1 }
 0x18d   :  { %1132 = vst [vmem:[%s2010_s3 + $0xe8] sm:$0xff] %v1089_v19  ;;  %v799_v55 = vadd.f32 %v1812_v62, %v798_v22  ;;  %v1055_v25 = vadd.f32 %v1327_v24, %v847_v18  ;;  %v800_v28 = vpop.f32.mrb[61].mxu0  ;;  %v1046_v29 = vpop.f32.mrb[61].mxu1 }
 0x18e   :  { %v1047_v32 = vadd.f32 %v1046_v29, %v839_v21  ;;  %v801_v47 = vpop.f32.mrb[62].mxu0  ;;  %v1328_v33 = vpop.f32.mrb[62].mxu1 }
 0x18f   :  { %v1007_v34 = vadd.f32 %v1907_v20, %v799_v55  ;;  %v1102_v36 = vmax.f32 %v1055_v25, 0.0  ;;  %v802_v37 = vadd.f32 %v1812_v62, %v801_v47  ;;  %v803_v38 = vpop.f32.mrb[63].mxu0  ;;  %v1049_v40 = vpop.f32.mrb[63].mxu1 }
 0x190   :  { %v1100_v41 = vmax.f32 %v1047_v32, 0.0  ;;  %v1050_v44 = vadd.f32 %v1049_v40, %v842_v30 }
 0x191   :  { %v1090_v45 = vmax.f32 %v1007_v34, 0.0  ;;  %1145 = vst [vmem:[%s2010_s3 + $0x150] sm:$0x3] %v1102_v36  ;;  %v1010_v42 = vadd.f32 %v1913_v26, %v802_v37 }
 0x192   :  { %1143 = vst [vmem:[%s2010_s3 + $0x140] sm:$0xff] %v1100_v41  ;;  %v1101_v51 = vmax.f32 %v1050_v44, 0.0 }
 0x193   :  { %1133 = vst [vmem:[%s2010_s3 + $0xf0] sm:$0xff] %v1090_v45  ;;  %v1091_v20 = vmax.f32 %v1010_v42, 0.0 }
 0x194   :  { %1144 = vst [vmem:[%s2010_s3 + $0x148] sm:$0xff] %v1101_v51  ;;  %v806_v23 = vpop.f32.mrb[64].mxu0 }
 0x195   :  { %1134 = vst [vmem:[%s2010_s3 + $0xf8] sm:$0xff] %v1091_v20  ;;  %v807_v26 = vadd.f32 %v1812_v62, %v806_v23  ;;  %v808_v48 = vpop.f32.mrb[65].mxu0 }
 0x196   :  { %v809_v49 = vpop.f32.mrb[66].mxu0 }
 0x197   :  { %v1015_v50 = vadd.f32 %v1927_v46, %v807_v26  ;;  %v810_v52 = vadd.f32 %v1812_v62, %v809_v49  ;;  %v811_v53 = vpop.f32.mrb[67].mxu0 }
 0x199   :  { %v1092_v56 = vmax.f32 %v1015_v50, 0.0  ;;  %v1018_v27 = vadd.f32 %v1930_v57, %v810_v52 }
 0x19b   :  { %1135 = vst [vmem:[%s2010_s3 + $0x100] sm:$0xff] %v1092_v56  ;;  %v1093_v59 = vmax.f32 %v1018_v27, 0.0 }
 0x19d   :  { %1136 = vst [vmem:[%s2010_s3 + $0x108] sm:$0xff] %v1093_v59 }

</bundles_post_ra>
